<compile_context>
chip_gen: v5e
topology: v5e:2x2
jax: 0.10.0
libtpu: 0.0.40
codegen_flags: <defaults>
</compile_context>

<pallas_src>
import functools

import jax
import jax.numpy as jnp
import numpy as np
from jax import lax
from jax.experimental import pallas as pl
from jax.experimental.pallas import tpu as pltpu


# ----------------------------- Pallas kernels ------------------------------

def _conv1_relu_pool_kernel(p_ref, w_ref, b_ref, o_ref):
    """conv1 as 4 patch-matmuls (one per 2x2 pool offset) + bias + relu, pooled via running max.

    p_ref: (4, TB*196, 128)  dim0=(dy,dx), rows=(n,ph,pw), lanes=(ci,kh,kw) (75 valid)
    w_ref: (128, 8), b_ref: (1, 8), o_ref: (TB*196, 8)
    """
    out = None
    for d in range(4):                                   # d = dy*2 + dx
        y = jnp.dot(p_ref[d], w_ref[...], preferred_element_type=jnp.float32)
        y = jnp.maximum(y + b_ref[...], 0.0)
        out = y if out is None else jnp.maximum(out, y)
    o_ref[...] = out


def _conv2_fc_kernel(p_ref, w2_ref, b2_ref, wf1_ref, bf1_ref, wf2_ref, bf2_ref,
                     wf3_ref, bf3_ref, o_ref, *, tb, n_pos):
    """conv2(+bias+relu) with fused 2x2 maxpool (running max over 4 offsets), then
    fc1 (batched 25-position matmul + sum), fc2, fc3 -- all intermediates stay in VMEM/vregs.

    p_ref: (4, 25, TB, 256)  dims=(pool offset, position p=(ph,pw), n, (ci,kh,kw) 150 valid)
    o_ref: (TB, 128) (10 valid logits)
    """
    pooled = None
    for d in range(4):                                   # d = dy*2 + dx
        y = jnp.dot(p_ref[d].reshape(n_pos * tb, 256), w2_ref[...],
                    preferred_element_type=jnp.float32)
        y = jnp.maximum(y + b2_ref[...], 0.0)
        pooled = y if pooled is None else jnp.maximum(pooled, y)   # (25*TB, 128), rows (p, n)

    # fc1: contract over (position p, channel c) as 25 independent MXU matmuls + a VPU sum
    # (no serialized accumulator chain through the result FIFO).
    pooled3 = pooled.reshape(n_pos, tb, 128)                       # trivial: TB multiple of 8
    part = jnp.einsum('pnc,pcj->pnj', pooled3, wf1_ref[...],
                      preferred_element_type=jnp.float32)          # (25, TB, 128)
    h = jnp.maximum(jnp.sum(part, axis=0) + bf1_ref[...], 0.0)     # (TB, 128)
    h = jnp.maximum(jnp.dot(h, wf2_ref[...], preferred_element_type=jnp.float32)
                    + bf2_ref[...], 0.0)
    o_ref[...] = jnp.dot(h, wf3_ref[...], preferred_element_type=jnp.float32) + bf3_ref[...]


# --------------------------- XLA glue (im2col) ------------------------------

def _conv1_pool_patches(x_nchw, K):
    """x (Np,C,H,W) -> (4, Np*PH*PW, 128): dim0=(dy,dx), rows=(n,ph,pw), lanes=(ci,kh,kw)."""
    Np, C, H, W = x_nchw.shape
    OH, OW = H - K + 1, W - K + 1
    PH, PW = OH // 2, OW // 2
    cols = []
    for ci in range(C):
        for kh in range(K):
            for kw in range(K):
                cols.append(x_nchw[:, ci, kh:kh + OH, kw:kw + OW])    # (Np, OH, OW)
    p = jnp.stack(cols, axis=-1)                                      # (Np, OH, OW, C*K*K)
    p = p.reshape(Np, PH, 2, PW, 2, C * K * K)                        # oh=2*ph+dy, ow=2*pw+dx
    p = jnp.transpose(p, (2, 4, 0, 1, 3, 5))                          # (dy, dx, n, ph, pw, k)
    p = p.reshape(4, Np * PH * PW, C * K * K)
    p = jnp.pad(p, ((0, 0), (0, 0), (0, 128 - C * K * K)))
    return p, PH, PW


def _conv2_pool_patches(pooled1, n_pad, C1, K, H1, k_pad):
    """pooled1 (n_pad*H1*H1, 8), rows=(n,h,w), lanes=channels ->
    (4, PH*PH, n_pad, k_pad): dims=(pool offset, position p=(ph,pw), n, (ci,kh,kw))."""
    act = pooled1[:, :C1].reshape(n_pad, H1, H1, C1)                  # NHWC
    OH = H1 - K + 1
    PH = OH // 2
    cols = []
    for ci in range(C1):
        for kh in range(K):
            for kw in range(K):
                cols.append(act[:, kh:kh + OH, kw:kw + OH, ci])       # (n_pad, OH, OH)
    p = jnp.stack(cols, axis=-1)                                      # (n_pad, OH, OH, C1*K*K)
    p = p.reshape(n_pad, PH, 2, PH, 2, C1 * K * K)
    p = jnp.transpose(p, (2, 4, 1, 3, 0, 5))                          # (dy, dx, ph, pw, n, k)
    p = p.reshape(4, PH * PH, n_pad, C1 * K * K)
    p = jnp.pad(p, ((0, 0), (0, 0), (0, 0), (0, k_pad - C1 * K * K)))
    return p, PH


# ----------------------- one-time parameter preparation ----------------------

def prepare_params(params):
    """Hoist all reshapes/transposes/permutations + lane zero-padding out of the forward."""
    f32 = jnp.float32
    # conv1: (6,3,5,5) -> (75,6) -> (128,8)   (8-lane output keeps the stage handoff small)
    w1m = params["w1"].reshape(6, -1).T
    w1p = jnp.zeros((128, 8), f32).at[:75, :6].set(w1m)
    b1p = jnp.zeros((1, 8), f32).at[0, :6].set(params["b1"])
    # conv2: (16,6,5,5) -> (150,16) -> (256,128)
    w2m = params["w2"].reshape(16, -1).T
    w2p = jnp.zeros((256, 128), f32).at[:150, :16].set(w2m)
    b2p = jnp.zeros((1, 128), f32).at[0, :16].set(params["b2"])
    # fc1: (120,400), torch flatten col = c*25 + p  ->  per-position (25,16,120) -> (25,128,128)
    wf1 = jnp.transpose(params["fc1_w"].reshape(120, 16, 25), (2, 1, 0))   # [p, c, j]
    wf1p = jnp.zeros((25, 128, 128), f32).at[:, :16, :120].set(wf1)
    bf1p = jnp.zeros((1, 128), f32).at[0, :120].set(params["fc1_b"])
    # fc2: (84,120) -> (120,84) -> (128,128)
    wf2p = jnp.zeros((128, 128), f32).at[:120, :84].set(params["fc2_w"].T)
    bf2p = jnp.zeros((1, 128), f32).at[0, :84].set(params["fc2_b"])
    # fc3: (10,84) -> (84,10) -> (128,128)
    wf3p = jnp.zeros((128, 128), f32).at[:84, :10].set(params["fc3_w"].T)
    bf3p = jnp.zeros((1, 128), f32).at[0, :10].set(params["fc3_b"])
    return dict(w1p=w1p, b1p=b1p, w2p=w2p, b2p=b2p, wf1p=wf1p, bf1p=bf1p,
                wf2p=wf2p, bf2p=bf2p, wf3p=wf3p, bf3p=bf3p)


# --------------------------------- forward -----------------------------------

def _round_up(x, m):
    return (x + m - 1) // m * m


def example_forward(x_nchw, pp, tile_batch=8):
    """Forward equivalent to Example.forward (PyTorch), input NCHW float32 -> (N, 10)."""
    N = x_nchw.shape[0]
    TB = tile_batch                                                    # samples per grid step
    n_pad = _round_up(max(N, TB), TB)
    x_p = jnp.pad(x_nchw, ((0, n_pad - N), (0, 0), (0, 0), (0, 0)))

    cparams = pltpu.CompilerParams(dimension_semantics=("parallel",),
                                   vmem_limit_bytes=32 * 1024 * 1024)

    # ---- stage 1: conv1 + relu + 2x2 maxpool, gridded over batch tiles ----
    p1, PH, PW = _conv1_pool_patches(x_p, 5)                           # (4, n_pad*196, 128)
    q1 = PH * PW                                                       # 196 pooled positions
    pooled1 = pl.pallas_call(
        _conv1_relu_pool_kernel,
        out_shape=jax.ShapeDtypeStruct((n_pad * q1, 8), jnp.float32),
        grid=(n_pad // TB,),
        in_specs=[pl.BlockSpec((4, TB * q1, 128), lambda b: (0, b, 0)),
                  pl.BlockSpec((128, 8), lambda b: (0, 0)),
                  pl.BlockSpec((1, 8), lambda b: (0, 0))],
        out_specs=pl.BlockSpec((TB * q1, 8), lambda b: (b, 0)),
        compiler_params=cparams,
    )(p1, pp["w1p"], pp["b1p"])                             # (n_pad*196, 8), rows (n, ph, pw)

    # ---- stage 2: conv2 + relu + maxpool + fc1 + relu + fc2 + relu + fc3, gridded over batch ----
    p2, P2 = _conv2_pool_patches(pooled1, n_pad, C1=6, K=5, H1=PH, k_pad=256)
    n_pos = P2 * P2                                                    # 25 pooled positions
    out_pad = pl.pallas_call(
        functools.partial(_conv2_fc_kernel, tb=TB, n_pos=n_pos),
        out_shape=jax.ShapeDtypeStruct((n_pad, 128), jnp.float32),
        grid=(n_pad // TB,),
        in_specs=[pl.BlockSpec((4, n_pos, TB, 256), lambda b: (0, 0, b, 0)),
                  pl.BlockSpec((256, 128), lambda b: (0, 0)),
                  pl.BlockSpec((1, 128), lambda b: (0, 0)),
                  pl.BlockSpec((n_pos, 128, 128), lambda b: (0, 0, 0)),
                  pl.BlockSpec((1, 128), lambda b: (0, 0)),
                  pl.BlockSpec((128, 128), lambda b: (0, 0)),
                  pl.BlockSpec((1, 128), lambda b: (0, 0)),
                  pl.BlockSpec((128, 128), lambda b: (0, 0)),
                  pl.BlockSpec((1, 128), lambda b: (0, 0))],
        out_specs=pl.BlockSpec((TB, 128), lambda b: (b, 0)),
        compiler_params=cparams,
    )(p2, pp["w2p"], pp["b2p"], pp["wf1p"], pp["bf1p"],
      pp["wf2p"], pp["bf2p"], pp["wf3p"], pp["bf3p"])

    return out_pad[:N, :10]                                            # drop padded rows / lanes once


# ------------------------- pure-JAX reference check -------------------------

def reference_forward(x_nchw, params):
    dn = lax.conv_dimension_numbers(x_nchw.shape, params["w1"].shape, ("NCHW", "OIHW", "NCHW"))
    y = lax.conv_general_dilated(x_nchw, params["w1"], (1, 1), "VALID", dimension_numbers=dn)
    y = jnp.maximum(y + params["b1"][None, :, None, None], 0.0)
    y = lax.reduce_window(y, -jnp.inf, lax.max, (1, 1, 2, 2), (1, 1, 2, 2), "VALID")
    dn = lax.conv_dimension_numbers(y.shape, params["w2"].shape, ("NCHW", "OIHW", "NCHW"))
    y = lax.conv_general_dilated(y, params["w2"], (1, 1), "VALID", dimension_numbers=dn)
    y = jnp.maximum(y + params["b2"][None, :, None, None], 0.0)
    y = lax.reduce_window(y, -jnp.inf, lax.max, (1, 1, 2, 2), (1, 1, 2, 2), "VALID")
    y = y.reshape(y.shape[0], -1)
    y = jnp.maximum(y @ params["fc1_w"].T + params["fc1_b"], 0.0)
    y = jnp.maximum(y @ params["fc2_w"].T + params["fc2_b"], 0.0)
    return y @ params["fc3_w"].T + params["fc3_b"]


# ---------------------------------- main ------------------------------------

def make_params():
    keys = jax.random.split(jax.random.PRNGKey(42), 10)
    s = 0.1
    return {
        "w1": s * jax.random.normal(keys[0], (6, 3, 5, 5), jnp.float32),
        "b1": s * jax.random.normal(keys[1], (6,), jnp.float32),
        "w2": s * jax.random.normal(keys[2], (16, 6, 5, 5), jnp.float32),
        "b2": s * jax.random.normal(keys[3], (16,), jnp.float32),
        "fc1_w": s * jax.random.normal(keys[4], (120, 400), jnp.float32),
        "fc1_b": s * jax.random.normal(keys[5], (120,), jnp.float32),
        "fc2_w": s * jax.random.normal(keys[6], (84, 120), jnp.float32),
        "fc2_b": s * jax.random.normal(keys[7], (84,), jnp.float32),
        "fc3_w": s * jax.random.normal(keys[8], (10, 84), jnp.float32),
        "fc3_b": s * jax.random.normal(keys[9], (10,), jnp.float32),
    }


if __name__ == "__main__":
    # 32x32 RGB input (the 16*5*5 flatten in fc1 implies 32x32), small batch of 2.
    x = jax.random.normal(jax.random.PRNGKey(0), (2, 3, 32, 32), jnp.float32)
    params = make_params()
    prepped = jax.block_until_ready(prepare_params(params))

    fwd = jax.jit(example_forward)
    out = jax.block_until_ready(fwd(x, prepped))
    assert out.shape == (2, 10) and out.dtype == jnp.float32

    ref = jax.block_until_ready(reference_forward(x, params))
    np.testing.assert_allclose(np.asarray(out), np.asarray(ref), rtol=2e-2, atol=2e-2)

    print("KERNEL_OK")
</pallas_src>

<mosaic_0001>
module attributes {stable_mosaic.version = 11 : i64} {
  func.func @_conv1_relu_pool_kernel(%arg0: i32, %arg1: memref<4x1568x128xf32, #tpu.memory_space<vmem>>, %arg2: memref<128x8xf32, #tpu.memory_space<vmem>>, %arg3: memref<1x8xf32, #tpu.memory_space<vmem>>, %arg4: memref<1568x8xf32, #tpu.memory_space<vmem>>) attributes {dimension_semantics = [#tpu.dimension_semantics<parallel>], iteration_bounds = array<i64: 1>, scalar_prefetch = 0 : i64, scratch_operands = 0 : i64, tpu.core_type = #tpu.core_type<tc>, window_params = [{transform_indices = @transform_0, window_bounds = array<i64: 4, 1568, 128>}, {pipeline_mode = #tpu.pipeline_mode<synchronous>, transform_indices = @transform_1, window_bounds = array<i64: 128, 8>}, {pipeline_mode = #tpu.pipeline_mode<synchronous>, transform_indices = @transform_2, window_bounds = array<i64: 1, 8>}, {transform_indices = @transform_3, window_bounds = array<i64: 1568, 8>}]} {
    %c0 = arith.constant 0 : index
    %c0_0 = arith.constant 0 : index
    %c0_1 = arith.constant 0 : index
    %0 = vector.load %arg1[%c0, %c0_0, %c0_1] : memref<4x1568x128xf32, #tpu.memory_space<vmem>>, vector<1x1568x128xf32>
    %1 = vector.shape_cast %0 : vector<1x1568x128xf32> to vector<1568x128xf32>
    %c0_2 = arith.constant 0 : index
    %c0_3 = arith.constant 0 : index
    %2 = vector.load %arg2[%c0_2, %c0_3] : memref<128x8xf32, #tpu.memory_space<vmem>>, vector<128x8xf32>
    %cst = arith.constant dense<0.000000e+00> : vector<1568x8xf32>
    %3 = tpu.matmul %1, %2, %cst {dimension_numbers = #tpu.dot_dimension_numbers<[1], [0], [0], [1], [0, 0, 1, 1], [], []>} : vector<1568x128xf32>, vector<128x8xf32>, vector<1568x8xf32> -> vector<1568x8xf32>
    %c0_4 = arith.constant 0 : index
    %c0_5 = arith.constant 0 : index
    %4 = vector.load %arg3[%c0_4, %c0_5] : memref<1x8xf32, #tpu.memory_space<vmem>>, vector<1x8xf32>
    %5 = vector.broadcast %4 : vector<1x8xf32> to vector<1568x8xf32>
    %6 = arith.addf %3, %5 : vector<1568x8xf32>
    %cst_6 = arith.constant 0.000000e+00 : f32
    %7 = vector.broadcast %cst_6 : f32 to vector<1568x8xf32>
    %8 = arith.maximumf %6, %7 : vector<1568x8xf32>
    %c1 = arith.constant 1 : index
    %c0_7 = arith.constant 0 : index
    %c0_8 = arith.constant 0 : index
    %9 = vector.load %arg1[%c1, %c0_7, %c0_8] : memref<4x1568x128xf32, #tpu.memory_space<vmem>>, vector<1x1568x128xf32>
    %10 = vector.shape_cast %9 : vector<1x1568x128xf32> to vector<1568x128xf32>
    %c0_9 = arith.constant 0 : index
    %c0_10 = arith.constant 0 : index
    %11 = vector.load %arg2[%c0_9, %c0_10] : memref<128x8xf32, #tpu.memory_space<vmem>>, vector<128x8xf32>
    %cst_11 = arith.constant dense<0.000000e+00> : vector<1568x8xf32>
    %12 = tpu.matmul %10, %11, %cst_11 {dimension_numbers = #tpu.dot_dimension_numbers<[1], [0], [0], [1], [0, 0, 1, 1], [], []>} : vector<1568x128xf32>, vector<128x8xf32>, vector<1568x8xf32> -> vector<1568x8xf32>
    %c0_12 = arith.constant 0 : index
    %c0_13 = arith.constant 0 : index
    %13 = vector.load %arg3[%c0_12, %c0_13] : memref<1x8xf32, #tpu.memory_space<vmem>>, vector<1x8xf32>
    %14 = vector.broadcast %13 : vector<1x8xf32> to vector<1568x8xf32>
    %15 = arith.addf %12, %14 : vector<1568x8xf32>
    %cst_14 = arith.constant 0.000000e+00 : f32
    %16 = vector.broadcast %cst_14 : f32 to vector<1568x8xf32>
    %17 = arith.maximumf %15, %16 : vector<1568x8xf32>
    %18 = arith.maximumf %8, %17 : vector<1568x8xf32>
    %c2 = arith.constant 2 : index
    %c0_15 = arith.constant 0 : index
    %c0_16 = arith.constant 0 : index
    %19 = vector.load %arg1[%c2, %c0_15, %c0_16] : memref<4x1568x128xf32, #tpu.memory_space<vmem>>, vector<1x1568x128xf32>
    %20 = vector.shape_cast %19 : vector<1x1568x128xf32> to vector<1568x128xf32>
    %c0_17 = arith.constant 0 : index
    %c0_18 = arith.constant 0 : index
    %21 = vector.load %arg2[%c0_17, %c0_18] : memref<128x8xf32, #tpu.memory_space<vmem>>, vector<128x8xf32>
    %cst_19 = arith.constant dense<0.000000e+00> : vector<1568x8xf32>
    %22 = tpu.matmul %20, %21, %cst_19 {dimension_numbers = #tpu.dot_dimension_numbers<[1], [0], [0], [1], [0, 0, 1, 1], [], []>} : vector<1568x128xf32>, vector<128x8xf32>, vector<1568x8xf32> -> vector<1568x8xf32>
    %c0_20 = arith.constant 0 : index
    %c0_21 = arith.constant 0 : index
    %23 = vector.load %arg3[%c0_20, %c0_21] : memref<1x8xf32, #tpu.memory_space<vmem>>, vector<1x8xf32>
    %24 = vector.broadcast %23 : vector<1x8xf32> to vector<1568x8xf32>
    %25 = arith.addf %22, %24 : vector<1568x8xf32>
    %cst_22 = arith.constant 0.000000e+00 : f32
    %26 = vector.broadcast %cst_22 : f32 to vector<1568x8xf32>
    %27 = arith.maximumf %25, %26 : vector<1568x8xf32>
    %28 = arith.maximumf %18, %27 : vector<1568x8xf32>
    %c3 = arith.constant 3 : index
    %c0_23 = arith.constant 0 : index
    %c0_24 = arith.constant 0 : index
    %29 = vector.load %arg1[%c3, %c0_23, %c0_24] : memref<4x1568x128xf32, #tpu.memory_space<vmem>>, vector<1x1568x128xf32>
    %30 = vector.shape_cast %29 : vector<1x1568x128xf32> to vector<1568x128xf32>
    %c0_25 = arith.constant 0 : index
    %c0_26 = arith.constant 0 : index
    %31 = vector.load %arg2[%c0_25, %c0_26] : memref<128x8xf32, #tpu.memory_space<vmem>>, vector<128x8xf32>
    %cst_27 = arith.constant dense<0.000000e+00> : vector<1568x8xf32>
    %32 = tpu.matmul %30, %31, %cst_27 {dimension_numbers = #tpu.dot_dimension_numbers<[1], [0], [0], [1], [0, 0, 1, 1], [], []>} : vector<1568x128xf32>, vector<128x8xf32>, vector<1568x8xf32> -> vector<1568x8xf32>
    %c0_28 = arith.constant 0 : index
    %c0_29 = arith.constant 0 : index
    %33 = vector.load %arg3[%c0_28, %c0_29] : memref<1x8xf32, #tpu.memory_space<vmem>>, vector<1x8xf32>
    %34 = vector.broadcast %33 : vector<1x8xf32> to vector<1568x8xf32>
    %35 = arith.addf %32, %34 : vector<1568x8xf32>
    %cst_30 = arith.constant 0.000000e+00 : f32
    %36 = vector.broadcast %cst_30 : f32 to vector<1568x8xf32>
    %37 = arith.maximumf %35, %36 : vector<1568x8xf32>
    %38 = arith.maximumf %28, %37 : vector<1568x8xf32>
    %c0_31 = arith.constant 0 : index
    %c0_32 = arith.constant 0 : index
    %39 = vector.load %arg4[%c0_31, %c0_32] : memref<1568x8xf32, #tpu.memory_space<vmem>>, vector<1568x8xf32>
    tpu.vector_store %arg4[%c0_31, %c0_32], %38 {strides = array<i32>} : memref<1568x8xf32, #tpu.memory_space<vmem>>, vector<1568x8xf32>,
    return
  }
  func.func @transform_0(%arg0: i32) -> (i32, i32, i32) {
    %c0_i32 = arith.constant 0 : i32
    %c0_i32_0 = arith.constant 0 : i32
    %c0_i32_1 = arith.constant 0 : i32
    return %c0_i32, %arg0, %c0_i32_0 : i32, i32, i32
  }
  func.func @transform_1(%arg0: i32) -> (i32, i32) {
    %c0_i32 = arith.constant 0 : i32
    %c0_i32_0 = arith.constant 0 : i32
    %c0_i32_1 = arith.constant 0 : i32
    return %c0_i32, %c0_i32_0 : i32, i32
  }
  func.func @transform_2(%arg0: i32) -> (i32, i32) {
    %c0_i32 = arith.constant 0 : i32
    %c0_i32_0 = arith.constant 0 : i32
    %c0_i32_1 = arith.constant 0 : i32
    return %c0_i32, %c0_i32_0 : i32, i32
  }
  func.func @transform_3(%arg0: i32) -> (i32, i32) {
    %c0_i32 = arith.constant 0 : i32
    %c0_i32_0 = arith.constant 0 : i32
    return %arg0, %c0_i32 : i32, i32
  }
}

module attributes {stable_mosaic.version = 11 : i64} {
  func.func @_conv2_fc_kernel(%arg0: i32, %arg1: memref<4x25x8x256xf32, #tpu.memory_space<vmem>>, %arg2: memref<256x128xf32, #tpu.memory_space<vmem>>, %arg3: memref<1x128xf32, #tpu.memory_space<vmem>>, %arg4: memref<25x128x128xf32, #tpu.memory_space<vmem>>, %arg5: memref<1x128xf32, #tpu.memory_space<vmem>>, %arg6: memref<128x128xf32, #tpu.memory_space<vmem>>, %arg7: memref<1x128xf32, #tpu.memory_space<vmem>>, %arg8: memref<128x128xf32, #tpu.memory_space<vmem>>, %arg9: memref<1x128xf32, #tpu.memory_space<vmem>>, %arg10: memref<8x128xf32, #tpu.memory_space<vmem>>) attributes {dimension_semantics = [#tpu.dimension_semantics<parallel>], iteration_bounds = array<i64: 1>, scalar_prefetch = 0 : i64, scratch_operands = 0 : i64, tpu.core_type = #tpu.core_type<tc>, window_params = [{transform_indices = @transform_0, window_bounds = array<i64: 4, 25, 8, 256>}, {pipeline_mode = #tpu.pipeline_mode<synchronous>, transform_indices = @transform_1, window_bounds = array<i64: 256, 128>}, {pipeline_mode = #tpu.pipeline_mode<synchronous>, transform_indices = @transform_2, window_bounds = array<i64: 1, 128>}, {pipeline_mode = #tpu.pipeline_mode<synchronous>, transform_indices = @transform_3, window_bounds = array<i64: 25, 128, 128>}, {pipeline_mode = #tpu.pipeline_mode<synchronous>, transform_indices = @transform_4, window_bounds = array<i64: 1, 128>}, {pipeline_mode = #tpu.pipeline_mode<synchronous>, transform_indices = @transform_5, window_bounds = array<i64: 128, 128>}, {pipeline_mode = #tpu.pipeline_mode<synchronous>, transform_indices = @transform_6, window_bounds = array<i64: 1, 128>}, {pipeline_mode = #tpu.pipeline_mode<synchronous>, transform_indices = @transform_7, window_bounds = array<i64: 128, 128>}, {pipeline_mode = #tpu.pipeline_mode<synchronous>, transform_indices = @transform_8, window_bounds = array<i64: 1, 128>}, {transform_indices = @transform_9, window_bounds = array<i64: 8, 128>}]} {
    %c0 = arith.constant 0 : index
    %c0_0 = arith.constant 0 : index
    %c0_1 = arith.constant 0 : index
    %c0_2 = arith.constant 0 : index
    %0 = vector.load %arg1[%c0, %c0_0, %c0_1, %c0_2] : memref<4x25x8x256xf32, #tpu.memory_space<vmem>>, vector<1x25x8x256xf32>
    %1 = vector.shape_cast %0 : vector<1x25x8x256xf32> to vector<25x8x256xf32>
    %2 = vector.shape_cast %1 : vector<25x8x256xf32> to vector<200x256xf32>
    %c0_3 = arith.constant 0 : index
    %c0_4 = arith.constant 0 : index
    %3 = vector.load %arg2[%c0_3, %c0_4] : memref<256x128xf32, #tpu.memory_space<vmem>>, vector<256x128xf32>
    %cst = arith.constant dense<0.000000e+00> : vector<200x128xf32>
    %4 = tpu.matmul %2, %3, %cst {dimension_numbers = #tpu.dot_dimension_numbers<[1], [0], [0], [1], [0, 0, 1, 1], [], []>} : vector<200x256xf32>, vector<256x128xf32>, vector<200x128xf32> -> vector<200x128xf32>
    %c0_5 = arith.constant 0 : index
    %c0_6 = arith.constant 0 : index
    %5 = vector.load %arg3[%c0_5, %c0_6] : memref<1x128xf32, #tpu.memory_space<vmem>>, vector<1x128xf32>
    %6 = vector.broadcast %5 : vector<1x128xf32> to vector<200x128xf32>
    %7 = arith.addf %4, %6 : vector<200x128xf32>
    %cst_7 = arith.constant 0.000000e+00 : f32
    %8 = vector.broadcast %cst_7 : f32 to vector<200x128xf32>
    %9 = arith.maximumf %7, %8 : vector<200x128xf32>
    %c1 = arith.constant 1 : index
    %c0_8 = arith.constant 0 : index
    %c0_9 = arith.constant 0 : index
    %c0_10 = arith.constant 0 : index
    %10 = vector.load %arg1[%c1, %c0_8, %c0_9, %c0_10] : memref<4x25x8x256xf32, #tpu.memory_space<vmem>>, vector<1x25x8x256xf32>
    %11 = vector.shape_cast %10 : vector<1x25x8x256xf32> to vector<25x8x256xf32>
    %12 = vector.shape_cast %11 : vector<25x8x256xf32> to vector<200x256xf32>
    %c0_11 = arith.constant 0 : index
    %c0_12 = arith.constant 0 : index
    %13 = vector.load %arg2[%c0_11, %c0_12] : memref<256x128xf32, #tpu.memory_space<vmem>>, vector<256x128xf32>
    %cst_13 = arith.constant dense<0.000000e+00> : vector<200x128xf32>
    %14 = tpu.matmul %12, %13, %cst_13 {dimension_numbers = #tpu.dot_dimension_numbers<[1], [0], [0], [1], [0, 0, 1, 1], [], []>} : vector<200x256xf32>, vector<256x128xf32>, vector<200x128xf32> -> vector<200x128xf32>
    %c0_14 = arith.constant 0 : index
    %c0_15 = arith.constant 0 : index
    %15 = vector.load %arg3[%c0_14, %c0_15] : memref<1x128xf32, #tpu.memory_space<vmem>>, vector<1x128xf32>
    %16 = vector.broadcast %15 : vector<1x128xf32> to vector<200x128xf32>
    %17 = arith.addf %14, %16 : vector<200x128xf32>
    %cst_16 = arith.constant 0.000000e+00 : f32
    %18 = vector.broadcast %cst_16 : f32 to vector<200x128xf32>
    %19 = arith.maximumf %17, %18 : vector<200x128xf32>
    %20 = arith.maximumf %9, %19 : vector<200x128xf32>
    %c2 = arith.constant 2 : index
    %c0_17 = arith.constant 0 : index
    %c0_18 = arith.constant 0 : index
    %c0_19 = arith.constant 0 : index
    %21 = vector.load %arg1[%c2, %c0_17, %c0_18, %c0_19] : memref<4x25x8x256xf32, #tpu.memory_space<vmem>>, vector<1x25x8x256xf32>
    %22 = vector.shape_cast %21 : vector<1x25x8x256xf32> to vector<25x8x256xf32>
    %23 = vector.shape_cast %22 : vector<25x8x256xf32> to vector<200x256xf32>
    %c0_20 = arith.constant 0 : index
    %c0_21 = arith.constant 0 : index
    %24 = vector.load %arg2[%c0_20, %c0_21] : memref<256x128xf32, #tpu.memory_space<vmem>>, vector<256x128xf32>
    %cst_22 = arith.constant dense<0.000000e+00> : vector<200x128xf32>
    %25 = tpu.matmul %23, %24, %cst_22 {dimension_numbers = #tpu.dot_dimension_numbers<[1], [0], [0], [1], [0, 0, 1, 1], [], []>} : vector<200x256xf32>, vector<256x128xf32>, vector<200x128xf32> -> vector<200x128xf32>
    %c0_23 = arith.constant 0 : index
    %c0_24 = arith.constant 0 : index
    %26 = vector.load %arg3[%c0_23, %c0_24] : memref<1x128xf32, #tpu.memory_space<vmem>>, vector<1x128xf32>
    %27 = vector.broadcast %26 : vector<1x128xf32> to vector<200x128xf32>
    %28 = arith.addf %25, %27 : vector<200x128xf32>
    %cst_25 = arith.constant 0.000000e+00 : f32
    %29 = vector.broadcast %cst_25 : f32 to vector<200x128xf32>
    %30 = arith.maximumf %28, %29 : vector<200x128xf32>
    %31 = arith.maximumf %20, %30 : vector<200x128xf32>
    %c3 = arith.constant 3 : index
    %c0_26 = arith.constant 0 : index
    %c0_27 = arith.constant 0 : index
    %c0_28 = arith.constant 0 : index
    %32 = vector.load %arg1[%c3, %c0_26, %c0_27, %c0_28] : memref<4x25x8x256xf32, #tpu.memory_space<vmem>>, vector<1x25x8x256xf32>
    %33 = vector.shape_cast %32 : vector<1x25x8x256xf32> to vector<25x8x256xf32>
    %34 = vector.shape_cast %33 : vector<25x8x256xf32> to vector<200x256xf32>
    %c0_29 = arith.constant 0 : index
    %c0_30 = arith.constant 0 : index
    %35 = vector.load %arg2[%c0_29, %c0_30] : memref<256x128xf32, #tpu.memory_space<vmem>>, vector<256x128xf32>
    %cst_31 = arith.constant dense<0.000000e+00> : vector<200x128xf32>
    %36 = tpu.matmul %34, %35, %cst_31 {dimension_numbers = #tpu.dot_dimension_numbers<[1], [0], [0], [1], [0, 0, 1, 1], [], []>} : vector<200x256xf32>, vector<256x128xf32>, vector<200x128xf32> -> vector<200x128xf32>
    %c0_32 = arith.constant 0 : index
    %c0_33 = arith.constant 0 : index
    %37 = vector.load %arg3[%c0_32, %c0_33] : memref<1x128xf32, #tpu.memory_space<vmem>>, vector<1x128xf32>
    %38 = vector.broadcast %37 : vector<1x128xf32> to vector<200x128xf32>
    %39 = arith.addf %36, %38 : vector<200x128xf32>
    %cst_34 = arith.constant 0.000000e+00 : f32
    %40 = vector.broadcast %cst_34 : f32 to vector<200x128xf32>
    %41 = arith.maximumf %39, %40 : vector<200x128xf32>
    %42 = arith.maximumf %31, %41 : vector<200x128xf32>
    %43 = vector.shape_cast %42 : vector<200x128xf32> to vector<25x8x128xf32>
    %c0_35 = arith.constant 0 : index
    %c0_36 = arith.constant 0 : index
    %c0_37 = arith.constant 0 : index
    %44 = vector.load %arg4[%c0_35, %c0_36, %c0_37] : memref<25x128x128xf32, #tpu.memory_space<vmem>>, vector<25x128x128xf32>
    "tpu.trace_start"() <{level = 10 : i32, message = "pnc,pcj->pnj"}> : () -> ()
    %cst_38 = arith.constant dense<0.000000e+00> : vector<25x8x128xf32>
    %45 = tpu.matmul %43, %44, %cst_38 {dimension_numbers = #tpu.dot_dimension_numbers<[2], [1], [1], [2], [0, 0, 0, 1, 1, 2], [0], [0]>} : vector<25x8x128xf32>, vector<25x128x128xf32>, vector<25x8x128xf32> -> vector<25x8x128xf32>
    "tpu.trace_stop"() : () -> ()
    %cst_39 = arith.constant dense<0.000000e+00> : vector<8x128xf32>
    %46 = vector.multi_reduction <add>, %45, %cst_39 [0] : vector<25x8x128xf32> to vector<8x128xf32>
    %c0_40 = arith.constant 0 : index
    %c0_41 = arith.constant 0 : index
    %47 = vector.load %arg5[%c0_40, %c0_41] : memref<1x128xf32, #tpu.memory_space<vmem>>, vector<1x128xf32>
    %48 = vector.broadcast %47 : vector<1x128xf32> to vector<8x128xf32>
    %49 = arith.addf %46, %48 : vector<8x128xf32>
    %cst_42 = arith.constant 0.000000e+00 : f32
    %50 = vector.broadcast %cst_42 : f32 to vector<8x128xf32>
    %51 = arith.maximumf %49, %50 : vector<8x128xf32>
    %c0_43 = arith.constant 0 : index
    %c0_44 = arith.constant 0 : index
    %52 = vector.load %arg6[%c0_43, %c0_44] : memref<128x128xf32, #tpu.memory_space<vmem>>, vector<128x128xf32>
    %cst_45 = arith.constant dense<0.000000e+00> : vector<8x128xf32>
    %53 = tpu.matmul %51, %52, %cst_45 {dimension_numbers = #tpu.dot_dimension_numbers<[1], [0], [0], [1], [0, 0, 1, 1], [], []>} : vector<8x128xf32>, vector<128x128xf32>, vector<8x128xf32> -> vector<8x128xf32>
    %c0_46 = arith.constant 0 : index
    %c0_47 = arith.constant 0 : index
    %54 = vector.load %arg7[%c0_46, %c0_47] : memref<1x128xf32, #tpu.memory_space<vmem>>, vector<1x128xf32>
    %55 = vector.broadcast %54 : vector<1x128xf32> to vector<8x128xf32>
    %56 = arith.addf %53, %55 : vector<8x128xf32>
    %cst_48 = arith.constant 0.000000e+00 : f32
    %57 = vector.broadcast %cst_48 : f32 to vector<8x128xf32>
    %58 = arith.maximumf %56, %57 : vector<8x128xf32>
    %c0_49 = arith.constant 0 : index
    %c0_50 = arith.constant 0 : index
    %59 = vector.load %arg8[%c0_49, %c0_50] : memref<128x128xf32, #tpu.memory_space<vmem>>, vector<128x128xf32>
    %cst_51 = arith.constant dense<0.000000e+00> : vector<8x128xf32>
    %60 = tpu.matmul %58, %59, %cst_51 {dimension_numbers = #tpu.dot_dimension_numbers<[1], [0], [0], [1], [0, 0, 1, 1], [], []>} : vector<8x128xf32>, vector<128x128xf32>, vector<8x128xf32> -> vector<8x128xf32>
    %c0_52 = arith.constant 0 : index
    %c0_53 = arith.constant 0 : index
    %61 = vector.load %arg9[%c0_52, %c0_53] : memref<1x128xf32, #tpu.memory_space<vmem>>, vector<1x128xf32>
    %62 = vector.broadcast %61 : vector<1x128xf32> to vector<8x128xf32>
    %63 = arith.addf %60, %62 : vector<8x128xf32>
    %c0_54 = arith.constant 0 : index
    %c0_55 = arith.constant 0 : index
    %64 = vector.load %arg10[%c0_54, %c0_55] : memref<8x128xf32, #tpu.memory_space<vmem>>, vector<8x128xf32>
    tpu.vector_store %arg10[%c0_54, %c0_55], %63 {strides = array<i32>} : memref<8x128xf32, #tpu.memory_space<vmem>>, vector<8x128xf32>,
    return
  }
  func.func @transform_0(%arg0: i32) -> (i32, i32, i32, i32) {
    %c0_i32 = arith.constant 0 : i32
    %c0_i32_0 = arith.constant 0 : i32
    %c0_i32_1 = arith.constant 0 : i32
    %c0_i32_2 = arith.constant 0 : i32
    return %c0_i32, %c0_i32_0, %arg0, %c0_i32_1 : i32, i32, i32, i32
  }
  func.func @transform_1(%arg0: i32) -> (i32, i32) {
    %c0_i32 = arith.constant 0 : i32
    %c0_i32_0 = arith.constant 0 : i32
    %c0_i32_1 = arith.constant 0 : i32
    return %c0_i32, %c0_i32_0 : i32, i32
  }
  func.func @transform_2(%arg0: i32) -> (i32, i32) {
    %c0_i32 = arith.constant 0 : i32
    %c0_i32_0 = arith.constant 0 : i32
    %c0_i32_1 = arith.constant 0 : i32
    return %c0_i32, %c0_i32_0 : i32, i32
  }
  func.func @transform_3(%arg0: i32) -> (i32, i32, i32) {
    %c0_i32 = arith.constant 0 : i32
    %c0_i32_0 = arith.constant 0 : i32
    %c0_i32_1 = arith.constant 0 : i32
    %c0_i32_2 = arith.constant 0 : i32
    return %c0_i32, %c0_i32_0, %c0_i32_1 : i32, i32, i32
  }
  func.func @transform_4(%arg0: i32) -> (i32, i32) {
    %c0_i32 = arith.constant 0 : i32
    %c0_i32_0 = arith.constant 0 : i32
    %c0_i32_1 = arith.constant 0 : i32
    return %c0_i32, %c0_i32_0 : i32, i32
  }
  func.func @transform_5(%arg0: i32) -> (i32, i32) {
    %c0_i32 = arith.constant 0 : i32
    %c0_i32_0 = arith.constant 0 : i32
    %c0_i32_1 = arith.constant 0 : i32
    return %c0_i32, %c0_i32_0 : i32, i32
  }
  func.func @transform_6(%arg0: i32) -> (i32, i32) {
    %c0_i32 = arith.constant 0 : i32
    %c0_i32_0 = arith.constant 0 : i32
    %c0_i32_1 = arith.constant 0 : i32
    return %c0_i32, %c0_i32_0 : i32, i32
  }
  func.func @transform_7(%arg0: i32) -> (i32, i32) {
    %c0_i32 = arith.constant 0 : i32
    %c0_i32_0 = arith.constant 0 : i32
    %c0_i32_1 = arith.constant 0 : i32
    return %c0_i32, %c0_i32_0 : i32, i32
  }
  func.func @transform_8(%arg0: i32) -> (i32, i32) {
    %c0_i32 = arith.constant 0 : i32
    %c0_i32_0 = arith.constant 0 : i32
    %c0_i32_1 = arith.constant 0 : i32
    return %c0_i32, %c0_i32_0 : i32, i32
  }
  func.func @transform_9(%arg0: i32) -> (i32, i32) {
    %c0_i32 = arith.constant 0 : i32
    %c0_i32_0 = arith.constant 0 : i32
    return %arg0, %c0_i32 : i32, i32
  }
}

</mosaic_0001>

<bundles_post_ra>
// kernel: example_forward.2
= control target key start
LH: loop header
LB: loop body
LE: loop exit
PB: predicated region body
PF: predicated region fallthrough
CT: control target
= control target key end

     0   :  { %vm4613_vm0 = vcmask 64512   ;;  %s9444_s1 = inlined_call_operand.vmem [shape: f32[128,8], index: 1, kind: input, shape index: {}]   ;;  %s9445_s0 = inlined_call_operand.vmem [shape: f32[4,1568,128], index: 0, kind: input, shape index: {}]   ;;  %s9446_s2 = inlined_call_operand.vmem [shape: f32[1,8], index: 2, kind: input, shape index: {}]   ;;  %s9447_s3 = inlined_call_operand.vmem [shape: f32[1568,8], index: 3, kind: output, shape index: {}]  }
   0x1   :  { %v225_v0 = vld [vmem:[%s9444_s1 + $0x78] sm:$0xff]  ;;  %v224_v1 = vld [vmem:[%s9444_s1 + $0x70] sm:$0xff]  ;;  %v223_v2 = vld [vmem:[%s9444_s1 + $0x68] sm:$0xff] }
   0x2   :  { %2422 = vmatpush.msra.mxu2 %v225_v0  ;;  %3616 = vmatpush.msra.mxu3 %v225_v0  ;;  %v222_v3 = vld [vmem:[%s9444_s1 + $0x60] sm:$0xff]  ;;  %v221_v4 = vld [vmem:[%s9444_s1 + $0x58] sm:$0xff]  ;;  %v220_v5 = vld [vmem:[%s9444_s1 + $0x50] sm:$0xff] }
   0x3   :  { %230 = vmatpush.msra.mxu0 %v225_v0  ;;  %1228 = vmatpush.msra.mxu1 %v225_v0  ;;  %v219_v6 = vld [vmem:[%s9444_s1 + $0x48] sm:$0xff]  ;;  %v218_v7 = vld [vmem:[%s9444_s1 + $0x40] sm:$0xff]  ;;  %v217_v8 = vld [vmem:[%s9444_s1 + $0x38] sm:$0xff] }
   0x4   :  { %2423 = vmatpush.msra.mxu2 %v224_v1  ;;  %3617 = vmatpush.msra.mxu3 %v224_v1  ;;  %v216_v9 = vld [vmem:[%s9444_s1 + $0x30] sm:$0xff]  ;;  %v215_v10 = vld [vmem:[%s9444_s1 + $0x28] sm:$0xff]  ;;  %v214_v11 = vld [vmem:[%s9444_s1 + $0x20] sm:$0xff] }
   0x5   :  { %231 = vmatpush.msra.mxu0 %v224_v1  ;;  %1229 = vmatpush.msra.mxu1 %v224_v1  ;;  %v213_v12 = vld [vmem:[%s9444_s1 + $0x18] sm:$0xff]  ;;  %v212_v13 = vld [vmem:[%s9444_s1 + $0x10] sm:$0xff]  ;;  %v211_v14 = vld [vmem:[%s9444_s1 + $0x8] sm:$0xff] }
   0x6   :  { %2424 = vmatpush.msra.mxu2 %v223_v2  ;;  %3618 = vmatpush.msra.mxu3 %v223_v2  ;;  %v210_v15 = vld [vmem:[%s9444_s1] sm:$0xff]  ;;  %v5011_v20 = vld [vmem:[%s9445_s0 + $0xc48] sm:$0xff]  ;;  %v5012_v24 = vld [vmem:[%s9445_s0 + $0xc50] sm:$0xff] }
   0x7   :  { %232 = vmatpush.msra.mxu0 %v223_v2  ;;  %1230 = vmatpush.msra.mxu1 %v223_v2  ;;  %v5010_v16 = vld [vmem:[%s9445_s0 + $0xc40] sm:$0xff]  ;;  %v5207_v21 = vld [vmem:[%s9445_s0 + $0x1268] sm:$0xff]  ;;  %v5208_v25 = vld [vmem:[%s9445_s0 + $0x1270] sm:$0xff] }
   0x8   :  { %2425 = vmatpush.msra.mxu2 %v222_v3  ;;  %3619 = vmatpush.msra.mxu3 %v222_v3  ;;  %v5206_v17 = vld [vmem:[%s9445_s0 + $0x1260] sm:$0xff]  ;;  %v15_v22 = vld [vmem:[%s9445_s0 + $0x8] sm:$0xff]  ;;  %v16_v26 = vld [vmem:[%s9445_s0 + $0x10] sm:$0xff] }
   0x9   :  { %233 = vmatpush.msra.mxu0 %v222_v3  ;;  %1231 = vmatpush.msra.mxu1 %v222_v3  ;;  %v14_v18 = vld [vmem:[%s9445_s0] sm:$0xff]  ;;  %v4815_v23 = vld [vmem:[%s9445_s0 + $0x628] sm:$0xff]  ;;  %v4816_v27 = vld [vmem:[%s9445_s0 + $0x630] sm:$0xff] }
   0xa   :  { %2426 = vmatpush.msra.mxu2 %v221_v4  ;;  %3620 = vmatpush.msra.mxu3 %v221_v4  ;;  %v4814_v19 = vld [vmem:[%s9445_s0 + $0x620] sm:$0xff]  ;;  %v5013_v28 = vld [vmem:[%s9445_s0 + $0xc58] sm:$0xff]  ;;  %v5015_v36 = vld [vmem:[%s9445_s0 + $0xc68] sm:$0xff] }
   0xb   :  { %234 = vmatpush.msra.mxu0 %v221_v4  ;;  %1232 = vmatpush.msra.mxu1 %v221_v4  ;;  %v5209_v29 = vld [vmem:[%s9445_s0 + $0x1278] sm:$0xff]  ;;  %v5014_v32 = vld [vmem:[%s9445_s0 + $0xc60] sm:$0xff]  ;;  %v5211_v37 = vld [vmem:[%s9445_s0 + $0x1288] sm:$0xff] }
   0xc   :  { %2427 = vmatpush.msra.mxu2 %v220_v5  ;;  %3621 = vmatpush.msra.mxu3 %v220_v5  ;;  %v17_v30 = vld [vmem:[%s9445_s0 + $0x18] sm:$0xff]  ;;  %v5210_v33 = vld [vmem:[%s9445_s0 + $0x1280] sm:$0xff]  ;;  %v19_v38 = vld [vmem:[%s9445_s0 + $0x28] sm:$0xff] }
   0xd   :  { %235 = vmatpush.msra.mxu0 %v220_v5  ;;  %1233 = vmatpush.msra.mxu1 %v220_v5  ;;  %v4817_v31 = vld [vmem:[%s9445_s0 + $0x638] sm:$0xff]  ;;  %v18_v34 = vld [vmem:[%s9445_s0 + $0x20] sm:$0xff]  ;;  %v4819_v39 = vld [vmem:[%s9445_s0 + $0x648] sm:$0xff] }
   0xe   :  { %2428 = vmatpush.msra.mxu2 %v219_v6  ;;  %3622 = vmatpush.msra.mxu3 %v219_v6  ;;  %v4818_v35 = vld [vmem:[%s9445_s0 + $0x640] sm:$0xff]  ;;  %v5016_v40 = vld [vmem:[%s9445_s0 + $0xc70] sm:$0xff]  ;;  %v5017_v44 = vld [vmem:[%s9445_s0 + $0xc78] sm:$0xff] }
   0xf   :  { %236 = vmatpush.msra.mxu0 %v219_v6  ;;  %1234 = vmatpush.msra.mxu1 %v219_v6  ;;  %v5212_v41 = vld [vmem:[%s9445_s0 + $0x1290] sm:$0xff]  ;;  %v5213_v45 = vld [vmem:[%s9445_s0 + $0x1298] sm:$0xff]  ;;  %v5018_v48 = vld [vmem:[%s9445_s0 + $0xc80] sm:$0xff] }
  0x10   :  { %2429 = vmatpush.msra.mxu2 %v218_v7  ;;  %3623 = vmatpush.msra.mxu3 %v218_v7  ;;  %v20_v42 = vld [vmem:[%s9445_s0 + $0x30] sm:$0xff]  ;;  %v21_v46 = vld [vmem:[%s9445_s0 + $0x38] sm:$0xff]  ;;  %v5214_v49 = vld [vmem:[%s9445_s0 + $0x12a0] sm:$0xff] }
  0x11   :  { %237 = vmatpush.msra.mxu0 %v218_v7  ;;  %1235 = vmatpush.msra.mxu1 %v218_v7  ;;  %v4820_v43 = vld [vmem:[%s9445_s0 + $0x650] sm:$0xff]  ;;  %v4821_v47 = vld [vmem:[%s9445_s0 + $0x658] sm:$0xff]  ;;  %v22_v50 = vld [vmem:[%s9445_s0 + $0x40] sm:$0xff] }
  0x12   :  { %2430 = vmatpush.msra.mxu2 %v217_v8  ;;  %3624 = vmatpush.msra.mxu3 %v217_v8  ;;  %v4822_v51 = vld [vmem:[%s9445_s0 + $0x660] sm:$0xff]  ;;  %v5019_v52 = vld [vmem:[%s9445_s0 + $0xc88] sm:$0xff]  ;;  %v5020_v56 = vld [vmem:[%s9445_s0 + $0xc90] sm:$0xff] }
  0x13   :  { %238 = vmatpush.msra.mxu0 %v217_v8  ;;  %1236 = vmatpush.msra.mxu1 %v217_v8  ;;  %v5215_v53 = vld [vmem:[%s9445_s0 + $0x12a8] sm:$0xff]  ;;  %v5216_v57 = vld [vmem:[%s9445_s0 + $0x12b0] sm:$0xff]  ;;  %v5021_v60 = vld [vmem:[%s9445_s0 + $0xc98] sm:$0xff] }
  0x14   :  { %2431 = vmatpush.msra.mxu2 %v216_v9  ;;  %3625 = vmatpush.msra.mxu3 %v216_v9  ;;  %v23_v54 = vld [vmem:[%s9445_s0 + $0x48] sm:$0xff]  ;;  %v24_v58 = vld [vmem:[%s9445_s0 + $0x50] sm:$0xff]  ;;  %v5217_v61 = vld [vmem:[%s9445_s0 + $0x12b8] sm:$0xff] }
  0x15   :  { %239 = vmatpush.msra.mxu0 %v216_v9  ;;  %1237 = vmatpush.msra.mxu1 %v216_v9  ;;  %v4823_v55 = vld [vmem:[%s9445_s0 + $0x668] sm:$0xff]  ;;  %v4824_v59 = vld [vmem:[%s9445_s0 + $0x670] sm:$0xff]  ;;  %v25_v62 = vld [vmem:[%s9445_s0 + $0x58] sm:$0xff] }
  0x16   :  { %2432 = vmatpush.msra.mxu2 %v215_v10  ;;  %3626 = vmatpush.msra.mxu3 %v215_v10  ;;  %v4825_v63 = vld [vmem:[%s9445_s0 + $0x678] sm:$0xff]  ;;  %v5022_v0 = vld [vmem:[%s9445_s0 + $0xca0] sm:$0xff]  ;;  %v5023_v4 = vld [vmem:[%s9445_s0 + $0xca8] sm:$0xff] }
  0x17   :  { %240 = vmatpush.msra.mxu0 %v215_v10  ;;  %1238 = vmatpush.msra.mxu1 %v215_v10  ;;  %v5218_v1 = vld [vmem:[%s9445_s0 + $0x12c0] sm:$0xff]  ;;  %v5219_v5 = vld [vmem:[%s9445_s0 + $0x12c8] sm:$0xff]  ;;  %v5024_v8 = vld [vmem:[%s9445_s0 + $0xcb0] sm:$0xff] }
  0x18   :  { %2433 = vmatpush.msra.mxu2 %v214_v11  ;;  %3627 = vmatpush.msra.mxu3 %v214_v11  ;;  %v26_v2 = vld [vmem:[%s9445_s0 + $0x60] sm:$0xff]  ;;  %v27_v6 = vld [vmem:[%s9445_s0 + $0x68] sm:$0xff]  ;;  %v5220_v9 = vld [vmem:[%s9445_s0 + $0x12d0] sm:$0xff] }
  0x19   :  { %241 = vmatpush.msra.mxu0 %v214_v11  ;;  %1239 = vmatpush.msra.mxu1 %v214_v11  ;;  %v4826_v3 = vld [vmem:[%s9445_s0 + $0x680] sm:$0xff]  ;;  %v4827_v7 = vld [vmem:[%s9445_s0 + $0x688] sm:$0xff]  ;;  %v28_v10 = vld [vmem:[%s9445_s0 + $0x70] sm:$0xff] }
  0x1a   :  { %2434 = vmatpush.msra.mxu2 %v213_v12  ;;  %3628 = vmatpush.msra.mxu3 %v213_v12  ;;  %v4828_v11 = vld [vmem:[%s9445_s0 + $0x690] sm:$0xff] }
  0x1b   :  { %242 = vmatpush.msra.mxu0 %v213_v12  ;;  %1240 = vmatpush.msra.mxu1 %v213_v12  ;;  %v5025_v12 = vld [vmem:[%s9445_s0 + $0xcb8] sm:$0xff] }
  0x1c   :  { %2435 = vmatpush.msra.mxu2 %v212_v13  ;;  %3629 = vmatpush.msra.mxu3 %v212_v13 }
  0x1d   :  { %243 = vmatpush.msra.mxu0 %v212_v13  ;;  %1241 = vmatpush.msra.mxu1 %v212_v13  ;;  %v5221_v13 = vld [vmem:[%s9445_s0 + $0x12d8] sm:$0xff] }
  0x1e   :  { %2436 = vmatpush.msra.mxu2 %v211_v14  ;;  %3630 = vmatpush.msra.mxu3 %v211_v14 }
  0x1f   :  { %244 = vmatpush.msra.mxu0 %v211_v14  ;;  %1242 = vmatpush.msra.mxu1 %v211_v14  ;;  %v29_v14 = vld [vmem:[%s9445_s0 + $0x78] sm:$0xff] }
  0x20   :  { %2437 = vmatpush.msra.mxu2 %v210_v15  ;;  %3631 = vmatpush.msra.mxu3 %v210_v15 }
  0x21   :  { %2438 = vmatmul.f32.vlgmr.msra.gmra.mxu2 %v5010_v16  ;;  %3632 = vmatmul.f32.vlgmr.msra.gmra.mxu3 %v5206_v17  ;;  %v5674_v16 = vld [vmem:[%s9446_s2] ss:$0 sm:$0xff] }
  0x22   :  { %245 = vmatpush.msra.mxu0 %v210_v15  ;;  %1243 = vmatpush.msra.mxu1 %v210_v15  ;;  %v4829_v15 = vld [vmem:[%s9445_s0 + $0x698] sm:$0xff]  ;;  %v5026_v17 = vld [vmem:[%s9445_s0 + $0xcc0] sm:$0xff] }
  0x23   :  { %246 = vmatmul.f32.vlgmr.msra.gmra.mxu0 %v14_v18  ;;  %1244 = vmatmul.f32.vlgmr.msra.gmra.mxu1 %v4814_v19  ;;  %v5222_v18 = vld [vmem:[%s9445_s0 + $0x12e0] sm:$0xff] }
  0x29   :  { %2441 = vmatmul.f32.gmra.mxu2 %v5011_v20  ;;  %3635 = vmatmul.f32.gmra.mxu3 %v5207_v21  ;;  %v30_v21 = vld [vmem:[%s9445_s0 + $0x80] sm:$0xff] }
  0x2b   :  { %249 = vmatmul.f32.gmra.mxu0 %v15_v22  ;;  %1247 = vmatmul.f32.gmra.mxu1 %v4815_v23  ;;  %v4830_v22 = vld [vmem:[%s9445_s0 + $0x6a0] sm:$0xff] }
  0x31   :  { %2444 = vmatmul.f32.gmra.mxu2 %v5012_v24  ;;  %3638 = vmatmul.f32.gmra.mxu3 %v5208_v25 }
  0x33   :  { %252 = vmatmul.f32.gmra.mxu0 %v16_v26  ;;  %1250 = vmatmul.f32.gmra.mxu1 %v4816_v27 }
  0x39   :  { %2447 = vmatmul.f32.gmra.mxu2 %v5013_v28  ;;  %3641 = vmatmul.f32.gmra.mxu3 %v5209_v29 }
  0x3b   :  { %255 = vmatmul.f32.gmra.mxu0 %v17_v30  ;;  %1253 = vmatmul.f32.gmra.mxu1 %v4817_v31 }
  0x41   :  { %2450 = vmatmul.f32.gmra.mxu2 %v5014_v32  ;;  %3644 = vmatmul.f32.gmra.mxu3 %v5210_v33  ;;  %v5027_v32 = vld [vmem:[%s9445_s0 + $0xcc8] sm:$0xff] }
  0x42   :  { %v5223_v33 = vld [vmem:[%s9445_s0 + $0x12e8] sm:$0xff] }
  0x43   :  { %258 = vmatmul.f32.gmra.mxu0 %v18_v34  ;;  %1256 = vmatmul.f32.gmra.mxu1 %v4818_v35 }
  0x49   :  { %2453 = vmatmul.f32.gmra.mxu2 %v5015_v36  ;;  %3647 = vmatmul.f32.gmra.mxu3 %v5211_v37 }
  0x4b   :  { %261 = vmatmul.f32.gmra.mxu0 %v19_v38  ;;  %1259 = vmatmul.f32.gmra.mxu1 %v4819_v39  ;;  %v31_v38 = vld [vmem:[%s9445_s0 + $0x88] sm:$0xff] }
  0x4c   :  { %v4831_v39 = vld [vmem:[%s9445_s0 + $0x6a8] sm:$0xff] }
  0x51   :  { %2456 = vmatmul.f32.gmra.mxu2 %v5016_v40  ;;  %3650 = vmatmul.f32.gmra.mxu3 %v5212_v41 }
  0x53   :  { %264 = vmatmul.f32.gmra.mxu0 %v20_v42  ;;  %1262 = vmatmul.f32.gmra.mxu1 %v4820_v43 }
  0x59   :  { %2459 = vmatmul.f32.gmra.mxu2 %v5017_v44  ;;  %3653 = vmatmul.f32.gmra.mxu3 %v5213_v45 }
  0x5b   :  { %267 = vmatmul.f32.gmra.mxu0 %v21_v46  ;;  %1265 = vmatmul.f32.gmra.mxu1 %v4821_v47 }
  0x61   :  { %2462 = vmatmul.f32.gmra.mxu2 %v5018_v48  ;;  %3656 = vmatmul.f32.gmra.mxu3 %v5214_v49 }
  0x63   :  { %270 = vmatmul.f32.gmra.mxu0 %v22_v50  ;;  %1268 = vmatmul.f32.gmra.mxu1 %v4822_v51  ;;  %v5028_v51 = vld [vmem:[%s9445_s0 + $0xcd0] sm:$0xff] }
  0x69   :  { %2465 = vmatmul.f32.gmra.mxu2 %v5019_v52  ;;  %3659 = vmatmul.f32.gmra.mxu3 %v5215_v53  ;;  %v5224_v52 = vld [vmem:[%s9445_s0 + $0x12f0] sm:$0xff] }
  0x6b   :  { %273 = vmatmul.f32.gmra.mxu0 %v23_v54  ;;  %1271 = vmatmul.f32.gmra.mxu1 %v4823_v55 }
  0x71   :  { %2468 = vmatmul.f32.gmra.mxu2 %v5020_v56  ;;  %3662 = vmatmul.f32.gmra.mxu3 %v5216_v57  ;;  %v32_v57 = vld [vmem:[%s9445_s0 + $0x90] sm:$0xff] }
  0x73   :  { %276 = vmatmul.f32.gmra.mxu0 %v24_v58  ;;  %1274 = vmatmul.f32.gmra.mxu1 %v4824_v59  ;;  %v4832_v58 = vld [vmem:[%s9445_s0 + $0x6b0] sm:$0xff] }
  0x79   :  { %2471 = vmatmul.f32.gmra.mxu2 %v5021_v60  ;;  %3665 = vmatmul.f32.gmra.mxu3 %v5217_v61 }
  0x7b   :  { %279 = vmatmul.f32.gmra.mxu0 %v25_v62  ;;  %1277 = vmatmul.f32.gmra.mxu1 %v4825_v63 }
  0x81   :  { %2474 = vmatmul.f32.gmra.mxu2 %v5022_v0  ;;  %3668 = vmatmul.f32.gmra.mxu3 %v5218_v1 }
  0x83   :  { %282 = vmatmul.f32.gmra.mxu0 %v26_v2  ;;  %1280 = vmatmul.f32.gmra.mxu1 %v4826_v3 }
  0x89   :  { %2477 = vmatmul.f32.gmra.mxu2 %v5023_v4  ;;  %3671 = vmatmul.f32.gmra.mxu3 %v5219_v5 }
  0x8b   :  { %285 = vmatmul.f32.gmra.mxu0 %v27_v6  ;;  %1283 = vmatmul.f32.gmra.mxu1 %v4827_v7  ;;  %v5029_v6 = vld [vmem:[%s9445_s0 + $0xcd8] sm:$0xff] }
  0x8c   :  { %v5225_v7 = vld [vmem:[%s9445_s0 + $0x12f8] sm:$0xff] }
  0x91   :  { %2480 = vmatmul.f32.gmra.mxu2 %v5024_v8  ;;  %3674 = vmatmul.f32.gmra.mxu3 %v5220_v9 }
  0x93   :  { %288 = vmatmul.f32.gmra.mxu0 %v28_v10  ;;  %1286 = vmatmul.f32.gmra.mxu1 %v4828_v11 }
  0x99   :  { %2483 = vmatmul.f32.gmra.mxu2 %v5025_v12  ;;  %3677 = vmatmul.f32.gmra.mxu3 %v5221_v13  ;;  %v33_v12 = vld [vmem:[%s9445_s0 + $0x98] sm:$0xff] }
  0x9a   :  { %v4833_v13 = vld [vmem:[%s9445_s0 + $0x6b8] sm:$0xff] }
  0x9b   :  { %291 = vmatmul.f32.gmra.mxu0 %v29_v14  ;;  %1289 = vmatmul.f32.gmra.mxu1 %v4829_v15 }
  0xa0   :  { %v247_v19 = vpop.f32.mrf.mxu0  ;;  %v1245_v20 = vpop.f32.mrf.mxu1 }
  0xa1   :  { %2486 = vmatmul.f32.gmra.mxu2 %v5026_v17  ;;  %v248_v23 = vadd.f32 %v5674_v16, %v247_v19  ;;  %v1246_v24 = vadd.f32 %v5674_v16, %v1245_v20  ;;  %3680 = vmatmul.f32.gmra.mxu3 %v5222_v18 }
  0xa3   :  { %v835_v25 = vmax.f32 %v248_v23, 0.0  ;;  %v1833_v26 = vmax.f32 %v1246_v24, 0.0  ;;  %294 = vmatmul.f32.gmra.mxu0 %v30_v21  ;;  %1292 = vmatmul.f32.gmra.mxu1 %v4830_v22 }
  0xa4   :  { %v2439_v27 = vpop.f32.mrf.mxu2  ;;  %v3633_v28 = vpop.f32.mrf.mxu3 }
  0xa5   :  { %v2029_v29 = vmax.f32 %v835_v25, %v1833_v26  ;;  %v2440_v30 = vadd.f32 %v5674_v16, %v2439_v27  ;;  %v3634_v31 = vadd.f32 %v5674_v16, %v3633_v28  ;;  %v5030_v26 = vld [vmem:[%s9445_s0 + $0xce0] sm:$0xff] }
  0xa6   :  { %v5226_v27 = vld [vmem:[%s9445_s0 + $0x1300] sm:$0xff] }
  0xa7   :  { %v3027_v34 = vmax.f32 %v2440_v30, 0.0  ;;  %v4221_v35 = vmax.f32 %v3634_v31, 0.0 }
  0xa8   :  { %v250_v36 = vpop.f32.mrf.mxu0  ;;  %v1248_v37 = vpop.f32.mrf.mxu1 }
  0xa9   :  { %v3223_v40 = vmax.f32 %v2029_v29, %v3027_v34  ;;  %2489 = vmatmul.f32.gmra.mxu2 %v5027_v32  ;;  %v251_v41 = vadd.f32 %v5674_v16, %v250_v36  ;;  %v1249_v42 = vadd.f32 %v5674_v16, %v1248_v37  ;;  %3683 = vmatmul.f32.gmra.mxu3 %v5223_v33  ;;  %v34_v32 = vld [vmem:[%s9445_s0 + $0xa0] sm:$0xff] }
  0xaa   :  { %v4834_v33 = vld [vmem:[%s9445_s0 + $0x6c0] sm:$0xff] }
  0xab   :  { %v4417_v43 = vmax.f32 %v3223_v40, %v4221_v35  ;;  %v836_v44 = vmax.f32 %v251_v41, 0.0  ;;  %v1834_v45 = vmax.f32 %v1249_v42, 0.0  ;;  %297 = vmatmul.f32.gmra.mxu0 %v31_v38  ;;  %1295 = vmatmul.f32.gmra.mxu1 %v4831_v39 }
  0xac   :  { %v2442_v46 = vpop.f32.mrf.mxu2  ;;  %v3636_v47 = vpop.f32.mrf.mxu3 }
  0xad   :  { %4614 = vst.msk [vmem:[%s9447_s3] sm:$0xff] %vm4613_vm0, %v4417_v43  ;;  %v2030_v48 = vmax.f32 %v836_v44, %v1834_v45  ;;  %v2443_v49 = vadd.f32 %v5674_v16, %v2442_v46  ;;  %v3637_v50 = vadd.f32 %v5674_v16, %v3636_v47  ;;  %v5031_v45 = vld [vmem:[%s9445_s0 + $0xce8] sm:$0xff] }
  0xae   :  { %v5227_v46 = vld [vmem:[%s9445_s0 + $0x1308] sm:$0xff] }
  0xaf   :  { %v3028_v53 = vmax.f32 %v2443_v49, 0.0  ;;  %v4222_v54 = vmax.f32 %v3637_v50, 0.0 }
  0xb0   :  { %v253_v55 = vpop.f32.mrf.mxu0  ;;  %v1251_v56 = vpop.f32.mrf.mxu1 }
  0xb1   :  { %v3224_v59 = vmax.f32 %v2030_v48, %v3028_v53  ;;  %2492 = vmatmul.f32.gmra.mxu2 %v5028_v51  ;;  %v254_v60 = vadd.f32 %v5674_v16, %v253_v55  ;;  %v1252_v61 = vadd.f32 %v5674_v16, %v1251_v56  ;;  %3686 = vmatmul.f32.gmra.mxu3 %v5224_v52  ;;  %v35_v51 = vld [vmem:[%s9445_s0 + $0xa8] sm:$0xff] }
  0xb2   :  { %v4835_v52 = vld [vmem:[%s9445_s0 + $0x6c8] sm:$0xff] }
  0xb3   :  { %v4418_v62 = vmax.f32 %v3224_v59, %v4222_v54  ;;  %v837_v63 = vmax.f32 %v254_v60, 0.0  ;;  %v1835_v0 = vmax.f32 %v1252_v61, 0.0  ;;  %300 = vmatmul.f32.gmra.mxu0 %v32_v57  ;;  %1298 = vmatmul.f32.gmra.mxu1 %v4832_v58 }
  0xb4   :  { %v2445_v1 = vpop.f32.mrf.mxu2  ;;  %v3639_v2 = vpop.f32.mrf.mxu3 }
  0xb5   :  { %4615 = vst.msk [vmem:[%s9447_s3 + $0x8] sm:$0xff] %vm4613_vm0, %v4418_v62  ;;  %v2031_v3 = vmax.f32 %v837_v63, %v1835_v0  ;;  %v2446_v4 = vadd.f32 %v5674_v16, %v2445_v1  ;;  %v3640_v5 = vadd.f32 %v5674_v16, %v3639_v2  ;;  %v5032_v0 = vld [vmem:[%s9445_s0 + $0xcf0] sm:$0xff] }
  0xb6   :  { %v5228_v1 = vld [vmem:[%s9445_s0 + $0x1310] sm:$0xff] }
  0xb7   :  { %v3029_v8 = vmax.f32 %v2446_v4, 0.0  ;;  %v4223_v9 = vmax.f32 %v3640_v5, 0.0 }
  0xb8   :  { %v256_v10 = vpop.f32.mrf.mxu0  ;;  %v1254_v11 = vpop.f32.mrf.mxu1 }
  0xb9   :  { %v3225_v14 = vmax.f32 %v2031_v3, %v3029_v8  ;;  %2495 = vmatmul.f32.gmra.mxu2 %v5029_v6  ;;  %v257_v15 = vadd.f32 %v5674_v16, %v256_v10  ;;  %v1255_v17 = vadd.f32 %v5674_v16, %v1254_v11  ;;  %3689 = vmatmul.f32.gmra.mxu3 %v5225_v7  ;;  %v36_v6 = vld [vmem:[%s9445_s0 + $0xb0] sm:$0xff] }
  0xba   :  { %v4836_v7 = vld [vmem:[%s9445_s0 + $0x6d0] sm:$0xff] }
  0xbb   :  { %v4419_v18 = vmax.f32 %v3225_v14, %v4223_v9  ;;  %v838_v19 = vmax.f32 %v257_v15, 0.0  ;;  %v1836_v20 = vmax.f32 %v1255_v17, 0.0  ;;  %303 = vmatmul.f32.gmra.mxu0 %v33_v12  ;;  %1301 = vmatmul.f32.gmra.mxu1 %v4833_v13 }
  0xbc   :  { %v2448_v21 = vpop.f32.mrf.mxu2  ;;  %v3642_v22 = vpop.f32.mrf.mxu3 }
  0xbd   :  { %4616 = vst.msk [vmem:[%s9447_s3 + $0x10] sm:$0xff] %vm4613_vm0, %v4419_v18  ;;  %v2032_v23 = vmax.f32 %v838_v19, %v1836_v20  ;;  %v2449_v24 = vadd.f32 %v5674_v16, %v2448_v21  ;;  %v3643_v25 = vadd.f32 %v5674_v16, %v3642_v22  ;;  %v5033_v20 = vld [vmem:[%s9445_s0 + $0xcf8] sm:$0xff] }
  0xbe   :  { %v5229_v21 = vld [vmem:[%s9445_s0 + $0x1318] sm:$0xff] }
  0xbf   :  { %v3030_v28 = vmax.f32 %v2449_v24, 0.0  ;;  %v4224_v29 = vmax.f32 %v3643_v25, 0.0 }
  0xc0   :  { %v259_v30 = vpop.f32.mrf.mxu0  ;;  %v1257_v31 = vpop.f32.mrf.mxu1 }
  0xc1   :  { %v3226_v34 = vmax.f32 %v2032_v23, %v3030_v28  ;;  %2498 = vmatmul.f32.gmra.mxu2 %v5030_v26  ;;  %v260_v35 = vadd.f32 %v5674_v16, %v259_v30  ;;  %v1258_v36 = vadd.f32 %v5674_v16, %v1257_v31  ;;  %3692 = vmatmul.f32.gmra.mxu3 %v5226_v27  ;;  %v37_v26 = vld [vmem:[%s9445_s0 + $0xb8] sm:$0xff] }
  0xc2   :  { %v4837_v27 = vld [vmem:[%s9445_s0 + $0x6d8] sm:$0xff] }
  0xc3   :  { %v4420_v37 = vmax.f32 %v3226_v34, %v4224_v29  ;;  %v839_v38 = vmax.f32 %v260_v35, 0.0  ;;  %v1837_v39 = vmax.f32 %v1258_v36, 0.0  ;;  %306 = vmatmul.f32.gmra.mxu0 %v34_v32  ;;  %1304 = vmatmul.f32.gmra.mxu1 %v4834_v33 }
  0xc4   :  { %v2451_v40 = vpop.f32.mrf.mxu2  ;;  %v3645_v41 = vpop.f32.mrf.mxu3 }
  0xc5   :  { %4617 = vst.msk [vmem:[%s9447_s3 + $0x18] sm:$0xff] %vm4613_vm0, %v4420_v37  ;;  %v2033_v42 = vmax.f32 %v839_v38, %v1837_v39  ;;  %v2452_v43 = vadd.f32 %v5674_v16, %v2451_v40  ;;  %v3646_v44 = vadd.f32 %v5674_v16, %v3645_v41  ;;  %v5034_v39 = vld [vmem:[%s9445_s0 + $0xd00] sm:$0xff] }
  0xc6   :  { %v5230_v40 = vld [vmem:[%s9445_s0 + $0x1320] sm:$0xff] }
  0xc7   :  { %v3031_v47 = vmax.f32 %v2452_v43, 0.0  ;;  %v4225_v48 = vmax.f32 %v3646_v44, 0.0 }
  0xc8   :  { %v262_v49 = vpop.f32.mrf.mxu0  ;;  %v1260_v50 = vpop.f32.mrf.mxu1 }
  0xc9   :  { %v3227_v53 = vmax.f32 %v2033_v42, %v3031_v47  ;;  %2501 = vmatmul.f32.gmra.mxu2 %v5031_v45  ;;  %v263_v54 = vadd.f32 %v5674_v16, %v262_v49  ;;  %v1261_v55 = vadd.f32 %v5674_v16, %v1260_v50  ;;  %3695 = vmatmul.f32.gmra.mxu3 %v5227_v46  ;;  %v38_v45 = vld [vmem:[%s9445_s0 + $0xc0] sm:$0xff] }
  0xca   :  { %v4838_v46 = vld [vmem:[%s9445_s0 + $0x6e0] sm:$0xff] }
  0xcb   :  { %v4421_v56 = vmax.f32 %v3227_v53, %v4225_v48  ;;  %v840_v57 = vmax.f32 %v263_v54, 0.0  ;;  %v1838_v58 = vmax.f32 %v1261_v55, 0.0  ;;  %309 = vmatmul.f32.gmra.mxu0 %v35_v51  ;;  %1307 = vmatmul.f32.gmra.mxu1 %v4835_v52 }
  0xcc   :  { %v2454_v59 = vpop.f32.mrf.mxu2  ;;  %v3648_v60 = vpop.f32.mrf.mxu3 }
  0xcd   :  { %4618 = vst.msk [vmem:[%s9447_s3 + $0x20] sm:$0xff] %vm4613_vm0, %v4421_v56  ;;  %v2034_v61 = vmax.f32 %v840_v57, %v1838_v58  ;;  %v2455_v62 = vadd.f32 %v5674_v16, %v2454_v59  ;;  %v3649_v63 = vadd.f32 %v5674_v16, %v3648_v60  ;;  %v5035_v58 = vld [vmem:[%s9445_s0 + $0xd08] sm:$0xff] }
  0xce   :  { %v5231_v59 = vld [vmem:[%s9445_s0 + $0x1328] sm:$0xff] }
  0xcf   :  { %v3032_v2 = vmax.f32 %v2455_v62, 0.0  ;;  %v4226_v3 = vmax.f32 %v3649_v63, 0.0 }
  0xd0   :  { %v265_v4 = vpop.f32.mrf.mxu0  ;;  %v1263_v5 = vpop.f32.mrf.mxu1 }
  0xd1   :  { %v3228_v8 = vmax.f32 %v2034_v61, %v3032_v2  ;;  %2504 = vmatmul.f32.gmra.mxu2 %v5032_v0  ;;  %v266_v9 = vadd.f32 %v5674_v16, %v265_v4  ;;  %v1264_v10 = vadd.f32 %v5674_v16, %v1263_v5  ;;  %3698 = vmatmul.f32.gmra.mxu3 %v5228_v1  ;;  %v39_v0 = vld [vmem:[%s9445_s0 + $0xc8] sm:$0xff] }
  0xd2   :  { %v4839_v1 = vld [vmem:[%s9445_s0 + $0x6e8] sm:$0xff] }
  0xd3   :  { %v4422_v11 = vmax.f32 %v3228_v8, %v4226_v3  ;;  %v841_v12 = vmax.f32 %v266_v9, 0.0  ;;  %v1839_v13 = vmax.f32 %v1264_v10, 0.0  ;;  %312 = vmatmul.f32.gmra.mxu0 %v36_v6  ;;  %1310 = vmatmul.f32.gmra.mxu1 %v4836_v7 }
  0xd4   :  { %v2457_v14 = vpop.f32.mrf.mxu2  ;;  %v3651_v15 = vpop.f32.mrf.mxu3 }
  0xd5   :  { %4619 = vst.msk [vmem:[%s9447_s3 + $0x28] sm:$0xff] %vm4613_vm0, %v4422_v11  ;;  %v2035_v17 = vmax.f32 %v841_v12, %v1839_v13  ;;  %v2458_v18 = vadd.f32 %v5674_v16, %v2457_v14  ;;  %v3652_v19 = vadd.f32 %v5674_v16, %v3651_v15  ;;  %v5036_v13 = vld [vmem:[%s9445_s0 + $0xd10] sm:$0xff] }
  0xd6   :  { %v5232_v14 = vld [vmem:[%s9445_s0 + $0x1330] sm:$0xff] }
  0xd7   :  { %v3033_v22 = vmax.f32 %v2458_v18, 0.0  ;;  %v4227_v23 = vmax.f32 %v3652_v19, 0.0 }
  0xd8   :  { %v268_v24 = vpop.f32.mrf.mxu0  ;;  %v1266_v25 = vpop.f32.mrf.mxu1 }
  0xd9   :  { %v3229_v28 = vmax.f32 %v2035_v17, %v3033_v22  ;;  %2507 = vmatmul.f32.gmra.mxu2 %v5033_v20  ;;  %v269_v29 = vadd.f32 %v5674_v16, %v268_v24  ;;  %v1267_v30 = vadd.f32 %v5674_v16, %v1266_v25  ;;  %3701 = vmatmul.f32.gmra.mxu3 %v5229_v21  ;;  %v40_v20 = vld [vmem:[%s9445_s0 + $0xd0] sm:$0xff] }
  0xda   :  { %v4840_v21 = vld [vmem:[%s9445_s0 + $0x6f0] sm:$0xff] }
  0xdb   :  { %v4423_v31 = vmax.f32 %v3229_v28, %v4227_v23  ;;  %v842_v32 = vmax.f32 %v269_v29, 0.0  ;;  %v1840_v33 = vmax.f32 %v1267_v30, 0.0  ;;  %315 = vmatmul.f32.gmra.mxu0 %v37_v26  ;;  %1313 = vmatmul.f32.gmra.mxu1 %v4837_v27 }
  0xdc   :  { %v2460_v34 = vpop.f32.mrf.mxu2  ;;  %v3654_v35 = vpop.f32.mrf.mxu3 }
  0xdd   :  { %4620 = vst.msk [vmem:[%s9447_s3 + $0x30] sm:$0xff] %vm4613_vm0, %v4423_v31  ;;  %v2036_v36 = vmax.f32 %v842_v32, %v1840_v33  ;;  %v2461_v37 = vadd.f32 %v5674_v16, %v2460_v34  ;;  %v3655_v38 = vadd.f32 %v5674_v16, %v3654_v35  ;;  %v5037_v33 = vld [vmem:[%s9445_s0 + $0xd18] sm:$0xff] }
  0xde   :  { %v5233_v34 = vld [vmem:[%s9445_s0 + $0x1338] sm:$0xff] }
  0xdf   :  { %v3034_v41 = vmax.f32 %v2461_v37, 0.0  ;;  %v4228_v42 = vmax.f32 %v3655_v38, 0.0 }
  0xe0   :  { %v271_v43 = vpop.f32.mrf.mxu0  ;;  %v1269_v44 = vpop.f32.mrf.mxu1 }
  0xe1   :  { %v3230_v47 = vmax.f32 %v2036_v36, %v3034_v41  ;;  %2510 = vmatmul.f32.gmra.mxu2 %v5034_v39  ;;  %v272_v48 = vadd.f32 %v5674_v16, %v271_v43  ;;  %v1270_v49 = vadd.f32 %v5674_v16, %v1269_v44  ;;  %3704 = vmatmul.f32.gmra.mxu3 %v5230_v40  ;;  %v41_v39 = vld [vmem:[%s9445_s0 + $0xd8] sm:$0xff] }
  0xe2   :  { %v4841_v40 = vld [vmem:[%s9445_s0 + $0x6f8] sm:$0xff] }
  0xe3   :  { %v4424_v50 = vmax.f32 %v3230_v47, %v4228_v42  ;;  %v843_v51 = vmax.f32 %v272_v48, 0.0  ;;  %v1841_v52 = vmax.f32 %v1270_v49, 0.0  ;;  %318 = vmatmul.f32.gmra.mxu0 %v38_v45  ;;  %1316 = vmatmul.f32.gmra.mxu1 %v4838_v46 }
  0xe4   :  { %v2463_v53 = vpop.f32.mrf.mxu2  ;;  %v3657_v54 = vpop.f32.mrf.mxu3 }
  0xe5   :  { %4621 = vst.msk [vmem:[%s9447_s3 + $0x38] sm:$0xff] %vm4613_vm0, %v4424_v50  ;;  %v2037_v55 = vmax.f32 %v843_v51, %v1841_v52  ;;  %v2464_v56 = vadd.f32 %v5674_v16, %v2463_v53  ;;  %v3658_v57 = vadd.f32 %v5674_v16, %v3657_v54  ;;  %v5038_v52 = vld [vmem:[%s9445_s0 + $0xd20] sm:$0xff] }
  0xe6   :  { %v5234_v53 = vld [vmem:[%s9445_s0 + $0x1340] sm:$0xff] }
  0xe7   :  { %v3035_v60 = vmax.f32 %v2464_v56, 0.0  ;;  %v4229_v61 = vmax.f32 %v3658_v57, 0.0 }
  0xe8   :  { %v274_v62 = vpop.f32.mrf.mxu0  ;;  %v1272_v63 = vpop.f32.mrf.mxu1 }
  0xe9   :  { %v3231_v2 = vmax.f32 %v2037_v55, %v3035_v60  ;;  %2513 = vmatmul.f32.gmra.mxu2 %v5035_v58  ;;  %v275_v3 = vadd.f32 %v5674_v16, %v274_v62  ;;  %v1273_v4 = vadd.f32 %v5674_v16, %v1272_v63  ;;  %3707 = vmatmul.f32.gmra.mxu3 %v5231_v59  ;;  %v42_v58 = vld [vmem:[%s9445_s0 + $0xe0] sm:$0xff] }
  0xea   :  { %v4842_v59 = vld [vmem:[%s9445_s0 + $0x700] sm:$0xff] }
  0xeb   :  { %v4425_v5 = vmax.f32 %v3231_v2, %v4229_v61  ;;  %v844_v6 = vmax.f32 %v275_v3, 0.0  ;;  %v1842_v7 = vmax.f32 %v1273_v4, 0.0  ;;  %321 = vmatmul.f32.gmra.mxu0 %v39_v0  ;;  %1319 = vmatmul.f32.gmra.mxu1 %v4839_v1 }
  0xec   :  { %v2466_v8 = vpop.f32.mrf.mxu2  ;;  %v3660_v9 = vpop.f32.mrf.mxu3 }
  0xed   :  { %4622 = vst.msk [vmem:[%s9447_s3 + $0x40] sm:$0xff] %vm4613_vm0, %v4425_v5  ;;  %v2038_v10 = vmax.f32 %v844_v6, %v1842_v7  ;;  %v2467_v11 = vadd.f32 %v5674_v16, %v2466_v8  ;;  %v3661_v12 = vadd.f32 %v5674_v16, %v3660_v9  ;;  %v5039_v7 = vld [vmem:[%s9445_s0 + $0xd28] sm:$0xff] }
  0xee   :  { %v5235_v8 = vld [vmem:[%s9445_s0 + $0x1348] sm:$0xff] }
  0xef   :  { %v3036_v15 = vmax.f32 %v2467_v11, 0.0  ;;  %v4230_v17 = vmax.f32 %v3661_v12, 0.0 }
  0xf0   :  { %v277_v18 = vpop.f32.mrf.mxu0  ;;  %v1275_v19 = vpop.f32.mrf.mxu1 }
  0xf1   :  { %v3232_v22 = vmax.f32 %v2038_v10, %v3036_v15  ;;  %2516 = vmatmul.f32.gmra.mxu2 %v5036_v13  ;;  %v278_v23 = vadd.f32 %v5674_v16, %v277_v18  ;;  %v1276_v24 = vadd.f32 %v5674_v16, %v1275_v19  ;;  %3710 = vmatmul.f32.gmra.mxu3 %v5232_v14  ;;  %v43_v13 = vld [vmem:[%s9445_s0 + $0xe8] sm:$0xff] }
  0xf2   :  { %v4843_v14 = vld [vmem:[%s9445_s0 + $0x708] sm:$0xff] }
  0xf3   :  { %v4426_v25 = vmax.f32 %v3232_v22, %v4230_v17  ;;  %v845_v26 = vmax.f32 %v278_v23, 0.0  ;;  %v1843_v27 = vmax.f32 %v1276_v24, 0.0  ;;  %324 = vmatmul.f32.gmra.mxu0 %v40_v20  ;;  %1322 = vmatmul.f32.gmra.mxu1 %v4840_v21 }
  0xf4   :  { %v2469_v28 = vpop.f32.mrf.mxu2  ;;  %v3663_v29 = vpop.f32.mrf.mxu3 }
  0xf5   :  { %4623 = vst.msk [vmem:[%s9447_s3 + $0x48] sm:$0xff] %vm4613_vm0, %v4426_v25  ;;  %v2039_v30 = vmax.f32 %v845_v26, %v1843_v27  ;;  %v2470_v31 = vadd.f32 %v5674_v16, %v2469_v28  ;;  %v3664_v32 = vadd.f32 %v5674_v16, %v3663_v29  ;;  %v5040_v27 = vld [vmem:[%s9445_s0 + $0xd30] sm:$0xff] }
  0xf6   :  { %v5236_v28 = vld [vmem:[%s9445_s0 + $0x1350] sm:$0xff] }
  0xf7   :  { %v3037_v35 = vmax.f32 %v2470_v31, 0.0  ;;  %v4231_v36 = vmax.f32 %v3664_v32, 0.0 }
  0xf8   :  { %v280_v37 = vpop.f32.mrf.mxu0  ;;  %v1278_v38 = vpop.f32.mrf.mxu1 }
  0xf9   :  { %v3233_v41 = vmax.f32 %v2039_v30, %v3037_v35  ;;  %2519 = vmatmul.f32.gmra.mxu2 %v5037_v33  ;;  %v281_v42 = vadd.f32 %v5674_v16, %v280_v37  ;;  %v1279_v43 = vadd.f32 %v5674_v16, %v1278_v38  ;;  %3713 = vmatmul.f32.gmra.mxu3 %v5233_v34  ;;  %v44_v33 = vld [vmem:[%s9445_s0 + $0xf0] sm:$0xff] }
  0xfa   :  { %v4844_v34 = vld [vmem:[%s9445_s0 + $0x710] sm:$0xff] }
  0xfb   :  { %v4427_v44 = vmax.f32 %v3233_v41, %v4231_v36  ;;  %v846_v45 = vmax.f32 %v281_v42, 0.0  ;;  %v1844_v46 = vmax.f32 %v1279_v43, 0.0  ;;  %327 = vmatmul.f32.gmra.mxu0 %v41_v39  ;;  %1325 = vmatmul.f32.gmra.mxu1 %v4841_v40 }
  0xfc   :  { %v2472_v47 = vpop.f32.mrf.mxu2  ;;  %v3666_v48 = vpop.f32.mrf.mxu3 }
  0xfd   :  { %4624 = vst.msk [vmem:[%s9447_s3 + $0x50] sm:$0xff] %vm4613_vm0, %v4427_v44  ;;  %v2040_v49 = vmax.f32 %v846_v45, %v1844_v46  ;;  %v2473_v50 = vadd.f32 %v5674_v16, %v2472_v47  ;;  %v3667_v51 = vadd.f32 %v5674_v16, %v3666_v48  ;;  %v5041_v46 = vld [vmem:[%s9445_s0 + $0xd38] sm:$0xff] }
  0xfe   :  { %v5237_v47 = vld [vmem:[%s9445_s0 + $0x1358] sm:$0xff] }
  0xff   :  { %v3038_v54 = vmax.f32 %v2473_v50, 0.0  ;;  %v4232_v55 = vmax.f32 %v3667_v51, 0.0 }
 0x100   :  { %v283_v56 = vpop.f32.mrf.mxu0  ;;  %v1281_v57 = vpop.f32.mrf.mxu1 }
 0x101   :  { %v3234_v60 = vmax.f32 %v2040_v49, %v3038_v54  ;;  %2522 = vmatmul.f32.gmra.mxu2 %v5038_v52  ;;  %v284_v61 = vadd.f32 %v5674_v16, %v283_v56  ;;  %v1282_v62 = vadd.f32 %v5674_v16, %v1281_v57  ;;  %3716 = vmatmul.f32.gmra.mxu3 %v5234_v53  ;;  %v45_v52 = vld [vmem:[%s9445_s0 + $0xf8] sm:$0xff] }
 0x102   :  { %v4845_v53 = vld [vmem:[%s9445_s0 + $0x718] sm:$0xff] }
 0x103   :  { %v4428_v63 = vmax.f32 %v3234_v60, %v4232_v55  ;;  %v847_v0 = vmax.f32 %v284_v61, 0.0  ;;  %v1845_v1 = vmax.f32 %v1282_v62, 0.0  ;;  %330 = vmatmul.f32.gmra.mxu0 %v42_v58  ;;  %1328 = vmatmul.f32.gmra.mxu1 %v4842_v59 }
 0x104   :  { %v2475_v2 = vpop.f32.mrf.mxu2  ;;  %v3669_v3 = vpop.f32.mrf.mxu3 }
 0x105   :  { %4625 = vst.msk [vmem:[%s9447_s3 + $0x58] sm:$0xff] %vm4613_vm0, %v4428_v63  ;;  %v2041_v4 = vmax.f32 %v847_v0, %v1845_v1  ;;  %v2476_v5 = vadd.f32 %v5674_v16, %v2475_v2  ;;  %v3670_v6 = vadd.f32 %v5674_v16, %v3669_v3  ;;  %v5042_v1 = vld [vmem:[%s9445_s0 + $0xd40] sm:$0xff] }
 0x106   :  { %v5238_v2 = vld [vmem:[%s9445_s0 + $0x1360] sm:$0xff] }
 0x107   :  { %v3039_v9 = vmax.f32 %v2476_v5, 0.0  ;;  %v4233_v10 = vmax.f32 %v3670_v6, 0.0 }
 0x108   :  { %v286_v11 = vpop.f32.mrf.mxu0  ;;  %v1284_v12 = vpop.f32.mrf.mxu1 }
 0x109   :  { %v3235_v15 = vmax.f32 %v2041_v4, %v3039_v9  ;;  %2525 = vmatmul.f32.gmra.mxu2 %v5039_v7  ;;  %v287_v17 = vadd.f32 %v5674_v16, %v286_v11  ;;  %v1285_v18 = vadd.f32 %v5674_v16, %v1284_v12  ;;  %3719 = vmatmul.f32.gmra.mxu3 %v5235_v8  ;;  %v46_v7 = vld [vmem:[%s9445_s0 + $0x100] sm:$0xff] }
 0x10a   :  { %v4846_v8 = vld [vmem:[%s9445_s0 + $0x720] sm:$0xff] }
 0x10b   :  { %v4429_v19 = vmax.f32 %v3235_v15, %v4233_v10  ;;  %v848_v20 = vmax.f32 %v287_v17, 0.0  ;;  %v1846_v21 = vmax.f32 %v1285_v18, 0.0  ;;  %333 = vmatmul.f32.gmra.mxu0 %v43_v13  ;;  %1331 = vmatmul.f32.gmra.mxu1 %v4843_v14 }
 0x10c   :  { %v2478_v22 = vpop.f32.mrf.mxu2  ;;  %v3672_v23 = vpop.f32.mrf.mxu3 }
 0x10d   :  { %4626 = vst.msk [vmem:[%s9447_s3 + $0x60] sm:$0xff] %vm4613_vm0, %v4429_v19  ;;  %v2042_v24 = vmax.f32 %v848_v20, %v1846_v21  ;;  %v2479_v25 = vadd.f32 %v5674_v16, %v2478_v22  ;;  %v3673_v26 = vadd.f32 %v5674_v16, %v3672_v23  ;;  %v5043_v21 = vld [vmem:[%s9445_s0 + $0xd48] sm:$0xff] }
 0x10e   :  { %v5239_v22 = vld [vmem:[%s9445_s0 + $0x1368] sm:$0xff] }
 0x10f   :  { %v3040_v29 = vmax.f32 %v2479_v25, 0.0  ;;  %v4234_v30 = vmax.f32 %v3673_v26, 0.0 }
 0x110   :  { %v289_v31 = vpop.f32.mrf.mxu0  ;;  %v1287_v32 = vpop.f32.mrf.mxu1 }
 0x111   :  { %v3236_v35 = vmax.f32 %v2042_v24, %v3040_v29  ;;  %2528 = vmatmul.f32.gmra.mxu2 %v5040_v27  ;;  %v290_v36 = vadd.f32 %v5674_v16, %v289_v31  ;;  %v1288_v37 = vadd.f32 %v5674_v16, %v1287_v32  ;;  %3722 = vmatmul.f32.gmra.mxu3 %v5236_v28  ;;  %v47_v27 = vld [vmem:[%s9445_s0 + $0x108] sm:$0xff] }
 0x112   :  { %v4847_v28 = vld [vmem:[%s9445_s0 + $0x728] sm:$0xff] }
 0x113   :  { %v4430_v38 = vmax.f32 %v3236_v35, %v4234_v30  ;;  %v849_v39 = vmax.f32 %v290_v36, 0.0  ;;  %v1847_v40 = vmax.f32 %v1288_v37, 0.0  ;;  %336 = vmatmul.f32.gmra.mxu0 %v44_v33  ;;  %1334 = vmatmul.f32.gmra.mxu1 %v4844_v34 }
 0x114   :  { %v2481_v41 = vpop.f32.mrf.mxu2  ;;  %v3675_v42 = vpop.f32.mrf.mxu3 }
 0x115   :  { %4627 = vst.msk [vmem:[%s9447_s3 + $0x68] sm:$0xff] %vm4613_vm0, %v4430_v38  ;;  %v2043_v43 = vmax.f32 %v849_v39, %v1847_v40  ;;  %v2482_v44 = vadd.f32 %v5674_v16, %v2481_v41  ;;  %v3676_v45 = vadd.f32 %v5674_v16, %v3675_v42  ;;  %v5044_v40 = vld [vmem:[%s9445_s0 + $0xd50] sm:$0xff] }
 0x116   :  { %v5240_v41 = vld [vmem:[%s9445_s0 + $0x1370] sm:$0xff] }
 0x117   :  { %v3041_v48 = vmax.f32 %v2482_v44, 0.0  ;;  %v4235_v49 = vmax.f32 %v3676_v45, 0.0 }
 0x118   :  { %v292_v50 = vpop.f32.mrf.mxu0  ;;  %v1290_v51 = vpop.f32.mrf.mxu1 }
 0x119   :  { %v3237_v54 = vmax.f32 %v2043_v43, %v3041_v48  ;;  %2531 = vmatmul.f32.gmra.mxu2 %v5041_v46  ;;  %v293_v55 = vadd.f32 %v5674_v16, %v292_v50  ;;  %v1291_v56 = vadd.f32 %v5674_v16, %v1290_v51  ;;  %3725 = vmatmul.f32.gmra.mxu3 %v5237_v47  ;;  %v48_v46 = vld [vmem:[%s9445_s0 + $0x110] sm:$0xff] }
 0x11a   :  { %v4848_v47 = vld [vmem:[%s9445_s0 + $0x730] sm:$0xff] }
 0x11b   :  { %v4431_v57 = vmax.f32 %v3237_v54, %v4235_v49  ;;  %v850_v58 = vmax.f32 %v293_v55, 0.0  ;;  %v1848_v59 = vmax.f32 %v1291_v56, 0.0  ;;  %339 = vmatmul.f32.gmra.mxu0 %v45_v52  ;;  %1337 = vmatmul.f32.gmra.mxu1 %v4845_v53 }
 0x11c   :  { %v2484_v60 = vpop.f32.mrf.mxu2  ;;  %v3678_v61 = vpop.f32.mrf.mxu3 }
 0x11d   :  { %4628 = vst.msk [vmem:[%s9447_s3 + $0x70] sm:$0xff] %vm4613_vm0, %v4431_v57  ;;  %v2044_v62 = vmax.f32 %v850_v58, %v1848_v59  ;;  %v2485_v63 = vadd.f32 %v5674_v16, %v2484_v60  ;;  %v3679_v0 = vadd.f32 %v5674_v16, %v3678_v61  ;;  %v5045_v59 = vld [vmem:[%s9445_s0 + $0xd58] sm:$0xff] }
 0x11e   :  { %v5241_v60 = vld [vmem:[%s9445_s0 + $0x1378] sm:$0xff] }
 0x11f   :  { %v3042_v3 = vmax.f32 %v2485_v63, 0.0  ;;  %v4236_v4 = vmax.f32 %v3679_v0, 0.0 }
 0x120   :  { %v295_v5 = vpop.f32.mrf.mxu0  ;;  %v1293_v6 = vpop.f32.mrf.mxu1 }
 0x121   :  { %v3238_v9 = vmax.f32 %v2044_v62, %v3042_v3  ;;  %2534 = vmatmul.f32.gmra.mxu2 %v5042_v1  ;;  %v296_v10 = vadd.f32 %v5674_v16, %v295_v5  ;;  %v1294_v11 = vadd.f32 %v5674_v16, %v1293_v6  ;;  %3728 = vmatmul.f32.gmra.mxu3 %v5238_v2  ;;  %v49_v1 = vld [vmem:[%s9445_s0 + $0x118] sm:$0xff] }
 0x122   :  { %v4849_v2 = vld [vmem:[%s9445_s0 + $0x738] sm:$0xff] }
 0x123   :  { %v4432_v12 = vmax.f32 %v3238_v9, %v4236_v4  ;;  %v851_v13 = vmax.f32 %v296_v10, 0.0  ;;  %v1849_v14 = vmax.f32 %v1294_v11, 0.0  ;;  %342 = vmatmul.f32.gmra.mxu0 %v46_v7  ;;  %1340 = vmatmul.f32.gmra.mxu1 %v4846_v8 }
 0x124   :  { %v2487_v15 = vpop.f32.mrf.mxu2  ;;  %v3681_v17 = vpop.f32.mrf.mxu3 }
 0x125   :  { %4629 = vst.msk [vmem:[%s9447_s3 + $0x78] sm:$0xff] %vm4613_vm0, %v4432_v12  ;;  %v2045_v18 = vmax.f32 %v851_v13, %v1849_v14  ;;  %v2488_v19 = vadd.f32 %v5674_v16, %v2487_v15  ;;  %v3682_v20 = vadd.f32 %v5674_v16, %v3681_v17  ;;  %v5046_v14 = vld [vmem:[%s9445_s0 + $0xd60] sm:$0xff] }
 0x126   :  { %v5242_v15 = vld [vmem:[%s9445_s0 + $0x1380] sm:$0xff] }
 0x127   :  { %v3043_v23 = vmax.f32 %v2488_v19, 0.0  ;;  %v4237_v24 = vmax.f32 %v3682_v20, 0.0 }
 0x128   :  { %v298_v25 = vpop.f32.mrf.mxu0  ;;  %v1296_v26 = vpop.f32.mrf.mxu1 }
 0x129   :  { %v3239_v29 = vmax.f32 %v2045_v18, %v3043_v23  ;;  %2537 = vmatmul.f32.gmra.mxu2 %v5043_v21  ;;  %v299_v30 = vadd.f32 %v5674_v16, %v298_v25  ;;  %v1297_v31 = vadd.f32 %v5674_v16, %v1296_v26  ;;  %3731 = vmatmul.f32.gmra.mxu3 %v5239_v22  ;;  %v50_v21 = vld [vmem:[%s9445_s0 + $0x120] sm:$0xff] }
 0x12a   :  { %v4850_v22 = vld [vmem:[%s9445_s0 + $0x740] sm:$0xff] }
 0x12b   :  { %v4433_v32 = vmax.f32 %v3239_v29, %v4237_v24  ;;  %v852_v33 = vmax.f32 %v299_v30, 0.0  ;;  %v1850_v34 = vmax.f32 %v1297_v31, 0.0  ;;  %345 = vmatmul.f32.gmra.mxu0 %v47_v27  ;;  %1343 = vmatmul.f32.gmra.mxu1 %v4847_v28 }
 0x12c   :  { %v2490_v35 = vpop.f32.mrf.mxu2  ;;  %v3684_v36 = vpop.f32.mrf.mxu3 }
 0x12d   :  { %4630 = vst.msk [vmem:[%s9447_s3 + $0x80] sm:$0xff] %vm4613_vm0, %v4433_v32  ;;  %v2046_v37 = vmax.f32 %v852_v33, %v1850_v34  ;;  %v2491_v38 = vadd.f32 %v5674_v16, %v2490_v35  ;;  %v3685_v39 = vadd.f32 %v5674_v16, %v3684_v36  ;;  %v5047_v34 = vld [vmem:[%s9445_s0 + $0xd68] sm:$0xff] }
 0x12e   :  { %v5243_v35 = vld [vmem:[%s9445_s0 + $0x1388] sm:$0xff] }
 0x12f   :  { %v3044_v42 = vmax.f32 %v2491_v38, 0.0  ;;  %v4238_v43 = vmax.f32 %v3685_v39, 0.0 }
 0x130   :  { %v301_v44 = vpop.f32.mrf.mxu0  ;;  %v1299_v45 = vpop.f32.mrf.mxu1 }
 0x131   :  { %v3240_v48 = vmax.f32 %v2046_v37, %v3044_v42  ;;  %2540 = vmatmul.f32.gmra.mxu2 %v5044_v40  ;;  %v302_v49 = vadd.f32 %v5674_v16, %v301_v44  ;;  %v1300_v50 = vadd.f32 %v5674_v16, %v1299_v45  ;;  %3734 = vmatmul.f32.gmra.mxu3 %v5240_v41  ;;  %v51_v40 = vld [vmem:[%s9445_s0 + $0x128] sm:$0xff]  ;;  %v6107_v42 = vld [vmem:[%s9446_s2] ss:$0 sm:$0xff] }
 0x133   :  { %v4434_v51 = vmax.f32 %v3240_v48, %v4238_v43  ;;  %v853_v52 = vmax.f32 %v302_v49, 0.0  ;;  %v1851_v53 = vmax.f32 %v1300_v50, 0.0  ;;  %348 = vmatmul.f32.gmra.mxu0 %v48_v46  ;;  %1346 = vmatmul.f32.gmra.mxu1 %v4848_v47 }
 0x134   :  { %v2493_v54 = vpop.f32.mrf.mxu2  ;;  %v3687_v55 = vpop.f32.mrf.mxu3 }
 0x135   :  { %4631 = vst.msk [vmem:[%s9447_s3 + $0x88] sm:$0xff] %vm4613_vm0, %v4434_v51  ;;  %v2047_v56 = vmax.f32 %v853_v52, %v1851_v53  ;;  %v2494_v57 = vadd.f32 %v5674_v16, %v2493_v54  ;;  %v3688_v58 = vadd.f32 %v5674_v16, %v3687_v55  ;;  %v5048_v53 = vld [vmem:[%s9445_s0 + $0xd70] sm:$0xff] }
 0x136   :  { %v5244_v54 = vld [vmem:[%s9445_s0 + $0x1390] sm:$0xff] }
 0x137   :  { %v3045_v61 = vmax.f32 %v2494_v57, 0.0  ;;  %v4239_v62 = vmax.f32 %v3688_v58, 0.0 }
 0x138   :  { %v304_v63 = vpop.f32.mrf.mxu0  ;;  %v1302_v0 = vpop.f32.mrf.mxu1 }
 0x139   :  { %v3241_v3 = vmax.f32 %v2047_v56, %v3045_v61  ;;  %2543 = vmatmul.f32.gmra.mxu2 %v5045_v59  ;;  %v305_v4 = vadd.f32 %v5674_v16, %v304_v63  ;;  %v1303_v5 = vadd.f32 %v5674_v16, %v1302_v0  ;;  %3737 = vmatmul.f32.gmra.mxu3 %v5241_v60  ;;  %v52_v59 = vld [vmem:[%s9445_s0 + $0x130] sm:$0xff] }
 0x13a   :  { %v4852_v60 = vld [vmem:[%s9445_s0 + $0x750] sm:$0xff] }
 0x13b   :  { %v4435_v6 = vmax.f32 %v3241_v3, %v4239_v62  ;;  %v854_v7 = vmax.f32 %v305_v4, 0.0  ;;  %v1852_v8 = vmax.f32 %v1303_v5, 0.0  ;;  %351 = vmatmul.f32.gmra.mxu0 %v49_v1  ;;  %1349 = vmatmul.f32.gmra.mxu1 %v4849_v2 }
 0x13c   :  { %v2496_v9 = vpop.f32.mrf.mxu2  ;;  %v3690_v10 = vpop.f32.mrf.mxu3 }
 0x13d   :  { %4632 = vst.msk [vmem:[%s9447_s3 + $0x90] sm:$0xff] %vm4613_vm0, %v4435_v6  ;;  %v2048_v11 = vmax.f32 %v854_v7, %v1852_v8  ;;  %v2497_v12 = vadd.f32 %v5674_v16, %v2496_v9  ;;  %v3691_v13 = vadd.f32 %v5674_v16, %v3690_v10  ;;  %v5049_v8 = vld [vmem:[%s9445_s0 + $0xd78] sm:$0xff] }
 0x13e   :  { %v5245_v9 = vld [vmem:[%s9445_s0 + $0x1398] sm:$0xff] }
 0x13f   :  { %v3046_v17 = vmax.f32 %v2497_v12, 0.0  ;;  %v4240_v18 = vmax.f32 %v3691_v13, 0.0 }
 0x140   :  { %v307_v19 = vpop.f32.mrf.mxu0  ;;  %v1305_v20 = vpop.f32.mrf.mxu1 }
 0x141   :  { %v3242_v23 = vmax.f32 %v2048_v11, %v3046_v17  ;;  %2546 = vmatmul.f32.gmra.mxu2 %v5046_v14  ;;  %v308_v24 = vadd.f32 %v5674_v16, %v307_v19  ;;  %v1306_v25 = vadd.f32 %v5674_v16, %v1305_v20  ;;  %3740 = vmatmul.f32.gmra.mxu3 %v5242_v15  ;;  %v53_v14 = vld [vmem:[%s9445_s0 + $0x138] sm:$0xff] }
 0x142   :  { %v4853_v15 = vld [vmem:[%s9445_s0 + $0x758] sm:$0xff] }
 0x143   :  { %v4436_v26 = vmax.f32 %v3242_v23, %v4240_v18  ;;  %v855_v27 = vmax.f32 %v308_v24, 0.0  ;;  %v1853_v28 = vmax.f32 %v1306_v25, 0.0  ;;  %354 = vmatmul.f32.gmra.mxu0 %v50_v21  ;;  %1352 = vmatmul.f32.gmra.mxu1 %v4850_v22 }
 0x144   :  { %v2499_v29 = vpop.f32.mrf.mxu2  ;;  %v3693_v30 = vpop.f32.mrf.mxu3 }
 0x145   :  { %4633 = vst.msk [vmem:[%s9447_s3 + $0x98] sm:$0xff] %vm4613_vm0, %v4436_v26  ;;  %v2049_v31 = vmax.f32 %v855_v27, %v1853_v28  ;;  %v2500_v32 = vadd.f32 %v5674_v16, %v2499_v29  ;;  %v3694_v33 = vadd.f32 %v5674_v16, %v3693_v30  ;;  %v4851_v16 = vld [vmem:[%s9445_s0 + $0x748] sm:$0xff]  ;;  %v5050_v28 = vld [vmem:[%s9445_s0 + $0xd80] sm:$0xff] }
 0x146   :  { %v5246_v29 = vld [vmem:[%s9445_s0 + $0x13a0] sm:$0xff] }
 0x147   :  { %v3047_v36 = vmax.f32 %v2500_v32, 0.0  ;;  %v4241_v37 = vmax.f32 %v3694_v33, 0.0 }
 0x148   :  { %v310_v38 = vpop.f32.mrf.mxu0  ;;  %v1308_v39 = vpop.f32.mrf.mxu1 }
 0x149   :  { %v3243_v41 = vmax.f32 %v2049_v31, %v3047_v36  ;;  %2549 = vmatmul.f32.gmra.mxu2 %v5047_v34  ;;  %v311_v43 = vadd.f32 %v6107_v42, %v310_v38  ;;  %v1309_v44 = vadd.f32 %v6107_v42, %v1308_v39  ;;  %3743 = vmatmul.f32.gmra.mxu3 %v5243_v35  ;;  %v54_v34 = vld [vmem:[%s9445_s0 + $0x140] sm:$0xff] }
 0x14a   :  { %v4854_v35 = vld [vmem:[%s9445_s0 + $0x760] sm:$0xff] }
 0x14b   :  { %v4437_v45 = vmax.f32 %v3243_v41, %v4241_v37  ;;  %v856_v46 = vmax.f32 %v311_v43, 0.0  ;;  %v1854_v47 = vmax.f32 %v1309_v44, 0.0  ;;  %357 = vmatmul.f32.gmra.mxu0 %v51_v40  ;;  %1355 = vmatmul.f32.gmra.mxu1 %v4851_v16 }
 0x14c   :  { %v2502_v48 = vpop.f32.mrf.mxu2  ;;  %v3696_v49 = vpop.f32.mrf.mxu3 }
 0x14d   :  { %4634 = vst.msk [vmem:[%s9447_s3 + $0xa0] sm:$0xff] %vm4613_vm0, %v4437_v45  ;;  %v2050_v50 = vmax.f32 %v856_v46, %v1854_v47  ;;  %v2503_v51 = vadd.f32 %v6107_v42, %v2502_v48  ;;  %v3697_v52 = vadd.f32 %v6107_v42, %v3696_v49  ;;  %v5051_v47 = vld [vmem:[%s9445_s0 + $0xd88] sm:$0xff] }
 0x14e   :  { %v5247_v48 = vld [vmem:[%s9445_s0 + $0x13a8] sm:$0xff] }
 0x14f   :  { %v3048_v55 = vmax.f32 %v2503_v51, 0.0  ;;  %v4242_v56 = vmax.f32 %v3697_v52, 0.0 }
 0x150   :  { %v313_v57 = vpop.f32.mrf.mxu0  ;;  %v1311_v58 = vpop.f32.mrf.mxu1 }
 0x151   :  { %v3244_v61 = vmax.f32 %v2050_v50, %v3048_v55  ;;  %2552 = vmatmul.f32.gmra.mxu2 %v5048_v53  ;;  %v314_v62 = vadd.f32 %v6107_v42, %v313_v57  ;;  %v1312_v63 = vadd.f32 %v6107_v42, %v1311_v58  ;;  %3746 = vmatmul.f32.gmra.mxu3 %v5244_v54  ;;  %v55_v53 = vld [vmem:[%s9445_s0 + $0x148] sm:$0xff] }
 0x152   :  { %v4855_v54 = vld [vmem:[%s9445_s0 + $0x768] sm:$0xff] }
 0x153   :  { %v4438_v0 = vmax.f32 %v3244_v61, %v4242_v56  ;;  %v857_v1 = vmax.f32 %v314_v62, 0.0  ;;  %v1855_v2 = vmax.f32 %v1312_v63, 0.0  ;;  %360 = vmatmul.f32.gmra.mxu0 %v52_v59  ;;  %1358 = vmatmul.f32.gmra.mxu1 %v4852_v60 }
 0x154   :  { %v2505_v3 = vpop.f32.mrf.mxu2  ;;  %v3699_v4 = vpop.f32.mrf.mxu3 }
 0x155   :  { %4635 = vst.msk [vmem:[%s9447_s3 + $0xa8] sm:$0xff] %vm4613_vm0, %v4438_v0  ;;  %v2051_v5 = vmax.f32 %v857_v1, %v1855_v2  ;;  %v2506_v6 = vadd.f32 %v6107_v42, %v2505_v3  ;;  %v3700_v7 = vadd.f32 %v6107_v42, %v3699_v4  ;;  %v5052_v2 = vld [vmem:[%s9445_s0 + $0xd90] sm:$0xff] }
 0x156   :  { %v5248_v3 = vld [vmem:[%s9445_s0 + $0x13b0] sm:$0xff] }
 0x157   :  { %v3049_v10 = vmax.f32 %v2506_v6, 0.0  ;;  %v4243_v11 = vmax.f32 %v3700_v7, 0.0 }
 0x158   :  { %v316_v12 = vpop.f32.mrf.mxu0  ;;  %v1314_v13 = vpop.f32.mrf.mxu1 }
 0x159   :  { %v3245_v17 = vmax.f32 %v2051_v5, %v3049_v10  ;;  %2555 = vmatmul.f32.gmra.mxu2 %v5049_v8  ;;  %v317_v18 = vadd.f32 %v6107_v42, %v316_v12  ;;  %v1315_v19 = vadd.f32 %v6107_v42, %v1314_v13  ;;  %3749 = vmatmul.f32.gmra.mxu3 %v5245_v9  ;;  %v56_v8 = vld [vmem:[%s9445_s0 + $0x150] sm:$0xff] }
 0x15a   :  { %v4856_v9 = vld [vmem:[%s9445_s0 + $0x770] sm:$0xff] }
 0x15b   :  { %v4439_v20 = vmax.f32 %v3245_v17, %v4243_v11  ;;  %v858_v21 = vmax.f32 %v317_v18, 0.0  ;;  %v1856_v22 = vmax.f32 %v1315_v19, 0.0  ;;  %363 = vmatmul.f32.gmra.mxu0 %v53_v14  ;;  %1361 = vmatmul.f32.gmra.mxu1 %v4853_v15 }
 0x15c   :  { %v2508_v23 = vpop.f32.mrf.mxu2  ;;  %v3702_v24 = vpop.f32.mrf.mxu3 }
 0x15d   :  { %4636 = vst.msk [vmem:[%s9447_s3 + $0xb0] sm:$0xff] %vm4613_vm0, %v4439_v20  ;;  %v2052_v25 = vmax.f32 %v858_v21, %v1856_v22  ;;  %v2509_v26 = vadd.f32 %v6107_v42, %v2508_v23  ;;  %v3703_v27 = vadd.f32 %v6107_v42, %v3702_v24  ;;  %v5053_v22 = vld [vmem:[%s9445_s0 + $0xd98] sm:$0xff] }
 0x15e   :  { %v5249_v23 = vld [vmem:[%s9445_s0 + $0x13b8] sm:$0xff] }
 0x15f   :  { %v3050_v30 = vmax.f32 %v2509_v26, 0.0  ;;  %v4244_v31 = vmax.f32 %v3703_v27, 0.0 }
 0x160   :  { %v319_v32 = vpop.f32.mrf.mxu0  ;;  %v1317_v33 = vpop.f32.mrf.mxu1 }
 0x161   :  { %v3246_v36 = vmax.f32 %v2052_v25, %v3050_v30  ;;  %2558 = vmatmul.f32.gmra.mxu2 %v5050_v28  ;;  %v320_v37 = vadd.f32 %v6107_v42, %v319_v32  ;;  %v1318_v38 = vadd.f32 %v6107_v42, %v1317_v33  ;;  %3752 = vmatmul.f32.gmra.mxu3 %v5246_v29  ;;  %v57_v28 = vld [vmem:[%s9445_s0 + $0x158] sm:$0xff] }
 0x162   :  { %v4857_v29 = vld [vmem:[%s9445_s0 + $0x778] sm:$0xff] }
 0x163   :  { %v4440_v39 = vmax.f32 %v3246_v36, %v4244_v31  ;;  %v859_v40 = vmax.f32 %v320_v37, 0.0  ;;  %v1857_v16 = vmax.f32 %v1318_v38, 0.0  ;;  %366 = vmatmul.f32.gmra.mxu0 %v54_v34  ;;  %1364 = vmatmul.f32.gmra.mxu1 %v4854_v35 }
 0x164   :  { %v2511_v41 = vpop.f32.mrf.mxu2  ;;  %v3705_v43 = vpop.f32.mrf.mxu3 }
 0x165   :  { %4637 = vst.msk [vmem:[%s9447_s3 + $0xb8] sm:$0xff] %vm4613_vm0, %v4440_v39  ;;  %v2053_v44 = vmax.f32 %v859_v40, %v1857_v16  ;;  %v2512_v45 = vadd.f32 %v6107_v42, %v2511_v41  ;;  %v3706_v46 = vadd.f32 %v6107_v42, %v3705_v43  ;;  %v5054_v16 = vld [vmem:[%s9445_s0 + $0xda0] sm:$0xff] }
 0x166   :  { %v5250_v41 = vld [vmem:[%s9445_s0 + $0x13c0] sm:$0xff] }
 0x167   :  { %v3051_v49 = vmax.f32 %v2512_v45, 0.0  ;;  %v4245_v50 = vmax.f32 %v3706_v46, 0.0 }
 0x168   :  { %v322_v51 = vpop.f32.mrf.mxu0  ;;  %v1320_v52 = vpop.f32.mrf.mxu1 }
 0x169   :  { %v3247_v55 = vmax.f32 %v2053_v44, %v3051_v49  ;;  %2561 = vmatmul.f32.gmra.mxu2 %v5051_v47  ;;  %v323_v56 = vadd.f32 %v6107_v42, %v322_v51  ;;  %v1321_v57 = vadd.f32 %v6107_v42, %v1320_v52  ;;  %3755 = vmatmul.f32.gmra.mxu3 %v5247_v48  ;;  %v58_v47 = vld [vmem:[%s9445_s0 + $0x160] sm:$0xff] }
 0x16a   :  { %v4858_v48 = vld [vmem:[%s9445_s0 + $0x780] sm:$0xff] }
 0x16b   :  { %v4441_v58 = vmax.f32 %v3247_v55, %v4245_v50  ;;  %v860_v59 = vmax.f32 %v323_v56, 0.0  ;;  %v1858_v60 = vmax.f32 %v1321_v57, 0.0  ;;  %369 = vmatmul.f32.gmra.mxu0 %v55_v53  ;;  %1367 = vmatmul.f32.gmra.mxu1 %v4855_v54 }
 0x16c   :  { %v2514_v61 = vpop.f32.mrf.mxu2  ;;  %v3708_v62 = vpop.f32.mrf.mxu3 }
 0x16d   :  { %4638 = vst.msk [vmem:[%s9447_s3 + $0xc0] sm:$0xff] %vm4613_vm0, %v4441_v58  ;;  %v2054_v63 = vmax.f32 %v860_v59, %v1858_v60  ;;  %v2515_v0 = vadd.f32 %v6107_v42, %v2514_v61  ;;  %v3709_v1 = vadd.f32 %v6107_v42, %v3708_v62  ;;  %v5055_v60 = vld [vmem:[%s9445_s0 + $0xda8] sm:$0xff] }
 0x16e   :  { %v5251_v61 = vld [vmem:[%s9445_s0 + $0x13c8] sm:$0xff] }
 0x16f   :  { %v3052_v4 = vmax.f32 %v2515_v0, 0.0  ;;  %v4246_v5 = vmax.f32 %v3709_v1, 0.0 }
 0x170   :  { %v325_v6 = vpop.f32.mrf.mxu0  ;;  %v1323_v7 = vpop.f32.mrf.mxu1 }
 0x171   :  { %v3248_v10 = vmax.f32 %v2054_v63, %v3052_v4  ;;  %2564 = vmatmul.f32.gmra.mxu2 %v5052_v2  ;;  %v326_v11 = vadd.f32 %v6107_v42, %v325_v6  ;;  %v1324_v12 = vadd.f32 %v6107_v42, %v1323_v7  ;;  %3758 = vmatmul.f32.gmra.mxu3 %v5248_v3  ;;  %v59_v2 = vld [vmem:[%s9445_s0 + $0x168] sm:$0xff] }
 0x172   :  { %v4859_v3 = vld [vmem:[%s9445_s0 + $0x788] sm:$0xff] }
 0x173   :  { %v4442_v13 = vmax.f32 %v3248_v10, %v4246_v5  ;;  %v861_v14 = vmax.f32 %v326_v11, 0.0  ;;  %v1859_v15 = vmax.f32 %v1324_v12, 0.0  ;;  %372 = vmatmul.f32.gmra.mxu0 %v56_v8  ;;  %1370 = vmatmul.f32.gmra.mxu1 %v4856_v9 }
 0x174   :  { %v2517_v17 = vpop.f32.mrf.mxu2  ;;  %v3711_v18 = vpop.f32.mrf.mxu3 }
 0x175   :  { %4639 = vst.msk [vmem:[%s9447_s3 + $0xc8] sm:$0xff] %vm4613_vm0, %v4442_v13  ;;  %v2055_v19 = vmax.f32 %v861_v14, %v1859_v15  ;;  %v2518_v20 = vadd.f32 %v6107_v42, %v2517_v17  ;;  %v3712_v21 = vadd.f32 %v6107_v42, %v3711_v18  ;;  %v5056_v15 = vld [vmem:[%s9445_s0 + $0xdb0] sm:$0xff] }
 0x176   :  { %v5252_v17 = vld [vmem:[%s9445_s0 + $0x13d0] sm:$0xff] }
 0x177   :  { %v3053_v24 = vmax.f32 %v2518_v20, 0.0  ;;  %v4247_v25 = vmax.f32 %v3712_v21, 0.0 }
 0x178   :  { %v328_v26 = vpop.f32.mrf.mxu0  ;;  %v1326_v27 = vpop.f32.mrf.mxu1 }
 0x179   :  { %v3249_v30 = vmax.f32 %v2055_v19, %v3053_v24  ;;  %2567 = vmatmul.f32.gmra.mxu2 %v5053_v22  ;;  %v329_v31 = vadd.f32 %v6107_v42, %v328_v26  ;;  %v1327_v32 = vadd.f32 %v6107_v42, %v1326_v27  ;;  %3761 = vmatmul.f32.gmra.mxu3 %v5249_v23  ;;  %v60_v22 = vld [vmem:[%s9445_s0 + $0x170] sm:$0xff] }
 0x17a   :  { %v4860_v23 = vld [vmem:[%s9445_s0 + $0x790] sm:$0xff] }
 0x17b   :  { %v4443_v33 = vmax.f32 %v3249_v30, %v4247_v25  ;;  %v862_v34 = vmax.f32 %v329_v31, 0.0  ;;  %v1860_v35 = vmax.f32 %v1327_v32, 0.0  ;;  %375 = vmatmul.f32.gmra.mxu0 %v57_v28  ;;  %1373 = vmatmul.f32.gmra.mxu1 %v4857_v29 }
 0x17c   :  { %v2520_v36 = vpop.f32.mrf.mxu2  ;;  %v3714_v37 = vpop.f32.mrf.mxu3 }
 0x17d   :  { %4640 = vst.msk [vmem:[%s9447_s3 + $0xd0] sm:$0xff] %vm4613_vm0, %v4443_v33  ;;  %v2056_v38 = vmax.f32 %v862_v34, %v1860_v35  ;;  %v2521_v39 = vadd.f32 %v6107_v42, %v2520_v36  ;;  %v3715_v40 = vadd.f32 %v6107_v42, %v3714_v37  ;;  %v5057_v35 = vld [vmem:[%s9445_s0 + $0xdb8] sm:$0xff] }
 0x17e   :  { %v5253_v36 = vld [vmem:[%s9445_s0 + $0x13d8] sm:$0xff] }
 0x17f   :  { %v3054_v43 = vmax.f32 %v2521_v39, 0.0  ;;  %v4248_v44 = vmax.f32 %v3715_v40, 0.0 }
 0x180   :  { %v331_v45 = vpop.f32.mrf.mxu0  ;;  %v1329_v46 = vpop.f32.mrf.mxu1 }
 0x181   :  { %v3250_v49 = vmax.f32 %v2056_v38, %v3054_v43  ;;  %2570 = vmatmul.f32.gmra.mxu2 %v5054_v16  ;;  %v332_v50 = vadd.f32 %v6107_v42, %v331_v45  ;;  %v1330_v51 = vadd.f32 %v6107_v42, %v1329_v46  ;;  %3764 = vmatmul.f32.gmra.mxu3 %v5250_v41  ;;  %v61_v16 = vld [vmem:[%s9445_s0 + $0x178] sm:$0xff] }
 0x182   :  { %v4861_v41 = vld [vmem:[%s9445_s0 + $0x798] sm:$0xff] }
 0x183   :  { %v4444_v52 = vmax.f32 %v3250_v49, %v4248_v44  ;;  %v863_v53 = vmax.f32 %v332_v50, 0.0  ;;  %v1861_v54 = vmax.f32 %v1330_v51, 0.0  ;;  %378 = vmatmul.f32.gmra.mxu0 %v58_v47  ;;  %1376 = vmatmul.f32.gmra.mxu1 %v4858_v48 }
 0x184   :  { %v2523_v55 = vpop.f32.mrf.mxu2  ;;  %v3717_v56 = vpop.f32.mrf.mxu3 }
 0x185   :  { %4641 = vst.msk [vmem:[%s9447_s3 + $0xd8] sm:$0xff] %vm4613_vm0, %v4444_v52  ;;  %v2057_v57 = vmax.f32 %v863_v53, %v1861_v54  ;;  %v2524_v58 = vadd.f32 %v6107_v42, %v2523_v55  ;;  %v3718_v59 = vadd.f32 %v6107_v42, %v3717_v56  ;;  %v5058_v54 = vld [vmem:[%s9445_s0 + $0xdc0] sm:$0xff] }
 0x186   :  { %v5254_v55 = vld [vmem:[%s9445_s0 + $0x13e0] sm:$0xff] }
 0x187   :  { %v3055_v62 = vmax.f32 %v2524_v58, 0.0  ;;  %v4249_v63 = vmax.f32 %v3718_v59, 0.0 }
 0x188   :  { %v334_v0 = vpop.f32.mrf.mxu0  ;;  %v1332_v1 = vpop.f32.mrf.mxu1 }
 0x189   :  { %v3251_v4 = vmax.f32 %v2057_v57, %v3055_v62  ;;  %2573 = vmatmul.f32.gmra.mxu2 %v5055_v60  ;;  %v335_v5 = vadd.f32 %v6107_v42, %v334_v0  ;;  %v1333_v6 = vadd.f32 %v6107_v42, %v1332_v1  ;;  %3767 = vmatmul.f32.gmra.mxu3 %v5251_v61  ;;  %v62_v60 = vld [vmem:[%s9445_s0 + $0x180] sm:$0xff] }
 0x18a   :  { %v4862_v61 = vld [vmem:[%s9445_s0 + $0x7a0] sm:$0xff] }
 0x18b   :  { %v4445_v7 = vmax.f32 %v3251_v4, %v4249_v63  ;;  %v864_v8 = vmax.f32 %v335_v5, 0.0  ;;  %v1862_v9 = vmax.f32 %v1333_v6, 0.0  ;;  %381 = vmatmul.f32.gmra.mxu0 %v59_v2  ;;  %1379 = vmatmul.f32.gmra.mxu1 %v4859_v3 }
 0x18c   :  { %v2526_v10 = vpop.f32.mrf.mxu2  ;;  %v3720_v11 = vpop.f32.mrf.mxu3 }
 0x18d   :  { %4642 = vst.msk [vmem:[%s9447_s3 + $0xe0] sm:$0xff] %vm4613_vm0, %v4445_v7  ;;  %v2058_v12 = vmax.f32 %v864_v8, %v1862_v9  ;;  %v2527_v13 = vadd.f32 %v6107_v42, %v2526_v10  ;;  %v3721_v14 = vadd.f32 %v6107_v42, %v3720_v11  ;;  %v5059_v9 = vld [vmem:[%s9445_s0 + $0xdc8] sm:$0xff] }
 0x18e   :  { %v5255_v10 = vld [vmem:[%s9445_s0 + $0x13e8] sm:$0xff] }
 0x18f   :  { %v3056_v18 = vmax.f32 %v2527_v13, 0.0  ;;  %v4250_v19 = vmax.f32 %v3721_v14, 0.0 }
 0x190   :  { %v337_v20 = vpop.f32.mrf.mxu0  ;;  %v1335_v21 = vpop.f32.mrf.mxu1 }
 0x191   :  { %v3252_v24 = vmax.f32 %v2058_v12, %v3056_v18  ;;  %2576 = vmatmul.f32.gmra.mxu2 %v5056_v15  ;;  %v338_v25 = vadd.f32 %v6107_v42, %v337_v20  ;;  %v1336_v26 = vadd.f32 %v6107_v42, %v1335_v21  ;;  %3770 = vmatmul.f32.gmra.mxu3 %v5252_v17  ;;  %v63_v15 = vld [vmem:[%s9445_s0 + $0x188] sm:$0xff] }
 0x192   :  { %v4863_v17 = vld [vmem:[%s9445_s0 + $0x7a8] sm:$0xff] }
 0x193   :  { %v4446_v27 = vmax.f32 %v3252_v24, %v4250_v19  ;;  %v865_v28 = vmax.f32 %v338_v25, 0.0  ;;  %v1863_v29 = vmax.f32 %v1336_v26, 0.0  ;;  %384 = vmatmul.f32.gmra.mxu0 %v60_v22  ;;  %1382 = vmatmul.f32.gmra.mxu1 %v4860_v23 }
 0x194   :  { %v2529_v30 = vpop.f32.mrf.mxu2  ;;  %v3723_v31 = vpop.f32.mrf.mxu3 }
 0x195   :  { %4643 = vst.msk [vmem:[%s9447_s3 + $0xe8] sm:$0xff] %vm4613_vm0, %v4446_v27  ;;  %v2059_v32 = vmax.f32 %v865_v28, %v1863_v29  ;;  %v2530_v33 = vadd.f32 %v6107_v42, %v2529_v30  ;;  %v3724_v34 = vadd.f32 %v6107_v42, %v3723_v31  ;;  %v5060_v29 = vld [vmem:[%s9445_s0 + $0xdd0] sm:$0xff] }
 0x196   :  { %v5256_v30 = vld [vmem:[%s9445_s0 + $0x13f0] sm:$0xff] }
 0x197   :  { %v3057_v37 = vmax.f32 %v2530_v33, 0.0  ;;  %v4251_v38 = vmax.f32 %v3724_v34, 0.0 }
 0x198   :  { %v340_v39 = vpop.f32.mrf.mxu0  ;;  %v1338_v40 = vpop.f32.mrf.mxu1 }
 0x199   :  { %v3253_v43 = vmax.f32 %v2059_v32, %v3057_v37  ;;  %2579 = vmatmul.f32.gmra.mxu2 %v5057_v35  ;;  %v341_v44 = vadd.f32 %v6107_v42, %v340_v39  ;;  %v1339_v45 = vadd.f32 %v6107_v42, %v1338_v40  ;;  %3773 = vmatmul.f32.gmra.mxu3 %v5253_v36  ;;  %v64_v35 = vld [vmem:[%s9445_s0 + $0x190] sm:$0xff] }
 0x19a   :  { %v4864_v36 = vld [vmem:[%s9445_s0 + $0x7b0] sm:$0xff] }
 0x19b   :  { %v4447_v46 = vmax.f32 %v3253_v43, %v4251_v38  ;;  %v866_v47 = vmax.f32 %v341_v44, 0.0  ;;  %v1864_v48 = vmax.f32 %v1339_v45, 0.0  ;;  %387 = vmatmul.f32.gmra.mxu0 %v61_v16  ;;  %1385 = vmatmul.f32.gmra.mxu1 %v4861_v41 }
 0x19c   :  { %v2532_v49 = vpop.f32.mrf.mxu2  ;;  %v3726_v50 = vpop.f32.mrf.mxu3 }
 0x19d   :  { %4644 = vst.msk [vmem:[%s9447_s3 + $0xf0] sm:$0xff] %vm4613_vm0, %v4447_v46  ;;  %v2060_v51 = vmax.f32 %v866_v47, %v1864_v48  ;;  %v2533_v52 = vadd.f32 %v6107_v42, %v2532_v49  ;;  %v3727_v53 = vadd.f32 %v6107_v42, %v3726_v50  ;;  %v5061_v48 = vld [vmem:[%s9445_s0 + $0xdd8] sm:$0xff] }
 0x19e   :  { %v5257_v49 = vld [vmem:[%s9445_s0 + $0x13f8] sm:$0xff] }
 0x19f   :  { %v3058_v56 = vmax.f32 %v2533_v52, 0.0  ;;  %v4252_v57 = vmax.f32 %v3727_v53, 0.0 }
 0x1a0   :  { %v343_v58 = vpop.f32.mrf.mxu0  ;;  %v1341_v59 = vpop.f32.mrf.mxu1 }
 0x1a1   :  { %v3254_v62 = vmax.f32 %v2060_v51, %v3058_v56  ;;  %2582 = vmatmul.f32.gmra.mxu2 %v5058_v54  ;;  %v344_v63 = vadd.f32 %v6107_v42, %v343_v58  ;;  %v1342_v0 = vadd.f32 %v6107_v42, %v1341_v59  ;;  %3776 = vmatmul.f32.gmra.mxu3 %v5254_v55  ;;  %v65_v54 = vld [vmem:[%s9445_s0 + $0x198] sm:$0xff] }
 0x1a2   :  { %v4865_v55 = vld [vmem:[%s9445_s0 + $0x7b8] sm:$0xff] }
 0x1a3   :  { %v4448_v1 = vmax.f32 %v3254_v62, %v4252_v57  ;;  %v867_v2 = vmax.f32 %v344_v63, 0.0  ;;  %v1865_v3 = vmax.f32 %v1342_v0, 0.0  ;;  %390 = vmatmul.f32.gmra.mxu0 %v62_v60  ;;  %1388 = vmatmul.f32.gmra.mxu1 %v4862_v61 }
 0x1a4   :  { %v2535_v4 = vpop.f32.mrf.mxu2  ;;  %v3729_v5 = vpop.f32.mrf.mxu3 }
 0x1a5   :  { %4645 = vst.msk [vmem:[%s9447_s3 + $0xf8] sm:$0xff] %vm4613_vm0, %v4448_v1  ;;  %v2061_v6 = vmax.f32 %v867_v2, %v1865_v3  ;;  %v2536_v7 = vadd.f32 %v6107_v42, %v2535_v4  ;;  %v3730_v8 = vadd.f32 %v6107_v42, %v3729_v5  ;;  %v5062_v3 = vld [vmem:[%s9445_s0 + $0xde0] sm:$0xff] }
 0x1a6   :  { %v5258_v4 = vld [vmem:[%s9445_s0 + $0x1400] sm:$0xff] }
 0x1a7   :  { %v3059_v11 = vmax.f32 %v2536_v7, 0.0  ;;  %v4253_v12 = vmax.f32 %v3730_v8, 0.0 }
 0x1a8   :  { %v346_v13 = vpop.f32.mrf.mxu0  ;;  %v1344_v14 = vpop.f32.mrf.mxu1 }
 0x1a9   :  { %v3255_v18 = vmax.f32 %v2061_v6, %v3059_v11  ;;  %2585 = vmatmul.f32.gmra.mxu2 %v5059_v9  ;;  %v347_v19 = vadd.f32 %v6107_v42, %v346_v13  ;;  %v1345_v20 = vadd.f32 %v6107_v42, %v1344_v14  ;;  %3779 = vmatmul.f32.gmra.mxu3 %v5255_v10  ;;  %v66_v9 = vld [vmem:[%s9445_s0 + $0x1a0] sm:$0xff] }
 0x1aa   :  { %v4866_v10 = vld [vmem:[%s9445_s0 + $0x7c0] sm:$0xff] }
 0x1ab   :  { %v4449_v21 = vmax.f32 %v3255_v18, %v4253_v12  ;;  %v868_v22 = vmax.f32 %v347_v19, 0.0  ;;  %v1866_v23 = vmax.f32 %v1345_v20, 0.0  ;;  %393 = vmatmul.f32.gmra.mxu0 %v63_v15  ;;  %1391 = vmatmul.f32.gmra.mxu1 %v4863_v17 }
 0x1ac   :  { %v2538_v24 = vpop.f32.mrf.mxu2  ;;  %v3732_v25 = vpop.f32.mrf.mxu3 }
 0x1ad   :  { %4646 = vst.msk [vmem:[%s9447_s3 + $0x100] sm:$0xff] %vm4613_vm0, %v4449_v21  ;;  %v2062_v26 = vmax.f32 %v868_v22, %v1866_v23  ;;  %v2539_v27 = vadd.f32 %v6107_v42, %v2538_v24  ;;  %v3733_v28 = vadd.f32 %v6107_v42, %v3732_v25  ;;  %v5063_v23 = vld [vmem:[%s9445_s0 + $0xde8] sm:$0xff] }
 0x1ae   :  { %v5259_v24 = vld [vmem:[%s9445_s0 + $0x1408] sm:$0xff] }
 0x1af   :  { %v3060_v31 = vmax.f32 %v2539_v27, 0.0  ;;  %v4254_v32 = vmax.f32 %v3733_v28, 0.0 }
 0x1b0   :  { %v349_v33 = vpop.f32.mrf.mxu0  ;;  %v1347_v34 = vpop.f32.mrf.mxu1 }
 0x1b1   :  { %v3256_v37 = vmax.f32 %v2062_v26, %v3060_v31  ;;  %2588 = vmatmul.f32.gmra.mxu2 %v5060_v29  ;;  %v350_v38 = vadd.f32 %v6107_v42, %v349_v33  ;;  %v1348_v39 = vadd.f32 %v6107_v42, %v1347_v34  ;;  %3782 = vmatmul.f32.gmra.mxu3 %v5256_v30  ;;  %v67_v29 = vld [vmem:[%s9445_s0 + $0x1a8] sm:$0xff] }
 0x1b2   :  { %v4867_v30 = vld [vmem:[%s9445_s0 + $0x7c8] sm:$0xff] }
 0x1b3   :  { %v4450_v40 = vmax.f32 %v3256_v37, %v4254_v32  ;;  %v869_v16 = vmax.f32 %v350_v38, 0.0  ;;  %v1867_v41 = vmax.f32 %v1348_v39, 0.0  ;;  %396 = vmatmul.f32.gmra.mxu0 %v64_v35  ;;  %1394 = vmatmul.f32.gmra.mxu1 %v4864_v36 }
 0x1b4   :  { %v2541_v43 = vpop.f32.mrf.mxu2  ;;  %v3735_v44 = vpop.f32.mrf.mxu3 }
 0x1b5   :  { %4647 = vst.msk [vmem:[%s9447_s3 + $0x108] sm:$0xff] %vm4613_vm0, %v4450_v40  ;;  %v2063_v45 = vmax.f32 %v869_v16, %v1867_v41  ;;  %v2542_v46 = vadd.f32 %v6107_v42, %v2541_v43  ;;  %v3736_v47 = vadd.f32 %v6107_v42, %v3735_v44  ;;  %v5064_v41 = vld [vmem:[%s9445_s0 + $0xdf0] sm:$0xff] }
 0x1b6   :  { %v5260_v43 = vld [vmem:[%s9445_s0 + $0x1410] sm:$0xff] }
 0x1b7   :  { %v3061_v50 = vmax.f32 %v2542_v46, 0.0  ;;  %v4255_v51 = vmax.f32 %v3736_v47, 0.0 }
 0x1b8   :  { %v352_v52 = vpop.f32.mrf.mxu0  ;;  %v1350_v53 = vpop.f32.mrf.mxu1 }
 0x1b9   :  { %v3257_v56 = vmax.f32 %v2063_v45, %v3061_v50  ;;  %2591 = vmatmul.f32.gmra.mxu2 %v5061_v48  ;;  %v353_v57 = vadd.f32 %v6107_v42, %v352_v52  ;;  %v1351_v58 = vadd.f32 %v6107_v42, %v1350_v53  ;;  %3785 = vmatmul.f32.gmra.mxu3 %v5257_v49  ;;  %v68_v48 = vld [vmem:[%s9445_s0 + $0x1b0] sm:$0xff] }
 0x1ba   :  { %v4868_v49 = vld [vmem:[%s9445_s0 + $0x7d0] sm:$0xff] }
 0x1bb   :  { %v4451_v59 = vmax.f32 %v3257_v56, %v4255_v51  ;;  %v870_v60 = vmax.f32 %v353_v57, 0.0  ;;  %v1868_v61 = vmax.f32 %v1351_v58, 0.0  ;;  %399 = vmatmul.f32.gmra.mxu0 %v65_v54  ;;  %1397 = vmatmul.f32.gmra.mxu1 %v4865_v55 }
 0x1bc   :  { %v2544_v62 = vpop.f32.mrf.mxu2  ;;  %v3738_v63 = vpop.f32.mrf.mxu3 }
 0x1bd   :  { %4648 = vst.msk [vmem:[%s9447_s3 + $0x110] sm:$0xff] %vm4613_vm0, %v4451_v59  ;;  %v2064_v0 = vmax.f32 %v870_v60, %v1868_v61  ;;  %v2545_v1 = vadd.f32 %v6107_v42, %v2544_v62  ;;  %v3739_v2 = vadd.f32 %v6107_v42, %v3738_v63  ;;  %v5065_v61 = vld [vmem:[%s9445_s0 + $0xdf8] sm:$0xff] }
 0x1be   :  { %v5261_v62 = vld [vmem:[%s9445_s0 + $0x1418] sm:$0xff] }
 0x1bf   :  { %v3062_v5 = vmax.f32 %v2545_v1, 0.0  ;;  %v4256_v6 = vmax.f32 %v3739_v2, 0.0 }
 0x1c0   :  { %v355_v7 = vpop.f32.mrf.mxu0  ;;  %v1353_v8 = vpop.f32.mrf.mxu1 }
 0x1c1   :  { %v3258_v11 = vmax.f32 %v2064_v0, %v3062_v5  ;;  %2594 = vmatmul.f32.gmra.mxu2 %v5062_v3  ;;  %v356_v12 = vadd.f32 %v6107_v42, %v355_v7  ;;  %v1354_v13 = vadd.f32 %v6107_v42, %v1353_v8  ;;  %3788 = vmatmul.f32.gmra.mxu3 %v5258_v4  ;;  %v69_v3 = vld [vmem:[%s9445_s0 + $0x1b8] sm:$0xff] }
 0x1c2   :  { %v4869_v4 = vld [vmem:[%s9445_s0 + $0x7d8] sm:$0xff] }
 0x1c3   :  { %v4452_v14 = vmax.f32 %v3258_v11, %v4256_v6  ;;  %v871_v15 = vmax.f32 %v356_v12, 0.0  ;;  %v1869_v17 = vmax.f32 %v1354_v13, 0.0  ;;  %402 = vmatmul.f32.gmra.mxu0 %v66_v9  ;;  %1400 = vmatmul.f32.gmra.mxu1 %v4866_v10 }
 0x1c4   :  { %v2547_v18 = vpop.f32.mrf.mxu2  ;;  %v3741_v19 = vpop.f32.mrf.mxu3 }
 0x1c5   :  { %4649 = vst.msk [vmem:[%s9447_s3 + $0x118] sm:$0xff] %vm4613_vm0, %v4452_v14  ;;  %v2065_v20 = vmax.f32 %v871_v15, %v1869_v17  ;;  %v2548_v21 = vadd.f32 %v6107_v42, %v2547_v18  ;;  %v3742_v22 = vadd.f32 %v6107_v42, %v3741_v19  ;;  %v5066_v17 = vld [vmem:[%s9445_s0 + $0xe00] sm:$0xff] }
 0x1c6   :  { %v5262_v18 = vld [vmem:[%s9445_s0 + $0x1420] sm:$0xff] }
 0x1c7   :  { %v3063_v25 = vmax.f32 %v2548_v21, 0.0  ;;  %v4257_v26 = vmax.f32 %v3742_v22, 0.0 }
 0x1c8   :  { %v358_v27 = vpop.f32.mrf.mxu0  ;;  %v1356_v28 = vpop.f32.mrf.mxu1 }
 0x1c9   :  { %v3259_v31 = vmax.f32 %v2065_v20, %v3063_v25  ;;  %2597 = vmatmul.f32.gmra.mxu2 %v5063_v23  ;;  %v359_v32 = vadd.f32 %v6107_v42, %v358_v27  ;;  %v1357_v33 = vadd.f32 %v6107_v42, %v1356_v28  ;;  %3791 = vmatmul.f32.gmra.mxu3 %v5259_v24  ;;  %v70_v23 = vld [vmem:[%s9445_s0 + $0x1c0] sm:$0xff] }
 0x1ca   :  { %v4870_v24 = vld [vmem:[%s9445_s0 + $0x7e0] sm:$0xff] }
 0x1cb   :  { %v4453_v34 = vmax.f32 %v3259_v31, %v4257_v26  ;;  %v872_v35 = vmax.f32 %v359_v32, 0.0  ;;  %v1870_v36 = vmax.f32 %v1357_v33, 0.0  ;;  %405 = vmatmul.f32.gmra.mxu0 %v67_v29  ;;  %1403 = vmatmul.f32.gmra.mxu1 %v4867_v30 }
 0x1cc   :  { %v2550_v37 = vpop.f32.mrf.mxu2  ;;  %v3744_v38 = vpop.f32.mrf.mxu3 }
 0x1cd   :  { %4650 = vst.msk [vmem:[%s9447_s3 + $0x120] sm:$0xff] %vm4613_vm0, %v4453_v34  ;;  %v2066_v39 = vmax.f32 %v872_v35, %v1870_v36  ;;  %v2551_v40 = vadd.f32 %v6107_v42, %v2550_v37  ;;  %v3745_v16 = vadd.f32 %v6107_v42, %v3744_v38  ;;  %v5067_v36 = vld [vmem:[%s9445_s0 + $0xe08] sm:$0xff] }
 0x1ce   :  { %v5263_v37 = vld [vmem:[%s9445_s0 + $0x1428] sm:$0xff] }
 0x1cf   :  { %v3064_v44 = vmax.f32 %v2551_v40, 0.0  ;;  %v4258_v45 = vmax.f32 %v3745_v16, 0.0 }
 0x1d0   :  { %v361_v46 = vpop.f32.mrf.mxu0  ;;  %v1359_v47 = vpop.f32.mrf.mxu1 }
 0x1d1   :  { %v3260_v50 = vmax.f32 %v2066_v39, %v3064_v44  ;;  %2600 = vmatmul.f32.gmra.mxu2 %v5064_v41  ;;  %v362_v51 = vadd.f32 %v6107_v42, %v361_v46  ;;  %v1360_v52 = vadd.f32 %v6107_v42, %v1359_v47  ;;  %3794 = vmatmul.f32.gmra.mxu3 %v5260_v43  ;;  %v71_v41 = vld [vmem:[%s9445_s0 + $0x1c8] sm:$0xff] }
 0x1d2   :  { %v4871_v43 = vld [vmem:[%s9445_s0 + $0x7e8] sm:$0xff] }
 0x1d3   :  { %v4454_v53 = vmax.f32 %v3260_v50, %v4258_v45  ;;  %v873_v54 = vmax.f32 %v362_v51, 0.0  ;;  %v1871_v55 = vmax.f32 %v1360_v52, 0.0  ;;  %408 = vmatmul.f32.gmra.mxu0 %v68_v48  ;;  %1406 = vmatmul.f32.gmra.mxu1 %v4868_v49 }
 0x1d4   :  { %v2553_v56 = vpop.f32.mrf.mxu2  ;;  %v3747_v57 = vpop.f32.mrf.mxu3 }
 0x1d5   :  { %4651 = vst.msk [vmem:[%s9447_s3 + $0x128] sm:$0xff] %vm4613_vm0, %v4454_v53  ;;  %v2067_v58 = vmax.f32 %v873_v54, %v1871_v55  ;;  %v2554_v59 = vadd.f32 %v6107_v42, %v2553_v56  ;;  %v3748_v60 = vadd.f32 %v6107_v42, %v3747_v57  ;;  %v5068_v55 = vld [vmem:[%s9445_s0 + $0xe10] sm:$0xff] }
 0x1d6   :  { %v5264_v56 = vld [vmem:[%s9445_s0 + $0x1430] sm:$0xff] }
 0x1d7   :  { %v3065_v63 = vmax.f32 %v2554_v59, 0.0  ;;  %v4259_v0 = vmax.f32 %v3748_v60, 0.0 }
 0x1d8   :  { %v364_v1 = vpop.f32.mrf.mxu0  ;;  %v1362_v2 = vpop.f32.mrf.mxu1 }
 0x1d9   :  { %v3261_v5 = vmax.f32 %v2067_v58, %v3065_v63  ;;  %2603 = vmatmul.f32.gmra.mxu2 %v5065_v61  ;;  %v365_v6 = vadd.f32 %v6107_v42, %v364_v1  ;;  %v1363_v7 = vadd.f32 %v6107_v42, %v1362_v2  ;;  %3797 = vmatmul.f32.gmra.mxu3 %v5261_v62  ;;  %v72_v61 = vld [vmem:[%s9445_s0 + $0x1d0] sm:$0xff] }
 0x1da   :  { %v4872_v62 = vld [vmem:[%s9445_s0 + $0x7f0] sm:$0xff] }
 0x1db   :  { %v4455_v8 = vmax.f32 %v3261_v5, %v4259_v0  ;;  %v874_v9 = vmax.f32 %v365_v6, 0.0  ;;  %v1872_v10 = vmax.f32 %v1363_v7, 0.0  ;;  %411 = vmatmul.f32.gmra.mxu0 %v69_v3  ;;  %1409 = vmatmul.f32.gmra.mxu1 %v4869_v4 }
 0x1dc   :  { %v2556_v11 = vpop.f32.mrf.mxu2  ;;  %v3750_v12 = vpop.f32.mrf.mxu3 }
 0x1dd   :  { %4652 = vst.msk [vmem:[%s9447_s3 + $0x130] sm:$0xff] %vm4613_vm0, %v4455_v8  ;;  %v2068_v13 = vmax.f32 %v874_v9, %v1872_v10  ;;  %v2557_v14 = vadd.f32 %v6107_v42, %v2556_v11  ;;  %v3751_v15 = vadd.f32 %v6107_v42, %v3750_v12  ;;  %v6538_v8 = vld [vmem:[%s9446_s2] ss:$0 sm:$0xff]  ;;  %v5069_v10 = vld [vmem:[%s9445_s0 + $0xe18] sm:$0xff] }
 0x1de   :  { %v5265_v11 = vld [vmem:[%s9445_s0 + $0x1438] sm:$0xff] }
 0x1df   :  { %v3066_v19 = vmax.f32 %v2557_v14, 0.0  ;;  %v4260_v20 = vmax.f32 %v3751_v15, 0.0 }
 0x1e0   :  { %v367_v21 = vpop.f32.mrf.mxu0  ;;  %v1365_v22 = vpop.f32.mrf.mxu1 }
 0x1e1   :  { %v3262_v25 = vmax.f32 %v2068_v13, %v3066_v19  ;;  %2606 = vmatmul.f32.gmra.mxu2 %v5066_v17  ;;  %v368_v26 = vadd.f32 %v6107_v42, %v367_v21  ;;  %v1366_v27 = vadd.f32 %v6107_v42, %v1365_v22  ;;  %3800 = vmatmul.f32.gmra.mxu3 %v5262_v18  ;;  %v73_v17 = vld [vmem:[%s9445_s0 + $0x1d8] sm:$0xff] }
 0x1e2   :  { %v4873_v18 = vld [vmem:[%s9445_s0 + $0x7f8] sm:$0xff] }
 0x1e3   :  { %v4456_v28 = vmax.f32 %v3262_v25, %v4260_v20  ;;  %v875_v29 = vmax.f32 %v368_v26, 0.0  ;;  %v1873_v30 = vmax.f32 %v1366_v27, 0.0  ;;  %414 = vmatmul.f32.gmra.mxu0 %v70_v23  ;;  %1412 = vmatmul.f32.gmra.mxu1 %v4870_v24 }
 0x1e4   :  { %v2559_v31 = vpop.f32.mrf.mxu2  ;;  %v3753_v32 = vpop.f32.mrf.mxu3 }
 0x1e5   :  { %4653 = vst.msk [vmem:[%s9447_s3 + $0x138] sm:$0xff] %vm4613_vm0, %v4456_v28  ;;  %v2069_v33 = vmax.f32 %v875_v29, %v1873_v30  ;;  %v2560_v34 = vadd.f32 %v6107_v42, %v2559_v31  ;;  %v3754_v35 = vadd.f32 %v6107_v42, %v3753_v32  ;;  %v5070_v30 = vld [vmem:[%s9445_s0 + $0xe20] sm:$0xff] }
 0x1e6   :  { %v5266_v31 = vld [vmem:[%s9445_s0 + $0x1440] sm:$0xff] }
 0x1e7   :  { %v3067_v38 = vmax.f32 %v2560_v34, 0.0  ;;  %v4261_v39 = vmax.f32 %v3754_v35, 0.0 }
 0x1e8   :  { %v370_v40 = vpop.f32.mrf.mxu0  ;;  %v1368_v16 = vpop.f32.mrf.mxu1 }
 0x1e9   :  { %v3263_v44 = vmax.f32 %v2069_v33, %v3067_v38  ;;  %2609 = vmatmul.f32.gmra.mxu2 %v5067_v36  ;;  %v371_v45 = vadd.f32 %v6107_v42, %v370_v40  ;;  %v1369_v46 = vadd.f32 %v6107_v42, %v1368_v16  ;;  %3803 = vmatmul.f32.gmra.mxu3 %v5263_v37  ;;  %v74_v36 = vld [vmem:[%s9445_s0 + $0x1e0] sm:$0xff] }
 0x1ea   :  { %v4874_v37 = vld [vmem:[%s9445_s0 + $0x800] sm:$0xff] }
 0x1eb   :  { %v4457_v47 = vmax.f32 %v3263_v44, %v4261_v39  ;;  %v876_v48 = vmax.f32 %v371_v45, 0.0  ;;  %v1874_v49 = vmax.f32 %v1369_v46, 0.0  ;;  %417 = vmatmul.f32.gmra.mxu0 %v71_v41  ;;  %1415 = vmatmul.f32.gmra.mxu1 %v4871_v43 }
 0x1ec   :  { %v2562_v50 = vpop.f32.mrf.mxu2  ;;  %v3756_v51 = vpop.f32.mrf.mxu3 }
 0x1ed   :  { %4654 = vst.msk [vmem:[%s9447_s3 + $0x140] sm:$0xff] %vm4613_vm0, %v4457_v47  ;;  %v2070_v52 = vmax.f32 %v876_v48, %v1874_v49  ;;  %v2563_v53 = vadd.f32 %v6107_v42, %v2562_v50  ;;  %v3757_v54 = vadd.f32 %v6107_v42, %v3756_v51  ;;  %v5071_v49 = vld [vmem:[%s9445_s0 + $0xe28] sm:$0xff] }
 0x1ee   :  { %v5267_v50 = vld [vmem:[%s9445_s0 + $0x1448] sm:$0xff] }
 0x1ef   :  { %v3068_v57 = vmax.f32 %v2563_v53, 0.0  ;;  %v4262_v58 = vmax.f32 %v3757_v54, 0.0 }
 0x1f0   :  { %v373_v59 = vpop.f32.mrf.mxu0  ;;  %v1371_v60 = vpop.f32.mrf.mxu1 }
 0x1f1   :  { %v3264_v63 = vmax.f32 %v2070_v52, %v3068_v57  ;;  %2612 = vmatmul.f32.gmra.mxu2 %v5068_v55  ;;  %v374_v0 = vadd.f32 %v6107_v42, %v373_v59  ;;  %v1372_v1 = vadd.f32 %v6107_v42, %v1371_v60  ;;  %3806 = vmatmul.f32.gmra.mxu3 %v5264_v56  ;;  %v75_v55 = vld [vmem:[%s9445_s0 + $0x1e8] sm:$0xff] }
 0x1f2   :  { %v4875_v56 = vld [vmem:[%s9445_s0 + $0x808] sm:$0xff] }
 0x1f3   :  { %v4458_v2 = vmax.f32 %v3264_v63, %v4262_v58  ;;  %v877_v3 = vmax.f32 %v374_v0, 0.0  ;;  %v1875_v4 = vmax.f32 %v1372_v1, 0.0  ;;  %420 = vmatmul.f32.gmra.mxu0 %v72_v61  ;;  %1418 = vmatmul.f32.gmra.mxu1 %v4872_v62 }
 0x1f4   :  { %v2565_v5 = vpop.f32.mrf.mxu2  ;;  %v3759_v6 = vpop.f32.mrf.mxu3 }
 0x1f5   :  { %4655 = vst.msk [vmem:[%s9447_s3 + $0x148] sm:$0xff] %vm4613_vm0, %v4458_v2  ;;  %v2071_v7 = vmax.f32 %v877_v3, %v1875_v4  ;;  %v2566_v42 = vadd.f32 %v6538_v8, %v2565_v5  ;;  %v3760_v9 = vadd.f32 %v6538_v8, %v3759_v6  ;;  %v5072_v4 = vld [vmem:[%s9445_s0 + $0xe30] sm:$0xff] }
 0x1f6   :  { %v5268_v5 = vld [vmem:[%s9445_s0 + $0x1450] sm:$0xff] }
 0x1f7   :  { %v3069_v12 = vmax.f32 %v2566_v42, 0.0  ;;  %v4263_v13 = vmax.f32 %v3760_v9, 0.0 }
 0x1f8   :  { %v376_v14 = vpop.f32.mrf.mxu0  ;;  %v1374_v15 = vpop.f32.mrf.mxu1 }
 0x1f9   :  { %v3265_v19 = vmax.f32 %v2071_v7, %v3069_v12  ;;  %2615 = vmatmul.f32.gmra.mxu2 %v5069_v10  ;;  %v377_v20 = vadd.f32 %v6538_v8, %v376_v14  ;;  %v1375_v21 = vadd.f32 %v6538_v8, %v1374_v15  ;;  %3809 = vmatmul.f32.gmra.mxu3 %v5265_v11  ;;  %v76_v10 = vld [vmem:[%s9445_s0 + $0x1f0] sm:$0xff] }
 0x1fa   :  { %v4876_v11 = vld [vmem:[%s9445_s0 + $0x810] sm:$0xff] }
 0x1fb   :  { %v4459_v22 = vmax.f32 %v3265_v19, %v4263_v13  ;;  %v878_v23 = vmax.f32 %v377_v20, 0.0  ;;  %v1876_v24 = vmax.f32 %v1375_v21, 0.0  ;;  %423 = vmatmul.f32.gmra.mxu0 %v73_v17  ;;  %1421 = vmatmul.f32.gmra.mxu1 %v4873_v18 }
 0x1fc   :  { %v2568_v25 = vpop.f32.mrf.mxu2  ;;  %v3762_v26 = vpop.f32.mrf.mxu3 }
 0x1fd   :  { %4656 = vst.msk [vmem:[%s9447_s3 + $0x150] sm:$0xff] %vm4613_vm0, %v4459_v22  ;;  %v2072_v27 = vmax.f32 %v878_v23, %v1876_v24  ;;  %v2569_v28 = vadd.f32 %v6538_v8, %v2568_v25  ;;  %v3763_v29 = vadd.f32 %v6538_v8, %v3762_v26  ;;  %v5073_v24 = vld [vmem:[%s9445_s0 + $0xe38] sm:$0xff] }
 0x1fe   :  { %v5269_v25 = vld [vmem:[%s9445_s0 + $0x1458] sm:$0xff] }
 0x1ff   :  { %v3070_v32 = vmax.f32 %v2569_v28, 0.0  ;;  %v4264_v33 = vmax.f32 %v3763_v29, 0.0 }
 0x200   :  { %v379_v34 = vpop.f32.mrf.mxu0  ;;  %v1377_v35 = vpop.f32.mrf.mxu1 }
 0x201   :  { %v3266_v38 = vmax.f32 %v2072_v27, %v3070_v32  ;;  %2618 = vmatmul.f32.gmra.mxu2 %v5070_v30  ;;  %v380_v39 = vadd.f32 %v6538_v8, %v379_v34  ;;  %v1378_v40 = vadd.f32 %v6538_v8, %v1377_v35  ;;  %3812 = vmatmul.f32.gmra.mxu3 %v5266_v31  ;;  %v77_v30 = vld [vmem:[%s9445_s0 + $0x1f8] sm:$0xff] }
 0x202   :  { %v4877_v31 = vld [vmem:[%s9445_s0 + $0x818] sm:$0xff] }
 0x203   :  { %v4460_v16 = vmax.f32 %v3266_v38, %v4264_v33  ;;  %v879_v41 = vmax.f32 %v380_v39, 0.0  ;;  %v1877_v43 = vmax.f32 %v1378_v40, 0.0  ;;  %426 = vmatmul.f32.gmra.mxu0 %v74_v36  ;;  %1424 = vmatmul.f32.gmra.mxu1 %v4874_v37 }
 0x204   :  { %v2571_v44 = vpop.f32.mrf.mxu2  ;;  %v3765_v45 = vpop.f32.mrf.mxu3 }
 0x205   :  { %4657 = vst.msk [vmem:[%s9447_s3 + $0x158] sm:$0xff] %vm4613_vm0, %v4460_v16  ;;  %v2073_v46 = vmax.f32 %v879_v41, %v1877_v43  ;;  %v2572_v47 = vadd.f32 %v6538_v8, %v2571_v44  ;;  %v3766_v48 = vadd.f32 %v6538_v8, %v3765_v45  ;;  %v5074_v43 = vld [vmem:[%s9445_s0 + $0xe40] sm:$0xff] }
 0x206   :  { %v5270_v44 = vld [vmem:[%s9445_s0 + $0x1460] sm:$0xff] }
 0x207   :  { %v3071_v51 = vmax.f32 %v2572_v47, 0.0  ;;  %v4265_v52 = vmax.f32 %v3766_v48, 0.0 }
 0x208   :  { %v382_v53 = vpop.f32.mrf.mxu0  ;;  %v1380_v54 = vpop.f32.mrf.mxu1 }
 0x209   :  { %v3267_v57 = vmax.f32 %v2073_v46, %v3071_v51  ;;  %2621 = vmatmul.f32.gmra.mxu2 %v5071_v49  ;;  %v383_v58 = vadd.f32 %v6538_v8, %v382_v53  ;;  %v1381_v59 = vadd.f32 %v6538_v8, %v1380_v54  ;;  %3815 = vmatmul.f32.gmra.mxu3 %v5267_v50  ;;  %v78_v49 = vld [vmem:[%s9445_s0 + $0x200] sm:$0xff] }
 0x20a   :  { %v4878_v50 = vld [vmem:[%s9445_s0 + $0x820] sm:$0xff] }
 0x20b   :  { %v4461_v60 = vmax.f32 %v3267_v57, %v4265_v52  ;;  %v880_v61 = vmax.f32 %v383_v58, 0.0  ;;  %v1878_v62 = vmax.f32 %v1381_v59, 0.0  ;;  %429 = vmatmul.f32.gmra.mxu0 %v75_v55  ;;  %1427 = vmatmul.f32.gmra.mxu1 %v4875_v56 }
 0x20c   :  { %v2574_v63 = vpop.f32.mrf.mxu2  ;;  %v3768_v0 = vpop.f32.mrf.mxu3 }
 0x20d   :  { %4658 = vst.msk [vmem:[%s9447_s3 + $0x160] sm:$0xff] %vm4613_vm0, %v4461_v60  ;;  %v2074_v1 = vmax.f32 %v880_v61, %v1878_v62  ;;  %v2575_v2 = vadd.f32 %v6538_v8, %v2574_v63  ;;  %v3769_v3 = vadd.f32 %v6538_v8, %v3768_v0  ;;  %v5075_v62 = vld [vmem:[%s9445_s0 + $0xe48] sm:$0xff] }
 0x20e   :  { %v5271_v63 = vld [vmem:[%s9445_s0 + $0x1468] sm:$0xff] }
 0x20f   :  { %v3072_v6 = vmax.f32 %v2575_v2, 0.0  ;;  %v4266_v7 = vmax.f32 %v3769_v3, 0.0 }
 0x210   :  { %v385_v42 = vpop.f32.mrf.mxu0  ;;  %v1383_v9 = vpop.f32.mrf.mxu1 }
 0x211   :  { %v3268_v12 = vmax.f32 %v2074_v1, %v3072_v6  ;;  %2624 = vmatmul.f32.gmra.mxu2 %v5072_v4  ;;  %v386_v13 = vadd.f32 %v6538_v8, %v385_v42  ;;  %v1384_v14 = vadd.f32 %v6538_v8, %v1383_v9  ;;  %3818 = vmatmul.f32.gmra.mxu3 %v5268_v5  ;;  %v79_v4 = vld [vmem:[%s9445_s0 + $0x208] sm:$0xff] }
 0x212   :  { %v4879_v5 = vld [vmem:[%s9445_s0 + $0x828] sm:$0xff] }
 0x213   :  { %v4462_v15 = vmax.f32 %v3268_v12, %v4266_v7  ;;  %v881_v17 = vmax.f32 %v386_v13, 0.0  ;;  %v1879_v18 = vmax.f32 %v1384_v14, 0.0  ;;  %432 = vmatmul.f32.gmra.mxu0 %v76_v10  ;;  %1430 = vmatmul.f32.gmra.mxu1 %v4876_v11 }
 0x214   :  { %v2577_v19 = vpop.f32.mrf.mxu2  ;;  %v3771_v20 = vpop.f32.mrf.mxu3 }
 0x215   :  { %4659 = vst.msk [vmem:[%s9447_s3 + $0x168] sm:$0xff] %vm4613_vm0, %v4462_v15  ;;  %v2075_v21 = vmax.f32 %v881_v17, %v1879_v18  ;;  %v2578_v22 = vadd.f32 %v6538_v8, %v2577_v19  ;;  %v3772_v23 = vadd.f32 %v6538_v8, %v3771_v20  ;;  %v5076_v18 = vld [vmem:[%s9445_s0 + $0xe50] sm:$0xff] }
 0x216   :  { %v5272_v19 = vld [vmem:[%s9445_s0 + $0x1470] sm:$0xff] }
 0x217   :  { %v3073_v26 = vmax.f32 %v2578_v22, 0.0  ;;  %v4267_v27 = vmax.f32 %v3772_v23, 0.0 }
 0x218   :  { %v388_v28 = vpop.f32.mrf.mxu0  ;;  %v1386_v29 = vpop.f32.mrf.mxu1 }
 0x219   :  { %v3269_v32 = vmax.f32 %v2075_v21, %v3073_v26  ;;  %2627 = vmatmul.f32.gmra.mxu2 %v5073_v24  ;;  %v389_v33 = vadd.f32 %v6538_v8, %v388_v28  ;;  %v1387_v34 = vadd.f32 %v6538_v8, %v1386_v29  ;;  %3821 = vmatmul.f32.gmra.mxu3 %v5269_v25  ;;  %v80_v24 = vld [vmem:[%s9445_s0 + $0x210] sm:$0xff] }
 0x21a   :  { %v4880_v25 = vld [vmem:[%s9445_s0 + $0x830] sm:$0xff] }
 0x21b   :  { %v4463_v35 = vmax.f32 %v3269_v32, %v4267_v27  ;;  %v882_v36 = vmax.f32 %v389_v33, 0.0  ;;  %v1880_v37 = vmax.f32 %v1387_v34, 0.0  ;;  %435 = vmatmul.f32.gmra.mxu0 %v77_v30  ;;  %1433 = vmatmul.f32.gmra.mxu1 %v4877_v31 }
 0x21c   :  { %v2580_v38 = vpop.f32.mrf.mxu2  ;;  %v3774_v39 = vpop.f32.mrf.mxu3 }
 0x21d   :  { %4660 = vst.msk [vmem:[%s9447_s3 + $0x170] sm:$0xff] %vm4613_vm0, %v4463_v35  ;;  %v2076_v40 = vmax.f32 %v882_v36, %v1880_v37  ;;  %v2581_v16 = vadd.f32 %v6538_v8, %v2580_v38  ;;  %v3775_v41 = vadd.f32 %v6538_v8, %v3774_v39  ;;  %v5077_v37 = vld [vmem:[%s9445_s0 + $0xe58] sm:$0xff] }
 0x21e   :  { %v5273_v38 = vld [vmem:[%s9445_s0 + $0x1478] sm:$0xff] }
 0x21f   :  { %v3074_v45 = vmax.f32 %v2581_v16, 0.0  ;;  %v4268_v46 = vmax.f32 %v3775_v41, 0.0 }
 0x220   :  { %v391_v47 = vpop.f32.mrf.mxu0  ;;  %v1389_v48 = vpop.f32.mrf.mxu1 }
 0x221   :  { %v3270_v51 = vmax.f32 %v2076_v40, %v3074_v45  ;;  %2630 = vmatmul.f32.gmra.mxu2 %v5074_v43  ;;  %v392_v52 = vadd.f32 %v6538_v8, %v391_v47  ;;  %v1390_v53 = vadd.f32 %v6538_v8, %v1389_v48  ;;  %3824 = vmatmul.f32.gmra.mxu3 %v5270_v44  ;;  %v81_v43 = vld [vmem:[%s9445_s0 + $0x218] sm:$0xff] }
 0x222   :  { %v4881_v44 = vld [vmem:[%s9445_s0 + $0x838] sm:$0xff] }
 0x223   :  { %v4464_v54 = vmax.f32 %v3270_v51, %v4268_v46  ;;  %v883_v55 = vmax.f32 %v392_v52, 0.0  ;;  %v1881_v56 = vmax.f32 %v1390_v53, 0.0  ;;  %438 = vmatmul.f32.gmra.mxu0 %v78_v49  ;;  %1436 = vmatmul.f32.gmra.mxu1 %v4878_v50 }
 0x224   :  { %v2583_v57 = vpop.f32.mrf.mxu2  ;;  %v3777_v58 = vpop.f32.mrf.mxu3 }
 0x225   :  { %4661 = vst.msk [vmem:[%s9447_s3 + $0x178] sm:$0xff] %vm4613_vm0, %v4464_v54  ;;  %v2077_v59 = vmax.f32 %v883_v55, %v1881_v56  ;;  %v2584_v60 = vadd.f32 %v6538_v8, %v2583_v57  ;;  %v3778_v61 = vadd.f32 %v6538_v8, %v3777_v58  ;;  %v5078_v56 = vld [vmem:[%s9445_s0 + $0xe60] sm:$0xff] }
 0x226   :  { %v5274_v57 = vld [vmem:[%s9445_s0 + $0x1480] sm:$0xff] }
 0x227   :  { %v3075_v0 = vmax.f32 %v2584_v60, 0.0  ;;  %v4269_v1 = vmax.f32 %v3778_v61, 0.0 }
 0x228   :  { %v394_v2 = vpop.f32.mrf.mxu0  ;;  %v1392_v3 = vpop.f32.mrf.mxu1 }
 0x229   :  { %v3271_v6 = vmax.f32 %v2077_v59, %v3075_v0  ;;  %2633 = vmatmul.f32.gmra.mxu2 %v5075_v62  ;;  %v395_v7 = vadd.f32 %v6538_v8, %v394_v2  ;;  %v1393_v42 = vadd.f32 %v6538_v8, %v1392_v3  ;;  %3827 = vmatmul.f32.gmra.mxu3 %v5271_v63  ;;  %v82_v62 = vld [vmem:[%s9445_s0 + $0x220] sm:$0xff] }
 0x22a   :  { %v4882_v63 = vld [vmem:[%s9445_s0 + $0x840] sm:$0xff] }
 0x22b   :  { %v4465_v9 = vmax.f32 %v3271_v6, %v4269_v1  ;;  %v884_v10 = vmax.f32 %v395_v7, 0.0  ;;  %v1882_v11 = vmax.f32 %v1393_v42, 0.0  ;;  %441 = vmatmul.f32.gmra.mxu0 %v79_v4  ;;  %1439 = vmatmul.f32.gmra.mxu1 %v4879_v5 }
 0x22c   :  { %v2586_v12 = vpop.f32.mrf.mxu2  ;;  %v3780_v13 = vpop.f32.mrf.mxu3 }
 0x22d   :  { %4662 = vst.msk [vmem:[%s9447_s3 + $0x180] sm:$0xff] %vm4613_vm0, %v4465_v9  ;;  %v2078_v14 = vmax.f32 %v884_v10, %v1882_v11  ;;  %v2587_v15 = vadd.f32 %v6538_v8, %v2586_v12  ;;  %v3781_v17 = vadd.f32 %v6538_v8, %v3780_v13  ;;  %v5079_v11 = vld [vmem:[%s9445_s0 + $0xe68] sm:$0xff] }
 0x22e   :  { %v5275_v12 = vld [vmem:[%s9445_s0 + $0x1488] sm:$0xff] }
 0x22f   :  { %v3076_v20 = vmax.f32 %v2587_v15, 0.0  ;;  %v4270_v21 = vmax.f32 %v3781_v17, 0.0 }
 0x230   :  { %v397_v22 = vpop.f32.mrf.mxu0  ;;  %v1395_v23 = vpop.f32.mrf.mxu1 }
 0x231   :  { %v3272_v26 = vmax.f32 %v2078_v14, %v3076_v20  ;;  %2636 = vmatmul.f32.gmra.mxu2 %v5076_v18  ;;  %v398_v27 = vadd.f32 %v6538_v8, %v397_v22  ;;  %v1396_v28 = vadd.f32 %v6538_v8, %v1395_v23  ;;  %3830 = vmatmul.f32.gmra.mxu3 %v5272_v19  ;;  %v83_v18 = vld [vmem:[%s9445_s0 + $0x228] sm:$0xff] }
 0x232   :  { %v4883_v19 = vld [vmem:[%s9445_s0 + $0x848] sm:$0xff] }
 0x233   :  { %v4466_v29 = vmax.f32 %v3272_v26, %v4270_v21  ;;  %v885_v30 = vmax.f32 %v398_v27, 0.0  ;;  %v1883_v31 = vmax.f32 %v1396_v28, 0.0  ;;  %444 = vmatmul.f32.gmra.mxu0 %v80_v24  ;;  %1442 = vmatmul.f32.gmra.mxu1 %v4880_v25 }
 0x234   :  { %v2589_v32 = vpop.f32.mrf.mxu2  ;;  %v3783_v33 = vpop.f32.mrf.mxu3 }
 0x235   :  { %4663 = vst.msk [vmem:[%s9447_s3 + $0x188] sm:$0xff] %vm4613_vm0, %v4466_v29  ;;  %v2079_v34 = vmax.f32 %v885_v30, %v1883_v31  ;;  %v2590_v35 = vadd.f32 %v6538_v8, %v2589_v32  ;;  %v3784_v36 = vadd.f32 %v6538_v8, %v3783_v33  ;;  %v5080_v31 = vld [vmem:[%s9445_s0 + $0xe70] sm:$0xff] }
 0x236   :  { %v5276_v32 = vld [vmem:[%s9445_s0 + $0x1490] sm:$0xff] }
 0x237   :  { %v3077_v39 = vmax.f32 %v2590_v35, 0.0  ;;  %v4271_v40 = vmax.f32 %v3784_v36, 0.0 }
 0x238   :  { %v400_v16 = vpop.f32.mrf.mxu0  ;;  %v1398_v41 = vpop.f32.mrf.mxu1 }
 0x239   :  { %v3273_v45 = vmax.f32 %v2079_v34, %v3077_v39  ;;  %2639 = vmatmul.f32.gmra.mxu2 %v5077_v37  ;;  %v401_v46 = vadd.f32 %v6538_v8, %v400_v16  ;;  %v1399_v47 = vadd.f32 %v6538_v8, %v1398_v41  ;;  %3833 = vmatmul.f32.gmra.mxu3 %v5273_v38  ;;  %v84_v37 = vld [vmem:[%s9445_s0 + $0x230] sm:$0xff] }
 0x23a   :  { %v4884_v38 = vld [vmem:[%s9445_s0 + $0x850] sm:$0xff] }
 0x23b   :  { %v4467_v48 = vmax.f32 %v3273_v45, %v4271_v40  ;;  %v886_v49 = vmax.f32 %v401_v46, 0.0  ;;  %v1884_v50 = vmax.f32 %v1399_v47, 0.0  ;;  %447 = vmatmul.f32.gmra.mxu0 %v81_v43  ;;  %1445 = vmatmul.f32.gmra.mxu1 %v4881_v44 }
 0x23c   :  { %v2592_v51 = vpop.f32.mrf.mxu2  ;;  %v3786_v52 = vpop.f32.mrf.mxu3 }
 0x23d   :  { %4664 = vst.msk [vmem:[%s9447_s3 + $0x190] sm:$0xff] %vm4613_vm0, %v4467_v48  ;;  %v2080_v53 = vmax.f32 %v886_v49, %v1884_v50  ;;  %v2593_v54 = vadd.f32 %v6538_v8, %v2592_v51  ;;  %v3787_v55 = vadd.f32 %v6538_v8, %v3786_v52  ;;  %v5081_v50 = vld [vmem:[%s9445_s0 + $0xe78] sm:$0xff] }
 0x23e   :  { %v5277_v51 = vld [vmem:[%s9445_s0 + $0x1498] sm:$0xff] }
 0x23f   :  { %v3078_v58 = vmax.f32 %v2593_v54, 0.0  ;;  %v4272_v59 = vmax.f32 %v3787_v55, 0.0 }
 0x240   :  { %v403_v60 = vpop.f32.mrf.mxu0  ;;  %v1401_v61 = vpop.f32.mrf.mxu1 }
 0x241   :  { %v3274_v0 = vmax.f32 %v2080_v53, %v3078_v58  ;;  %2642 = vmatmul.f32.gmra.mxu2 %v5078_v56  ;;  %v404_v1 = vadd.f32 %v6538_v8, %v403_v60  ;;  %v1402_v2 = vadd.f32 %v6538_v8, %v1401_v61  ;;  %3836 = vmatmul.f32.gmra.mxu3 %v5274_v57  ;;  %v85_v56 = vld [vmem:[%s9445_s0 + $0x238] sm:$0xff] }
 0x242   :  { %v4885_v57 = vld [vmem:[%s9445_s0 + $0x858] sm:$0xff] }
 0x243   :  { %v4468_v3 = vmax.f32 %v3274_v0, %v4272_v59  ;;  %v887_v4 = vmax.f32 %v404_v1, 0.0  ;;  %v1885_v5 = vmax.f32 %v1402_v2, 0.0  ;;  %450 = vmatmul.f32.gmra.mxu0 %v82_v62  ;;  %1448 = vmatmul.f32.gmra.mxu1 %v4882_v63 }
 0x244   :  { %v2595_v6 = vpop.f32.mrf.mxu2  ;;  %v3789_v7 = vpop.f32.mrf.mxu3 }
 0x245   :  { %4665 = vst.msk [vmem:[%s9447_s3 + $0x198] sm:$0xff] %vm4613_vm0, %v4468_v3  ;;  %v2081_v42 = vmax.f32 %v887_v4, %v1885_v5  ;;  %v2596_v9 = vadd.f32 %v6538_v8, %v2595_v6  ;;  %v3790_v10 = vadd.f32 %v6538_v8, %v3789_v7  ;;  %v5082_v5 = vld [vmem:[%s9445_s0 + $0xe80] sm:$0xff] }
 0x246   :  { %v5278_v6 = vld [vmem:[%s9445_s0 + $0x14a0] sm:$0xff] }
 0x247   :  { %v3079_v13 = vmax.f32 %v2596_v9, 0.0  ;;  %v4273_v14 = vmax.f32 %v3790_v10, 0.0 }
 0x248   :  { %v406_v15 = vpop.f32.mrf.mxu0  ;;  %v1404_v17 = vpop.f32.mrf.mxu1 }
 0x249   :  { %v3275_v20 = vmax.f32 %v2081_v42, %v3079_v13  ;;  %2645 = vmatmul.f32.gmra.mxu2 %v5079_v11  ;;  %v407_v21 = vadd.f32 %v6538_v8, %v406_v15  ;;  %v1405_v22 = vadd.f32 %v6538_v8, %v1404_v17  ;;  %3839 = vmatmul.f32.gmra.mxu3 %v5275_v12  ;;  %v86_v11 = vld [vmem:[%s9445_s0 + $0x240] sm:$0xff] }
 0x24a   :  { %v4886_v12 = vld [vmem:[%s9445_s0 + $0x860] sm:$0xff] }
 0x24b   :  { %v4469_v23 = vmax.f32 %v3275_v20, %v4273_v14  ;;  %v888_v24 = vmax.f32 %v407_v21, 0.0  ;;  %v1886_v25 = vmax.f32 %v1405_v22, 0.0  ;;  %453 = vmatmul.f32.gmra.mxu0 %v83_v18  ;;  %1451 = vmatmul.f32.gmra.mxu1 %v4883_v19 }
 0x24c   :  { %v2598_v26 = vpop.f32.mrf.mxu2  ;;  %v3792_v27 = vpop.f32.mrf.mxu3 }
 0x24d   :  { %4666 = vst.msk [vmem:[%s9447_s3 + $0x1a0] sm:$0xff] %vm4613_vm0, %v4469_v23  ;;  %v2082_v28 = vmax.f32 %v888_v24, %v1886_v25  ;;  %v2599_v29 = vadd.f32 %v6538_v8, %v2598_v26  ;;  %v3793_v30 = vadd.f32 %v6538_v8, %v3792_v27  ;;  %v5083_v25 = vld [vmem:[%s9445_s0 + $0xe88] sm:$0xff] }
 0x24e   :  { %v5279_v26 = vld [vmem:[%s9445_s0 + $0x14a8] sm:$0xff] }
 0x24f   :  { %v3080_v33 = vmax.f32 %v2599_v29, 0.0  ;;  %v4274_v34 = vmax.f32 %v3793_v30, 0.0 }
 0x250   :  { %v409_v35 = vpop.f32.mrf.mxu0  ;;  %v1407_v36 = vpop.f32.mrf.mxu1 }
 0x251   :  { %v3276_v39 = vmax.f32 %v2082_v28, %v3080_v33  ;;  %2648 = vmatmul.f32.gmra.mxu2 %v5080_v31  ;;  %v410_v40 = vadd.f32 %v6538_v8, %v409_v35  ;;  %v1408_v16 = vadd.f32 %v6538_v8, %v1407_v36  ;;  %3842 = vmatmul.f32.gmra.mxu3 %v5276_v32  ;;  %v87_v31 = vld [vmem:[%s9445_s0 + $0x248] sm:$0xff] }
 0x252   :  { %v4887_v32 = vld [vmem:[%s9445_s0 + $0x868] sm:$0xff] }
 0x253   :  { %v4470_v41 = vmax.f32 %v3276_v39, %v4274_v34  ;;  %v889_v43 = vmax.f32 %v410_v40, 0.0  ;;  %v1887_v44 = vmax.f32 %v1408_v16, 0.0  ;;  %456 = vmatmul.f32.gmra.mxu0 %v84_v37  ;;  %1454 = vmatmul.f32.gmra.mxu1 %v4884_v38 }
 0x254   :  { %v2601_v45 = vpop.f32.mrf.mxu2  ;;  %v3795_v46 = vpop.f32.mrf.mxu3 }
 0x255   :  { %4667 = vst.msk [vmem:[%s9447_s3 + $0x1a8] sm:$0xff] %vm4613_vm0, %v4470_v41  ;;  %v2083_v47 = vmax.f32 %v889_v43, %v1887_v44  ;;  %v2602_v48 = vadd.f32 %v6538_v8, %v2601_v45  ;;  %v3796_v49 = vadd.f32 %v6538_v8, %v3795_v46  ;;  %v5084_v44 = vld [vmem:[%s9445_s0 + $0xe90] sm:$0xff] }
 0x256   :  { %v5280_v45 = vld [vmem:[%s9445_s0 + $0x14b0] sm:$0xff] }
 0x257   :  { %v3081_v52 = vmax.f32 %v2602_v48, 0.0  ;;  %v4275_v53 = vmax.f32 %v3796_v49, 0.0 }
 0x258   :  { %v412_v54 = vpop.f32.mrf.mxu0  ;;  %v1410_v55 = vpop.f32.mrf.mxu1 }
 0x259   :  { %v3277_v58 = vmax.f32 %v2083_v47, %v3081_v52  ;;  %2651 = vmatmul.f32.gmra.mxu2 %v5081_v50  ;;  %v413_v59 = vadd.f32 %v6538_v8, %v412_v54  ;;  %v1411_v60 = vadd.f32 %v6538_v8, %v1410_v55  ;;  %3845 = vmatmul.f32.gmra.mxu3 %v5277_v51  ;;  %v88_v50 = vld [vmem:[%s9445_s0 + $0x250] sm:$0xff] }
 0x25a   :  { %v4888_v51 = vld [vmem:[%s9445_s0 + $0x870] sm:$0xff] }
 0x25b   :  { %v4471_v61 = vmax.f32 %v3277_v58, %v4275_v53  ;;  %v890_v62 = vmax.f32 %v413_v59, 0.0  ;;  %v1888_v63 = vmax.f32 %v1411_v60, 0.0  ;;  %459 = vmatmul.f32.gmra.mxu0 %v85_v56  ;;  %1457 = vmatmul.f32.gmra.mxu1 %v4885_v57 }
 0x25c   :  { %v2604_v0 = vpop.f32.mrf.mxu2  ;;  %v3798_v1 = vpop.f32.mrf.mxu3 }
 0x25d   :  { %4668 = vst.msk [vmem:[%s9447_s3 + $0x1b0] sm:$0xff] %vm4613_vm0, %v4471_v61  ;;  %v2084_v2 = vmax.f32 %v890_v62, %v1888_v63  ;;  %v2605_v3 = vadd.f32 %v6538_v8, %v2604_v0  ;;  %v3799_v4 = vadd.f32 %v6538_v8, %v3798_v1  ;;  %v5085_v63 = vld [vmem:[%s9445_s0 + $0xe98] sm:$0xff] }
 0x25e   :  { %v5281_v0 = vld [vmem:[%s9445_s0 + $0x14b8] sm:$0xff] }
 0x25f   :  { %v3082_v7 = vmax.f32 %v2605_v3, 0.0  ;;  %v4276_v42 = vmax.f32 %v3799_v4, 0.0 }
 0x260   :  { %v415_v9 = vpop.f32.mrf.mxu0  ;;  %v1413_v10 = vpop.f32.mrf.mxu1 }
 0x261   :  { %v3278_v13 = vmax.f32 %v2084_v2, %v3082_v7  ;;  %2654 = vmatmul.f32.gmra.mxu2 %v5082_v5  ;;  %v416_v14 = vadd.f32 %v6538_v8, %v415_v9  ;;  %v1414_v15 = vadd.f32 %v6538_v8, %v1413_v10  ;;  %3848 = vmatmul.f32.gmra.mxu3 %v5278_v6  ;;  %v89_v5 = vld [vmem:[%s9445_s0 + $0x258] sm:$0xff] }
 0x262   :  { %v4889_v6 = vld [vmem:[%s9445_s0 + $0x878] sm:$0xff] }
 0x263   :  { %v4472_v17 = vmax.f32 %v3278_v13, %v4276_v42  ;;  %v891_v18 = vmax.f32 %v416_v14, 0.0  ;;  %v1889_v19 = vmax.f32 %v1414_v15, 0.0  ;;  %462 = vmatmul.f32.gmra.mxu0 %v86_v11  ;;  %1460 = vmatmul.f32.gmra.mxu1 %v4886_v12 }
 0x264   :  { %v2607_v20 = vpop.f32.mrf.mxu2  ;;  %v3801_v21 = vpop.f32.mrf.mxu3 }
 0x265   :  { %4669 = vst.msk [vmem:[%s9447_s3 + $0x1b8] sm:$0xff] %vm4613_vm0, %v4472_v17  ;;  %v2085_v22 = vmax.f32 %v891_v18, %v1889_v19  ;;  %v2608_v23 = vadd.f32 %v6538_v8, %v2607_v20  ;;  %v3802_v24 = vadd.f32 %v6538_v8, %v3801_v21  ;;  %v5086_v19 = vld [vmem:[%s9445_s0 + $0xea0] sm:$0xff] }
 0x266   :  { %v5282_v20 = vld [vmem:[%s9445_s0 + $0x14c0] sm:$0xff] }
 0x267   :  { %v3083_v27 = vmax.f32 %v2608_v23, 0.0  ;;  %v4277_v28 = vmax.f32 %v3802_v24, 0.0 }
 0x268   :  { %v418_v29 = vpop.f32.mrf.mxu0  ;;  %v1416_v30 = vpop.f32.mrf.mxu1 }
 0x269   :  { %v3279_v33 = vmax.f32 %v2085_v22, %v3083_v27  ;;  %2657 = vmatmul.f32.gmra.mxu2 %v5083_v25  ;;  %v419_v34 = vadd.f32 %v6538_v8, %v418_v29  ;;  %v1417_v35 = vadd.f32 %v6538_v8, %v1416_v30  ;;  %3851 = vmatmul.f32.gmra.mxu3 %v5279_v26  ;;  %v90_v25 = vld [vmem:[%s9445_s0 + $0x260] sm:$0xff] }
 0x26a   :  { %v4890_v26 = vld [vmem:[%s9445_s0 + $0x880] sm:$0xff] }
 0x26b   :  { %v4473_v36 = vmax.f32 %v3279_v33, %v4277_v28  ;;  %v892_v37 = vmax.f32 %v419_v34, 0.0  ;;  %v1890_v38 = vmax.f32 %v1417_v35, 0.0  ;;  %465 = vmatmul.f32.gmra.mxu0 %v87_v31  ;;  %1463 = vmatmul.f32.gmra.mxu1 %v4887_v32 }
 0x26c   :  { %v2610_v39 = vpop.f32.mrf.mxu2  ;;  %v3804_v40 = vpop.f32.mrf.mxu3 }
 0x26d   :  { %4670 = vst.msk [vmem:[%s9447_s3 + $0x1c0] sm:$0xff] %vm4613_vm0, %v4473_v36  ;;  %v2086_v16 = vmax.f32 %v892_v37, %v1890_v38  ;;  %v2611_v41 = vadd.f32 %v6538_v8, %v2610_v39  ;;  %v3805_v43 = vadd.f32 %v6538_v8, %v3804_v40  ;;  %v5087_v38 = vld [vmem:[%s9445_s0 + $0xea8] sm:$0xff] }
 0x26e   :  { %v5283_v39 = vld [vmem:[%s9445_s0 + $0x14c8] sm:$0xff] }
 0x26f   :  { %v3084_v46 = vmax.f32 %v2611_v41, 0.0  ;;  %v4278_v47 = vmax.f32 %v3805_v43, 0.0 }
 0x270   :  { %v421_v48 = vpop.f32.mrf.mxu0  ;;  %v1419_v49 = vpop.f32.mrf.mxu1 }
 0x271   :  { %v3280_v52 = vmax.f32 %v2086_v16, %v3084_v46  ;;  %2660 = vmatmul.f32.gmra.mxu2 %v5084_v44  ;;  %v422_v53 = vadd.f32 %v6538_v8, %v421_v48  ;;  %v1420_v54 = vadd.f32 %v6538_v8, %v1419_v49  ;;  %3854 = vmatmul.f32.gmra.mxu3 %v5280_v45  ;;  %v91_v44 = vld [vmem:[%s9445_s0 + $0x268] sm:$0xff] }
 0x272   :  { %v4891_v45 = vld [vmem:[%s9445_s0 + $0x888] sm:$0xff] }
 0x273   :  { %v4474_v55 = vmax.f32 %v3280_v52, %v4278_v47  ;;  %v893_v56 = vmax.f32 %v422_v53, 0.0  ;;  %v1891_v57 = vmax.f32 %v1420_v54, 0.0  ;;  %468 = vmatmul.f32.gmra.mxu0 %v88_v50  ;;  %1466 = vmatmul.f32.gmra.mxu1 %v4888_v51 }
 0x274   :  { %v2613_v58 = vpop.f32.mrf.mxu2  ;;  %v3807_v59 = vpop.f32.mrf.mxu3 }
 0x275   :  { %4671 = vst.msk [vmem:[%s9447_s3 + $0x1c8] sm:$0xff] %vm4613_vm0, %v4474_v55  ;;  %v2087_v60 = vmax.f32 %v893_v56, %v1891_v57  ;;  %v2614_v61 = vadd.f32 %v6538_v8, %v2613_v58  ;;  %v3808_v62 = vadd.f32 %v6538_v8, %v3807_v59  ;;  %v5088_v57 = vld [vmem:[%s9445_s0 + $0xeb0] sm:$0xff] }
 0x276   :  { %v5284_v58 = vld [vmem:[%s9445_s0 + $0x14d0] sm:$0xff] }
 0x277   :  { %v3085_v1 = vmax.f32 %v2614_v61, 0.0  ;;  %v4279_v2 = vmax.f32 %v3808_v62, 0.0 }
 0x278   :  { %v424_v3 = vpop.f32.mrf.mxu0  ;;  %v1422_v4 = vpop.f32.mrf.mxu1 }
 0x279   :  { %v3281_v7 = vmax.f32 %v2087_v60, %v3085_v1  ;;  %2663 = vmatmul.f32.gmra.mxu2 %v5085_v63  ;;  %v425_v42 = vadd.f32 %v6538_v8, %v424_v3  ;;  %v1423_v9 = vadd.f32 %v6538_v8, %v1422_v4  ;;  %3857 = vmatmul.f32.gmra.mxu3 %v5281_v0  ;;  %v92_v63 = vld [vmem:[%s9445_s0 + $0x270] sm:$0xff] }
 0x27a   :  { %v4892_v0 = vld [vmem:[%s9445_s0 + $0x890] sm:$0xff] }
 0x27b   :  { %v4475_v10 = vmax.f32 %v3281_v7, %v4279_v2  ;;  %v894_v11 = vmax.f32 %v425_v42, 0.0  ;;  %v1892_v12 = vmax.f32 %v1423_v9, 0.0  ;;  %471 = vmatmul.f32.gmra.mxu0 %v89_v5  ;;  %1469 = vmatmul.f32.gmra.mxu1 %v4889_v6 }
 0x27c   :  { %v2616_v13 = vpop.f32.mrf.mxu2  ;;  %v3810_v14 = vpop.f32.mrf.mxu3 }
 0x27d   :  { %4672 = vst.msk [vmem:[%s9447_s3 + $0x1d0] sm:$0xff] %vm4613_vm0, %v4475_v10  ;;  %v2088_v15 = vmax.f32 %v894_v11, %v1892_v12  ;;  %v2617_v17 = vadd.f32 %v6538_v8, %v2616_v13  ;;  %v3811_v18 = vadd.f32 %v6538_v8, %v3810_v14  ;;  %v5089_v12 = vld [vmem:[%s9445_s0 + $0xeb8] sm:$0xff] }
 0x27e   :  { %v5285_v13 = vld [vmem:[%s9445_s0 + $0x14d8] sm:$0xff] }
 0x27f   :  { %v3086_v21 = vmax.f32 %v2617_v17, 0.0  ;;  %v4280_v22 = vmax.f32 %v3811_v18, 0.0 }
 0x280   :  { %v427_v23 = vpop.f32.mrf.mxu0  ;;  %v1425_v24 = vpop.f32.mrf.mxu1 }
 0x281   :  { %v3282_v27 = vmax.f32 %v2088_v15, %v3086_v21  ;;  %2666 = vmatmul.f32.gmra.mxu2 %v5086_v19  ;;  %v428_v28 = vadd.f32 %v6538_v8, %v427_v23  ;;  %v1426_v29 = vadd.f32 %v6538_v8, %v1425_v24  ;;  %3860 = vmatmul.f32.gmra.mxu3 %v5282_v20  ;;  %v93_v19 = vld [vmem:[%s9445_s0 + $0x278] sm:$0xff] }
 0x282   :  { %v4893_v20 = vld [vmem:[%s9445_s0 + $0x898] sm:$0xff] }
 0x283   :  { %v4476_v30 = vmax.f32 %v3282_v27, %v4280_v22  ;;  %v895_v31 = vmax.f32 %v428_v28, 0.0  ;;  %v1893_v32 = vmax.f32 %v1426_v29, 0.0  ;;  %474 = vmatmul.f32.gmra.mxu0 %v90_v25  ;;  %1472 = vmatmul.f32.gmra.mxu1 %v4890_v26 }
 0x284   :  { %v2619_v33 = vpop.f32.mrf.mxu2  ;;  %v3813_v34 = vpop.f32.mrf.mxu3 }
 0x285   :  { %4673 = vst.msk [vmem:[%s9447_s3 + $0x1d8] sm:$0xff] %vm4613_vm0, %v4476_v30  ;;  %v2089_v35 = vmax.f32 %v895_v31, %v1893_v32  ;;  %v2620_v36 = vadd.f32 %v6538_v8, %v2619_v33  ;;  %v3814_v37 = vadd.f32 %v6538_v8, %v3813_v34  ;;  %v5090_v32 = vld [vmem:[%s9445_s0 + $0xec0] sm:$0xff] }
 0x286   :  { %v5286_v33 = vld [vmem:[%s9445_s0 + $0x14e0] sm:$0xff] }
 0x287   :  { %v3087_v40 = vmax.f32 %v2620_v36, 0.0  ;;  %v4281_v16 = vmax.f32 %v3814_v37, 0.0 }
 0x288   :  { %v430_v41 = vpop.f32.mrf.mxu0  ;;  %v1428_v43 = vpop.f32.mrf.mxu1 }
 0x289   :  { %v3283_v46 = vmax.f32 %v2089_v35, %v3087_v40  ;;  %2669 = vmatmul.f32.gmra.mxu2 %v5087_v38  ;;  %v431_v47 = vadd.f32 %v6538_v8, %v430_v41  ;;  %v1429_v48 = vadd.f32 %v6538_v8, %v1428_v43  ;;  %3863 = vmatmul.f32.gmra.mxu3 %v5283_v39  ;;  %v94_v38 = vld [vmem:[%s9445_s0 + $0x280] sm:$0xff] }
 0x28a   :  { %v6977_v40 = vld [vmem:[%s9446_s2] ss:$0 sm:$0xff] }
 0x28b   :  { %v4477_v49 = vmax.f32 %v3283_v46, %v4281_v16  ;;  %v896_v50 = vmax.f32 %v431_v47, 0.0  ;;  %v1894_v51 = vmax.f32 %v1429_v48, 0.0  ;;  %477 = vmatmul.f32.gmra.mxu0 %v91_v44  ;;  %1475 = vmatmul.f32.gmra.mxu1 %v4891_v45 }
 0x28c   :  { %v2622_v52 = vpop.f32.mrf.mxu2  ;;  %v3816_v53 = vpop.f32.mrf.mxu3 }
 0x28d   :  { %4674 = vst.msk [vmem:[%s9447_s3 + $0x1e0] sm:$0xff] %vm4613_vm0, %v4477_v49  ;;  %v2090_v54 = vmax.f32 %v896_v50, %v1894_v51  ;;  %v2623_v55 = vadd.f32 %v6538_v8, %v2622_v52  ;;  %v3817_v56 = vadd.f32 %v6538_v8, %v3816_v53  ;;  %v5091_v51 = vld [vmem:[%s9445_s0 + $0xec8] sm:$0xff] }
 0x28e   :  { %v5287_v52 = vld [vmem:[%s9445_s0 + $0x14e8] sm:$0xff] }
 0x28f   :  { %v3088_v59 = vmax.f32 %v2623_v55, 0.0  ;;  %v4282_v60 = vmax.f32 %v3817_v56, 0.0 }
 0x290   :  { %v433_v61 = vpop.f32.mrf.mxu0  ;;  %v1431_v62 = vpop.f32.mrf.mxu1 }
 0x291   :  { %v3284_v1 = vmax.f32 %v2090_v54, %v3088_v59  ;;  %2672 = vmatmul.f32.gmra.mxu2 %v5088_v57  ;;  %v434_v2 = vadd.f32 %v6538_v8, %v433_v61  ;;  %v1432_v3 = vadd.f32 %v6538_v8, %v1431_v62  ;;  %3866 = vmatmul.f32.gmra.mxu3 %v5284_v58  ;;  %v95_v57 = vld [vmem:[%s9445_s0 + $0x288] sm:$0xff] }
 0x292   :  { %v4895_v58 = vld [vmem:[%s9445_s0 + $0x8a8] sm:$0xff] }
 0x293   :  { %v4478_v4 = vmax.f32 %v3284_v1, %v4282_v60  ;;  %v897_v5 = vmax.f32 %v434_v2, 0.0  ;;  %v1895_v6 = vmax.f32 %v1432_v3, 0.0  ;;  %480 = vmatmul.f32.gmra.mxu0 %v92_v63  ;;  %1478 = vmatmul.f32.gmra.mxu1 %v4892_v0 }
 0x294   :  { %v2625_v7 = vpop.f32.mrf.mxu2  ;;  %v3819_v42 = vpop.f32.mrf.mxu3 }
 0x295   :  { %4675 = vst.msk [vmem:[%s9447_s3 + $0x1e8] sm:$0xff] %vm4613_vm0, %v4478_v4  ;;  %v2091_v9 = vmax.f32 %v897_v5, %v1895_v6  ;;  %v2626_v10 = vadd.f32 %v6538_v8, %v2625_v7  ;;  %v3820_v11 = vadd.f32 %v6538_v8, %v3819_v42  ;;  %v5092_v6 = vld [vmem:[%s9445_s0 + $0xed0] sm:$0xff] }
 0x296   :  { %v5288_v7 = vld [vmem:[%s9445_s0 + $0x14f0] sm:$0xff] }
 0x297   :  { %v3089_v14 = vmax.f32 %v2626_v10, 0.0  ;;  %v4283_v15 = vmax.f32 %v3820_v11, 0.0 }
 0x298   :  { %v436_v17 = vpop.f32.mrf.mxu0  ;;  %v1434_v18 = vpop.f32.mrf.mxu1 }
 0x299   :  { %v3285_v21 = vmax.f32 %v2091_v9, %v3089_v14  ;;  %2675 = vmatmul.f32.gmra.mxu2 %v5089_v12  ;;  %v437_v22 = vadd.f32 %v6538_v8, %v436_v17  ;;  %v1435_v23 = vadd.f32 %v6538_v8, %v1434_v18  ;;  %3869 = vmatmul.f32.gmra.mxu3 %v5285_v13  ;;  %v96_v12 = vld [vmem:[%s9445_s0 + $0x290] sm:$0xff] }
 0x29a   :  { %v4896_v13 = vld [vmem:[%s9445_s0 + $0x8b0] sm:$0xff] }
 0x29b   :  { %v4479_v24 = vmax.f32 %v3285_v21, %v4283_v15  ;;  %v898_v25 = vmax.f32 %v437_v22, 0.0  ;;  %v1896_v26 = vmax.f32 %v1435_v23, 0.0  ;;  %483 = vmatmul.f32.gmra.mxu0 %v93_v19  ;;  %1481 = vmatmul.f32.gmra.mxu1 %v4893_v20 }
 0x29c   :  { %v2628_v27 = vpop.f32.mrf.mxu2  ;;  %v3822_v28 = vpop.f32.mrf.mxu3 }
 0x29d   :  { %4676 = vst.msk [vmem:[%s9447_s3 + $0x1f0] sm:$0xff] %vm4613_vm0, %v4479_v24  ;;  %v2092_v29 = vmax.f32 %v898_v25, %v1896_v26  ;;  %v2629_v30 = vadd.f32 %v6538_v8, %v2628_v27  ;;  %v3823_v31 = vadd.f32 %v6538_v8, %v3822_v28  ;;  %v4894_v8 = vld [vmem:[%s9445_s0 + $0x8a0] sm:$0xff]  ;;  %v5093_v26 = vld [vmem:[%s9445_s0 + $0xed8] sm:$0xff] }
 0x29e   :  { %v5289_v27 = vld [vmem:[%s9445_s0 + $0x14f8] sm:$0xff] }
 0x29f   :  { %v3090_v34 = vmax.f32 %v2629_v30, 0.0  ;;  %v4284_v35 = vmax.f32 %v3823_v31, 0.0 }
 0x2a0   :  { %v439_v36 = vpop.f32.mrf.mxu0  ;;  %v1437_v37 = vpop.f32.mrf.mxu1 }
 0x2a1   :  { %v3286_v39 = vmax.f32 %v2092_v29, %v3090_v34  ;;  %2678 = vmatmul.f32.gmra.mxu2 %v5090_v32  ;;  %v440_v16 = vadd.f32 %v6977_v40, %v439_v36  ;;  %v1438_v41 = vadd.f32 %v6977_v40, %v1437_v37  ;;  %3872 = vmatmul.f32.gmra.mxu3 %v5286_v33  ;;  %v97_v32 = vld [vmem:[%s9445_s0 + $0x298] sm:$0xff] }
 0x2a2   :  { %v4897_v33 = vld [vmem:[%s9445_s0 + $0x8b8] sm:$0xff] }
 0x2a3   :  { %v4480_v43 = vmax.f32 %v3286_v39, %v4284_v35  ;;  %v899_v44 = vmax.f32 %v440_v16, 0.0  ;;  %v1897_v45 = vmax.f32 %v1438_v41, 0.0  ;;  %486 = vmatmul.f32.gmra.mxu0 %v94_v38  ;;  %1484 = vmatmul.f32.gmra.mxu1 %v4894_v8 }
 0x2a4   :  { %v2631_v46 = vpop.f32.mrf.mxu2  ;;  %v3825_v47 = vpop.f32.mrf.mxu3 }
 0x2a5   :  { %4677 = vst.msk [vmem:[%s9447_s3 + $0x1f8] sm:$0xff] %vm4613_vm0, %v4480_v43  ;;  %v2093_v48 = vmax.f32 %v899_v44, %v1897_v45  ;;  %v2632_v49 = vadd.f32 %v6977_v40, %v2631_v46  ;;  %v3826_v50 = vadd.f32 %v6977_v40, %v3825_v47  ;;  %v5094_v45 = vld [vmem:[%s9445_s0 + $0xee0] sm:$0xff] }
 0x2a6   :  { %v5290_v46 = vld [vmem:[%s9445_s0 + $0x1500] sm:$0xff] }
 0x2a7   :  { %v3091_v53 = vmax.f32 %v2632_v49, 0.0  ;;  %v4285_v54 = vmax.f32 %v3826_v50, 0.0 }
 0x2a8   :  { %v442_v55 = vpop.f32.mrf.mxu0  ;;  %v1440_v56 = vpop.f32.mrf.mxu1 }
 0x2a9   :  { %v3287_v59 = vmax.f32 %v2093_v48, %v3091_v53  ;;  %2681 = vmatmul.f32.gmra.mxu2 %v5091_v51  ;;  %v443_v60 = vadd.f32 %v6977_v40, %v442_v55  ;;  %v1441_v61 = vadd.f32 %v6977_v40, %v1440_v56  ;;  %3875 = vmatmul.f32.gmra.mxu3 %v5287_v52  ;;  %v98_v51 = vld [vmem:[%s9445_s0 + $0x2a0] sm:$0xff] }
 0x2aa   :  { %v4898_v52 = vld [vmem:[%s9445_s0 + $0x8c0] sm:$0xff] }
 0x2ab   :  { %v4481_v62 = vmax.f32 %v3287_v59, %v4285_v54  ;;  %v900_v63 = vmax.f32 %v443_v60, 0.0  ;;  %v1898_v0 = vmax.f32 %v1441_v61, 0.0  ;;  %489 = vmatmul.f32.gmra.mxu0 %v95_v57  ;;  %1487 = vmatmul.f32.gmra.mxu1 %v4895_v58 }
 0x2ac   :  { %v2634_v1 = vpop.f32.mrf.mxu2  ;;  %v3828_v2 = vpop.f32.mrf.mxu3 }
 0x2ad   :  { %4678 = vst.msk [vmem:[%s9447_s3 + $0x200] sm:$0xff] %vm4613_vm0, %v4481_v62  ;;  %v2094_v3 = vmax.f32 %v900_v63, %v1898_v0  ;;  %v2635_v4 = vadd.f32 %v6977_v40, %v2634_v1  ;;  %v3829_v5 = vadd.f32 %v6977_v40, %v3828_v2  ;;  %v5095_v0 = vld [vmem:[%s9445_s0 + $0xee8] sm:$0xff] }
 0x2ae   :  { %v5291_v1 = vld [vmem:[%s9445_s0 + $0x1508] sm:$0xff] }
 0x2af   :  { %v3092_v42 = vmax.f32 %v2635_v4, 0.0  ;;  %v4286_v9 = vmax.f32 %v3829_v5, 0.0 }
 0x2b0   :  { %v445_v10 = vpop.f32.mrf.mxu0  ;;  %v1443_v11 = vpop.f32.mrf.mxu1 }
 0x2b1   :  { %v3288_v14 = vmax.f32 %v2094_v3, %v3092_v42  ;;  %2684 = vmatmul.f32.gmra.mxu2 %v5092_v6  ;;  %v446_v15 = vadd.f32 %v6977_v40, %v445_v10  ;;  %v1444_v17 = vadd.f32 %v6977_v40, %v1443_v11  ;;  %3878 = vmatmul.f32.gmra.mxu3 %v5288_v7  ;;  %v99_v6 = vld [vmem:[%s9445_s0 + $0x2a8] sm:$0xff] }
 0x2b2   :  { %v4899_v7 = vld [vmem:[%s9445_s0 + $0x8c8] sm:$0xff] }
 0x2b3   :  { %v4482_v18 = vmax.f32 %v3288_v14, %v4286_v9  ;;  %v901_v19 = vmax.f32 %v446_v15, 0.0  ;;  %v1899_v20 = vmax.f32 %v1444_v17, 0.0  ;;  %492 = vmatmul.f32.gmra.mxu0 %v96_v12  ;;  %1490 = vmatmul.f32.gmra.mxu1 %v4896_v13 }
 0x2b4   :  { %v2637_v21 = vpop.f32.mrf.mxu2  ;;  %v3831_v22 = vpop.f32.mrf.mxu3 }
 0x2b5   :  { %4679 = vst.msk [vmem:[%s9447_s3 + $0x208] sm:$0xff] %vm4613_vm0, %v4482_v18  ;;  %v2095_v23 = vmax.f32 %v901_v19, %v1899_v20  ;;  %v2638_v24 = vadd.f32 %v6977_v40, %v2637_v21  ;;  %v3832_v25 = vadd.f32 %v6977_v40, %v3831_v22  ;;  %v5096_v20 = vld [vmem:[%s9445_s0 + $0xef0] sm:$0xff] }
 0x2b6   :  { %v5292_v21 = vld [vmem:[%s9445_s0 + $0x1510] sm:$0xff] }
 0x2b7   :  { %v3093_v28 = vmax.f32 %v2638_v24, 0.0  ;;  %v4287_v29 = vmax.f32 %v3832_v25, 0.0 }
 0x2b8   :  { %v448_v30 = vpop.f32.mrf.mxu0  ;;  %v1446_v31 = vpop.f32.mrf.mxu1 }
 0x2b9   :  { %v3289_v34 = vmax.f32 %v2095_v23, %v3093_v28  ;;  %2687 = vmatmul.f32.gmra.mxu2 %v5093_v26  ;;  %v449_v35 = vadd.f32 %v6977_v40, %v448_v30  ;;  %v1447_v36 = vadd.f32 %v6977_v40, %v1446_v31  ;;  %3881 = vmatmul.f32.gmra.mxu3 %v5289_v27  ;;  %v100_v26 = vld [vmem:[%s9445_s0 + $0x2b0] sm:$0xff] }
 0x2ba   :  { %v4900_v27 = vld [vmem:[%s9445_s0 + $0x8d0] sm:$0xff] }
 0x2bb   :  { %v4483_v37 = vmax.f32 %v3289_v34, %v4287_v29  ;;  %v902_v38 = vmax.f32 %v449_v35, 0.0  ;;  %v1900_v8 = vmax.f32 %v1447_v36, 0.0  ;;  %495 = vmatmul.f32.gmra.mxu0 %v97_v32  ;;  %1493 = vmatmul.f32.gmra.mxu1 %v4897_v33 }
 0x2bc   :  { %v2640_v39 = vpop.f32.mrf.mxu2  ;;  %v3834_v16 = vpop.f32.mrf.mxu3 }
 0x2bd   :  { %4680 = vst.msk [vmem:[%s9447_s3 + $0x210] sm:$0xff] %vm4613_vm0, %v4483_v37  ;;  %v2096_v41 = vmax.f32 %v902_v38, %v1900_v8  ;;  %v2641_v43 = vadd.f32 %v6977_v40, %v2640_v39  ;;  %v3835_v44 = vadd.f32 %v6977_v40, %v3834_v16  ;;  %v5097_v8 = vld [vmem:[%s9445_s0 + $0xef8] sm:$0xff] }
 0x2be   :  { %v5293_v39 = vld [vmem:[%s9445_s0 + $0x1518] sm:$0xff] }
 0x2bf   :  { %v3094_v47 = vmax.f32 %v2641_v43, 0.0  ;;  %v4288_v48 = vmax.f32 %v3835_v44, 0.0 }
 0x2c0   :  { %v451_v49 = vpop.f32.mrf.mxu0  ;;  %v1449_v50 = vpop.f32.mrf.mxu1 }
 0x2c1   :  { %v3290_v53 = vmax.f32 %v2096_v41, %v3094_v47  ;;  %2690 = vmatmul.f32.gmra.mxu2 %v5094_v45  ;;  %v452_v54 = vadd.f32 %v6977_v40, %v451_v49  ;;  %v1450_v55 = vadd.f32 %v6977_v40, %v1449_v50  ;;  %3884 = vmatmul.f32.gmra.mxu3 %v5290_v46  ;;  %v101_v45 = vld [vmem:[%s9445_s0 + $0x2b8] sm:$0xff] }
 0x2c2   :  { %v4901_v46 = vld [vmem:[%s9445_s0 + $0x8d8] sm:$0xff] }
 0x2c3   :  { %v4484_v56 = vmax.f32 %v3290_v53, %v4288_v48  ;;  %v903_v57 = vmax.f32 %v452_v54, 0.0  ;;  %v1901_v58 = vmax.f32 %v1450_v55, 0.0  ;;  %498 = vmatmul.f32.gmra.mxu0 %v98_v51  ;;  %1496 = vmatmul.f32.gmra.mxu1 %v4898_v52 }
 0x2c4   :  { %v2643_v59 = vpop.f32.mrf.mxu2  ;;  %v3837_v60 = vpop.f32.mrf.mxu3 }
 0x2c5   :  { %4681 = vst.msk [vmem:[%s9447_s3 + $0x218] sm:$0xff] %vm4613_vm0, %v4484_v56  ;;  %v2097_v61 = vmax.f32 %v903_v57, %v1901_v58  ;;  %v2644_v62 = vadd.f32 %v6977_v40, %v2643_v59  ;;  %v3838_v63 = vadd.f32 %v6977_v40, %v3837_v60  ;;  %v5098_v58 = vld [vmem:[%s9445_s0 + $0xf00] sm:$0xff] }
 0x2c6   :  { %v5294_v59 = vld [vmem:[%s9445_s0 + $0x1520] sm:$0xff] }
 0x2c7   :  { %v3095_v2 = vmax.f32 %v2644_v62, 0.0  ;;  %v4289_v3 = vmax.f32 %v3838_v63, 0.0 }
 0x2c8   :  { %v454_v4 = vpop.f32.mrf.mxu0  ;;  %v1452_v5 = vpop.f32.mrf.mxu1 }
 0x2c9   :  { %v3291_v42 = vmax.f32 %v2097_v61, %v3095_v2  ;;  %2693 = vmatmul.f32.gmra.mxu2 %v5095_v0  ;;  %v455_v9 = vadd.f32 %v6977_v40, %v454_v4  ;;  %v1453_v10 = vadd.f32 %v6977_v40, %v1452_v5  ;;  %3887 = vmatmul.f32.gmra.mxu3 %v5291_v1  ;;  %v102_v0 = vld [vmem:[%s9445_s0 + $0x2c0] sm:$0xff] }
 0x2ca   :  { %v4902_v1 = vld [vmem:[%s9445_s0 + $0x8e0] sm:$0xff] }
 0x2cb   :  { %v4485_v11 = vmax.f32 %v3291_v42, %v4289_v3  ;;  %v904_v12 = vmax.f32 %v455_v9, 0.0  ;;  %v1902_v13 = vmax.f32 %v1453_v10, 0.0  ;;  %501 = vmatmul.f32.gmra.mxu0 %v99_v6  ;;  %1499 = vmatmul.f32.gmra.mxu1 %v4899_v7 }
 0x2cc   :  { %v2646_v14 = vpop.f32.mrf.mxu2  ;;  %v3840_v15 = vpop.f32.mrf.mxu3 }
 0x2cd   :  { %4682 = vst.msk [vmem:[%s9447_s3 + $0x220] sm:$0xff] %vm4613_vm0, %v4485_v11  ;;  %v2098_v17 = vmax.f32 %v904_v12, %v1902_v13  ;;  %v2647_v18 = vadd.f32 %v6977_v40, %v2646_v14  ;;  %v3841_v19 = vadd.f32 %v6977_v40, %v3840_v15  ;;  %v5099_v13 = vld [vmem:[%s9445_s0 + $0xf08] sm:$0xff] }
 0x2ce   :  { %v5295_v14 = vld [vmem:[%s9445_s0 + $0x1528] sm:$0xff] }
 0x2cf   :  { %v3096_v22 = vmax.f32 %v2647_v18, 0.0  ;;  %v4290_v23 = vmax.f32 %v3841_v19, 0.0 }
 0x2d0   :  { %v457_v24 = vpop.f32.mrf.mxu0  ;;  %v1455_v25 = vpop.f32.mrf.mxu1 }
 0x2d1   :  { %v3292_v28 = vmax.f32 %v2098_v17, %v3096_v22  ;;  %2696 = vmatmul.f32.gmra.mxu2 %v5096_v20  ;;  %v458_v29 = vadd.f32 %v6977_v40, %v457_v24  ;;  %v1456_v30 = vadd.f32 %v6977_v40, %v1455_v25  ;;  %3890 = vmatmul.f32.gmra.mxu3 %v5292_v21  ;;  %v103_v20 = vld [vmem:[%s9445_s0 + $0x2c8] sm:$0xff] }
 0x2d2   :  { %v4903_v21 = vld [vmem:[%s9445_s0 + $0x8e8] sm:$0xff] }
 0x2d3   :  { %v4486_v31 = vmax.f32 %v3292_v28, %v4290_v23  ;;  %v905_v32 = vmax.f32 %v458_v29, 0.0  ;;  %v1903_v33 = vmax.f32 %v1456_v30, 0.0  ;;  %504 = vmatmul.f32.gmra.mxu0 %v100_v26  ;;  %1502 = vmatmul.f32.gmra.mxu1 %v4900_v27 }
 0x2d4   :  { %v2649_v34 = vpop.f32.mrf.mxu2  ;;  %v3843_v35 = vpop.f32.mrf.mxu3 }
 0x2d5   :  { %4683 = vst.msk [vmem:[%s9447_s3 + $0x228] sm:$0xff] %vm4613_vm0, %v4486_v31  ;;  %v2099_v36 = vmax.f32 %v905_v32, %v1903_v33  ;;  %v2650_v37 = vadd.f32 %v6977_v40, %v2649_v34  ;;  %v3844_v38 = vadd.f32 %v6977_v40, %v3843_v35  ;;  %v5100_v33 = vld [vmem:[%s9445_s0 + $0xf10] sm:$0xff] }
 0x2d6   :  { %v5296_v34 = vld [vmem:[%s9445_s0 + $0x1530] sm:$0xff] }
 0x2d7   :  { %v3097_v16 = vmax.f32 %v2650_v37, 0.0  ;;  %v4291_v41 = vmax.f32 %v3844_v38, 0.0 }
 0x2d8   :  { %v460_v43 = vpop.f32.mrf.mxu0  ;;  %v1458_v44 = vpop.f32.mrf.mxu1 }
 0x2d9   :  { %v3293_v47 = vmax.f32 %v2099_v36, %v3097_v16  ;;  %2699 = vmatmul.f32.gmra.mxu2 %v5097_v8  ;;  %v461_v48 = vadd.f32 %v6977_v40, %v460_v43  ;;  %v1459_v49 = vadd.f32 %v6977_v40, %v1458_v44  ;;  %3893 = vmatmul.f32.gmra.mxu3 %v5293_v39  ;;  %v104_v8 = vld [vmem:[%s9445_s0 + $0x2d0] sm:$0xff] }
 0x2da   :  { %v4904_v39 = vld [vmem:[%s9445_s0 + $0x8f0] sm:$0xff] }
 0x2db   :  { %v4487_v50 = vmax.f32 %v3293_v47, %v4291_v41  ;;  %v906_v51 = vmax.f32 %v461_v48, 0.0  ;;  %v1904_v52 = vmax.f32 %v1459_v49, 0.0  ;;  %507 = vmatmul.f32.gmra.mxu0 %v101_v45  ;;  %1505 = vmatmul.f32.gmra.mxu1 %v4901_v46 }
 0x2dc   :  { %v2652_v53 = vpop.f32.mrf.mxu2  ;;  %v3846_v54 = vpop.f32.mrf.mxu3 }
 0x2dd   :  { %4684 = vst.msk [vmem:[%s9447_s3 + $0x230] sm:$0xff] %vm4613_vm0, %v4487_v50  ;;  %v2100_v55 = vmax.f32 %v906_v51, %v1904_v52  ;;  %v2653_v56 = vadd.f32 %v6977_v40, %v2652_v53  ;;  %v3847_v57 = vadd.f32 %v6977_v40, %v3846_v54  ;;  %v5101_v52 = vld [vmem:[%s9445_s0 + $0xf18] sm:$0xff] }
 0x2de   :  { %v5297_v53 = vld [vmem:[%s9445_s0 + $0x1538] sm:$0xff] }
 0x2df   :  { %v3098_v60 = vmax.f32 %v2653_v56, 0.0  ;;  %v4292_v61 = vmax.f32 %v3847_v57, 0.0 }
 0x2e0   :  { %v463_v62 = vpop.f32.mrf.mxu0  ;;  %v1461_v63 = vpop.f32.mrf.mxu1 }
 0x2e1   :  { %v3294_v2 = vmax.f32 %v2100_v55, %v3098_v60  ;;  %2702 = vmatmul.f32.gmra.mxu2 %v5098_v58  ;;  %v464_v3 = vadd.f32 %v6977_v40, %v463_v62  ;;  %v1462_v4 = vadd.f32 %v6977_v40, %v1461_v63  ;;  %3896 = vmatmul.f32.gmra.mxu3 %v5294_v59  ;;  %v105_v58 = vld [vmem:[%s9445_s0 + $0x2d8] sm:$0xff] }
 0x2e2   :  { %v4905_v59 = vld [vmem:[%s9445_s0 + $0x8f8] sm:$0xff] }
 0x2e3   :  { %v4488_v5 = vmax.f32 %v3294_v2, %v4292_v61  ;;  %v907_v6 = vmax.f32 %v464_v3, 0.0  ;;  %v1905_v7 = vmax.f32 %v1462_v4, 0.0  ;;  %510 = vmatmul.f32.gmra.mxu0 %v102_v0  ;;  %1508 = vmatmul.f32.gmra.mxu1 %v4902_v1 }
 0x2e4   :  { %v2655_v42 = vpop.f32.mrf.mxu2  ;;  %v3849_v9 = vpop.f32.mrf.mxu3 }
 0x2e5   :  { %4685 = vst.msk [vmem:[%s9447_s3 + $0x238] sm:$0xff] %vm4613_vm0, %v4488_v5  ;;  %v2101_v10 = vmax.f32 %v907_v6, %v1905_v7  ;;  %v2656_v11 = vadd.f32 %v6977_v40, %v2655_v42  ;;  %v3850_v12 = vadd.f32 %v6977_v40, %v3849_v9  ;;  %v5102_v7 = vld [vmem:[%s9445_s0 + $0xf20] sm:$0xff] }
 0x2e6   :  { %v5298_v42 = vld [vmem:[%s9445_s0 + $0x1540] sm:$0xff] }
 0x2e7   :  { %v3099_v15 = vmax.f32 %v2656_v11, 0.0  ;;  %v4293_v17 = vmax.f32 %v3850_v12, 0.0 }
 0x2e8   :  { %v466_v18 = vpop.f32.mrf.mxu0  ;;  %v1464_v19 = vpop.f32.mrf.mxu1 }
 0x2e9   :  { %v3295_v22 = vmax.f32 %v2101_v10, %v3099_v15  ;;  %2705 = vmatmul.f32.gmra.mxu2 %v5099_v13  ;;  %v467_v23 = vadd.f32 %v6977_v40, %v466_v18  ;;  %v1465_v24 = vadd.f32 %v6977_v40, %v1464_v19  ;;  %3899 = vmatmul.f32.gmra.mxu3 %v5295_v14  ;;  %v106_v13 = vld [vmem:[%s9445_s0 + $0x2e0] sm:$0xff] }
 0x2ea   :  { %v4906_v14 = vld [vmem:[%s9445_s0 + $0x900] sm:$0xff] }
 0x2eb   :  { %v4489_v25 = vmax.f32 %v3295_v22, %v4293_v17  ;;  %v908_v26 = vmax.f32 %v467_v23, 0.0  ;;  %v1906_v27 = vmax.f32 %v1465_v24, 0.0  ;;  %513 = vmatmul.f32.gmra.mxu0 %v103_v20  ;;  %1511 = vmatmul.f32.gmra.mxu1 %v4903_v21 }
 0x2ec   :  { %v2658_v28 = vpop.f32.mrf.mxu2  ;;  %v3852_v29 = vpop.f32.mrf.mxu3 }
 0x2ed   :  { %4686 = vst.msk [vmem:[%s9447_s3 + $0x240] sm:$0xff] %vm4613_vm0, %v4489_v25  ;;  %v2102_v30 = vmax.f32 %v908_v26, %v1906_v27  ;;  %v2659_v31 = vadd.f32 %v6977_v40, %v2658_v28  ;;  %v3853_v32 = vadd.f32 %v6977_v40, %v3852_v29  ;;  %v5103_v27 = vld [vmem:[%s9445_s0 + $0xf28] sm:$0xff] }
 0x2ee   :  { %v5299_v28 = vld [vmem:[%s9445_s0 + $0x1548] sm:$0xff] }
 0x2ef   :  { %v3100_v35 = vmax.f32 %v2659_v31, 0.0  ;;  %v4294_v36 = vmax.f32 %v3853_v32, 0.0 }
 0x2f0   :  { %v469_v37 = vpop.f32.mrf.mxu0  ;;  %v1467_v38 = vpop.f32.mrf.mxu1 }
 0x2f1   :  { %v3296_v16 = vmax.f32 %v2102_v30, %v3100_v35  ;;  %2708 = vmatmul.f32.gmra.mxu2 %v5100_v33  ;;  %v470_v41 = vadd.f32 %v6977_v40, %v469_v37  ;;  %v1468_v43 = vadd.f32 %v6977_v40, %v1467_v38  ;;  %3902 = vmatmul.f32.gmra.mxu3 %v5296_v34  ;;  %v107_v33 = vld [vmem:[%s9445_s0 + $0x2e8] sm:$0xff] }
 0x2f2   :  { %v4907_v34 = vld [vmem:[%s9445_s0 + $0x908] sm:$0xff] }
 0x2f3   :  { %v4490_v44 = vmax.f32 %v3296_v16, %v4294_v36  ;;  %v909_v45 = vmax.f32 %v470_v41, 0.0  ;;  %v1907_v46 = vmax.f32 %v1468_v43, 0.0  ;;  %516 = vmatmul.f32.gmra.mxu0 %v104_v8  ;;  %1514 = vmatmul.f32.gmra.mxu1 %v4904_v39 }
 0x2f4   :  { %v2661_v47 = vpop.f32.mrf.mxu2  ;;  %v3855_v48 = vpop.f32.mrf.mxu3 }
 0x2f5   :  { %4687 = vst.msk [vmem:[%s9447_s3 + $0x248] sm:$0xff] %vm4613_vm0, %v4490_v44  ;;  %v2103_v49 = vmax.f32 %v909_v45, %v1907_v46  ;;  %v2662_v50 = vadd.f32 %v6977_v40, %v2661_v47  ;;  %v3856_v51 = vadd.f32 %v6977_v40, %v3855_v48  ;;  %v5104_v46 = vld [vmem:[%s9445_s0 + $0xf30] sm:$0xff] }
 0x2f6   :  { %v5300_v47 = vld [vmem:[%s9445_s0 + $0x1550] sm:$0xff] }
 0x2f7   :  { %v3101_v54 = vmax.f32 %v2662_v50, 0.0  ;;  %v4295_v55 = vmax.f32 %v3856_v51, 0.0 }
 0x2f8   :  { %v472_v56 = vpop.f32.mrf.mxu0  ;;  %v1470_v57 = vpop.f32.mrf.mxu1 }
 0x2f9   :  { %v3297_v60 = vmax.f32 %v2103_v49, %v3101_v54  ;;  %2711 = vmatmul.f32.gmra.mxu2 %v5101_v52  ;;  %v473_v61 = vadd.f32 %v6977_v40, %v472_v56  ;;  %v1471_v62 = vadd.f32 %v6977_v40, %v1470_v57  ;;  %3905 = vmatmul.f32.gmra.mxu3 %v5297_v53  ;;  %v108_v52 = vld [vmem:[%s9445_s0 + $0x2f0] sm:$0xff] }
 0x2fa   :  { %v4908_v53 = vld [vmem:[%s9445_s0 + $0x910] sm:$0xff] }
 0x2fb   :  { %v4491_v63 = vmax.f32 %v3297_v60, %v4295_v55  ;;  %v910_v0 = vmax.f32 %v473_v61, 0.0  ;;  %v1908_v1 = vmax.f32 %v1471_v62, 0.0  ;;  %519 = vmatmul.f32.gmra.mxu0 %v105_v58  ;;  %1517 = vmatmul.f32.gmra.mxu1 %v4905_v59 }
 0x2fc   :  { %v2664_v2 = vpop.f32.mrf.mxu2  ;;  %v3858_v3 = vpop.f32.mrf.mxu3 }
 0x2fd   :  { %4688 = vst.msk [vmem:[%s9447_s3 + $0x250] sm:$0xff] %vm4613_vm0, %v4491_v63  ;;  %v2104_v4 = vmax.f32 %v910_v0, %v1908_v1  ;;  %v2665_v5 = vadd.f32 %v6977_v40, %v2664_v2  ;;  %v3859_v6 = vadd.f32 %v6977_v40, %v3858_v3  ;;  %v5105_v1 = vld [vmem:[%s9445_s0 + $0xf38] sm:$0xff] }
 0x2fe   :  { %v5301_v2 = vld [vmem:[%s9445_s0 + $0x1558] sm:$0xff] }
 0x2ff   :  { %v3102_v9 = vmax.f32 %v2665_v5, 0.0  ;;  %v4296_v10 = vmax.f32 %v3859_v6, 0.0 }
 0x300   :  { %v475_v11 = vpop.f32.mrf.mxu0  ;;  %v1473_v12 = vpop.f32.mrf.mxu1 }
 0x301   :  { %v3298_v15 = vmax.f32 %v2104_v4, %v3102_v9  ;;  %2714 = vmatmul.f32.gmra.mxu2 %v5102_v7  ;;  %v476_v17 = vadd.f32 %v6977_v40, %v475_v11  ;;  %v1474_v18 = vadd.f32 %v6977_v40, %v1473_v12  ;;  %3908 = vmatmul.f32.gmra.mxu3 %v5298_v42  ;;  %v109_v7 = vld [vmem:[%s9445_s0 + $0x2f8] sm:$0xff] }
 0x302   :  { %v4909_v42 = vld [vmem:[%s9445_s0 + $0x918] sm:$0xff] }
 0x303   :  { %v4492_v19 = vmax.f32 %v3298_v15, %v4296_v10  ;;  %v911_v20 = vmax.f32 %v476_v17, 0.0  ;;  %v1909_v21 = vmax.f32 %v1474_v18, 0.0  ;;  %522 = vmatmul.f32.gmra.mxu0 %v106_v13  ;;  %1520 = vmatmul.f32.gmra.mxu1 %v4906_v14 }
 0x304   :  { %v2667_v22 = vpop.f32.mrf.mxu2  ;;  %v3861_v23 = vpop.f32.mrf.mxu3 }
 0x305   :  { %4689 = vst.msk [vmem:[%s9447_s3 + $0x258] sm:$0xff] %vm4613_vm0, %v4492_v19  ;;  %v2105_v24 = vmax.f32 %v911_v20, %v1909_v21  ;;  %v2668_v25 = vadd.f32 %v6977_v40, %v2667_v22  ;;  %v3862_v26 = vadd.f32 %v6977_v40, %v3861_v23  ;;  %v5106_v21 = vld [vmem:[%s9445_s0 + $0xf40] sm:$0xff] }
 0x306   :  { %v5302_v22 = vld [vmem:[%s9445_s0 + $0x1560] sm:$0xff] }
 0x307   :  { %v3103_v29 = vmax.f32 %v2668_v25, 0.0  ;;  %v4297_v30 = vmax.f32 %v3862_v26, 0.0 }
 0x308   :  { %v478_v31 = vpop.f32.mrf.mxu0  ;;  %v1476_v32 = vpop.f32.mrf.mxu1 }
 0x309   :  { %v3299_v35 = vmax.f32 %v2105_v24, %v3103_v29  ;;  %2717 = vmatmul.f32.gmra.mxu2 %v5103_v27  ;;  %v479_v36 = vadd.f32 %v6977_v40, %v478_v31  ;;  %v1477_v37 = vadd.f32 %v6977_v40, %v1476_v32  ;;  %3911 = vmatmul.f32.gmra.mxu3 %v5299_v28  ;;  %v110_v27 = vld [vmem:[%s9445_s0 + $0x300] sm:$0xff] }
 0x30a   :  { %v4910_v28 = vld [vmem:[%s9445_s0 + $0x920] sm:$0xff] }
 0x30b   :  { %v4493_v38 = vmax.f32 %v3299_v35, %v4297_v30  ;;  %v912_v8 = vmax.f32 %v479_v36, 0.0  ;;  %v1910_v39 = vmax.f32 %v1477_v37, 0.0  ;;  %525 = vmatmul.f32.gmra.mxu0 %v107_v33  ;;  %1523 = vmatmul.f32.gmra.mxu1 %v4907_v34 }
 0x30c   :  { %v2670_v16 = vpop.f32.mrf.mxu2  ;;  %v3864_v41 = vpop.f32.mrf.mxu3 }
 0x30d   :  { %4690 = vst.msk [vmem:[%s9447_s3 + $0x260] sm:$0xff] %vm4613_vm0, %v4493_v38  ;;  %v2106_v43 = vmax.f32 %v912_v8, %v1910_v39  ;;  %v2671_v44 = vadd.f32 %v6977_v40, %v2670_v16  ;;  %v3865_v45 = vadd.f32 %v6977_v40, %v3864_v41  ;;  %v5107_v39 = vld [vmem:[%s9445_s0 + $0xf48] sm:$0xff] }
 0x30e   :  { %v5303_v16 = vld [vmem:[%s9445_s0 + $0x1568] sm:$0xff] }
 0x30f   :  { %v3104_v48 = vmax.f32 %v2671_v44, 0.0  ;;  %v4298_v49 = vmax.f32 %v3865_v45, 0.0 }
 0x310   :  { %v481_v50 = vpop.f32.mrf.mxu0  ;;  %v1479_v51 = vpop.f32.mrf.mxu1 }
 0x311   :  { %v3300_v54 = vmax.f32 %v2106_v43, %v3104_v48  ;;  %2720 = vmatmul.f32.gmra.mxu2 %v5104_v46  ;;  %v482_v55 = vadd.f32 %v6977_v40, %v481_v50  ;;  %v1480_v56 = vadd.f32 %v6977_v40, %v1479_v51  ;;  %3914 = vmatmul.f32.gmra.mxu3 %v5300_v47  ;;  %v111_v46 = vld [vmem:[%s9445_s0 + $0x308] sm:$0xff] }
 0x312   :  { %v4911_v47 = vld [vmem:[%s9445_s0 + $0x928] sm:$0xff] }
 0x313   :  { %v4494_v57 = vmax.f32 %v3300_v54, %v4298_v49  ;;  %v913_v58 = vmax.f32 %v482_v55, 0.0  ;;  %v1911_v59 = vmax.f32 %v1480_v56, 0.0  ;;  %528 = vmatmul.f32.gmra.mxu0 %v108_v52  ;;  %1526 = vmatmul.f32.gmra.mxu1 %v4908_v53 }
 0x314   :  { %v2673_v60 = vpop.f32.mrf.mxu2  ;;  %v3867_v61 = vpop.f32.mrf.mxu3 }
 0x315   :  { %4691 = vst.msk [vmem:[%s9447_s3 + $0x268] sm:$0xff] %vm4613_vm0, %v4494_v57  ;;  %v2107_v62 = vmax.f32 %v913_v58, %v1911_v59  ;;  %v2674_v63 = vadd.f32 %v6977_v40, %v2673_v60  ;;  %v3868_v0 = vadd.f32 %v6977_v40, %v3867_v61  ;;  %v5108_v59 = vld [vmem:[%s9445_s0 + $0xf50] sm:$0xff] }
 0x316   :  { %v5304_v60 = vld [vmem:[%s9445_s0 + $0x1570] sm:$0xff] }
 0x317   :  { %v3105_v3 = vmax.f32 %v2674_v63, 0.0  ;;  %v4299_v4 = vmax.f32 %v3868_v0, 0.0 }
 0x318   :  { %v484_v5 = vpop.f32.mrf.mxu0  ;;  %v1482_v6 = vpop.f32.mrf.mxu1 }
 0x319   :  { %v3301_v9 = vmax.f32 %v2107_v62, %v3105_v3  ;;  %2723 = vmatmul.f32.gmra.mxu2 %v5105_v1  ;;  %v485_v10 = vadd.f32 %v6977_v40, %v484_v5  ;;  %v1483_v11 = vadd.f32 %v6977_v40, %v1482_v6  ;;  %3917 = vmatmul.f32.gmra.mxu3 %v5301_v2  ;;  %v112_v1 = vld [vmem:[%s9445_s0 + $0x310] sm:$0xff] }
 0x31a   :  { %v4912_v2 = vld [vmem:[%s9445_s0 + $0x930] sm:$0xff] }
 0x31b   :  { %v4495_v12 = vmax.f32 %v3301_v9, %v4299_v4  ;;  %v914_v13 = vmax.f32 %v485_v10, 0.0  ;;  %v1912_v14 = vmax.f32 %v1483_v11, 0.0  ;;  %531 = vmatmul.f32.gmra.mxu0 %v109_v7  ;;  %1529 = vmatmul.f32.gmra.mxu1 %v4909_v42 }
 0x31c   :  { %v2676_v15 = vpop.f32.mrf.mxu2  ;;  %v3870_v17 = vpop.f32.mrf.mxu3 }
 0x31d   :  { %4692 = vst.msk [vmem:[%s9447_s3 + $0x270] sm:$0xff] %vm4613_vm0, %v4495_v12  ;;  %v2108_v18 = vmax.f32 %v914_v13, %v1912_v14  ;;  %v2677_v19 = vadd.f32 %v6977_v40, %v2676_v15  ;;  %v3871_v20 = vadd.f32 %v6977_v40, %v3870_v17  ;;  %v5109_v14 = vld [vmem:[%s9445_s0 + $0xf58] sm:$0xff] }
 0x31e   :  { %v5305_v15 = vld [vmem:[%s9445_s0 + $0x1578] sm:$0xff] }
 0x31f   :  { %v3106_v23 = vmax.f32 %v2677_v19, 0.0  ;;  %v4300_v24 = vmax.f32 %v3871_v20, 0.0 }
 0x320   :  { %v487_v25 = vpop.f32.mrf.mxu0  ;;  %v1485_v26 = vpop.f32.mrf.mxu1 }
 0x321   :  { %v3302_v29 = vmax.f32 %v2108_v18, %v3106_v23  ;;  %2726 = vmatmul.f32.gmra.mxu2 %v5106_v21  ;;  %v488_v30 = vadd.f32 %v6977_v40, %v487_v25  ;;  %v1486_v31 = vadd.f32 %v6977_v40, %v1485_v26  ;;  %3920 = vmatmul.f32.gmra.mxu3 %v5302_v22  ;;  %v113_v21 = vld [vmem:[%s9445_s0 + $0x318] sm:$0xff] }
 0x322   :  { %v4913_v22 = vld [vmem:[%s9445_s0 + $0x938] sm:$0xff] }
 0x323   :  { %v4496_v32 = vmax.f32 %v3302_v29, %v4300_v24  ;;  %v915_v33 = vmax.f32 %v488_v30, 0.0  ;;  %v1913_v34 = vmax.f32 %v1486_v31, 0.0  ;;  %534 = vmatmul.f32.gmra.mxu0 %v110_v27  ;;  %1532 = vmatmul.f32.gmra.mxu1 %v4910_v28 }
 0x324   :  { %v2679_v35 = vpop.f32.mrf.mxu2  ;;  %v3873_v36 = vpop.f32.mrf.mxu3 }
 0x325   :  { %4693 = vst.msk [vmem:[%s9447_s3 + $0x278] sm:$0xff] %vm4613_vm0, %v4496_v32  ;;  %v2109_v37 = vmax.f32 %v915_v33, %v1913_v34  ;;  %v2680_v38 = vadd.f32 %v6977_v40, %v2679_v35  ;;  %v3874_v8 = vadd.f32 %v6977_v40, %v3873_v36  ;;  %v5110_v34 = vld [vmem:[%s9445_s0 + $0xf60] sm:$0xff] }
 0x326   :  { %v5306_v35 = vld [vmem:[%s9445_s0 + $0x1580] sm:$0xff] }
 0x327   :  { %v3107_v41 = vmax.f32 %v2680_v38, 0.0  ;;  %v4301_v43 = vmax.f32 %v3874_v8, 0.0 }
 0x328   :  { %v490_v44 = vpop.f32.mrf.mxu0  ;;  %v1488_v45 = vpop.f32.mrf.mxu1 }
 0x329   :  { %v3303_v48 = vmax.f32 %v2109_v37, %v3107_v41  ;;  %2729 = vmatmul.f32.gmra.mxu2 %v5107_v39  ;;  %v491_v49 = vadd.f32 %v6977_v40, %v490_v44  ;;  %v1489_v50 = vadd.f32 %v6977_v40, %v1488_v45  ;;  %3923 = vmatmul.f32.gmra.mxu3 %v5303_v16  ;;  %v114_v39 = vld [vmem:[%s9445_s0 + $0x320] sm:$0xff] }
 0x32a   :  { %v4914_v16 = vld [vmem:[%s9445_s0 + $0x940] sm:$0xff] }
 0x32b   :  { %v4497_v51 = vmax.f32 %v3303_v48, %v4301_v43  ;;  %v916_v52 = vmax.f32 %v491_v49, 0.0  ;;  %v1914_v53 = vmax.f32 %v1489_v50, 0.0  ;;  %537 = vmatmul.f32.gmra.mxu0 %v111_v46  ;;  %1535 = vmatmul.f32.gmra.mxu1 %v4911_v47 }
 0x32c   :  { %v2682_v54 = vpop.f32.mrf.mxu2  ;;  %v3876_v55 = vpop.f32.mrf.mxu3 }
 0x32d   :  { %4694 = vst.msk [vmem:[%s9447_s3 + $0x280] sm:$0xff] %vm4613_vm0, %v4497_v51  ;;  %v2110_v56 = vmax.f32 %v916_v52, %v1914_v53  ;;  %v2683_v57 = vadd.f32 %v6977_v40, %v2682_v54  ;;  %v3877_v58 = vadd.f32 %v6977_v40, %v3876_v55  ;;  %v5111_v53 = vld [vmem:[%s9445_s0 + $0xf68] sm:$0xff] }
 0x32e   :  { %v5307_v54 = vld [vmem:[%s9445_s0 + $0x1588] sm:$0xff] }
 0x32f   :  { %v3108_v61 = vmax.f32 %v2683_v57, 0.0  ;;  %v4302_v62 = vmax.f32 %v3877_v58, 0.0 }
 0x330   :  { %v493_v63 = vpop.f32.mrf.mxu0  ;;  %v1491_v0 = vpop.f32.mrf.mxu1 }
 0x331   :  { %v3304_v3 = vmax.f32 %v2110_v56, %v3108_v61  ;;  %2732 = vmatmul.f32.gmra.mxu2 %v5108_v59  ;;  %v494_v4 = vadd.f32 %v6977_v40, %v493_v63  ;;  %v1492_v5 = vadd.f32 %v6977_v40, %v1491_v0  ;;  %3926 = vmatmul.f32.gmra.mxu3 %v5304_v60  ;;  %v115_v59 = vld [vmem:[%s9445_s0 + $0x328] sm:$0xff] }
 0x332   :  { %v4915_v60 = vld [vmem:[%s9445_s0 + $0x948] sm:$0xff] }
 0x333   :  { %v4498_v6 = vmax.f32 %v3304_v3, %v4302_v62  ;;  %v917_v7 = vmax.f32 %v494_v4, 0.0  ;;  %v1915_v42 = vmax.f32 %v1492_v5, 0.0  ;;  %540 = vmatmul.f32.gmra.mxu0 %v112_v1  ;;  %1538 = vmatmul.f32.gmra.mxu1 %v4912_v2 }
 0x334   :  { %v2685_v9 = vpop.f32.mrf.mxu2  ;;  %v3879_v10 = vpop.f32.mrf.mxu3 }
 0x335   :  { %4695 = vst.msk [vmem:[%s9447_s3 + $0x288] sm:$0xff] %vm4613_vm0, %v4498_v6  ;;  %v2111_v11 = vmax.f32 %v917_v7, %v1915_v42  ;;  %v2686_v12 = vadd.f32 %v6977_v40, %v2685_v9  ;;  %v3880_v13 = vadd.f32 %v6977_v40, %v3879_v10  ;;  %v7408_v6 = vld [vmem:[%s9446_s2] ss:$0 sm:$0xff]  ;;  %v5112_v42 = vld [vmem:[%s9445_s0 + $0xf70] sm:$0xff] }
 0x336   :  { %v5308_v9 = vld [vmem:[%s9445_s0 + $0x1590] sm:$0xff] }
 0x337   :  { %v3109_v17 = vmax.f32 %v2686_v12, 0.0  ;;  %v4303_v18 = vmax.f32 %v3880_v13, 0.0 }
 0x338   :  { %v496_v19 = vpop.f32.mrf.mxu0  ;;  %v1494_v20 = vpop.f32.mrf.mxu1 }
 0x339   :  { %v3305_v23 = vmax.f32 %v2111_v11, %v3109_v17  ;;  %2735 = vmatmul.f32.gmra.mxu2 %v5109_v14  ;;  %v497_v24 = vadd.f32 %v6977_v40, %v496_v19  ;;  %v1495_v25 = vadd.f32 %v6977_v40, %v1494_v20  ;;  %3929 = vmatmul.f32.gmra.mxu3 %v5305_v15  ;;  %v116_v14 = vld [vmem:[%s9445_s0 + $0x330] sm:$0xff] }
 0x33a   :  { %v4916_v15 = vld [vmem:[%s9445_s0 + $0x950] sm:$0xff] }
 0x33b   :  { %v4499_v26 = vmax.f32 %v3305_v23, %v4303_v18  ;;  %v918_v27 = vmax.f32 %v497_v24, 0.0  ;;  %v1916_v28 = vmax.f32 %v1495_v25, 0.0  ;;  %543 = vmatmul.f32.gmra.mxu0 %v113_v21  ;;  %1541 = vmatmul.f32.gmra.mxu1 %v4913_v22 }
 0x33c   :  { %v2688_v29 = vpop.f32.mrf.mxu2  ;;  %v3882_v30 = vpop.f32.mrf.mxu3 }
 0x33d   :  { %4696 = vst.msk [vmem:[%s9447_s3 + $0x290] sm:$0xff] %vm4613_vm0, %v4499_v26  ;;  %v2112_v31 = vmax.f32 %v918_v27, %v1916_v28  ;;  %v2689_v32 = vadd.f32 %v6977_v40, %v2688_v29  ;;  %v3883_v33 = vadd.f32 %v6977_v40, %v3882_v30  ;;  %v5113_v28 = vld [vmem:[%s9445_s0 + $0xf78] sm:$0xff] }
 0x33e   :  { %v5309_v29 = vld [vmem:[%s9445_s0 + $0x1598] sm:$0xff] }
 0x33f   :  { %v3110_v36 = vmax.f32 %v2689_v32, 0.0  ;;  %v4304_v37 = vmax.f32 %v3883_v33, 0.0 }
 0x340   :  { %v499_v38 = vpop.f32.mrf.mxu0  ;;  %v1497_v8 = vpop.f32.mrf.mxu1 }
 0x341   :  { %v3306_v41 = vmax.f32 %v2112_v31, %v3110_v36  ;;  %2738 = vmatmul.f32.gmra.mxu2 %v5110_v34  ;;  %v500_v43 = vadd.f32 %v6977_v40, %v499_v38  ;;  %v1498_v44 = vadd.f32 %v6977_v40, %v1497_v8  ;;  %3932 = vmatmul.f32.gmra.mxu3 %v5306_v35  ;;  %v117_v34 = vld [vmem:[%s9445_s0 + $0x338] sm:$0xff] }
 0x342   :  { %v4917_v35 = vld [vmem:[%s9445_s0 + $0x958] sm:$0xff] }
 0x343   :  { %v4500_v45 = vmax.f32 %v3306_v41, %v4304_v37  ;;  %v919_v46 = vmax.f32 %v500_v43, 0.0  ;;  %v1917_v47 = vmax.f32 %v1498_v44, 0.0  ;;  %546 = vmatmul.f32.gmra.mxu0 %v114_v39  ;;  %1544 = vmatmul.f32.gmra.mxu1 %v4914_v16 }
 0x344   :  { %v2691_v48 = vpop.f32.mrf.mxu2  ;;  %v3885_v49 = vpop.f32.mrf.mxu3 }
 0x345   :  { %4697 = vst.msk [vmem:[%s9447_s3 + $0x298] sm:$0xff] %vm4613_vm0, %v4500_v45  ;;  %v2113_v50 = vmax.f32 %v919_v46, %v1917_v47  ;;  %v2692_v51 = vadd.f32 %v6977_v40, %v2691_v48  ;;  %v3886_v52 = vadd.f32 %v6977_v40, %v3885_v49  ;;  %v5114_v47 = vld [vmem:[%s9445_s0 + $0xf80] sm:$0xff] }
 0x346   :  { %v5310_v48 = vld [vmem:[%s9445_s0 + $0x15a0] sm:$0xff] }
 0x347   :  { %v3111_v55 = vmax.f32 %v2692_v51, 0.0  ;;  %v4305_v56 = vmax.f32 %v3886_v52, 0.0 }
 0x348   :  { %v502_v57 = vpop.f32.mrf.mxu0  ;;  %v1500_v58 = vpop.f32.mrf.mxu1 }
 0x349   :  { %v3307_v61 = vmax.f32 %v2113_v50, %v3111_v55  ;;  %2741 = vmatmul.f32.gmra.mxu2 %v5111_v53  ;;  %v503_v62 = vadd.f32 %v6977_v40, %v502_v57  ;;  %v1501_v63 = vadd.f32 %v6977_v40, %v1500_v58  ;;  %3935 = vmatmul.f32.gmra.mxu3 %v5307_v54  ;;  %v118_v53 = vld [vmem:[%s9445_s0 + $0x340] sm:$0xff] }
 0x34a   :  { %v4918_v54 = vld [vmem:[%s9445_s0 + $0x960] sm:$0xff] }
 0x34b   :  { %v4501_v0 = vmax.f32 %v3307_v61, %v4305_v56  ;;  %v920_v1 = vmax.f32 %v503_v62, 0.0  ;;  %v1918_v2 = vmax.f32 %v1501_v63, 0.0  ;;  %549 = vmatmul.f32.gmra.mxu0 %v115_v59  ;;  %1547 = vmatmul.f32.gmra.mxu1 %v4915_v60 }
 0x34c   :  { %v2694_v3 = vpop.f32.mrf.mxu2  ;;  %v3888_v4 = vpop.f32.mrf.mxu3 }
 0x34d   :  { %4698 = vst.msk [vmem:[%s9447_s3 + $0x2a0] sm:$0xff] %vm4613_vm0, %v4501_v0  ;;  %v2114_v5 = vmax.f32 %v920_v1, %v1918_v2  ;;  %v2695_v40 = vadd.f32 %v7408_v6, %v2694_v3  ;;  %v3889_v7 = vadd.f32 %v7408_v6, %v3888_v4  ;;  %v5115_v2 = vld [vmem:[%s9445_s0 + $0xf88] sm:$0xff] }
 0x34e   :  { %v5311_v3 = vld [vmem:[%s9445_s0 + $0x15a8] sm:$0xff] }
 0x34f   :  { %v3112_v10 = vmax.f32 %v2695_v40, 0.0  ;;  %v4306_v11 = vmax.f32 %v3889_v7, 0.0 }
 0x350   :  { %v505_v12 = vpop.f32.mrf.mxu0  ;;  %v1503_v13 = vpop.f32.mrf.mxu1 }
 0x351   :  { %v3308_v17 = vmax.f32 %v2114_v5, %v3112_v10  ;;  %2744 = vmatmul.f32.gmra.mxu2 %v5112_v42  ;;  %v506_v18 = vadd.f32 %v7408_v6, %v505_v12  ;;  %v1504_v19 = vadd.f32 %v7408_v6, %v1503_v13  ;;  %3938 = vmatmul.f32.gmra.mxu3 %v5308_v9  ;;  %v119_v42 = vld [vmem:[%s9445_s0 + $0x348] sm:$0xff] }
 0x352   :  { %v4919_v9 = vld [vmem:[%s9445_s0 + $0x968] sm:$0xff] }
 0x353   :  { %v4502_v20 = vmax.f32 %v3308_v17, %v4306_v11  ;;  %v921_v21 = vmax.f32 %v506_v18, 0.0  ;;  %v1919_v22 = vmax.f32 %v1504_v19, 0.0  ;;  %552 = vmatmul.f32.gmra.mxu0 %v116_v14  ;;  %1550 = vmatmul.f32.gmra.mxu1 %v4916_v15 }
 0x354   :  { %v2697_v23 = vpop.f32.mrf.mxu2  ;;  %v3891_v24 = vpop.f32.mrf.mxu3 }
 0x355   :  { %4699 = vst.msk [vmem:[%s9447_s3 + $0x2a8] sm:$0xff] %vm4613_vm0, %v4502_v20  ;;  %v2115_v25 = vmax.f32 %v921_v21, %v1919_v22  ;;  %v2698_v26 = vadd.f32 %v7408_v6, %v2697_v23  ;;  %v3892_v27 = vadd.f32 %v7408_v6, %v3891_v24  ;;  %v5116_v22 = vld [vmem:[%s9445_s0 + $0xf90] sm:$0xff] }
 0x356   :  { %v5312_v23 = vld [vmem:[%s9445_s0 + $0x15b0] sm:$0xff] }
 0x357   :  { %v3113_v30 = vmax.f32 %v2698_v26, 0.0  ;;  %v4307_v31 = vmax.f32 %v3892_v27, 0.0 }
 0x358   :  { %v508_v32 = vpop.f32.mrf.mxu0  ;;  %v1506_v33 = vpop.f32.mrf.mxu1 }
 0x359   :  { %v3309_v36 = vmax.f32 %v2115_v25, %v3113_v30  ;;  %2747 = vmatmul.f32.gmra.mxu2 %v5113_v28  ;;  %v509_v37 = vadd.f32 %v7408_v6, %v508_v32  ;;  %v1507_v38 = vadd.f32 %v7408_v6, %v1506_v33  ;;  %3941 = vmatmul.f32.gmra.mxu3 %v5309_v29  ;;  %v120_v28 = vld [vmem:[%s9445_s0 + $0x350] sm:$0xff] }
 0x35a   :  { %v4920_v29 = vld [vmem:[%s9445_s0 + $0x970] sm:$0xff] }
 0x35b   :  { %v4503_v8 = vmax.f32 %v3309_v36, %v4307_v31  ;;  %v922_v39 = vmax.f32 %v509_v37, 0.0  ;;  %v1920_v16 = vmax.f32 %v1507_v38, 0.0  ;;  %555 = vmatmul.f32.gmra.mxu0 %v117_v34  ;;  %1553 = vmatmul.f32.gmra.mxu1 %v4917_v35 }
 0x35c   :  { %v2700_v41 = vpop.f32.mrf.mxu2  ;;  %v3894_v43 = vpop.f32.mrf.mxu3 }
 0x35d   :  { %4700 = vst.msk [vmem:[%s9447_s3 + $0x2b0] sm:$0xff] %vm4613_vm0, %v4503_v8  ;;  %v2116_v44 = vmax.f32 %v922_v39, %v1920_v16  ;;  %v2701_v45 = vadd.f32 %v7408_v6, %v2700_v41  ;;  %v3895_v46 = vadd.f32 %v7408_v6, %v3894_v43  ;;  %v5117_v16 = vld [vmem:[%s9445_s0 + $0xf98] sm:$0xff] }
 0x35e   :  { %v5313_v41 = vld [vmem:[%s9445_s0 + $0x15b8] sm:$0xff] }
 0x35f   :  { %v3114_v49 = vmax.f32 %v2701_v45, 0.0  ;;  %v4308_v50 = vmax.f32 %v3895_v46, 0.0 }
 0x360   :  { %v511_v51 = vpop.f32.mrf.mxu0  ;;  %v1509_v52 = vpop.f32.mrf.mxu1 }
 0x361   :  { %v3310_v55 = vmax.f32 %v2116_v44, %v3114_v49  ;;  %2750 = vmatmul.f32.gmra.mxu2 %v5114_v47  ;;  %v512_v56 = vadd.f32 %v7408_v6, %v511_v51  ;;  %v1510_v57 = vadd.f32 %v7408_v6, %v1509_v52  ;;  %3944 = vmatmul.f32.gmra.mxu3 %v5310_v48  ;;  %v121_v47 = vld [vmem:[%s9445_s0 + $0x358] sm:$0xff] }
 0x362   :  { %v4921_v48 = vld [vmem:[%s9445_s0 + $0x978] sm:$0xff] }
 0x363   :  { %v4504_v58 = vmax.f32 %v3310_v55, %v4308_v50  ;;  %v923_v59 = vmax.f32 %v512_v56, 0.0  ;;  %v1921_v60 = vmax.f32 %v1510_v57, 0.0  ;;  %558 = vmatmul.f32.gmra.mxu0 %v118_v53  ;;  %1556 = vmatmul.f32.gmra.mxu1 %v4918_v54 }
 0x364   :  { %v2703_v61 = vpop.f32.mrf.mxu2  ;;  %v3897_v62 = vpop.f32.mrf.mxu3 }
 0x365   :  { %4701 = vst.msk [vmem:[%s9447_s3 + $0x2b8] sm:$0xff] %vm4613_vm0, %v4504_v58  ;;  %v2117_v63 = vmax.f32 %v923_v59, %v1921_v60  ;;  %v2704_v0 = vadd.f32 %v7408_v6, %v2703_v61  ;;  %v3898_v1 = vadd.f32 %v7408_v6, %v3897_v62  ;;  %v5118_v60 = vld [vmem:[%s9445_s0 + $0xfa0] sm:$0xff] }
 0x366   :  { %v5314_v61 = vld [vmem:[%s9445_s0 + $0x15c0] sm:$0xff] }
 0x367   :  { %v3115_v4 = vmax.f32 %v2704_v0, 0.0  ;;  %v4309_v5 = vmax.f32 %v3898_v1, 0.0 }
 0x368   :  { %v514_v40 = vpop.f32.mrf.mxu0  ;;  %v1512_v7 = vpop.f32.mrf.mxu1 }
 0x369   :  { %v3311_v10 = vmax.f32 %v2117_v63, %v3115_v4  ;;  %2753 = vmatmul.f32.gmra.mxu2 %v5115_v2  ;;  %v515_v11 = vadd.f32 %v7408_v6, %v514_v40  ;;  %v1513_v12 = vadd.f32 %v7408_v6, %v1512_v7  ;;  %3947 = vmatmul.f32.gmra.mxu3 %v5311_v3  ;;  %v122_v2 = vld [vmem:[%s9445_s0 + $0x360] sm:$0xff] }
 0x36a   :  { %v4922_v3 = vld [vmem:[%s9445_s0 + $0x980] sm:$0xff] }
 0x36b   :  { %v4505_v13 = vmax.f32 %v3311_v10, %v4309_v5  ;;  %v924_v14 = vmax.f32 %v515_v11, 0.0  ;;  %v1922_v15 = vmax.f32 %v1513_v12, 0.0  ;;  %561 = vmatmul.f32.gmra.mxu0 %v119_v42  ;;  %1559 = vmatmul.f32.gmra.mxu1 %v4919_v9 }
 0x36c   :  { %v2706_v17 = vpop.f32.mrf.mxu2  ;;  %v3900_v18 = vpop.f32.mrf.mxu3 }
 0x36d   :  { %4702 = vst.msk [vmem:[%s9447_s3 + $0x2c0] sm:$0xff] %vm4613_vm0, %v4505_v13  ;;  %v2118_v19 = vmax.f32 %v924_v14, %v1922_v15  ;;  %v2707_v20 = vadd.f32 %v7408_v6, %v2706_v17  ;;  %v3901_v21 = vadd.f32 %v7408_v6, %v3900_v18  ;;  %v5119_v15 = vld [vmem:[%s9445_s0 + $0xfa8] sm:$0xff] }
 0x36e   :  { %v5315_v17 = vld [vmem:[%s9445_s0 + $0x15c8] sm:$0xff] }
 0x36f   :  { %v3116_v24 = vmax.f32 %v2707_v20, 0.0  ;;  %v4310_v25 = vmax.f32 %v3901_v21, 0.0 }
 0x370   :  { %v517_v26 = vpop.f32.mrf.mxu0  ;;  %v1515_v27 = vpop.f32.mrf.mxu1 }
 0x371   :  { %v3312_v30 = vmax.f32 %v2118_v19, %v3116_v24  ;;  %2756 = vmatmul.f32.gmra.mxu2 %v5116_v22  ;;  %v518_v31 = vadd.f32 %v7408_v6, %v517_v26  ;;  %v1516_v32 = vadd.f32 %v7408_v6, %v1515_v27  ;;  %3950 = vmatmul.f32.gmra.mxu3 %v5312_v23  ;;  %v123_v22 = vld [vmem:[%s9445_s0 + $0x368] sm:$0xff] }
 0x372   :  { %v4923_v23 = vld [vmem:[%s9445_s0 + $0x988] sm:$0xff] }
 0x373   :  { %v4506_v33 = vmax.f32 %v3312_v30, %v4310_v25  ;;  %v925_v34 = vmax.f32 %v518_v31, 0.0  ;;  %v1923_v35 = vmax.f32 %v1516_v32, 0.0  ;;  %564 = vmatmul.f32.gmra.mxu0 %v120_v28  ;;  %1562 = vmatmul.f32.gmra.mxu1 %v4920_v29 }
 0x374   :  { %v2709_v36 = vpop.f32.mrf.mxu2  ;;  %v3903_v37 = vpop.f32.mrf.mxu3 }
 0x375   :  { %4703 = vst.msk [vmem:[%s9447_s3 + $0x2c8] sm:$0xff] %vm4613_vm0, %v4506_v33  ;;  %v2119_v38 = vmax.f32 %v925_v34, %v1923_v35  ;;  %v2710_v8 = vadd.f32 %v7408_v6, %v2709_v36  ;;  %v3904_v39 = vadd.f32 %v7408_v6, %v3903_v37  ;;  %v5120_v35 = vld [vmem:[%s9445_s0 + $0xfb0] sm:$0xff] }
 0x376   :  { %v5316_v36 = vld [vmem:[%s9445_s0 + $0x15d0] sm:$0xff] }
 0x377   :  { %v3117_v43 = vmax.f32 %v2710_v8, 0.0  ;;  %v4311_v44 = vmax.f32 %v3904_v39, 0.0 }
 0x378   :  { %v520_v45 = vpop.f32.mrf.mxu0  ;;  %v1518_v46 = vpop.f32.mrf.mxu1 }
 0x379   :  { %v3313_v49 = vmax.f32 %v2119_v38, %v3117_v43  ;;  %2759 = vmatmul.f32.gmra.mxu2 %v5117_v16  ;;  %v521_v50 = vadd.f32 %v7408_v6, %v520_v45  ;;  %v1519_v51 = vadd.f32 %v7408_v6, %v1518_v46  ;;  %3953 = vmatmul.f32.gmra.mxu3 %v5313_v41  ;;  %v124_v16 = vld [vmem:[%s9445_s0 + $0x370] sm:$0xff] }
 0x37a   :  { %v4924_v41 = vld [vmem:[%s9445_s0 + $0x990] sm:$0xff] }
 0x37b   :  { %v4507_v52 = vmax.f32 %v3313_v49, %v4311_v44  ;;  %v926_v53 = vmax.f32 %v521_v50, 0.0  ;;  %v1924_v54 = vmax.f32 %v1519_v51, 0.0  ;;  %567 = vmatmul.f32.gmra.mxu0 %v121_v47  ;;  %1565 = vmatmul.f32.gmra.mxu1 %v4921_v48 }
 0x37c   :  { %v2712_v55 = vpop.f32.mrf.mxu2  ;;  %v3906_v56 = vpop.f32.mrf.mxu3 }
 0x37d   :  { %4704 = vst.msk [vmem:[%s9447_s3 + $0x2d0] sm:$0xff] %vm4613_vm0, %v4507_v52  ;;  %v2120_v57 = vmax.f32 %v926_v53, %v1924_v54  ;;  %v2713_v58 = vadd.f32 %v7408_v6, %v2712_v55  ;;  %v3907_v59 = vadd.f32 %v7408_v6, %v3906_v56  ;;  %v5121_v54 = vld [vmem:[%s9445_s0 + $0xfb8] sm:$0xff] }
 0x37e   :  { %v5317_v55 = vld [vmem:[%s9445_s0 + $0x15d8] sm:$0xff] }
 0x37f   :  { %v3118_v62 = vmax.f32 %v2713_v58, 0.0  ;;  %v4312_v63 = vmax.f32 %v3907_v59, 0.0 }
 0x380   :  { %v523_v0 = vpop.f32.mrf.mxu0  ;;  %v1521_v1 = vpop.f32.mrf.mxu1 }
 0x381   :  { %v3314_v4 = vmax.f32 %v2120_v57, %v3118_v62  ;;  %2762 = vmatmul.f32.gmra.mxu2 %v5118_v60  ;;  %v524_v5 = vadd.f32 %v7408_v6, %v523_v0  ;;  %v1522_v40 = vadd.f32 %v7408_v6, %v1521_v1  ;;  %3956 = vmatmul.f32.gmra.mxu3 %v5314_v61  ;;  %v125_v60 = vld [vmem:[%s9445_s0 + $0x378] sm:$0xff] }
 0x382   :  { %v4925_v61 = vld [vmem:[%s9445_s0 + $0x998] sm:$0xff] }
 0x383   :  { %v4508_v7 = vmax.f32 %v3314_v4, %v4312_v63  ;;  %v927_v42 = vmax.f32 %v524_v5, 0.0  ;;  %v1925_v9 = vmax.f32 %v1522_v40, 0.0  ;;  %570 = vmatmul.f32.gmra.mxu0 %v122_v2  ;;  %1568 = vmatmul.f32.gmra.mxu1 %v4922_v3 }
 0x384   :  { %v2715_v10 = vpop.f32.mrf.mxu2  ;;  %v3909_v11 = vpop.f32.mrf.mxu3 }
 0x385   :  { %4705 = vst.msk [vmem:[%s9447_s3 + $0x2d8] sm:$0xff] %vm4613_vm0, %v4508_v7  ;;  %v2121_v12 = vmax.f32 %v927_v42, %v1925_v9  ;;  %v2716_v13 = vadd.f32 %v7408_v6, %v2715_v10  ;;  %v3910_v14 = vadd.f32 %v7408_v6, %v3909_v11  ;;  %v5122_v9 = vld [vmem:[%s9445_s0 + $0xfc0] sm:$0xff] }
 0x386   :  { %v5318_v10 = vld [vmem:[%s9445_s0 + $0x15e0] sm:$0xff] }
 0x387   :  { %v3119_v18 = vmax.f32 %v2716_v13, 0.0  ;;  %v4313_v19 = vmax.f32 %v3910_v14, 0.0 }
 0x388   :  { %v526_v20 = vpop.f32.mrf.mxu0  ;;  %v1524_v21 = vpop.f32.mrf.mxu1 }
 0x389   :  { %v3315_v24 = vmax.f32 %v2121_v12, %v3119_v18  ;;  %2765 = vmatmul.f32.gmra.mxu2 %v5119_v15  ;;  %v527_v25 = vadd.f32 %v7408_v6, %v526_v20  ;;  %v1525_v26 = vadd.f32 %v7408_v6, %v1524_v21  ;;  %3959 = vmatmul.f32.gmra.mxu3 %v5315_v17  ;;  %v126_v15 = vld [vmem:[%s9445_s0 + $0x380] sm:$0xff] }
 0x38a   :  { %v4926_v17 = vld [vmem:[%s9445_s0 + $0x9a0] sm:$0xff] }
 0x38b   :  { %v4509_v27 = vmax.f32 %v3315_v24, %v4313_v19  ;;  %v928_v28 = vmax.f32 %v527_v25, 0.0  ;;  %v1926_v29 = vmax.f32 %v1525_v26, 0.0  ;;  %573 = vmatmul.f32.gmra.mxu0 %v123_v22  ;;  %1571 = vmatmul.f32.gmra.mxu1 %v4923_v23 }
 0x38c   :  { %v2718_v30 = vpop.f32.mrf.mxu2  ;;  %v3912_v31 = vpop.f32.mrf.mxu3 }
 0x38d   :  { %4706 = vst.msk [vmem:[%s9447_s3 + $0x2e0] sm:$0xff] %vm4613_vm0, %v4509_v27  ;;  %v2122_v32 = vmax.f32 %v928_v28, %v1926_v29  ;;  %v2719_v33 = vadd.f32 %v7408_v6, %v2718_v30  ;;  %v3913_v34 = vadd.f32 %v7408_v6, %v3912_v31  ;;  %v5123_v29 = vld [vmem:[%s9445_s0 + $0xfc8] sm:$0xff] }
 0x38e   :  { %v5319_v30 = vld [vmem:[%s9445_s0 + $0x15e8] sm:$0xff] }
 0x38f   :  { %v3120_v37 = vmax.f32 %v2719_v33, 0.0  ;;  %v4314_v38 = vmax.f32 %v3913_v34, 0.0 }
 0x390   :  { %v529_v8 = vpop.f32.mrf.mxu0  ;;  %v1527_v39 = vpop.f32.mrf.mxu1 }
 0x391   :  { %v3316_v43 = vmax.f32 %v2122_v32, %v3120_v37  ;;  %2768 = vmatmul.f32.gmra.mxu2 %v5120_v35  ;;  %v530_v44 = vadd.f32 %v7408_v6, %v529_v8  ;;  %v1528_v45 = vadd.f32 %v7408_v6, %v1527_v39  ;;  %3962 = vmatmul.f32.gmra.mxu3 %v5316_v36  ;;  %v127_v35 = vld [vmem:[%s9445_s0 + $0x388] sm:$0xff] }
 0x392   :  { %v4927_v36 = vld [vmem:[%s9445_s0 + $0x9a8] sm:$0xff] }
 0x393   :  { %v4510_v46 = vmax.f32 %v3316_v43, %v4314_v38  ;;  %v929_v47 = vmax.f32 %v530_v44, 0.0  ;;  %v1927_v48 = vmax.f32 %v1528_v45, 0.0  ;;  %576 = vmatmul.f32.gmra.mxu0 %v124_v16  ;;  %1574 = vmatmul.f32.gmra.mxu1 %v4924_v41 }
 0x394   :  { %v2721_v49 = vpop.f32.mrf.mxu2  ;;  %v3915_v50 = vpop.f32.mrf.mxu3 }
 0x395   :  { %4707 = vst.msk [vmem:[%s9447_s3 + $0x2e8] sm:$0xff] %vm4613_vm0, %v4510_v46  ;;  %v2123_v51 = vmax.f32 %v929_v47, %v1927_v48  ;;  %v2722_v52 = vadd.f32 %v7408_v6, %v2721_v49  ;;  %v3916_v53 = vadd.f32 %v7408_v6, %v3915_v50  ;;  %v5124_v48 = vld [vmem:[%s9445_s0 + $0xfd0] sm:$0xff] }
 0x396   :  { %v5320_v49 = vld [vmem:[%s9445_s0 + $0x15f0] sm:$0xff] }
 0x397   :  { %v3121_v56 = vmax.f32 %v2722_v52, 0.0  ;;  %v4315_v57 = vmax.f32 %v3916_v53, 0.0 }
 0x398   :  { %v532_v58 = vpop.f32.mrf.mxu0  ;;  %v1530_v59 = vpop.f32.mrf.mxu1 }
 0x399   :  { %v3317_v62 = vmax.f32 %v2123_v51, %v3121_v56  ;;  %2771 = vmatmul.f32.gmra.mxu2 %v5121_v54  ;;  %v533_v63 = vadd.f32 %v7408_v6, %v532_v58  ;;  %v1531_v0 = vadd.f32 %v7408_v6, %v1530_v59  ;;  %3965 = vmatmul.f32.gmra.mxu3 %v5317_v55  ;;  %v128_v54 = vld [vmem:[%s9445_s0 + $0x390] sm:$0xff] }
 0x39a   :  { %v4928_v55 = vld [vmem:[%s9445_s0 + $0x9b0] sm:$0xff] }
 0x39b   :  { %v4511_v1 = vmax.f32 %v3317_v62, %v4315_v57  ;;  %v930_v2 = vmax.f32 %v533_v63, 0.0  ;;  %v1928_v3 = vmax.f32 %v1531_v0, 0.0  ;;  %579 = vmatmul.f32.gmra.mxu0 %v125_v60  ;;  %1577 = vmatmul.f32.gmra.mxu1 %v4925_v61 }
 0x39c   :  { %v2724_v4 = vpop.f32.mrf.mxu2  ;;  %v3918_v5 = vpop.f32.mrf.mxu3 }
 0x39d   :  { %4708 = vst.msk [vmem:[%s9447_s3 + $0x2f0] sm:$0xff] %vm4613_vm0, %v4511_v1  ;;  %v2124_v40 = vmax.f32 %v930_v2, %v1928_v3  ;;  %v2725_v7 = vadd.f32 %v7408_v6, %v2724_v4  ;;  %v3919_v42 = vadd.f32 %v7408_v6, %v3918_v5  ;;  %v5125_v3 = vld [vmem:[%s9445_s0 + $0xfd8] sm:$0xff] }
 0x39e   :  { %v5321_v4 = vld [vmem:[%s9445_s0 + $0x15f8] sm:$0xff] }
 0x39f   :  { %v3122_v11 = vmax.f32 %v2725_v7, 0.0  ;;  %v4316_v12 = vmax.f32 %v3919_v42, 0.0 }
 0x3a0   :  { %v535_v13 = vpop.f32.mrf.mxu0  ;;  %v1533_v14 = vpop.f32.mrf.mxu1 }
 0x3a1   :  { %v3318_v18 = vmax.f32 %v2124_v40, %v3122_v11  ;;  %2774 = vmatmul.f32.gmra.mxu2 %v5122_v9  ;;  %v536_v19 = vadd.f32 %v7408_v6, %v535_v13  ;;  %v1534_v20 = vadd.f32 %v7408_v6, %v1533_v14  ;;  %3968 = vmatmul.f32.gmra.mxu3 %v5318_v10  ;;  %v129_v9 = vld [vmem:[%s9445_s0 + $0x398] sm:$0xff] }
 0x3a2   :  { %v4929_v10 = vld [vmem:[%s9445_s0 + $0x9b8] sm:$0xff] }
 0x3a3   :  { %v4512_v21 = vmax.f32 %v3318_v18, %v4316_v12  ;;  %v931_v22 = vmax.f32 %v536_v19, 0.0  ;;  %v1929_v23 = vmax.f32 %v1534_v20, 0.0  ;;  %582 = vmatmul.f32.gmra.mxu0 %v126_v15  ;;  %1580 = vmatmul.f32.gmra.mxu1 %v4926_v17 }
 0x3a4   :  { %v2727_v24 = vpop.f32.mrf.mxu2  ;;  %v3921_v25 = vpop.f32.mrf.mxu3 }
 0x3a5   :  { %4709 = vst.msk [vmem:[%s9447_s3 + $0x2f8] sm:$0xff] %vm4613_vm0, %v4512_v21  ;;  %v2125_v26 = vmax.f32 %v931_v22, %v1929_v23  ;;  %v2728_v27 = vadd.f32 %v7408_v6, %v2727_v24  ;;  %v3922_v28 = vadd.f32 %v7408_v6, %v3921_v25  ;;  %v5126_v23 = vld [vmem:[%s9445_s0 + $0xfe0] sm:$0xff] }
 0x3a6   :  { %v5322_v24 = vld [vmem:[%s9445_s0 + $0x1600] sm:$0xff] }
 0x3a7   :  { %v3123_v31 = vmax.f32 %v2728_v27, 0.0  ;;  %v4317_v32 = vmax.f32 %v3922_v28, 0.0 }
 0x3a8   :  { %v538_v33 = vpop.f32.mrf.mxu0  ;;  %v1536_v34 = vpop.f32.mrf.mxu1 }
 0x3a9   :  { %v3319_v37 = vmax.f32 %v2125_v26, %v3123_v31  ;;  %2777 = vmatmul.f32.gmra.mxu2 %v5123_v29  ;;  %v539_v38 = vadd.f32 %v7408_v6, %v538_v33  ;;  %v1537_v8 = vadd.f32 %v7408_v6, %v1536_v34  ;;  %3971 = vmatmul.f32.gmra.mxu3 %v5319_v30  ;;  %v130_v29 = vld [vmem:[%s9445_s0 + $0x3a0] sm:$0xff] }
 0x3aa   :  { %v4930_v30 = vld [vmem:[%s9445_s0 + $0x9c0] sm:$0xff] }
 0x3ab   :  { %v4513_v39 = vmax.f32 %v3319_v37, %v4317_v32  ;;  %v932_v16 = vmax.f32 %v539_v38, 0.0  ;;  %v1930_v41 = vmax.f32 %v1537_v8, 0.0  ;;  %585 = vmatmul.f32.gmra.mxu0 %v127_v35  ;;  %1583 = vmatmul.f32.gmra.mxu1 %v4927_v36 }
 0x3ac   :  { %v2730_v43 = vpop.f32.mrf.mxu2  ;;  %v3924_v44 = vpop.f32.mrf.mxu3 }
 0x3ad   :  { %4710 = vst.msk [vmem:[%s9447_s3 + $0x300] sm:$0xff] %vm4613_vm0, %v4513_v39  ;;  %v2126_v45 = vmax.f32 %v932_v16, %v1930_v41  ;;  %v2731_v46 = vadd.f32 %v7408_v6, %v2730_v43  ;;  %v3925_v47 = vadd.f32 %v7408_v6, %v3924_v44  ;;  %v5127_v41 = vld [vmem:[%s9445_s0 + $0xfe8] sm:$0xff] }
 0x3ae   :  { %v5323_v43 = vld [vmem:[%s9445_s0 + $0x1608] sm:$0xff] }
 0x3af   :  { %v3124_v50 = vmax.f32 %v2731_v46, 0.0  ;;  %v4318_v51 = vmax.f32 %v3925_v47, 0.0 }
 0x3b0   :  { %v541_v52 = vpop.f32.mrf.mxu0  ;;  %v1539_v53 = vpop.f32.mrf.mxu1 }
 0x3b1   :  { %v3320_v56 = vmax.f32 %v2126_v45, %v3124_v50  ;;  %2780 = vmatmul.f32.gmra.mxu2 %v5124_v48  ;;  %v542_v57 = vadd.f32 %v7408_v6, %v541_v52  ;;  %v1540_v58 = vadd.f32 %v7408_v6, %v1539_v53  ;;  %3974 = vmatmul.f32.gmra.mxu3 %v5320_v49  ;;  %v131_v48 = vld [vmem:[%s9445_s0 + $0x3a8] sm:$0xff] }
 0x3b2   :  { %v4931_v49 = vld [vmem:[%s9445_s0 + $0x9c8] sm:$0xff] }
 0x3b3   :  { %v4514_v59 = vmax.f32 %v3320_v56, %v4318_v51  ;;  %v933_v60 = vmax.f32 %v542_v57, 0.0  ;;  %v1931_v61 = vmax.f32 %v1540_v58, 0.0  ;;  %588 = vmatmul.f32.gmra.mxu0 %v128_v54  ;;  %1586 = vmatmul.f32.gmra.mxu1 %v4928_v55 }
 0x3b4   :  { %v2733_v62 = vpop.f32.mrf.mxu2  ;;  %v3927_v63 = vpop.f32.mrf.mxu3 }
 0x3b5   :  { %4711 = vst.msk [vmem:[%s9447_s3 + $0x308] sm:$0xff] %vm4613_vm0, %v4514_v59  ;;  %v2127_v0 = vmax.f32 %v933_v60, %v1931_v61  ;;  %v2734_v1 = vadd.f32 %v7408_v6, %v2733_v62  ;;  %v3928_v2 = vadd.f32 %v7408_v6, %v3927_v63  ;;  %v5128_v61 = vld [vmem:[%s9445_s0 + $0xff0] sm:$0xff] }
 0x3b6   :  { %v5324_v62 = vld [vmem:[%s9445_s0 + $0x1610] sm:$0xff] }
 0x3b7   :  { %v3125_v5 = vmax.f32 %v2734_v1, 0.0  ;;  %v4319_v40 = vmax.f32 %v3928_v2, 0.0 }
 0x3b8   :  { %v544_v7 = vpop.f32.mrf.mxu0  ;;  %v1542_v42 = vpop.f32.mrf.mxu1 }
 0x3b9   :  { %v3321_v11 = vmax.f32 %v2127_v0, %v3125_v5  ;;  %2783 = vmatmul.f32.gmra.mxu2 %v5125_v3  ;;  %v545_v12 = vadd.f32 %v7408_v6, %v544_v7  ;;  %v1543_v13 = vadd.f32 %v7408_v6, %v1542_v42  ;;  %3977 = vmatmul.f32.gmra.mxu3 %v5321_v4  ;;  %v132_v3 = vld [vmem:[%s9445_s0 + $0x3b0] sm:$0xff] }
 0x3ba   :  { %v4932_v4 = vld [vmem:[%s9445_s0 + $0x9d0] sm:$0xff] }
 0x3bb   :  { %v4515_v14 = vmax.f32 %v3321_v11, %v4319_v40  ;;  %v934_v15 = vmax.f32 %v545_v12, 0.0  ;;  %v1932_v17 = vmax.f32 %v1543_v13, 0.0  ;;  %591 = vmatmul.f32.gmra.mxu0 %v129_v9  ;;  %1589 = vmatmul.f32.gmra.mxu1 %v4929_v10 }
 0x3bc   :  { %v2736_v18 = vpop.f32.mrf.mxu2  ;;  %v3930_v19 = vpop.f32.mrf.mxu3 }
 0x3bd   :  { %4712 = vst.msk [vmem:[%s9447_s3 + $0x310] sm:$0xff] %vm4613_vm0, %v4515_v14  ;;  %v2128_v20 = vmax.f32 %v934_v15, %v1932_v17  ;;  %v2737_v21 = vadd.f32 %v7408_v6, %v2736_v18  ;;  %v3931_v22 = vadd.f32 %v7408_v6, %v3930_v19  ;;  %v5129_v17 = vld [vmem:[%s9445_s0 + $0xff8] sm:$0xff] }
 0x3be   :  { %v5325_v18 = vld [vmem:[%s9445_s0 + $0x1618] sm:$0xff] }
 0x3bf   :  { %v3126_v25 = vmax.f32 %v2737_v21, 0.0  ;;  %v4320_v26 = vmax.f32 %v3931_v22, 0.0 }
 0x3c0   :  { %v547_v27 = vpop.f32.mrf.mxu0  ;;  %v1545_v28 = vpop.f32.mrf.mxu1 }
 0x3c1   :  { %v3322_v31 = vmax.f32 %v2128_v20, %v3126_v25  ;;  %2786 = vmatmul.f32.gmra.mxu2 %v5126_v23  ;;  %v548_v32 = vadd.f32 %v7408_v6, %v547_v27  ;;  %v1546_v33 = vadd.f32 %v7408_v6, %v1545_v28  ;;  %3980 = vmatmul.f32.gmra.mxu3 %v5322_v24  ;;  %v133_v23 = vld [vmem:[%s9445_s0 + $0x3b8] sm:$0xff] }
 0x3c2   :  { %v4933_v24 = vld [vmem:[%s9445_s0 + $0x9d8] sm:$0xff] }
 0x3c3   :  { %v4516_v34 = vmax.f32 %v3322_v31, %v4320_v26  ;;  %v935_v35 = vmax.f32 %v548_v32, 0.0  ;;  %v1933_v36 = vmax.f32 %v1546_v33, 0.0  ;;  %594 = vmatmul.f32.gmra.mxu0 %v130_v29  ;;  %1592 = vmatmul.f32.gmra.mxu1 %v4930_v30 }
 0x3c4   :  { %v2739_v37 = vpop.f32.mrf.mxu2  ;;  %v3933_v38 = vpop.f32.mrf.mxu3 }
 0x3c5   :  { %4713 = vst.msk [vmem:[%s9447_s3 + $0x318] sm:$0xff] %vm4613_vm0, %v4516_v34  ;;  %v2129_v8 = vmax.f32 %v935_v35, %v1933_v36  ;;  %v2740_v39 = vadd.f32 %v7408_v6, %v2739_v37  ;;  %v3934_v16 = vadd.f32 %v7408_v6, %v3933_v38  ;;  %v5130_v36 = vld [vmem:[%s9445_s0 + $0x1000] sm:$0xff] }
 0x3c6   :  { %v5326_v37 = vld [vmem:[%s9445_s0 + $0x1620] sm:$0xff] }
 0x3c7   :  { %v3127_v44 = vmax.f32 %v2740_v39, 0.0  ;;  %v4321_v45 = vmax.f32 %v3934_v16, 0.0 }
 0x3c8   :  { %v550_v46 = vpop.f32.mrf.mxu0  ;;  %v1548_v47 = vpop.f32.mrf.mxu1 }
 0x3c9   :  { %v3323_v50 = vmax.f32 %v2129_v8, %v3127_v44  ;;  %2789 = vmatmul.f32.gmra.mxu2 %v5127_v41  ;;  %v551_v51 = vadd.f32 %v7408_v6, %v550_v46  ;;  %v1549_v52 = vadd.f32 %v7408_v6, %v1548_v47  ;;  %3983 = vmatmul.f32.gmra.mxu3 %v5323_v43  ;;  %v134_v41 = vld [vmem:[%s9445_s0 + $0x3c0] sm:$0xff] }
 0x3ca   :  { %v4934_v43 = vld [vmem:[%s9445_s0 + $0x9e0] sm:$0xff] }
 0x3cb   :  { %v4517_v53 = vmax.f32 %v3323_v50, %v4321_v45  ;;  %v936_v54 = vmax.f32 %v551_v51, 0.0  ;;  %v1934_v55 = vmax.f32 %v1549_v52, 0.0  ;;  %597 = vmatmul.f32.gmra.mxu0 %v131_v48  ;;  %1595 = vmatmul.f32.gmra.mxu1 %v4931_v49 }
 0x3cc   :  { %v2742_v56 = vpop.f32.mrf.mxu2  ;;  %v3936_v57 = vpop.f32.mrf.mxu3 }
 0x3cd   :  { %4714 = vst.msk [vmem:[%s9447_s3 + $0x320] sm:$0xff] %vm4613_vm0, %v4517_v53  ;;  %v2130_v58 = vmax.f32 %v936_v54, %v1934_v55  ;;  %v2743_v59 = vadd.f32 %v7408_v6, %v2742_v56  ;;  %v3937_v60 = vadd.f32 %v7408_v6, %v3936_v57  ;;  %v5131_v55 = vld [vmem:[%s9445_s0 + $0x1008] sm:$0xff] }
 0x3ce   :  { %v5327_v56 = vld [vmem:[%s9445_s0 + $0x1628] sm:$0xff] }
 0x3cf   :  { %v3128_v63 = vmax.f32 %v2743_v59, 0.0  ;;  %v4322_v0 = vmax.f32 %v3937_v60, 0.0 }
 0x3d0   :  { %v553_v1 = vpop.f32.mrf.mxu0  ;;  %v1551_v2 = vpop.f32.mrf.mxu1 }
 0x3d1   :  { %v3324_v5 = vmax.f32 %v2130_v58, %v3128_v63  ;;  %2792 = vmatmul.f32.gmra.mxu2 %v5128_v61  ;;  %v554_v40 = vadd.f32 %v7408_v6, %v553_v1  ;;  %v1552_v7 = vadd.f32 %v7408_v6, %v1551_v2  ;;  %3986 = vmatmul.f32.gmra.mxu3 %v5324_v62  ;;  %v135_v61 = vld [vmem:[%s9445_s0 + $0x3c8] sm:$0xff] }
 0x3d2   :  { %v4935_v62 = vld [vmem:[%s9445_s0 + $0x9e8] sm:$0xff] }
 0x3d3   :  { %v4518_v42 = vmax.f32 %v3324_v5, %v4322_v0  ;;  %v937_v9 = vmax.f32 %v554_v40, 0.0  ;;  %v1935_v10 = vmax.f32 %v1552_v7, 0.0  ;;  %600 = vmatmul.f32.gmra.mxu0 %v132_v3  ;;  %1598 = vmatmul.f32.gmra.mxu1 %v4932_v4 }
 0x3d4   :  { %v2745_v11 = vpop.f32.mrf.mxu2  ;;  %v3939_v12 = vpop.f32.mrf.mxu3 }
 0x3d5   :  { %4715 = vst.msk [vmem:[%s9447_s3 + $0x328] sm:$0xff] %vm4613_vm0, %v4518_v42  ;;  %v2131_v13 = vmax.f32 %v937_v9, %v1935_v10  ;;  %v2746_v14 = vadd.f32 %v7408_v6, %v2745_v11  ;;  %v3940_v15 = vadd.f32 %v7408_v6, %v3939_v12  ;;  %v5132_v10 = vld [vmem:[%s9445_s0 + $0x1010] sm:$0xff] }
 0x3d6   :  { %v5328_v11 = vld [vmem:[%s9445_s0 + $0x1630] sm:$0xff] }
 0x3d7   :  { %v3129_v19 = vmax.f32 %v2746_v14, 0.0  ;;  %v4323_v20 = vmax.f32 %v3940_v15, 0.0 }
 0x3d8   :  { %v556_v21 = vpop.f32.mrf.mxu0  ;;  %v1554_v22 = vpop.f32.mrf.mxu1 }
 0x3d9   :  { %v3325_v25 = vmax.f32 %v2131_v13, %v3129_v19  ;;  %2795 = vmatmul.f32.gmra.mxu2 %v5129_v17  ;;  %v557_v26 = vadd.f32 %v7408_v6, %v556_v21  ;;  %v1555_v27 = vadd.f32 %v7408_v6, %v1554_v22  ;;  %3989 = vmatmul.f32.gmra.mxu3 %v5325_v18  ;;  %v136_v17 = vld [vmem:[%s9445_s0 + $0x3d0] sm:$0xff] }
 0x3da   :  { %v4936_v18 = vld [vmem:[%s9445_s0 + $0x9f0] sm:$0xff] }
 0x3db   :  { %v4519_v28 = vmax.f32 %v3325_v25, %v4323_v20  ;;  %v938_v29 = vmax.f32 %v557_v26, 0.0  ;;  %v1936_v30 = vmax.f32 %v1555_v27, 0.0  ;;  %603 = vmatmul.f32.gmra.mxu0 %v133_v23  ;;  %1601 = vmatmul.f32.gmra.mxu1 %v4933_v24 }
 0x3dc   :  { %v2748_v31 = vpop.f32.mrf.mxu2  ;;  %v3942_v32 = vpop.f32.mrf.mxu3 }
 0x3dd   :  { %4716 = vst.msk [vmem:[%s9447_s3 + $0x330] sm:$0xff] %vm4613_vm0, %v4519_v28  ;;  %v2132_v33 = vmax.f32 %v938_v29, %v1936_v30  ;;  %v2749_v34 = vadd.f32 %v7408_v6, %v2748_v31  ;;  %v3943_v35 = vadd.f32 %v7408_v6, %v3942_v32  ;;  %v5133_v30 = vld [vmem:[%s9445_s0 + $0x1018] sm:$0xff] }
 0x3de   :  { %v5329_v31 = vld [vmem:[%s9445_s0 + $0x1638] sm:$0xff] }
 0x3df   :  { %v3130_v38 = vmax.f32 %v2749_v34, 0.0  ;;  %v4324_v8 = vmax.f32 %v3943_v35, 0.0 }
 0x3e0   :  { %v559_v39 = vpop.f32.mrf.mxu0  ;;  %v1557_v16 = vpop.f32.mrf.mxu1 }
 0x3e1   :  { %v3326_v44 = vmax.f32 %v2132_v33, %v3130_v38  ;;  %2798 = vmatmul.f32.gmra.mxu2 %v5130_v36  ;;  %v560_v45 = vadd.f32 %v7408_v6, %v559_v39  ;;  %v1558_v46 = vadd.f32 %v7408_v6, %v1557_v16  ;;  %3992 = vmatmul.f32.gmra.mxu3 %v5326_v37  ;;  %v137_v36 = vld [vmem:[%s9445_s0 + $0x3d8] sm:$0xff]  ;;  %v7847_v38 = vld [vmem:[%s9446_s2] ss:$0 sm:$0xff] }
 0x3e3   :  { %v4520_v47 = vmax.f32 %v3326_v44, %v4324_v8  ;;  %v939_v48 = vmax.f32 %v560_v45, 0.0  ;;  %v1937_v49 = vmax.f32 %v1558_v46, 0.0  ;;  %606 = vmatmul.f32.gmra.mxu0 %v134_v41  ;;  %1604 = vmatmul.f32.gmra.mxu1 %v4934_v43 }
 0x3e4   :  { %v2751_v50 = vpop.f32.mrf.mxu2  ;;  %v3945_v51 = vpop.f32.mrf.mxu3 }
 0x3e5   :  { %4717 = vst.msk [vmem:[%s9447_s3 + $0x338] sm:$0xff] %vm4613_vm0, %v4520_v47  ;;  %v2133_v52 = vmax.f32 %v939_v48, %v1937_v49  ;;  %v2752_v53 = vadd.f32 %v7408_v6, %v2751_v50  ;;  %v3946_v54 = vadd.f32 %v7408_v6, %v3945_v51  ;;  %v5134_v49 = vld [vmem:[%s9445_s0 + $0x1020] sm:$0xff] }
 0x3e6   :  { %v5330_v50 = vld [vmem:[%s9445_s0 + $0x1640] sm:$0xff] }
 0x3e7   :  { %v3131_v57 = vmax.f32 %v2752_v53, 0.0  ;;  %v4325_v58 = vmax.f32 %v3946_v54, 0.0 }
 0x3e8   :  { %v562_v59 = vpop.f32.mrf.mxu0  ;;  %v1560_v60 = vpop.f32.mrf.mxu1 }
 0x3e9   :  { %v3327_v63 = vmax.f32 %v2133_v52, %v3131_v57  ;;  %2801 = vmatmul.f32.gmra.mxu2 %v5131_v55  ;;  %v563_v0 = vadd.f32 %v7408_v6, %v562_v59  ;;  %v1561_v1 = vadd.f32 %v7408_v6, %v1560_v60  ;;  %3995 = vmatmul.f32.gmra.mxu3 %v5327_v56  ;;  %v138_v55 = vld [vmem:[%s9445_s0 + $0x3e0] sm:$0xff] }
 0x3ea   :  { %v4938_v56 = vld [vmem:[%s9445_s0 + $0xa00] sm:$0xff] }
 0x3eb   :  { %v4521_v2 = vmax.f32 %v3327_v63, %v4325_v58  ;;  %v940_v3 = vmax.f32 %v563_v0, 0.0  ;;  %v1938_v4 = vmax.f32 %v1561_v1, 0.0  ;;  %609 = vmatmul.f32.gmra.mxu0 %v135_v61  ;;  %1607 = vmatmul.f32.gmra.mxu1 %v4935_v62 }
 0x3ec   :  { %v2754_v5 = vpop.f32.mrf.mxu2  ;;  %v3948_v40 = vpop.f32.mrf.mxu3 }
 0x3ed   :  { %4718 = vst.msk [vmem:[%s9447_s3 + $0x340] sm:$0xff] %vm4613_vm0, %v4521_v2  ;;  %v2134_v7 = vmax.f32 %v940_v3, %v1938_v4  ;;  %v2755_v42 = vadd.f32 %v7408_v6, %v2754_v5  ;;  %v3949_v9 = vadd.f32 %v7408_v6, %v3948_v40  ;;  %v5135_v4 = vld [vmem:[%s9445_s0 + $0x1028] sm:$0xff] }
 0x3ee   :  { %v5331_v5 = vld [vmem:[%s9445_s0 + $0x1648] sm:$0xff] }
 0x3ef   :  { %v3132_v12 = vmax.f32 %v2755_v42, 0.0  ;;  %v4326_v13 = vmax.f32 %v3949_v9, 0.0 }
 0x3f0   :  { %v565_v14 = vpop.f32.mrf.mxu0  ;;  %v1563_v15 = vpop.f32.mrf.mxu1 }
 0x3f1   :  { %v3328_v19 = vmax.f32 %v2134_v7, %v3132_v12  ;;  %2804 = vmatmul.f32.gmra.mxu2 %v5132_v10  ;;  %v566_v20 = vadd.f32 %v7408_v6, %v565_v14  ;;  %v1564_v21 = vadd.f32 %v7408_v6, %v1563_v15  ;;  %3998 = vmatmul.f32.gmra.mxu3 %v5328_v11  ;;  %v139_v10 = vld [vmem:[%s9445_s0 + $0x3e8] sm:$0xff] }
 0x3f2   :  { %v4939_v11 = vld [vmem:[%s9445_s0 + $0xa08] sm:$0xff] }
 0x3f3   :  { %v4522_v22 = vmax.f32 %v3328_v19, %v4326_v13  ;;  %v941_v23 = vmax.f32 %v566_v20, 0.0  ;;  %v1939_v24 = vmax.f32 %v1564_v21, 0.0  ;;  %612 = vmatmul.f32.gmra.mxu0 %v136_v17  ;;  %1610 = vmatmul.f32.gmra.mxu1 %v4936_v18 }
 0x3f4   :  { %v2757_v25 = vpop.f32.mrf.mxu2  ;;  %v3951_v26 = vpop.f32.mrf.mxu3 }
 0x3f5   :  { %4719 = vst.msk [vmem:[%s9447_s3 + $0x348] sm:$0xff] %vm4613_vm0, %v4522_v22  ;;  %v2135_v27 = vmax.f32 %v941_v23, %v1939_v24  ;;  %v2758_v28 = vadd.f32 %v7408_v6, %v2757_v25  ;;  %v3952_v29 = vadd.f32 %v7408_v6, %v3951_v26  ;;  %v4937_v6 = vld [vmem:[%s9445_s0 + $0x9f8] sm:$0xff]  ;;  %v5136_v24 = vld [vmem:[%s9445_s0 + $0x1030] sm:$0xff] }
 0x3f6   :  { %v5332_v25 = vld [vmem:[%s9445_s0 + $0x1650] sm:$0xff] }
 0x3f7   :  { %v3133_v32 = vmax.f32 %v2758_v28, 0.0  ;;  %v4327_v33 = vmax.f32 %v3952_v29, 0.0 }
 0x3f8   :  { %v568_v34 = vpop.f32.mrf.mxu0  ;;  %v1566_v35 = vpop.f32.mrf.mxu1 }
 0x3f9   :  { %v3329_v37 = vmax.f32 %v2135_v27, %v3133_v32  ;;  %2807 = vmatmul.f32.gmra.mxu2 %v5133_v30  ;;  %v569_v8 = vadd.f32 %v7847_v38, %v568_v34  ;;  %v1567_v39 = vadd.f32 %v7847_v38, %v1566_v35  ;;  %4001 = vmatmul.f32.gmra.mxu3 %v5329_v31  ;;  %v140_v30 = vld [vmem:[%s9445_s0 + $0x3f0] sm:$0xff] }
 0x3fa   :  { %v4940_v31 = vld [vmem:[%s9445_s0 + $0xa10] sm:$0xff] }
 0x3fb   :  { %v4523_v16 = vmax.f32 %v3329_v37, %v4327_v33  ;;  %v942_v41 = vmax.f32 %v569_v8, 0.0  ;;  %v1940_v43 = vmax.f32 %v1567_v39, 0.0  ;;  %615 = vmatmul.f32.gmra.mxu0 %v137_v36  ;;  %1613 = vmatmul.f32.gmra.mxu1 %v4937_v6 }
 0x3fc   :  { %v2760_v44 = vpop.f32.mrf.mxu2  ;;  %v3954_v45 = vpop.f32.mrf.mxu3 }
 0x3fd   :  { %4720 = vst.msk [vmem:[%s9447_s3 + $0x350] sm:$0xff] %vm4613_vm0, %v4523_v16  ;;  %v2136_v46 = vmax.f32 %v942_v41, %v1940_v43  ;;  %v2761_v47 = vadd.f32 %v7847_v38, %v2760_v44  ;;  %v3955_v48 = vadd.f32 %v7847_v38, %v3954_v45  ;;  %v5137_v43 = vld [vmem:[%s9445_s0 + $0x1038] sm:$0xff] }
 0x3fe   :  { %v5333_v44 = vld [vmem:[%s9445_s0 + $0x1658] sm:$0xff] }
 0x3ff   :  { %v3134_v51 = vmax.f32 %v2761_v47, 0.0  ;;  %v4328_v52 = vmax.f32 %v3955_v48, 0.0 }
 0x400   :  { %v571_v53 = vpop.f32.mrf.mxu0  ;;  %v1569_v54 = vpop.f32.mrf.mxu1 }
 0x401   :  { %v3330_v57 = vmax.f32 %v2136_v46, %v3134_v51  ;;  %2810 = vmatmul.f32.gmra.mxu2 %v5134_v49  ;;  %v572_v58 = vadd.f32 %v7847_v38, %v571_v53  ;;  %v1570_v59 = vadd.f32 %v7847_v38, %v1569_v54  ;;  %4004 = vmatmul.f32.gmra.mxu3 %v5330_v50  ;;  %v141_v49 = vld [vmem:[%s9445_s0 + $0x3f8] sm:$0xff] }
 0x402   :  { %v4941_v50 = vld [vmem:[%s9445_s0 + $0xa18] sm:$0xff] }
 0x403   :  { %v4524_v60 = vmax.f32 %v3330_v57, %v4328_v52  ;;  %v943_v61 = vmax.f32 %v572_v58, 0.0  ;;  %v1941_v62 = vmax.f32 %v1570_v59, 0.0  ;;  %618 = vmatmul.f32.gmra.mxu0 %v138_v55  ;;  %1616 = vmatmul.f32.gmra.mxu1 %v4938_v56 }
 0x404   :  { %v2763_v63 = vpop.f32.mrf.mxu2  ;;  %v3957_v0 = vpop.f32.mrf.mxu3 }
 0x405   :  { %4721 = vst.msk [vmem:[%s9447_s3 + $0x358] sm:$0xff] %vm4613_vm0, %v4524_v60  ;;  %v2137_v1 = vmax.f32 %v943_v61, %v1941_v62  ;;  %v2764_v2 = vadd.f32 %v7847_v38, %v2763_v63  ;;  %v3958_v3 = vadd.f32 %v7847_v38, %v3957_v0  ;;  %v5138_v62 = vld [vmem:[%s9445_s0 + $0x1040] sm:$0xff] }
 0x406   :  { %v5334_v63 = vld [vmem:[%s9445_s0 + $0x1660] sm:$0xff] }
 0x407   :  { %v3135_v40 = vmax.f32 %v2764_v2, 0.0  ;;  %v4329_v7 = vmax.f32 %v3958_v3, 0.0 }
 0x408   :  { %v574_v42 = vpop.f32.mrf.mxu0  ;;  %v1572_v9 = vpop.f32.mrf.mxu1 }
 0x409   :  { %v3331_v12 = vmax.f32 %v2137_v1, %v3135_v40  ;;  %2813 = vmatmul.f32.gmra.mxu2 %v5135_v4  ;;  %v575_v13 = vadd.f32 %v7847_v38, %v574_v42  ;;  %v1573_v14 = vadd.f32 %v7847_v38, %v1572_v9  ;;  %4007 = vmatmul.f32.gmra.mxu3 %v5331_v5  ;;  %v142_v4 = vld [vmem:[%s9445_s0 + $0x400] sm:$0xff] }
 0x40a   :  { %v4942_v5 = vld [vmem:[%s9445_s0 + $0xa20] sm:$0xff] }
 0x40b   :  { %v4525_v15 = vmax.f32 %v3331_v12, %v4329_v7  ;;  %v944_v17 = vmax.f32 %v575_v13, 0.0  ;;  %v1942_v18 = vmax.f32 %v1573_v14, 0.0  ;;  %621 = vmatmul.f32.gmra.mxu0 %v139_v10  ;;  %1619 = vmatmul.f32.gmra.mxu1 %v4939_v11 }
 0x40c   :  { %v2766_v19 = vpop.f32.mrf.mxu2  ;;  %v3960_v20 = vpop.f32.mrf.mxu3 }
 0x40d   :  { %4722 = vst.msk [vmem:[%s9447_s3 + $0x360] sm:$0xff] %vm4613_vm0, %v4525_v15  ;;  %v2138_v21 = vmax.f32 %v944_v17, %v1942_v18  ;;  %v2767_v22 = vadd.f32 %v7847_v38, %v2766_v19  ;;  %v3961_v23 = vadd.f32 %v7847_v38, %v3960_v20  ;;  %v5139_v18 = vld [vmem:[%s9445_s0 + $0x1048] sm:$0xff] }
 0x40e   :  { %v5335_v19 = vld [vmem:[%s9445_s0 + $0x1668] sm:$0xff] }
 0x40f   :  { %v3136_v26 = vmax.f32 %v2767_v22, 0.0  ;;  %v4330_v27 = vmax.f32 %v3961_v23, 0.0 }
 0x410   :  { %v577_v28 = vpop.f32.mrf.mxu0  ;;  %v1575_v29 = vpop.f32.mrf.mxu1 }
 0x411   :  { %v3332_v32 = vmax.f32 %v2138_v21, %v3136_v26  ;;  %2816 = vmatmul.f32.gmra.mxu2 %v5136_v24  ;;  %v578_v33 = vadd.f32 %v7847_v38, %v577_v28  ;;  %v1576_v34 = vadd.f32 %v7847_v38, %v1575_v29  ;;  %4010 = vmatmul.f32.gmra.mxu3 %v5332_v25  ;;  %v143_v24 = vld [vmem:[%s9445_s0 + $0x408] sm:$0xff] }
 0x412   :  { %v4943_v25 = vld [vmem:[%s9445_s0 + $0xa28] sm:$0xff] }
 0x413   :  { %v4526_v35 = vmax.f32 %v3332_v32, %v4330_v27  ;;  %v945_v36 = vmax.f32 %v578_v33, 0.0  ;;  %v1943_v6 = vmax.f32 %v1576_v34, 0.0  ;;  %624 = vmatmul.f32.gmra.mxu0 %v140_v30  ;;  %1622 = vmatmul.f32.gmra.mxu1 %v4940_v31 }
 0x414   :  { %v2769_v37 = vpop.f32.mrf.mxu2  ;;  %v3963_v8 = vpop.f32.mrf.mxu3 }
 0x415   :  { %4723 = vst.msk [vmem:[%s9447_s3 + $0x368] sm:$0xff] %vm4613_vm0, %v4526_v35  ;;  %v2139_v39 = vmax.f32 %v945_v36, %v1943_v6  ;;  %v2770_v16 = vadd.f32 %v7847_v38, %v2769_v37  ;;  %v3964_v41 = vadd.f32 %v7847_v38, %v3963_v8  ;;  %v5140_v6 = vld [vmem:[%s9445_s0 + $0x1050] sm:$0xff] }
 0x416   :  { %v5336_v37 = vld [vmem:[%s9445_s0 + $0x1670] sm:$0xff] }
 0x417   :  { %v3137_v45 = vmax.f32 %v2770_v16, 0.0  ;;  %v4331_v46 = vmax.f32 %v3964_v41, 0.0 }
 0x418   :  { %v580_v47 = vpop.f32.mrf.mxu0  ;;  %v1578_v48 = vpop.f32.mrf.mxu1 }
 0x419   :  { %v3333_v51 = vmax.f32 %v2139_v39, %v3137_v45  ;;  %2819 = vmatmul.f32.gmra.mxu2 %v5137_v43  ;;  %v581_v52 = vadd.f32 %v7847_v38, %v580_v47  ;;  %v1579_v53 = vadd.f32 %v7847_v38, %v1578_v48  ;;  %4013 = vmatmul.f32.gmra.mxu3 %v5333_v44  ;;  %v144_v43 = vld [vmem:[%s9445_s0 + $0x410] sm:$0xff] }
 0x41a   :  { %v4944_v44 = vld [vmem:[%s9445_s0 + $0xa30] sm:$0xff] }
 0x41b   :  { %v4527_v54 = vmax.f32 %v3333_v51, %v4331_v46  ;;  %v946_v55 = vmax.f32 %v581_v52, 0.0  ;;  %v1944_v56 = vmax.f32 %v1579_v53, 0.0  ;;  %627 = vmatmul.f32.gmra.mxu0 %v141_v49  ;;  %1625 = vmatmul.f32.gmra.mxu1 %v4941_v50 }
 0x41c   :  { %v2772_v57 = vpop.f32.mrf.mxu2  ;;  %v3966_v58 = vpop.f32.mrf.mxu3 }
 0x41d   :  { %4724 = vst.msk [vmem:[%s9447_s3 + $0x370] sm:$0xff] %vm4613_vm0, %v4527_v54  ;;  %v2140_v59 = vmax.f32 %v946_v55, %v1944_v56  ;;  %v2773_v60 = vadd.f32 %v7847_v38, %v2772_v57  ;;  %v3967_v61 = vadd.f32 %v7847_v38, %v3966_v58  ;;  %v5141_v56 = vld [vmem:[%s9445_s0 + $0x1058] sm:$0xff] }
 0x41e   :  { %v5337_v57 = vld [vmem:[%s9445_s0 + $0x1678] sm:$0xff] }
 0x41f   :  { %v3138_v0 = vmax.f32 %v2773_v60, 0.0  ;;  %v4332_v1 = vmax.f32 %v3967_v61, 0.0 }
 0x420   :  { %v583_v2 = vpop.f32.mrf.mxu0  ;;  %v1581_v3 = vpop.f32.mrf.mxu1 }
 0x421   :  { %v3334_v40 = vmax.f32 %v2140_v59, %v3138_v0  ;;  %2822 = vmatmul.f32.gmra.mxu2 %v5138_v62  ;;  %v584_v7 = vadd.f32 %v7847_v38, %v583_v2  ;;  %v1582_v42 = vadd.f32 %v7847_v38, %v1581_v3  ;;  %4016 = vmatmul.f32.gmra.mxu3 %v5334_v63  ;;  %v145_v62 = vld [vmem:[%s9445_s0 + $0x418] sm:$0xff] }
 0x422   :  { %v4945_v63 = vld [vmem:[%s9445_s0 + $0xa38] sm:$0xff] }
 0x423   :  { %v4528_v9 = vmax.f32 %v3334_v40, %v4332_v1  ;;  %v947_v10 = vmax.f32 %v584_v7, 0.0  ;;  %v1945_v11 = vmax.f32 %v1582_v42, 0.0  ;;  %630 = vmatmul.f32.gmra.mxu0 %v142_v4  ;;  %1628 = vmatmul.f32.gmra.mxu1 %v4942_v5 }
 0x424   :  { %v2775_v12 = vpop.f32.mrf.mxu2  ;;  %v3969_v13 = vpop.f32.mrf.mxu3 }
 0x425   :  { %4725 = vst.msk [vmem:[%s9447_s3 + $0x378] sm:$0xff] %vm4613_vm0, %v4528_v9  ;;  %v2141_v14 = vmax.f32 %v947_v10, %v1945_v11  ;;  %v2776_v15 = vadd.f32 %v7847_v38, %v2775_v12  ;;  %v3970_v17 = vadd.f32 %v7847_v38, %v3969_v13  ;;  %v5142_v11 = vld [vmem:[%s9445_s0 + $0x1060] sm:$0xff] }
 0x426   :  { %v5338_v12 = vld [vmem:[%s9445_s0 + $0x1680] sm:$0xff] }
 0x427   :  { %v3139_v20 = vmax.f32 %v2776_v15, 0.0  ;;  %v4333_v21 = vmax.f32 %v3970_v17, 0.0 }
 0x428   :  { %v586_v22 = vpop.f32.mrf.mxu0  ;;  %v1584_v23 = vpop.f32.mrf.mxu1 }
 0x429   :  { %v3335_v26 = vmax.f32 %v2141_v14, %v3139_v20  ;;  %2825 = vmatmul.f32.gmra.mxu2 %v5139_v18  ;;  %v587_v27 = vadd.f32 %v7847_v38, %v586_v22  ;;  %v1585_v28 = vadd.f32 %v7847_v38, %v1584_v23  ;;  %4019 = vmatmul.f32.gmra.mxu3 %v5335_v19  ;;  %v146_v18 = vld [vmem:[%s9445_s0 + $0x420] sm:$0xff] }
 0x42a   :  { %v4946_v19 = vld [vmem:[%s9445_s0 + $0xa40] sm:$0xff] }
 0x42b   :  { %v4529_v29 = vmax.f32 %v3335_v26, %v4333_v21  ;;  %v948_v30 = vmax.f32 %v587_v27, 0.0  ;;  %v1946_v31 = vmax.f32 %v1585_v28, 0.0  ;;  %633 = vmatmul.f32.gmra.mxu0 %v143_v24  ;;  %1631 = vmatmul.f32.gmra.mxu1 %v4943_v25 }
 0x42c   :  { %v2778_v32 = vpop.f32.mrf.mxu2  ;;  %v3972_v33 = vpop.f32.mrf.mxu3 }
 0x42d   :  { %4726 = vst.msk [vmem:[%s9447_s3 + $0x380] sm:$0xff] %vm4613_vm0, %v4529_v29  ;;  %v2142_v34 = vmax.f32 %v948_v30, %v1946_v31  ;;  %v2779_v35 = vadd.f32 %v7847_v38, %v2778_v32  ;;  %v3973_v36 = vadd.f32 %v7847_v38, %v3972_v33  ;;  %v5143_v31 = vld [vmem:[%s9445_s0 + $0x1068] sm:$0xff] }
 0x42e   :  { %v5339_v32 = vld [vmem:[%s9445_s0 + $0x1688] sm:$0xff] }
 0x42f   :  { %v3140_v8 = vmax.f32 %v2779_v35, 0.0  ;;  %v4334_v39 = vmax.f32 %v3973_v36, 0.0 }
 0x430   :  { %v589_v16 = vpop.f32.mrf.mxu0  ;;  %v1587_v41 = vpop.f32.mrf.mxu1 }
 0x431   :  { %v3336_v45 = vmax.f32 %v2142_v34, %v3140_v8  ;;  %2828 = vmatmul.f32.gmra.mxu2 %v5140_v6  ;;  %v590_v46 = vadd.f32 %v7847_v38, %v589_v16  ;;  %v1588_v47 = vadd.f32 %v7847_v38, %v1587_v41  ;;  %4022 = vmatmul.f32.gmra.mxu3 %v5336_v37  ;;  %v147_v6 = vld [vmem:[%s9445_s0 + $0x428] sm:$0xff] }
 0x432   :  { %v4947_v37 = vld [vmem:[%s9445_s0 + $0xa48] sm:$0xff] }
 0x433   :  { %v4530_v48 = vmax.f32 %v3336_v45, %v4334_v39  ;;  %v949_v49 = vmax.f32 %v590_v46, 0.0  ;;  %v1947_v50 = vmax.f32 %v1588_v47, 0.0  ;;  %636 = vmatmul.f32.gmra.mxu0 %v144_v43  ;;  %1634 = vmatmul.f32.gmra.mxu1 %v4944_v44 }
 0x434   :  { %v2781_v51 = vpop.f32.mrf.mxu2  ;;  %v3975_v52 = vpop.f32.mrf.mxu3 }
 0x435   :  { %4727 = vst.msk [vmem:[%s9447_s3 + $0x388] sm:$0xff] %vm4613_vm0, %v4530_v48  ;;  %v2143_v53 = vmax.f32 %v949_v49, %v1947_v50  ;;  %v2782_v54 = vadd.f32 %v7847_v38, %v2781_v51  ;;  %v3976_v55 = vadd.f32 %v7847_v38, %v3975_v52  ;;  %v5144_v50 = vld [vmem:[%s9445_s0 + $0x1070] sm:$0xff] }
 0x436   :  { %v5340_v51 = vld [vmem:[%s9445_s0 + $0x1690] sm:$0xff] }
 0x437   :  { %v3141_v58 = vmax.f32 %v2782_v54, 0.0  ;;  %v4335_v59 = vmax.f32 %v3976_v55, 0.0 }
 0x438   :  { %v592_v60 = vpop.f32.mrf.mxu0  ;;  %v1590_v61 = vpop.f32.mrf.mxu1 }
 0x439   :  { %v3337_v0 = vmax.f32 %v2143_v53, %v3141_v58  ;;  %2831 = vmatmul.f32.gmra.mxu2 %v5141_v56  ;;  %v593_v1 = vadd.f32 %v7847_v38, %v592_v60  ;;  %v1591_v2 = vadd.f32 %v7847_v38, %v1590_v61  ;;  %4025 = vmatmul.f32.gmra.mxu3 %v5337_v57  ;;  %v148_v56 = vld [vmem:[%s9445_s0 + $0x430] sm:$0xff] }
 0x43a   :  { %v4948_v57 = vld [vmem:[%s9445_s0 + $0xa50] sm:$0xff] }
 0x43b   :  { %v4531_v3 = vmax.f32 %v3337_v0, %v4335_v59  ;;  %v950_v4 = vmax.f32 %v593_v1, 0.0  ;;  %v1948_v5 = vmax.f32 %v1591_v2, 0.0  ;;  %639 = vmatmul.f32.gmra.mxu0 %v145_v62  ;;  %1637 = vmatmul.f32.gmra.mxu1 %v4945_v63 }
 0x43c   :  { %v2784_v40 = vpop.f32.mrf.mxu2  ;;  %v3978_v7 = vpop.f32.mrf.mxu3 }
 0x43d   :  { %4728 = vst.msk [vmem:[%s9447_s3 + $0x390] sm:$0xff] %vm4613_vm0, %v4531_v3  ;;  %v2144_v42 = vmax.f32 %v950_v4, %v1948_v5  ;;  %v2785_v9 = vadd.f32 %v7847_v38, %v2784_v40  ;;  %v3979_v10 = vadd.f32 %v7847_v38, %v3978_v7  ;;  %v5145_v5 = vld [vmem:[%s9445_s0 + $0x1078] sm:$0xff] }
 0x43e   :  { %v5341_v40 = vld [vmem:[%s9445_s0 + $0x1698] sm:$0xff] }
 0x43f   :  { %v3142_v13 = vmax.f32 %v2785_v9, 0.0  ;;  %v4336_v14 = vmax.f32 %v3979_v10, 0.0 }
 0x440   :  { %v595_v15 = vpop.f32.mrf.mxu0  ;;  %v1593_v17 = vpop.f32.mrf.mxu1 }
 0x441   :  { %v3338_v20 = vmax.f32 %v2144_v42, %v3142_v13  ;;  %2834 = vmatmul.f32.gmra.mxu2 %v5142_v11  ;;  %v596_v21 = vadd.f32 %v7847_v38, %v595_v15  ;;  %v1594_v22 = vadd.f32 %v7847_v38, %v1593_v17  ;;  %4028 = vmatmul.f32.gmra.mxu3 %v5338_v12  ;;  %v149_v11 = vld [vmem:[%s9445_s0 + $0x438] sm:$0xff] }
 0x442   :  { %v4949_v12 = vld [vmem:[%s9445_s0 + $0xa58] sm:$0xff] }
 0x443   :  { %v4532_v23 = vmax.f32 %v3338_v20, %v4336_v14  ;;  %v951_v24 = vmax.f32 %v596_v21, 0.0  ;;  %v1949_v25 = vmax.f32 %v1594_v22, 0.0  ;;  %642 = vmatmul.f32.gmra.mxu0 %v146_v18  ;;  %1640 = vmatmul.f32.gmra.mxu1 %v4946_v19 }
 0x444   :  { %v2787_v26 = vpop.f32.mrf.mxu2  ;;  %v3981_v27 = vpop.f32.mrf.mxu3 }
 0x445   :  { %4729 = vst.msk [vmem:[%s9447_s3 + $0x398] sm:$0xff] %vm4613_vm0, %v4532_v23  ;;  %v2145_v28 = vmax.f32 %v951_v24, %v1949_v25  ;;  %v2788_v29 = vadd.f32 %v7847_v38, %v2787_v26  ;;  %v3982_v30 = vadd.f32 %v7847_v38, %v3981_v27  ;;  %v5146_v25 = vld [vmem:[%s9445_s0 + $0x1080] sm:$0xff] }
 0x446   :  { %v5342_v26 = vld [vmem:[%s9445_s0 + $0x16a0] sm:$0xff] }
 0x447   :  { %v3143_v33 = vmax.f32 %v2788_v29, 0.0  ;;  %v4337_v34 = vmax.f32 %v3982_v30, 0.0 }
 0x448   :  { %v598_v35 = vpop.f32.mrf.mxu0  ;;  %v1596_v36 = vpop.f32.mrf.mxu1 }
 0x449   :  { %v3339_v8 = vmax.f32 %v2145_v28, %v3143_v33  ;;  %2837 = vmatmul.f32.gmra.mxu2 %v5143_v31  ;;  %v599_v39 = vadd.f32 %v7847_v38, %v598_v35  ;;  %v1597_v16 = vadd.f32 %v7847_v38, %v1596_v36  ;;  %4031 = vmatmul.f32.gmra.mxu3 %v5339_v32  ;;  %v150_v31 = vld [vmem:[%s9445_s0 + $0x440] sm:$0xff] }
 0x44a   :  { %v4950_v32 = vld [vmem:[%s9445_s0 + $0xa60] sm:$0xff] }
 0x44b   :  { %v4533_v41 = vmax.f32 %v3339_v8, %v4337_v34  ;;  %v952_v43 = vmax.f32 %v599_v39, 0.0  ;;  %v1950_v44 = vmax.f32 %v1597_v16, 0.0  ;;  %645 = vmatmul.f32.gmra.mxu0 %v147_v6  ;;  %1643 = vmatmul.f32.gmra.mxu1 %v4947_v37 }
 0x44c   :  { %v2790_v45 = vpop.f32.mrf.mxu2  ;;  %v3984_v46 = vpop.f32.mrf.mxu3 }
 0x44d   :  { %4730 = vst.msk [vmem:[%s9447_s3 + $0x3a0] sm:$0xff] %vm4613_vm0, %v4533_v41  ;;  %v2146_v47 = vmax.f32 %v952_v43, %v1950_v44  ;;  %v2791_v48 = vadd.f32 %v7847_v38, %v2790_v45  ;;  %v3985_v49 = vadd.f32 %v7847_v38, %v3984_v46  ;;  %v5147_v44 = vld [vmem:[%s9445_s0 + $0x1088] sm:$0xff] }
 0x44e   :  { %v5343_v45 = vld [vmem:[%s9445_s0 + $0x16a8] sm:$0xff] }
 0x44f   :  { %v3144_v52 = vmax.f32 %v2791_v48, 0.0  ;;  %v4338_v53 = vmax.f32 %v3985_v49, 0.0 }
 0x450   :  { %v601_v54 = vpop.f32.mrf.mxu0  ;;  %v1599_v55 = vpop.f32.mrf.mxu1 }
 0x451   :  { %v3340_v58 = vmax.f32 %v2146_v47, %v3144_v52  ;;  %2840 = vmatmul.f32.gmra.mxu2 %v5144_v50  ;;  %v602_v59 = vadd.f32 %v7847_v38, %v601_v54  ;;  %v1600_v60 = vadd.f32 %v7847_v38, %v1599_v55  ;;  %4034 = vmatmul.f32.gmra.mxu3 %v5340_v51  ;;  %v151_v50 = vld [vmem:[%s9445_s0 + $0x448] sm:$0xff] }
 0x452   :  { %v4951_v51 = vld [vmem:[%s9445_s0 + $0xa68] sm:$0xff] }
 0x453   :  { %v4534_v61 = vmax.f32 %v3340_v58, %v4338_v53  ;;  %v953_v62 = vmax.f32 %v602_v59, 0.0  ;;  %v1951_v63 = vmax.f32 %v1600_v60, 0.0  ;;  %648 = vmatmul.f32.gmra.mxu0 %v148_v56  ;;  %1646 = vmatmul.f32.gmra.mxu1 %v4948_v57 }
 0x454   :  { %v2793_v0 = vpop.f32.mrf.mxu2  ;;  %v3987_v1 = vpop.f32.mrf.mxu3 }
 0x455   :  { %4731 = vst.msk [vmem:[%s9447_s3 + $0x3a8] sm:$0xff] %vm4613_vm0, %v4534_v61  ;;  %v2147_v2 = vmax.f32 %v953_v62, %v1951_v63  ;;  %v2794_v3 = vadd.f32 %v7847_v38, %v2793_v0  ;;  %v3988_v4 = vadd.f32 %v7847_v38, %v3987_v1  ;;  %v5148_v63 = vld [vmem:[%s9445_s0 + $0x1090] sm:$0xff] }
 0x456   :  { %v5344_v0 = vld [vmem:[%s9445_s0 + $0x16b0] sm:$0xff] }
 0x457   :  { %v3145_v7 = vmax.f32 %v2794_v3, 0.0  ;;  %v4339_v42 = vmax.f32 %v3988_v4, 0.0 }
 0x458   :  { %v604_v9 = vpop.f32.mrf.mxu0  ;;  %v1602_v10 = vpop.f32.mrf.mxu1 }
 0x459   :  { %v3341_v13 = vmax.f32 %v2147_v2, %v3145_v7  ;;  %2843 = vmatmul.f32.gmra.mxu2 %v5145_v5  ;;  %v605_v14 = vadd.f32 %v7847_v38, %v604_v9  ;;  %v1603_v15 = vadd.f32 %v7847_v38, %v1602_v10  ;;  %4037 = vmatmul.f32.gmra.mxu3 %v5341_v40  ;;  %v152_v5 = vld [vmem:[%s9445_s0 + $0x450] sm:$0xff] }
 0x45a   :  { %v4952_v40 = vld [vmem:[%s9445_s0 + $0xa70] sm:$0xff] }
 0x45b   :  { %v4535_v17 = vmax.f32 %v3341_v13, %v4339_v42  ;;  %v954_v18 = vmax.f32 %v605_v14, 0.0  ;;  %v1952_v19 = vmax.f32 %v1603_v15, 0.0  ;;  %651 = vmatmul.f32.gmra.mxu0 %v149_v11  ;;  %1649 = vmatmul.f32.gmra.mxu1 %v4949_v12 }
 0x45c   :  { %v2796_v20 = vpop.f32.mrf.mxu2  ;;  %v3990_v21 = vpop.f32.mrf.mxu3 }
 0x45d   :  { %4732 = vst.msk [vmem:[%s9447_s3 + $0x3b0] sm:$0xff] %vm4613_vm0, %v4535_v17  ;;  %v2148_v22 = vmax.f32 %v954_v18, %v1952_v19  ;;  %v2797_v23 = vadd.f32 %v7847_v38, %v2796_v20  ;;  %v3991_v24 = vadd.f32 %v7847_v38, %v3990_v21  ;;  %v5149_v19 = vld [vmem:[%s9445_s0 + $0x1098] sm:$0xff] }
 0x45e   :  { %v5345_v20 = vld [vmem:[%s9445_s0 + $0x16b8] sm:$0xff] }
 0x45f   :  { %v3146_v27 = vmax.f32 %v2797_v23, 0.0  ;;  %v4340_v28 = vmax.f32 %v3991_v24, 0.0 }
 0x460   :  { %v607_v29 = vpop.f32.mrf.mxu0  ;;  %v1605_v30 = vpop.f32.mrf.mxu1 }
 0x461   :  { %v3342_v33 = vmax.f32 %v2148_v22, %v3146_v27  ;;  %2846 = vmatmul.f32.gmra.mxu2 %v5146_v25  ;;  %v608_v34 = vadd.f32 %v7847_v38, %v607_v29  ;;  %v1606_v35 = vadd.f32 %v7847_v38, %v1605_v30  ;;  %4040 = vmatmul.f32.gmra.mxu3 %v5342_v26  ;;  %v153_v25 = vld [vmem:[%s9445_s0 + $0x458] sm:$0xff] }
 0x462   :  { %v4953_v26 = vld [vmem:[%s9445_s0 + $0xa78] sm:$0xff] }
 0x463   :  { %v4536_v36 = vmax.f32 %v3342_v33, %v4340_v28  ;;  %v955_v6 = vmax.f32 %v608_v34, 0.0  ;;  %v1953_v37 = vmax.f32 %v1606_v35, 0.0  ;;  %654 = vmatmul.f32.gmra.mxu0 %v150_v31  ;;  %1652 = vmatmul.f32.gmra.mxu1 %v4950_v32 }
 0x464   :  { %v2799_v8 = vpop.f32.mrf.mxu2  ;;  %v3993_v39 = vpop.f32.mrf.mxu3 }
 0x465   :  { %4733 = vst.msk [vmem:[%s9447_s3 + $0x3b8] sm:$0xff] %vm4613_vm0, %v4536_v36  ;;  %v2149_v16 = vmax.f32 %v955_v6, %v1953_v37  ;;  %v2800_v41 = vadd.f32 %v7847_v38, %v2799_v8  ;;  %v3994_v43 = vadd.f32 %v7847_v38, %v3993_v39  ;;  %v5150_v37 = vld [vmem:[%s9445_s0 + $0x10a0] sm:$0xff] }
 0x466   :  { %v5346_v8 = vld [vmem:[%s9445_s0 + $0x16c0] sm:$0xff] }
 0x467   :  { %v3147_v46 = vmax.f32 %v2800_v41, 0.0  ;;  %v4341_v47 = vmax.f32 %v3994_v43, 0.0 }
 0x468   :  { %v610_v48 = vpop.f32.mrf.mxu0  ;;  %v1608_v49 = vpop.f32.mrf.mxu1 }
 0x469   :  { %v3343_v52 = vmax.f32 %v2149_v16, %v3147_v46  ;;  %2849 = vmatmul.f32.gmra.mxu2 %v5147_v44  ;;  %v611_v53 = vadd.f32 %v7847_v38, %v610_v48  ;;  %v1609_v54 = vadd.f32 %v7847_v38, %v1608_v49  ;;  %4043 = vmatmul.f32.gmra.mxu3 %v5343_v45  ;;  %v154_v44 = vld [vmem:[%s9445_s0 + $0x460] sm:$0xff] }
 0x46a   :  { %v4954_v45 = vld [vmem:[%s9445_s0 + $0xa80] sm:$0xff] }
 0x46b   :  { %v4537_v55 = vmax.f32 %v3343_v52, %v4341_v47  ;;  %v956_v56 = vmax.f32 %v611_v53, 0.0  ;;  %v1954_v57 = vmax.f32 %v1609_v54, 0.0  ;;  %657 = vmatmul.f32.gmra.mxu0 %v151_v50  ;;  %1655 = vmatmul.f32.gmra.mxu1 %v4951_v51 }
 0x46c   :  { %v2802_v58 = vpop.f32.mrf.mxu2  ;;  %v3996_v59 = vpop.f32.mrf.mxu3 }
 0x46d   :  { %4734 = vst.msk [vmem:[%s9447_s3 + $0x3c0] sm:$0xff] %vm4613_vm0, %v4537_v55  ;;  %v2150_v60 = vmax.f32 %v956_v56, %v1954_v57  ;;  %v2803_v61 = vadd.f32 %v7847_v38, %v2802_v58  ;;  %v3997_v62 = vadd.f32 %v7847_v38, %v3996_v59  ;;  %v5151_v57 = vld [vmem:[%s9445_s0 + $0x10a8] sm:$0xff] }
 0x46e   :  { %v5347_v58 = vld [vmem:[%s9445_s0 + $0x16c8] sm:$0xff] }
 0x46f   :  { %v3148_v1 = vmax.f32 %v2803_v61, 0.0  ;;  %v4342_v2 = vmax.f32 %v3997_v62, 0.0 }
 0x470   :  { %v613_v3 = vpop.f32.mrf.mxu0  ;;  %v1611_v4 = vpop.f32.mrf.mxu1 }
 0x471   :  { %v3344_v7 = vmax.f32 %v2150_v60, %v3148_v1  ;;  %2852 = vmatmul.f32.gmra.mxu2 %v5148_v63  ;;  %v614_v42 = vadd.f32 %v7847_v38, %v613_v3  ;;  %v1612_v9 = vadd.f32 %v7847_v38, %v1611_v4  ;;  %4046 = vmatmul.f32.gmra.mxu3 %v5344_v0  ;;  %v155_v63 = vld [vmem:[%s9445_s0 + $0x468] sm:$0xff] }
 0x472   :  { %v4955_v0 = vld [vmem:[%s9445_s0 + $0xa88] sm:$0xff] }
 0x473   :  { %v4538_v10 = vmax.f32 %v3344_v7, %v4342_v2  ;;  %v957_v11 = vmax.f32 %v614_v42, 0.0  ;;  %v1955_v12 = vmax.f32 %v1612_v9, 0.0  ;;  %660 = vmatmul.f32.gmra.mxu0 %v152_v5  ;;  %1658 = vmatmul.f32.gmra.mxu1 %v4952_v40 }
 0x474   :  { %v2805_v13 = vpop.f32.mrf.mxu2  ;;  %v3999_v14 = vpop.f32.mrf.mxu3 }
 0x475   :  { %4735 = vst.msk [vmem:[%s9447_s3 + $0x3c8] sm:$0xff] %vm4613_vm0, %v4538_v10  ;;  %v2151_v15 = vmax.f32 %v957_v11, %v1955_v12  ;;  %v2806_v17 = vadd.f32 %v7847_v38, %v2805_v13  ;;  %v4000_v18 = vadd.f32 %v7847_v38, %v3999_v14  ;;  %v5152_v12 = vld [vmem:[%s9445_s0 + $0x10b0] sm:$0xff] }
 0x476   :  { %v5348_v13 = vld [vmem:[%s9445_s0 + $0x16d0] sm:$0xff] }
 0x477   :  { %v3149_v21 = vmax.f32 %v2806_v17, 0.0  ;;  %v4343_v22 = vmax.f32 %v4000_v18, 0.0 }
 0x478   :  { %v616_v23 = vpop.f32.mrf.mxu0  ;;  %v1614_v24 = vpop.f32.mrf.mxu1 }
 0x479   :  { %v3345_v27 = vmax.f32 %v2151_v15, %v3149_v21  ;;  %2855 = vmatmul.f32.gmra.mxu2 %v5149_v19  ;;  %v617_v28 = vadd.f32 %v7847_v38, %v616_v23  ;;  %v1615_v29 = vadd.f32 %v7847_v38, %v1614_v24  ;;  %4049 = vmatmul.f32.gmra.mxu3 %v5345_v20  ;;  %v156_v19 = vld [vmem:[%s9445_s0 + $0x470] sm:$0xff] }
 0x47a   :  { %v4956_v20 = vld [vmem:[%s9445_s0 + $0xa90] sm:$0xff] }
 0x47b   :  { %v4539_v30 = vmax.f32 %v3345_v27, %v4343_v22  ;;  %v958_v31 = vmax.f32 %v617_v28, 0.0  ;;  %v1956_v32 = vmax.f32 %v1615_v29, 0.0  ;;  %663 = vmatmul.f32.gmra.mxu0 %v153_v25  ;;  %1661 = vmatmul.f32.gmra.mxu1 %v4953_v26 }
 0x47c   :  { %v2808_v33 = vpop.f32.mrf.mxu2  ;;  %v4002_v34 = vpop.f32.mrf.mxu3 }
 0x47d   :  { %4736 = vst.msk [vmem:[%s9447_s3 + $0x3d0] sm:$0xff] %vm4613_vm0, %v4539_v30  ;;  %v2152_v35 = vmax.f32 %v958_v31, %v1956_v32  ;;  %v2809_v36 = vadd.f32 %v7847_v38, %v2808_v33  ;;  %v4003_v6 = vadd.f32 %v7847_v38, %v4002_v34  ;;  %v5153_v32 = vld [vmem:[%s9445_s0 + $0x10b8] sm:$0xff] }
 0x47e   :  { %v5349_v33 = vld [vmem:[%s9445_s0 + $0x16d8] sm:$0xff] }
 0x47f   :  { %v3150_v39 = vmax.f32 %v2809_v36, 0.0  ;;  %v4344_v16 = vmax.f32 %v4003_v6, 0.0 }
 0x480   :  { %v619_v41 = vpop.f32.mrf.mxu0  ;;  %v1617_v43 = vpop.f32.mrf.mxu1 }
 0x481   :  { %v3346_v46 = vmax.f32 %v2152_v35, %v3150_v39  ;;  %2858 = vmatmul.f32.gmra.mxu2 %v5150_v37  ;;  %v620_v47 = vadd.f32 %v7847_v38, %v619_v41  ;;  %v1618_v48 = vadd.f32 %v7847_v38, %v1617_v43  ;;  %4052 = vmatmul.f32.gmra.mxu3 %v5346_v8  ;;  %v157_v37 = vld [vmem:[%s9445_s0 + $0x478] sm:$0xff] }
 0x482   :  { %v4957_v8 = vld [vmem:[%s9445_s0 + $0xa98] sm:$0xff] }
 0x483   :  { %v4540_v49 = vmax.f32 %v3346_v46, %v4344_v16  ;;  %v959_v50 = vmax.f32 %v620_v47, 0.0  ;;  %v1957_v51 = vmax.f32 %v1618_v48, 0.0  ;;  %666 = vmatmul.f32.gmra.mxu0 %v154_v44  ;;  %1664 = vmatmul.f32.gmra.mxu1 %v4954_v45 }
 0x484   :  { %v2811_v52 = vpop.f32.mrf.mxu2  ;;  %v4005_v53 = vpop.f32.mrf.mxu3 }
 0x485   :  { %4737 = vst.msk [vmem:[%s9447_s3 + $0x3d8] sm:$0xff] %vm4613_vm0, %v4540_v49  ;;  %v2153_v54 = vmax.f32 %v959_v50, %v1957_v51  ;;  %v2812_v55 = vadd.f32 %v7847_v38, %v2811_v52  ;;  %v4006_v56 = vadd.f32 %v7847_v38, %v4005_v53  ;;  %v5154_v51 = vld [vmem:[%s9445_s0 + $0x10c0] sm:$0xff] }
 0x486   :  { %v5350_v52 = vld [vmem:[%s9445_s0 + $0x16e0] sm:$0xff] }
 0x487   :  { %v3151_v59 = vmax.f32 %v2812_v55, 0.0  ;;  %v4345_v60 = vmax.f32 %v4006_v56, 0.0 }
 0x488   :  { %v622_v61 = vpop.f32.mrf.mxu0  ;;  %v1620_v62 = vpop.f32.mrf.mxu1 }
 0x489   :  { %v3347_v1 = vmax.f32 %v2153_v54, %v3151_v59  ;;  %2861 = vmatmul.f32.gmra.mxu2 %v5151_v57  ;;  %v623_v2 = vadd.f32 %v7847_v38, %v622_v61  ;;  %v1621_v3 = vadd.f32 %v7847_v38, %v1620_v62  ;;  %4055 = vmatmul.f32.gmra.mxu3 %v5347_v58  ;;  %v158_v57 = vld [vmem:[%s9445_s0 + $0x480] sm:$0xff] }
 0x48a   :  { %v4958_v58 = vld [vmem:[%s9445_s0 + $0xaa0] sm:$0xff] }
 0x48b   :  { %v4541_v4 = vmax.f32 %v3347_v1, %v4345_v60  ;;  %v960_v5 = vmax.f32 %v623_v2, 0.0  ;;  %v1958_v40 = vmax.f32 %v1621_v3, 0.0  ;;  %669 = vmatmul.f32.gmra.mxu0 %v155_v63  ;;  %1667 = vmatmul.f32.gmra.mxu1 %v4955_v0 }
 0x48c   :  { %v2814_v7 = vpop.f32.mrf.mxu2  ;;  %v4008_v42 = vpop.f32.mrf.mxu3 }
 0x48d   :  { %4738 = vst.msk [vmem:[%s9447_s3 + $0x3e0] sm:$0xff] %vm4613_vm0, %v4541_v4  ;;  %v2154_v9 = vmax.f32 %v960_v5, %v1958_v40  ;;  %v2815_v10 = vadd.f32 %v7847_v38, %v2814_v7  ;;  %v4009_v11 = vadd.f32 %v7847_v38, %v4008_v42  ;;  %v8278_v4 = vld [vmem:[%s9446_s2] ss:$0 sm:$0xff]  ;;  %v5155_v40 = vld [vmem:[%s9445_s0 + $0x10c8] sm:$0xff] }
 0x48e   :  { %v5351_v7 = vld [vmem:[%s9445_s0 + $0x16e8] sm:$0xff] }
 0x48f   :  { %v3152_v14 = vmax.f32 %v2815_v10, 0.0  ;;  %v4346_v15 = vmax.f32 %v4009_v11, 0.0 }
 0x490   :  { %v625_v17 = vpop.f32.mrf.mxu0  ;;  %v1623_v18 = vpop.f32.mrf.mxu1 }
 0x491   :  { %v3348_v21 = vmax.f32 %v2154_v9, %v3152_v14  ;;  %2864 = vmatmul.f32.gmra.mxu2 %v5152_v12  ;;  %v626_v22 = vadd.f32 %v7847_v38, %v625_v17  ;;  %v1624_v23 = vadd.f32 %v7847_v38, %v1623_v18  ;;  %4058 = vmatmul.f32.gmra.mxu3 %v5348_v13  ;;  %v159_v12 = vld [vmem:[%s9445_s0 + $0x488] sm:$0xff] }
 0x492   :  { %v4959_v13 = vld [vmem:[%s9445_s0 + $0xaa8] sm:$0xff] }
 0x493   :  { %v4542_v24 = vmax.f32 %v3348_v21, %v4346_v15  ;;  %v961_v25 = vmax.f32 %v626_v22, 0.0  ;;  %v1959_v26 = vmax.f32 %v1624_v23, 0.0  ;;  %672 = vmatmul.f32.gmra.mxu0 %v156_v19  ;;  %1670 = vmatmul.f32.gmra.mxu1 %v4956_v20 }
 0x494   :  { %v2817_v27 = vpop.f32.mrf.mxu2  ;;  %v4011_v28 = vpop.f32.mrf.mxu3 }
 0x495   :  { %4739 = vst.msk [vmem:[%s9447_s3 + $0x3e8] sm:$0xff] %vm4613_vm0, %v4542_v24  ;;  %v2155_v29 = vmax.f32 %v961_v25, %v1959_v26  ;;  %v2818_v30 = vadd.f32 %v7847_v38, %v2817_v27  ;;  %v4012_v31 = vadd.f32 %v7847_v38, %v4011_v28  ;;  %v5156_v26 = vld [vmem:[%s9445_s0 + $0x10d0] sm:$0xff] }
 0x496   :  { %v5352_v27 = vld [vmem:[%s9445_s0 + $0x16f0] sm:$0xff] }
 0x497   :  { %v3153_v34 = vmax.f32 %v2818_v30, 0.0  ;;  %v4347_v35 = vmax.f32 %v4012_v31, 0.0 }
 0x498   :  { %v628_v36 = vpop.f32.mrf.mxu0  ;;  %v1626_v6 = vpop.f32.mrf.mxu1 }
 0x499   :  { %v3349_v39 = vmax.f32 %v2155_v29, %v3153_v34  ;;  %2867 = vmatmul.f32.gmra.mxu2 %v5153_v32  ;;  %v629_v16 = vadd.f32 %v7847_v38, %v628_v36  ;;  %v1627_v41 = vadd.f32 %v7847_v38, %v1626_v6  ;;  %4061 = vmatmul.f32.gmra.mxu3 %v5349_v33  ;;  %v160_v32 = vld [vmem:[%s9445_s0 + $0x490] sm:$0xff] }
 0x49a   :  { %v4960_v33 = vld [vmem:[%s9445_s0 + $0xab0] sm:$0xff] }
 0x49b   :  { %v4543_v43 = vmax.f32 %v3349_v39, %v4347_v35  ;;  %v962_v44 = vmax.f32 %v629_v16, 0.0  ;;  %v1960_v45 = vmax.f32 %v1627_v41, 0.0  ;;  %675 = vmatmul.f32.gmra.mxu0 %v157_v37  ;;  %1673 = vmatmul.f32.gmra.mxu1 %v4957_v8 }
 0x49c   :  { %v2820_v46 = vpop.f32.mrf.mxu2  ;;  %v4014_v47 = vpop.f32.mrf.mxu3 }
 0x49d   :  { %4740 = vst.msk [vmem:[%s9447_s3 + $0x3f0] sm:$0xff] %vm4613_vm0, %v4543_v43  ;;  %v2156_v48 = vmax.f32 %v962_v44, %v1960_v45  ;;  %v2821_v49 = vadd.f32 %v7847_v38, %v2820_v46  ;;  %v4015_v50 = vadd.f32 %v7847_v38, %v4014_v47  ;;  %v5157_v45 = vld [vmem:[%s9445_s0 + $0x10d8] sm:$0xff] }
 0x49e   :  { %v5353_v46 = vld [vmem:[%s9445_s0 + $0x16f8] sm:$0xff] }
 0x49f   :  { %v3154_v53 = vmax.f32 %v2821_v49, 0.0  ;;  %v4348_v54 = vmax.f32 %v4015_v50, 0.0 }
 0x4a0   :  { %v631_v55 = vpop.f32.mrf.mxu0  ;;  %v1629_v56 = vpop.f32.mrf.mxu1 }
 0x4a1   :  { %v3350_v59 = vmax.f32 %v2156_v48, %v3154_v53  ;;  %2870 = vmatmul.f32.gmra.mxu2 %v5154_v51  ;;  %v632_v60 = vadd.f32 %v7847_v38, %v631_v55  ;;  %v1630_v61 = vadd.f32 %v7847_v38, %v1629_v56  ;;  %4064 = vmatmul.f32.gmra.mxu3 %v5350_v52  ;;  %v161_v51 = vld [vmem:[%s9445_s0 + $0x498] sm:$0xff] }
 0x4a2   :  { %v4961_v52 = vld [vmem:[%s9445_s0 + $0xab8] sm:$0xff] }
 0x4a3   :  { %v4544_v62 = vmax.f32 %v3350_v59, %v4348_v54  ;;  %v963_v63 = vmax.f32 %v632_v60, 0.0  ;;  %v1961_v0 = vmax.f32 %v1630_v61, 0.0  ;;  %678 = vmatmul.f32.gmra.mxu0 %v158_v57  ;;  %1676 = vmatmul.f32.gmra.mxu1 %v4958_v58 }
 0x4a4   :  { %v2823_v1 = vpop.f32.mrf.mxu2  ;;  %v4017_v2 = vpop.f32.mrf.mxu3 }
 0x4a5   :  { %4741 = vst.msk [vmem:[%s9447_s3 + $0x3f8] sm:$0xff] %vm4613_vm0, %v4544_v62  ;;  %v2157_v3 = vmax.f32 %v963_v63, %v1961_v0  ;;  %v2824_v38 = vadd.f32 %v8278_v4, %v2823_v1  ;;  %v4018_v5 = vadd.f32 %v8278_v4, %v4017_v2  ;;  %v5158_v0 = vld [vmem:[%s9445_s0 + $0x10e0] sm:$0xff] }
 0x4a6   :  { %v5354_v1 = vld [vmem:[%s9445_s0 + $0x1700] sm:$0xff] }
 0x4a7   :  { %v3155_v42 = vmax.f32 %v2824_v38, 0.0  ;;  %v4349_v9 = vmax.f32 %v4018_v5, 0.0 }
 0x4a8   :  { %v634_v10 = vpop.f32.mrf.mxu0  ;;  %v1632_v11 = vpop.f32.mrf.mxu1 }
 0x4a9   :  { %v3351_v14 = vmax.f32 %v2157_v3, %v3155_v42  ;;  %2873 = vmatmul.f32.gmra.mxu2 %v5155_v40  ;;  %v635_v15 = vadd.f32 %v8278_v4, %v634_v10  ;;  %v1633_v17 = vadd.f32 %v8278_v4, %v1632_v11  ;;  %4067 = vmatmul.f32.gmra.mxu3 %v5351_v7  ;;  %v162_v40 = vld [vmem:[%s9445_s0 + $0x4a0] sm:$0xff] }
 0x4aa   :  { %v4962_v7 = vld [vmem:[%s9445_s0 + $0xac0] sm:$0xff] }
 0x4ab   :  { %v4545_v18 = vmax.f32 %v3351_v14, %v4349_v9  ;;  %v964_v19 = vmax.f32 %v635_v15, 0.0  ;;  %v1962_v20 = vmax.f32 %v1633_v17, 0.0  ;;  %681 = vmatmul.f32.gmra.mxu0 %v159_v12  ;;  %1679 = vmatmul.f32.gmra.mxu1 %v4959_v13 }
 0x4ac   :  { %v2826_v21 = vpop.f32.mrf.mxu2  ;;  %v4020_v22 = vpop.f32.mrf.mxu3 }
 0x4ad   :  { %4742 = vst.msk [vmem:[%s9447_s3 + $0x400] sm:$0xff] %vm4613_vm0, %v4545_v18  ;;  %v2158_v23 = vmax.f32 %v964_v19, %v1962_v20  ;;  %v2827_v24 = vadd.f32 %v8278_v4, %v2826_v21  ;;  %v4021_v25 = vadd.f32 %v8278_v4, %v4020_v22  ;;  %v5159_v20 = vld [vmem:[%s9445_s0 + $0x10e8] sm:$0xff] }
 0x4ae   :  { %v5355_v21 = vld [vmem:[%s9445_s0 + $0x1708] sm:$0xff] }
 0x4af   :  { %v3156_v28 = vmax.f32 %v2827_v24, 0.0  ;;  %v4350_v29 = vmax.f32 %v4021_v25, 0.0 }
 0x4b0   :  { %v637_v30 = vpop.f32.mrf.mxu0  ;;  %v1635_v31 = vpop.f32.mrf.mxu1 }
 0x4b1   :  { %v3352_v34 = vmax.f32 %v2158_v23, %v3156_v28  ;;  %2876 = vmatmul.f32.gmra.mxu2 %v5156_v26  ;;  %v638_v35 = vadd.f32 %v8278_v4, %v637_v30  ;;  %v1636_v36 = vadd.f32 %v8278_v4, %v1635_v31  ;;  %4070 = vmatmul.f32.gmra.mxu3 %v5352_v27  ;;  %v163_v26 = vld [vmem:[%s9445_s0 + $0x4a8] sm:$0xff] }
 0x4b2   :  { %v4963_v27 = vld [vmem:[%s9445_s0 + $0xac8] sm:$0xff] }
 0x4b3   :  { %v4546_v6 = vmax.f32 %v3352_v34, %v4350_v29  ;;  %v965_v37 = vmax.f32 %v638_v35, 0.0  ;;  %v1963_v8 = vmax.f32 %v1636_v36, 0.0  ;;  %684 = vmatmul.f32.gmra.mxu0 %v160_v32  ;;  %1682 = vmatmul.f32.gmra.mxu1 %v4960_v33 }
 0x4b4   :  { %v2829_v39 = vpop.f32.mrf.mxu2  ;;  %v4023_v16 = vpop.f32.mrf.mxu3 }
 0x4b5   :  { %4743 = vst.msk [vmem:[%s9447_s3 + $0x408] sm:$0xff] %vm4613_vm0, %v4546_v6  ;;  %v2159_v41 = vmax.f32 %v965_v37, %v1963_v8  ;;  %v2830_v43 = vadd.f32 %v8278_v4, %v2829_v39  ;;  %v4024_v44 = vadd.f32 %v8278_v4, %v4023_v16  ;;  %v5160_v8 = vld [vmem:[%s9445_s0 + $0x10f0] sm:$0xff] }
 0x4b6   :  { %v5356_v39 = vld [vmem:[%s9445_s0 + $0x1710] sm:$0xff] }
 0x4b7   :  { %v3157_v47 = vmax.f32 %v2830_v43, 0.0  ;;  %v4351_v48 = vmax.f32 %v4024_v44, 0.0 }
 0x4b8   :  { %v640_v49 = vpop.f32.mrf.mxu0  ;;  %v1638_v50 = vpop.f32.mrf.mxu1 }
 0x4b9   :  { %v3353_v53 = vmax.f32 %v2159_v41, %v3157_v47  ;;  %2879 = vmatmul.f32.gmra.mxu2 %v5157_v45  ;;  %v641_v54 = vadd.f32 %v8278_v4, %v640_v49  ;;  %v1639_v55 = vadd.f32 %v8278_v4, %v1638_v50  ;;  %4073 = vmatmul.f32.gmra.mxu3 %v5353_v46  ;;  %v164_v45 = vld [vmem:[%s9445_s0 + $0x4b0] sm:$0xff] }
 0x4ba   :  { %v4964_v46 = vld [vmem:[%s9445_s0 + $0xad0] sm:$0xff] }
 0x4bb   :  { %v4547_v56 = vmax.f32 %v3353_v53, %v4351_v48  ;;  %v966_v57 = vmax.f32 %v641_v54, 0.0  ;;  %v1964_v58 = vmax.f32 %v1639_v55, 0.0  ;;  %687 = vmatmul.f32.gmra.mxu0 %v161_v51  ;;  %1685 = vmatmul.f32.gmra.mxu1 %v4961_v52 }
 0x4bc   :  { %v2832_v59 = vpop.f32.mrf.mxu2  ;;  %v4026_v60 = vpop.f32.mrf.mxu3 }
 0x4bd   :  { %4744 = vst.msk [vmem:[%s9447_s3 + $0x410] sm:$0xff] %vm4613_vm0, %v4547_v56  ;;  %v2160_v61 = vmax.f32 %v966_v57, %v1964_v58  ;;  %v2833_v62 = vadd.f32 %v8278_v4, %v2832_v59  ;;  %v4027_v63 = vadd.f32 %v8278_v4, %v4026_v60  ;;  %v5161_v58 = vld [vmem:[%s9445_s0 + $0x10f8] sm:$0xff] }
 0x4be   :  { %v5357_v59 = vld [vmem:[%s9445_s0 + $0x1718] sm:$0xff] }
 0x4bf   :  { %v3158_v2 = vmax.f32 %v2833_v62, 0.0  ;;  %v4352_v3 = vmax.f32 %v4027_v63, 0.0 }
 0x4c0   :  { %v643_v38 = vpop.f32.mrf.mxu0  ;;  %v1641_v5 = vpop.f32.mrf.mxu1 }
 0x4c1   :  { %v3354_v42 = vmax.f32 %v2160_v61, %v3158_v2  ;;  %2882 = vmatmul.f32.gmra.mxu2 %v5158_v0  ;;  %v644_v9 = vadd.f32 %v8278_v4, %v643_v38  ;;  %v1642_v10 = vadd.f32 %v8278_v4, %v1641_v5  ;;  %4076 = vmatmul.f32.gmra.mxu3 %v5354_v1  ;;  %v165_v0 = vld [vmem:[%s9445_s0 + $0x4b8] sm:$0xff] }
 0x4c2   :  { %v4965_v1 = vld [vmem:[%s9445_s0 + $0xad8] sm:$0xff] }
 0x4c3   :  { %v4548_v11 = vmax.f32 %v3354_v42, %v4352_v3  ;;  %v967_v12 = vmax.f32 %v644_v9, 0.0  ;;  %v1965_v13 = vmax.f32 %v1642_v10, 0.0  ;;  %690 = vmatmul.f32.gmra.mxu0 %v162_v40  ;;  %1688 = vmatmul.f32.gmra.mxu1 %v4962_v7 }
 0x4c4   :  { %v2835_v14 = vpop.f32.mrf.mxu2  ;;  %v4029_v15 = vpop.f32.mrf.mxu3 }
 0x4c5   :  { %4745 = vst.msk [vmem:[%s9447_s3 + $0x418] sm:$0xff] %vm4613_vm0, %v4548_v11  ;;  %v2161_v17 = vmax.f32 %v967_v12, %v1965_v13  ;;  %v2836_v18 = vadd.f32 %v8278_v4, %v2835_v14  ;;  %v4030_v19 = vadd.f32 %v8278_v4, %v4029_v15  ;;  %v5162_v13 = vld [vmem:[%s9445_s0 + $0x1100] sm:$0xff] }
 0x4c6   :  { %v5358_v14 = vld [vmem:[%s9445_s0 + $0x1720] sm:$0xff] }
 0x4c7   :  { %v3159_v22 = vmax.f32 %v2836_v18, 0.0  ;;  %v4353_v23 = vmax.f32 %v4030_v19, 0.0 }
 0x4c8   :  { %v646_v24 = vpop.f32.mrf.mxu0  ;;  %v1644_v25 = vpop.f32.mrf.mxu1 }
 0x4c9   :  { %v3355_v28 = vmax.f32 %v2161_v17, %v3159_v22  ;;  %2885 = vmatmul.f32.gmra.mxu2 %v5159_v20  ;;  %v647_v29 = vadd.f32 %v8278_v4, %v646_v24  ;;  %v1645_v30 = vadd.f32 %v8278_v4, %v1644_v25  ;;  %4079 = vmatmul.f32.gmra.mxu3 %v5355_v21  ;;  %v166_v20 = vld [vmem:[%s9445_s0 + $0x4c0] sm:$0xff] }
 0x4ca   :  { %v4966_v21 = vld [vmem:[%s9445_s0 + $0xae0] sm:$0xff] }
 0x4cb   :  { %v4549_v31 = vmax.f32 %v3355_v28, %v4353_v23  ;;  %v968_v32 = vmax.f32 %v647_v29, 0.0  ;;  %v1966_v33 = vmax.f32 %v1645_v30, 0.0  ;;  %693 = vmatmul.f32.gmra.mxu0 %v163_v26  ;;  %1691 = vmatmul.f32.gmra.mxu1 %v4963_v27 }
 0x4cc   :  { %v2838_v34 = vpop.f32.mrf.mxu2  ;;  %v4032_v35 = vpop.f32.mrf.mxu3 }
 0x4cd   :  { %4746 = vst.msk [vmem:[%s9447_s3 + $0x420] sm:$0xff] %vm4613_vm0, %v4549_v31  ;;  %v2162_v36 = vmax.f32 %v968_v32, %v1966_v33  ;;  %v2839_v6 = vadd.f32 %v8278_v4, %v2838_v34  ;;  %v4033_v37 = vadd.f32 %v8278_v4, %v4032_v35  ;;  %v5163_v33 = vld [vmem:[%s9445_s0 + $0x1108] sm:$0xff] }
 0x4ce   :  { %v5359_v34 = vld [vmem:[%s9445_s0 + $0x1728] sm:$0xff] }
 0x4cf   :  { %v3160_v16 = vmax.f32 %v2839_v6, 0.0  ;;  %v4354_v41 = vmax.f32 %v4033_v37, 0.0 }
 0x4d0   :  { %v649_v43 = vpop.f32.mrf.mxu0  ;;  %v1647_v44 = vpop.f32.mrf.mxu1 }
 0x4d1   :  { %v3356_v47 = vmax.f32 %v2162_v36, %v3160_v16  ;;  %2888 = vmatmul.f32.gmra.mxu2 %v5160_v8  ;;  %v650_v48 = vadd.f32 %v8278_v4, %v649_v43  ;;  %v1648_v49 = vadd.f32 %v8278_v4, %v1647_v44  ;;  %4082 = vmatmul.f32.gmra.mxu3 %v5356_v39  ;;  %v167_v8 = vld [vmem:[%s9445_s0 + $0x4c8] sm:$0xff] }
 0x4d2   :  { %v4967_v39 = vld [vmem:[%s9445_s0 + $0xae8] sm:$0xff] }
 0x4d3   :  { %v4550_v50 = vmax.f32 %v3356_v47, %v4354_v41  ;;  %v969_v51 = vmax.f32 %v650_v48, 0.0  ;;  %v1967_v52 = vmax.f32 %v1648_v49, 0.0  ;;  %696 = vmatmul.f32.gmra.mxu0 %v164_v45  ;;  %1694 = vmatmul.f32.gmra.mxu1 %v4964_v46 }
 0x4d4   :  { %v2841_v53 = vpop.f32.mrf.mxu2  ;;  %v4035_v54 = vpop.f32.mrf.mxu3 }
 0x4d5   :  { %4747 = vst.msk [vmem:[%s9447_s3 + $0x428] sm:$0xff] %vm4613_vm0, %v4550_v50  ;;  %v2163_v55 = vmax.f32 %v969_v51, %v1967_v52  ;;  %v2842_v56 = vadd.f32 %v8278_v4, %v2841_v53  ;;  %v4036_v57 = vadd.f32 %v8278_v4, %v4035_v54  ;;  %v5164_v52 = vld [vmem:[%s9445_s0 + $0x1110] sm:$0xff] }
 0x4d6   :  { %v5360_v53 = vld [vmem:[%s9445_s0 + $0x1730] sm:$0xff] }
 0x4d7   :  { %v3161_v60 = vmax.f32 %v2842_v56, 0.0  ;;  %v4355_v61 = vmax.f32 %v4036_v57, 0.0 }
 0x4d8   :  { %v652_v62 = vpop.f32.mrf.mxu0  ;;  %v1650_v63 = vpop.f32.mrf.mxu1 }
 0x4d9   :  { %v3357_v2 = vmax.f32 %v2163_v55, %v3161_v60  ;;  %2891 = vmatmul.f32.gmra.mxu2 %v5161_v58  ;;  %v653_v3 = vadd.f32 %v8278_v4, %v652_v62  ;;  %v1651_v38 = vadd.f32 %v8278_v4, %v1650_v63  ;;  %4085 = vmatmul.f32.gmra.mxu3 %v5357_v59  ;;  %v168_v58 = vld [vmem:[%s9445_s0 + $0x4d0] sm:$0xff] }
 0x4da   :  { %v4968_v59 = vld [vmem:[%s9445_s0 + $0xaf0] sm:$0xff] }
 0x4db   :  { %v4551_v5 = vmax.f32 %v3357_v2, %v4355_v61  ;;  %v970_v40 = vmax.f32 %v653_v3, 0.0  ;;  %v1968_v7 = vmax.f32 %v1651_v38, 0.0  ;;  %699 = vmatmul.f32.gmra.mxu0 %v165_v0  ;;  %1697 = vmatmul.f32.gmra.mxu1 %v4965_v1 }
 0x4dc   :  { %v2844_v42 = vpop.f32.mrf.mxu2  ;;  %v4038_v9 = vpop.f32.mrf.mxu3 }
 0x4dd   :  { %4748 = vst.msk [vmem:[%s9447_s3 + $0x430] sm:$0xff] %vm4613_vm0, %v4551_v5  ;;  %v2164_v10 = vmax.f32 %v970_v40, %v1968_v7  ;;  %v2845_v11 = vadd.f32 %v8278_v4, %v2844_v42  ;;  %v4039_v12 = vadd.f32 %v8278_v4, %v4038_v9  ;;  %v5165_v7 = vld [vmem:[%s9445_s0 + $0x1118] sm:$0xff] }
 0x4de   :  { %v5361_v42 = vld [vmem:[%s9445_s0 + $0x1738] sm:$0xff] }
 0x4df   :  { %v3162_v15 = vmax.f32 %v2845_v11, 0.0  ;;  %v4356_v17 = vmax.f32 %v4039_v12, 0.0 }
 0x4e0   :  { %v655_v18 = vpop.f32.mrf.mxu0  ;;  %v1653_v19 = vpop.f32.mrf.mxu1 }
 0x4e1   :  { %v3358_v22 = vmax.f32 %v2164_v10, %v3162_v15  ;;  %2894 = vmatmul.f32.gmra.mxu2 %v5162_v13  ;;  %v656_v23 = vadd.f32 %v8278_v4, %v655_v18  ;;  %v1654_v24 = vadd.f32 %v8278_v4, %v1653_v19  ;;  %4088 = vmatmul.f32.gmra.mxu3 %v5358_v14  ;;  %v169_v13 = vld [vmem:[%s9445_s0 + $0x4d8] sm:$0xff] }
 0x4e2   :  { %v4969_v14 = vld [vmem:[%s9445_s0 + $0xaf8] sm:$0xff] }
 0x4e3   :  { %v4552_v25 = vmax.f32 %v3358_v22, %v4356_v17  ;;  %v971_v26 = vmax.f32 %v656_v23, 0.0  ;;  %v1969_v27 = vmax.f32 %v1654_v24, 0.0  ;;  %702 = vmatmul.f32.gmra.mxu0 %v166_v20  ;;  %1700 = vmatmul.f32.gmra.mxu1 %v4966_v21 }
 0x4e4   :  { %v2847_v28 = vpop.f32.mrf.mxu2  ;;  %v4041_v29 = vpop.f32.mrf.mxu3 }
 0x4e5   :  { %4749 = vst.msk [vmem:[%s9447_s3 + $0x438] sm:$0xff] %vm4613_vm0, %v4552_v25  ;;  %v2165_v30 = vmax.f32 %v971_v26, %v1969_v27  ;;  %v2848_v31 = vadd.f32 %v8278_v4, %v2847_v28  ;;  %v4042_v32 = vadd.f32 %v8278_v4, %v4041_v29  ;;  %v5166_v27 = vld [vmem:[%s9445_s0 + $0x1120] sm:$0xff] }
 0x4e6   :  { %v5362_v28 = vld [vmem:[%s9445_s0 + $0x1740] sm:$0xff] }
 0x4e7   :  { %v3163_v35 = vmax.f32 %v2848_v31, 0.0  ;;  %v4357_v36 = vmax.f32 %v4042_v32, 0.0 }
 0x4e8   :  { %v658_v6 = vpop.f32.mrf.mxu0  ;;  %v1656_v37 = vpop.f32.mrf.mxu1 }
 0x4e9   :  { %v3359_v16 = vmax.f32 %v2165_v30, %v3163_v35  ;;  %2897 = vmatmul.f32.gmra.mxu2 %v5163_v33  ;;  %v659_v41 = vadd.f32 %v8278_v4, %v658_v6  ;;  %v1657_v43 = vadd.f32 %v8278_v4, %v1656_v37  ;;  %4091 = vmatmul.f32.gmra.mxu3 %v5359_v34  ;;  %v170_v33 = vld [vmem:[%s9445_s0 + $0x4e0] sm:$0xff] }
 0x4ea   :  { %v4970_v34 = vld [vmem:[%s9445_s0 + $0xb00] sm:$0xff] }
 0x4eb   :  { %v4553_v44 = vmax.f32 %v3359_v16, %v4357_v36  ;;  %v972_v45 = vmax.f32 %v659_v41, 0.0  ;;  %v1970_v46 = vmax.f32 %v1657_v43, 0.0  ;;  %705 = vmatmul.f32.gmra.mxu0 %v167_v8  ;;  %1703 = vmatmul.f32.gmra.mxu1 %v4967_v39 }
 0x4ec   :  { %v2850_v47 = vpop.f32.mrf.mxu2  ;;  %v4044_v48 = vpop.f32.mrf.mxu3 }
 0x4ed   :  { %4750 = vst.msk [vmem:[%s9447_s3 + $0x440] sm:$0xff] %vm4613_vm0, %v4553_v44  ;;  %v2166_v49 = vmax.f32 %v972_v45, %v1970_v46  ;;  %v2851_v50 = vadd.f32 %v8278_v4, %v2850_v47  ;;  %v4045_v51 = vadd.f32 %v8278_v4, %v4044_v48  ;;  %v5167_v46 = vld [vmem:[%s9445_s0 + $0x1128] sm:$0xff] }
 0x4ee   :  { %v5363_v47 = vld [vmem:[%s9445_s0 + $0x1748] sm:$0xff] }
 0x4ef   :  { %v3164_v54 = vmax.f32 %v2851_v50, 0.0  ;;  %v4358_v55 = vmax.f32 %v4045_v51, 0.0 }
 0x4f0   :  { %v661_v56 = vpop.f32.mrf.mxu0  ;;  %v1659_v57 = vpop.f32.mrf.mxu1 }
 0x4f1   :  { %v3360_v60 = vmax.f32 %v2166_v49, %v3164_v54  ;;  %2900 = vmatmul.f32.gmra.mxu2 %v5164_v52  ;;  %v662_v61 = vadd.f32 %v8278_v4, %v661_v56  ;;  %v1660_v62 = vadd.f32 %v8278_v4, %v1659_v57  ;;  %4094 = vmatmul.f32.gmra.mxu3 %v5360_v53  ;;  %v171_v52 = vld [vmem:[%s9445_s0 + $0x4e8] sm:$0xff] }
 0x4f2   :  { %v4971_v53 = vld [vmem:[%s9445_s0 + $0xb08] sm:$0xff] }
 0x4f3   :  { %v4554_v63 = vmax.f32 %v3360_v60, %v4358_v55  ;;  %v973_v0 = vmax.f32 %v662_v61, 0.0  ;;  %v1971_v1 = vmax.f32 %v1660_v62, 0.0  ;;  %708 = vmatmul.f32.gmra.mxu0 %v168_v58  ;;  %1706 = vmatmul.f32.gmra.mxu1 %v4968_v59 }
 0x4f4   :  { %v2853_v2 = vpop.f32.mrf.mxu2  ;;  %v4047_v3 = vpop.f32.mrf.mxu3 }
 0x4f5   :  { %4751 = vst.msk [vmem:[%s9447_s3 + $0x448] sm:$0xff] %vm4613_vm0, %v4554_v63  ;;  %v2167_v38 = vmax.f32 %v973_v0, %v1971_v1  ;;  %v2854_v5 = vadd.f32 %v8278_v4, %v2853_v2  ;;  %v4048_v40 = vadd.f32 %v8278_v4, %v4047_v3  ;;  %v5168_v1 = vld [vmem:[%s9445_s0 + $0x1130] sm:$0xff] }
 0x4f6   :  { %v5364_v2 = vld [vmem:[%s9445_s0 + $0x1750] sm:$0xff] }
 0x4f7   :  { %v3165_v9 = vmax.f32 %v2854_v5, 0.0  ;;  %v4359_v10 = vmax.f32 %v4048_v40, 0.0 }
 0x4f8   :  { %v664_v11 = vpop.f32.mrf.mxu0  ;;  %v1662_v12 = vpop.f32.mrf.mxu1 }
 0x4f9   :  { %v3361_v15 = vmax.f32 %v2167_v38, %v3165_v9  ;;  %2903 = vmatmul.f32.gmra.mxu2 %v5165_v7  ;;  %v665_v17 = vadd.f32 %v8278_v4, %v664_v11  ;;  %v1663_v18 = vadd.f32 %v8278_v4, %v1662_v12  ;;  %4097 = vmatmul.f32.gmra.mxu3 %v5361_v42  ;;  %v172_v7 = vld [vmem:[%s9445_s0 + $0x4f0] sm:$0xff] }
 0x4fa   :  { %v4972_v42 = vld [vmem:[%s9445_s0 + $0xb10] sm:$0xff] }
 0x4fb   :  { %v4555_v19 = vmax.f32 %v3361_v15, %v4359_v10  ;;  %v974_v20 = vmax.f32 %v665_v17, 0.0  ;;  %v1972_v21 = vmax.f32 %v1663_v18, 0.0  ;;  %711 = vmatmul.f32.gmra.mxu0 %v169_v13  ;;  %1709 = vmatmul.f32.gmra.mxu1 %v4969_v14 }
 0x4fc   :  { %v2856_v22 = vpop.f32.mrf.mxu2  ;;  %v4050_v23 = vpop.f32.mrf.mxu3 }
 0x4fd   :  { %4752 = vst.msk [vmem:[%s9447_s3 + $0x450] sm:$0xff] %vm4613_vm0, %v4555_v19  ;;  %v2168_v24 = vmax.f32 %v974_v20, %v1972_v21  ;;  %v2857_v25 = vadd.f32 %v8278_v4, %v2856_v22  ;;  %v4051_v26 = vadd.f32 %v8278_v4, %v4050_v23  ;;  %v5169_v21 = vld [vmem:[%s9445_s0 + $0x1138] sm:$0xff] }
 0x4fe   :  { %v5365_v22 = vld [vmem:[%s9445_s0 + $0x1758] sm:$0xff] }
 0x4ff   :  { %v3166_v29 = vmax.f32 %v2857_v25, 0.0  ;;  %v4360_v30 = vmax.f32 %v4051_v26, 0.0 }
 0x500   :  { %v667_v31 = vpop.f32.mrf.mxu0  ;;  %v1665_v32 = vpop.f32.mrf.mxu1 }
 0x501   :  { %v3362_v35 = vmax.f32 %v2168_v24, %v3166_v29  ;;  %2906 = vmatmul.f32.gmra.mxu2 %v5166_v27  ;;  %v668_v36 = vadd.f32 %v8278_v4, %v667_v31  ;;  %v1666_v6 = vadd.f32 %v8278_v4, %v1665_v32  ;;  %4100 = vmatmul.f32.gmra.mxu3 %v5362_v28  ;;  %v173_v27 = vld [vmem:[%s9445_s0 + $0x4f8] sm:$0xff] }
 0x502   :  { %v4973_v28 = vld [vmem:[%s9445_s0 + $0xb18] sm:$0xff] }
 0x503   :  { %v4556_v37 = vmax.f32 %v3362_v35, %v4360_v30  ;;  %v975_v8 = vmax.f32 %v668_v36, 0.0  ;;  %v1973_v39 = vmax.f32 %v1666_v6, 0.0  ;;  %714 = vmatmul.f32.gmra.mxu0 %v170_v33  ;;  %1712 = vmatmul.f32.gmra.mxu1 %v4970_v34 }
 0x504   :  { %v2859_v16 = vpop.f32.mrf.mxu2  ;;  %v4053_v41 = vpop.f32.mrf.mxu3 }
 0x505   :  { %4753 = vst.msk [vmem:[%s9447_s3 + $0x458] sm:$0xff] %vm4613_vm0, %v4556_v37  ;;  %v2169_v43 = vmax.f32 %v975_v8, %v1973_v39  ;;  %v2860_v44 = vadd.f32 %v8278_v4, %v2859_v16  ;;  %v4054_v45 = vadd.f32 %v8278_v4, %v4053_v41  ;;  %v5170_v39 = vld [vmem:[%s9445_s0 + $0x1140] sm:$0xff] }
 0x506   :  { %v5366_v16 = vld [vmem:[%s9445_s0 + $0x1760] sm:$0xff] }
 0x507   :  { %v3167_v48 = vmax.f32 %v2860_v44, 0.0  ;;  %v4361_v49 = vmax.f32 %v4054_v45, 0.0 }
 0x508   :  { %v670_v50 = vpop.f32.mrf.mxu0  ;;  %v1668_v51 = vpop.f32.mrf.mxu1 }
 0x509   :  { %v3363_v54 = vmax.f32 %v2169_v43, %v3167_v48  ;;  %2909 = vmatmul.f32.gmra.mxu2 %v5167_v46  ;;  %v671_v55 = vadd.f32 %v8278_v4, %v670_v50  ;;  %v1669_v56 = vadd.f32 %v8278_v4, %v1668_v51  ;;  %4103 = vmatmul.f32.gmra.mxu3 %v5363_v47  ;;  %v174_v46 = vld [vmem:[%s9445_s0 + $0x500] sm:$0xff] }
 0x50a   :  { %v4974_v47 = vld [vmem:[%s9445_s0 + $0xb20] sm:$0xff] }
 0x50b   :  { %v4557_v57 = vmax.f32 %v3363_v54, %v4361_v49  ;;  %v976_v58 = vmax.f32 %v671_v55, 0.0  ;;  %v1974_v59 = vmax.f32 %v1669_v56, 0.0  ;;  %717 = vmatmul.f32.gmra.mxu0 %v171_v52  ;;  %1715 = vmatmul.f32.gmra.mxu1 %v4971_v53 }
 0x50c   :  { %v2862_v60 = vpop.f32.mrf.mxu2  ;;  %v4056_v61 = vpop.f32.mrf.mxu3 }
 0x50d   :  { %4754 = vst.msk [vmem:[%s9447_s3 + $0x460] sm:$0xff] %vm4613_vm0, %v4557_v57  ;;  %v2170_v62 = vmax.f32 %v976_v58, %v1974_v59  ;;  %v2863_v63 = vadd.f32 %v8278_v4, %v2862_v60  ;;  %v4057_v0 = vadd.f32 %v8278_v4, %v4056_v61  ;;  %v5171_v59 = vld [vmem:[%s9445_s0 + $0x1148] sm:$0xff] }
 0x50e   :  { %v5367_v60 = vld [vmem:[%s9445_s0 + $0x1768] sm:$0xff] }
 0x50f   :  { %v3168_v3 = vmax.f32 %v2863_v63, 0.0  ;;  %v4362_v38 = vmax.f32 %v4057_v0, 0.0 }
 0x510   :  { %v673_v5 = vpop.f32.mrf.mxu0  ;;  %v1671_v40 = vpop.f32.mrf.mxu1 }
 0x511   :  { %v3364_v9 = vmax.f32 %v2170_v62, %v3168_v3  ;;  %2912 = vmatmul.f32.gmra.mxu2 %v5168_v1  ;;  %v674_v10 = vadd.f32 %v8278_v4, %v673_v5  ;;  %v1672_v11 = vadd.f32 %v8278_v4, %v1671_v40  ;;  %4106 = vmatmul.f32.gmra.mxu3 %v5364_v2  ;;  %v175_v1 = vld [vmem:[%s9445_s0 + $0x508] sm:$0xff] }
 0x512   :  { %v4975_v2 = vld [vmem:[%s9445_s0 + $0xb28] sm:$0xff] }
 0x513   :  { %v4558_v12 = vmax.f32 %v3364_v9, %v4362_v38  ;;  %v977_v13 = vmax.f32 %v674_v10, 0.0  ;;  %v1975_v14 = vmax.f32 %v1672_v11, 0.0  ;;  %720 = vmatmul.f32.gmra.mxu0 %v172_v7  ;;  %1718 = vmatmul.f32.gmra.mxu1 %v4972_v42 }
 0x514   :  { %v2865_v15 = vpop.f32.mrf.mxu2  ;;  %v4059_v17 = vpop.f32.mrf.mxu3 }
 0x515   :  { %4755 = vst.msk [vmem:[%s9447_s3 + $0x468] sm:$0xff] %vm4613_vm0, %v4558_v12  ;;  %v2171_v18 = vmax.f32 %v977_v13, %v1975_v14  ;;  %v2866_v19 = vadd.f32 %v8278_v4, %v2865_v15  ;;  %v4060_v20 = vadd.f32 %v8278_v4, %v4059_v17  ;;  %v5172_v14 = vld [vmem:[%s9445_s0 + $0x1150] sm:$0xff] }
 0x516   :  { %v5368_v15 = vld [vmem:[%s9445_s0 + $0x1770] sm:$0xff] }
 0x517   :  { %v3169_v23 = vmax.f32 %v2866_v19, 0.0  ;;  %v4363_v24 = vmax.f32 %v4060_v20, 0.0 }
 0x518   :  { %v676_v25 = vpop.f32.mrf.mxu0  ;;  %v1674_v26 = vpop.f32.mrf.mxu1 }
 0x519   :  { %v3365_v29 = vmax.f32 %v2171_v18, %v3169_v23  ;;  %2915 = vmatmul.f32.gmra.mxu2 %v5169_v21  ;;  %v677_v30 = vadd.f32 %v8278_v4, %v676_v25  ;;  %v1675_v31 = vadd.f32 %v8278_v4, %v1674_v26  ;;  %4109 = vmatmul.f32.gmra.mxu3 %v5365_v22  ;;  %v176_v21 = vld [vmem:[%s9445_s0 + $0x510] sm:$0xff] }
 0x51a   :  { %v4976_v22 = vld [vmem:[%s9445_s0 + $0xb30] sm:$0xff] }
 0x51b   :  { %v4559_v32 = vmax.f32 %v3365_v29, %v4363_v24  ;;  %v978_v33 = vmax.f32 %v677_v30, 0.0  ;;  %v1976_v34 = vmax.f32 %v1675_v31, 0.0  ;;  %723 = vmatmul.f32.gmra.mxu0 %v173_v27  ;;  %1721 = vmatmul.f32.gmra.mxu1 %v4973_v28 }
 0x51c   :  { %v2868_v35 = vpop.f32.mrf.mxu2  ;;  %v4062_v36 = vpop.f32.mrf.mxu3 }
 0x51d   :  { %4756 = vst.msk [vmem:[%s9447_s3 + $0x470] sm:$0xff] %vm4613_vm0, %v4559_v32  ;;  %v2172_v6 = vmax.f32 %v978_v33, %v1976_v34  ;;  %v2869_v37 = vadd.f32 %v8278_v4, %v2868_v35  ;;  %v4063_v8 = vadd.f32 %v8278_v4, %v4062_v36  ;;  %v5173_v34 = vld [vmem:[%s9445_s0 + $0x1158] sm:$0xff] }
 0x51e   :  { %v5369_v35 = vld [vmem:[%s9445_s0 + $0x1778] sm:$0xff] }
 0x51f   :  { %v3170_v41 = vmax.f32 %v2869_v37, 0.0  ;;  %v4364_v43 = vmax.f32 %v4063_v8, 0.0 }
 0x520   :  { %v679_v44 = vpop.f32.mrf.mxu0  ;;  %v1677_v45 = vpop.f32.mrf.mxu1 }
 0x521   :  { %v3366_v48 = vmax.f32 %v2172_v6, %v3170_v41  ;;  %2918 = vmatmul.f32.gmra.mxu2 %v5170_v39  ;;  %v680_v49 = vadd.f32 %v8278_v4, %v679_v44  ;;  %v1678_v50 = vadd.f32 %v8278_v4, %v1677_v45  ;;  %4112 = vmatmul.f32.gmra.mxu3 %v5366_v16  ;;  %v177_v39 = vld [vmem:[%s9445_s0 + $0x518] sm:$0xff] }
 0x522   :  { %v4977_v16 = vld [vmem:[%s9445_s0 + $0xb38] sm:$0xff] }
 0x523   :  { %v4560_v51 = vmax.f32 %v3366_v48, %v4364_v43  ;;  %v979_v52 = vmax.f32 %v680_v49, 0.0  ;;  %v1977_v53 = vmax.f32 %v1678_v50, 0.0  ;;  %726 = vmatmul.f32.gmra.mxu0 %v174_v46  ;;  %1724 = vmatmul.f32.gmra.mxu1 %v4974_v47 }
 0x524   :  { %v2871_v54 = vpop.f32.mrf.mxu2  ;;  %v4065_v55 = vpop.f32.mrf.mxu3 }
 0x525   :  { %4757 = vst.msk [vmem:[%s9447_s3 + $0x478] sm:$0xff] %vm4613_vm0, %v4560_v51  ;;  %v2173_v56 = vmax.f32 %v979_v52, %v1977_v53  ;;  %v2872_v57 = vadd.f32 %v8278_v4, %v2871_v54  ;;  %v4066_v58 = vadd.f32 %v8278_v4, %v4065_v55  ;;  %v5174_v53 = vld [vmem:[%s9445_s0 + $0x1160] sm:$0xff] }
 0x526   :  { %v5370_v54 = vld [vmem:[%s9445_s0 + $0x1780] sm:$0xff] }
 0x527   :  { %v3171_v61 = vmax.f32 %v2872_v57, 0.0  ;;  %v4365_v62 = vmax.f32 %v4066_v58, 0.0 }
 0x528   :  { %v682_v63 = vpop.f32.mrf.mxu0  ;;  %v1680_v0 = vpop.f32.mrf.mxu1 }
 0x529   :  { %v3367_v3 = vmax.f32 %v2173_v56, %v3171_v61  ;;  %2921 = vmatmul.f32.gmra.mxu2 %v5171_v59  ;;  %v683_v38 = vadd.f32 %v8278_v4, %v682_v63  ;;  %v1681_v5 = vadd.f32 %v8278_v4, %v1680_v0  ;;  %4115 = vmatmul.f32.gmra.mxu3 %v5367_v60  ;;  %v178_v59 = vld [vmem:[%s9445_s0 + $0x520] sm:$0xff] }
 0x52a   :  { %v4978_v60 = vld [vmem:[%s9445_s0 + $0xb40] sm:$0xff] }
 0x52b   :  { %v4561_v40 = vmax.f32 %v3367_v3, %v4365_v62  ;;  %v980_v7 = vmax.f32 %v683_v38, 0.0  ;;  %v1978_v42 = vmax.f32 %v1681_v5, 0.0  ;;  %729 = vmatmul.f32.gmra.mxu0 %v175_v1  ;;  %1727 = vmatmul.f32.gmra.mxu1 %v4975_v2 }
 0x52c   :  { %v2874_v9 = vpop.f32.mrf.mxu2  ;;  %v4068_v10 = vpop.f32.mrf.mxu3 }
 0x52d   :  { %4758 = vst.msk [vmem:[%s9447_s3 + $0x480] sm:$0xff] %vm4613_vm0, %v4561_v40  ;;  %v2174_v11 = vmax.f32 %v980_v7, %v1978_v42  ;;  %v2875_v12 = vadd.f32 %v8278_v4, %v2874_v9  ;;  %v4069_v13 = vadd.f32 %v8278_v4, %v4068_v10  ;;  %v5175_v42 = vld [vmem:[%s9445_s0 + $0x1168] sm:$0xff] }
 0x52e   :  { %v5371_v9 = vld [vmem:[%s9445_s0 + $0x1788] sm:$0xff] }
 0x52f   :  { %v3172_v17 = vmax.f32 %v2875_v12, 0.0  ;;  %v4366_v18 = vmax.f32 %v4069_v13, 0.0 }
 0x530   :  { %v685_v19 = vpop.f32.mrf.mxu0  ;;  %v1683_v20 = vpop.f32.mrf.mxu1 }
 0x531   :  { %v3368_v23 = vmax.f32 %v2174_v11, %v3172_v17  ;;  %2924 = vmatmul.f32.gmra.mxu2 %v5172_v14  ;;  %v686_v24 = vadd.f32 %v8278_v4, %v685_v19  ;;  %v1684_v25 = vadd.f32 %v8278_v4, %v1683_v20  ;;  %4118 = vmatmul.f32.gmra.mxu3 %v5368_v15  ;;  %v179_v14 = vld [vmem:[%s9445_s0 + $0x528] sm:$0xff] }
 0x532   :  { %v4979_v15 = vld [vmem:[%s9445_s0 + $0xb48] sm:$0xff] }
 0x533   :  { %v4562_v26 = vmax.f32 %v3368_v23, %v4366_v18  ;;  %v981_v27 = vmax.f32 %v686_v24, 0.0  ;;  %v1979_v28 = vmax.f32 %v1684_v25, 0.0  ;;  %732 = vmatmul.f32.gmra.mxu0 %v176_v21  ;;  %1730 = vmatmul.f32.gmra.mxu1 %v4976_v22 }
 0x534   :  { %v2877_v29 = vpop.f32.mrf.mxu2  ;;  %v4071_v30 = vpop.f32.mrf.mxu3 }
 0x535   :  { %4759 = vst.msk [vmem:[%s9447_s3 + $0x488] sm:$0xff] %vm4613_vm0, %v4562_v26  ;;  %v2175_v31 = vmax.f32 %v981_v27, %v1979_v28  ;;  %v2878_v32 = vadd.f32 %v8278_v4, %v2877_v29  ;;  %v4072_v33 = vadd.f32 %v8278_v4, %v4071_v30  ;;  %v5176_v28 = vld [vmem:[%s9445_s0 + $0x1170] sm:$0xff] }
 0x536   :  { %v5372_v29 = vld [vmem:[%s9445_s0 + $0x1790] sm:$0xff] }
 0x537   :  { %v3173_v36 = vmax.f32 %v2878_v32, 0.0  ;;  %v4367_v6 = vmax.f32 %v4072_v33, 0.0 }
 0x538   :  { %v688_v37 = vpop.f32.mrf.mxu0  ;;  %v1686_v8 = vpop.f32.mrf.mxu1 }
 0x539   :  { %v3369_v41 = vmax.f32 %v2175_v31, %v3173_v36  ;;  %2927 = vmatmul.f32.gmra.mxu2 %v5173_v34  ;;  %v689_v43 = vadd.f32 %v8278_v4, %v688_v37  ;;  %v1687_v44 = vadd.f32 %v8278_v4, %v1686_v8  ;;  %4121 = vmatmul.f32.gmra.mxu3 %v5369_v35  ;;  %v180_v34 = vld [vmem:[%s9445_s0 + $0x530] sm:$0xff]  ;;  %v8717_v36 = vld [vmem:[%s9446_s2] ss:$0 sm:$0xff] }
 0x53b   :  { %v4563_v45 = vmax.f32 %v3369_v41, %v4367_v6  ;;  %v982_v46 = vmax.f32 %v689_v43, 0.0  ;;  %v1980_v47 = vmax.f32 %v1687_v44, 0.0  ;;  %735 = vmatmul.f32.gmra.mxu0 %v177_v39  ;;  %1733 = vmatmul.f32.gmra.mxu1 %v4977_v16 }
 0x53c   :  { %v2880_v48 = vpop.f32.mrf.mxu2  ;;  %v4074_v49 = vpop.f32.mrf.mxu3 }
 0x53d   :  { %4760 = vst.msk [vmem:[%s9447_s3 + $0x490] sm:$0xff] %vm4613_vm0, %v4563_v45  ;;  %v2176_v50 = vmax.f32 %v982_v46, %v1980_v47  ;;  %v2881_v51 = vadd.f32 %v8278_v4, %v2880_v48  ;;  %v4075_v52 = vadd.f32 %v8278_v4, %v4074_v49  ;;  %v5177_v47 = vld [vmem:[%s9445_s0 + $0x1178] sm:$0xff] }
 0x53e   :  { %v5373_v48 = vld [vmem:[%s9445_s0 + $0x1798] sm:$0xff] }
 0x53f   :  { %v3174_v55 = vmax.f32 %v2881_v51, 0.0  ;;  %v4368_v56 = vmax.f32 %v4075_v52, 0.0 }
 0x540   :  { %v691_v57 = vpop.f32.mrf.mxu0  ;;  %v1689_v58 = vpop.f32.mrf.mxu1 }
 0x541   :  { %v3370_v61 = vmax.f32 %v2176_v50, %v3174_v55  ;;  %2930 = vmatmul.f32.gmra.mxu2 %v5174_v53  ;;  %v692_v62 = vadd.f32 %v8278_v4, %v691_v57  ;;  %v1690_v63 = vadd.f32 %v8278_v4, %v1689_v58  ;;  %4124 = vmatmul.f32.gmra.mxu3 %v5370_v54  ;;  %v181_v53 = vld [vmem:[%s9445_s0 + $0x538] sm:$0xff] }
 0x542   :  { %v4981_v54 = vld [vmem:[%s9445_s0 + $0xb58] sm:$0xff] }
 0x543   :  { %v4564_v0 = vmax.f32 %v3370_v61, %v4368_v56  ;;  %v983_v1 = vmax.f32 %v692_v62, 0.0  ;;  %v1981_v2 = vmax.f32 %v1690_v63, 0.0  ;;  %738 = vmatmul.f32.gmra.mxu0 %v178_v59  ;;  %1736 = vmatmul.f32.gmra.mxu1 %v4978_v60 }
 0x544   :  { %v2883_v3 = vpop.f32.mrf.mxu2  ;;  %v4077_v38 = vpop.f32.mrf.mxu3 }
 0x545   :  { %4761 = vst.msk [vmem:[%s9447_s3 + $0x498] sm:$0xff] %vm4613_vm0, %v4564_v0  ;;  %v2177_v5 = vmax.f32 %v983_v1, %v1981_v2  ;;  %v2884_v40 = vadd.f32 %v8278_v4, %v2883_v3  ;;  %v4078_v7 = vadd.f32 %v8278_v4, %v4077_v38  ;;  %v5178_v2 = vld [vmem:[%s9445_s0 + $0x1180] sm:$0xff] }
 0x546   :  { %v5374_v3 = vld [vmem:[%s9445_s0 + $0x17a0] sm:$0xff] }
 0x547   :  { %v3175_v10 = vmax.f32 %v2884_v40, 0.0  ;;  %v4369_v11 = vmax.f32 %v4078_v7, 0.0 }
 0x548   :  { %v694_v12 = vpop.f32.mrf.mxu0  ;;  %v1692_v13 = vpop.f32.mrf.mxu1 }
 0x549   :  { %v3371_v17 = vmax.f32 %v2177_v5, %v3175_v10  ;;  %2933 = vmatmul.f32.gmra.mxu2 %v5175_v42  ;;  %v695_v18 = vadd.f32 %v8278_v4, %v694_v12  ;;  %v1693_v19 = vadd.f32 %v8278_v4, %v1692_v13  ;;  %4127 = vmatmul.f32.gmra.mxu3 %v5371_v9  ;;  %v182_v42 = vld [vmem:[%s9445_s0 + $0x540] sm:$0xff] }
 0x54a   :  { %v4982_v9 = vld [vmem:[%s9445_s0 + $0xb60] sm:$0xff] }
 0x54b   :  { %v4565_v20 = vmax.f32 %v3371_v17, %v4369_v11  ;;  %v984_v21 = vmax.f32 %v695_v18, 0.0  ;;  %v1982_v22 = vmax.f32 %v1693_v19, 0.0  ;;  %741 = vmatmul.f32.gmra.mxu0 %v179_v14  ;;  %1739 = vmatmul.f32.gmra.mxu1 %v4979_v15 }
 0x54c   :  { %v2886_v23 = vpop.f32.mrf.mxu2  ;;  %v4080_v24 = vpop.f32.mrf.mxu3 }
 0x54d   :  { %4762 = vst.msk [vmem:[%s9447_s3 + $0x4a0] sm:$0xff] %vm4613_vm0, %v4565_v20  ;;  %v2178_v25 = vmax.f32 %v984_v21, %v1982_v22  ;;  %v2887_v26 = vadd.f32 %v8278_v4, %v2886_v23  ;;  %v4081_v27 = vadd.f32 %v8278_v4, %v4080_v24  ;;  %v4980_v4 = vld [vmem:[%s9445_s0 + $0xb50] sm:$0xff]  ;;  %v5179_v22 = vld [vmem:[%s9445_s0 + $0x1188] sm:$0xff] }
 0x54e   :  { %v5375_v23 = vld [vmem:[%s9445_s0 + $0x17a8] sm:$0xff] }
 0x54f   :  { %v3176_v30 = vmax.f32 %v2887_v26, 0.0  ;;  %v4370_v31 = vmax.f32 %v4081_v27, 0.0 }
 0x550   :  { %v697_v32 = vpop.f32.mrf.mxu0  ;;  %v1695_v33 = vpop.f32.mrf.mxu1 }
 0x551   :  { %v3372_v35 = vmax.f32 %v2178_v25, %v3176_v30  ;;  %2936 = vmatmul.f32.gmra.mxu2 %v5176_v28  ;;  %v698_v6 = vadd.f32 %v8717_v36, %v697_v32  ;;  %v1696_v37 = vadd.f32 %v8717_v36, %v1695_v33  ;;  %4130 = vmatmul.f32.gmra.mxu3 %v5372_v29  ;;  %v183_v28 = vld [vmem:[%s9445_s0 + $0x548] sm:$0xff] }
 0x552   :  { %v4983_v29 = vld [vmem:[%s9445_s0 + $0xb68] sm:$0xff] }
 0x553   :  { %v4566_v8 = vmax.f32 %v3372_v35, %v4370_v31  ;;  %v985_v39 = vmax.f32 %v698_v6, 0.0  ;;  %v1983_v16 = vmax.f32 %v1696_v37, 0.0  ;;  %744 = vmatmul.f32.gmra.mxu0 %v180_v34  ;;  %1742 = vmatmul.f32.gmra.mxu1 %v4980_v4 }
 0x554   :  { %v2889_v41 = vpop.f32.mrf.mxu2  ;;  %v4083_v43 = vpop.f32.mrf.mxu3 }
 0x555   :  { %4763 = vst.msk [vmem:[%s9447_s3 + $0x4a8] sm:$0xff] %vm4613_vm0, %v4566_v8  ;;  %v2179_v44 = vmax.f32 %v985_v39, %v1983_v16  ;;  %v2890_v45 = vadd.f32 %v8717_v36, %v2889_v41  ;;  %v4084_v46 = vadd.f32 %v8717_v36, %v4083_v43  ;;  %v5180_v16 = vld [vmem:[%s9445_s0 + $0x1190] sm:$0xff] }
 0x556   :  { %v5376_v41 = vld [vmem:[%s9445_s0 + $0x17b0] sm:$0xff] }
 0x557   :  { %v3177_v49 = vmax.f32 %v2890_v45, 0.0  ;;  %v4371_v50 = vmax.f32 %v4084_v46, 0.0 }
 0x558   :  { %v700_v51 = vpop.f32.mrf.mxu0  ;;  %v1698_v52 = vpop.f32.mrf.mxu1 }
 0x559   :  { %v3373_v55 = vmax.f32 %v2179_v44, %v3177_v49  ;;  %2939 = vmatmul.f32.gmra.mxu2 %v5177_v47  ;;  %v701_v56 = vadd.f32 %v8717_v36, %v700_v51  ;;  %v1699_v57 = vadd.f32 %v8717_v36, %v1698_v52  ;;  %4133 = vmatmul.f32.gmra.mxu3 %v5373_v48  ;;  %v184_v47 = vld [vmem:[%s9445_s0 + $0x550] sm:$0xff] }
 0x55a   :  { %v4984_v48 = vld [vmem:[%s9445_s0 + $0xb70] sm:$0xff] }
 0x55b   :  { %v4567_v58 = vmax.f32 %v3373_v55, %v4371_v50  ;;  %v986_v59 = vmax.f32 %v701_v56, 0.0  ;;  %v1984_v60 = vmax.f32 %v1699_v57, 0.0  ;;  %747 = vmatmul.f32.gmra.mxu0 %v181_v53  ;;  %1745 = vmatmul.f32.gmra.mxu1 %v4981_v54 }
 0x55c   :  { %v2892_v61 = vpop.f32.mrf.mxu2  ;;  %v4086_v62 = vpop.f32.mrf.mxu3 }
 0x55d   :  { %4764 = vst.msk [vmem:[%s9447_s3 + $0x4b0] sm:$0xff] %vm4613_vm0, %v4567_v58  ;;  %v2180_v63 = vmax.f32 %v986_v59, %v1984_v60  ;;  %v2893_v0 = vadd.f32 %v8717_v36, %v2892_v61  ;;  %v4087_v1 = vadd.f32 %v8717_v36, %v4086_v62  ;;  %v5181_v60 = vld [vmem:[%s9445_s0 + $0x1198] sm:$0xff] }
 0x55e   :  { %v5377_v61 = vld [vmem:[%s9445_s0 + $0x17b8] sm:$0xff] }
 0x55f   :  { %v3178_v38 = vmax.f32 %v2893_v0, 0.0  ;;  %v4372_v5 = vmax.f32 %v4087_v1, 0.0 }
 0x560   :  { %v703_v40 = vpop.f32.mrf.mxu0  ;;  %v1701_v7 = vpop.f32.mrf.mxu1 }
 0x561   :  { %v3374_v10 = vmax.f32 %v2180_v63, %v3178_v38  ;;  %2942 = vmatmul.f32.gmra.mxu2 %v5178_v2  ;;  %v704_v11 = vadd.f32 %v8717_v36, %v703_v40  ;;  %v1702_v12 = vadd.f32 %v8717_v36, %v1701_v7  ;;  %4136 = vmatmul.f32.gmra.mxu3 %v5374_v3  ;;  %v185_v2 = vld [vmem:[%s9445_s0 + $0x558] sm:$0xff] }
 0x562   :  { %v4985_v3 = vld [vmem:[%s9445_s0 + $0xb78] sm:$0xff] }
 0x563   :  { %v4568_v13 = vmax.f32 %v3374_v10, %v4372_v5  ;;  %v987_v14 = vmax.f32 %v704_v11, 0.0  ;;  %v1985_v15 = vmax.f32 %v1702_v12, 0.0  ;;  %750 = vmatmul.f32.gmra.mxu0 %v182_v42  ;;  %1748 = vmatmul.f32.gmra.mxu1 %v4982_v9 }
 0x564   :  { %v2895_v17 = vpop.f32.mrf.mxu2  ;;  %v4089_v18 = vpop.f32.mrf.mxu3 }
 0x565   :  { %4765 = vst.msk [vmem:[%s9447_s3 + $0x4b8] sm:$0xff] %vm4613_vm0, %v4568_v13  ;;  %v2181_v19 = vmax.f32 %v987_v14, %v1985_v15  ;;  %v2896_v20 = vadd.f32 %v8717_v36, %v2895_v17  ;;  %v4090_v21 = vadd.f32 %v8717_v36, %v4089_v18  ;;  %v5182_v15 = vld [vmem:[%s9445_s0 + $0x11a0] sm:$0xff] }
 0x566   :  { %v5378_v17 = vld [vmem:[%s9445_s0 + $0x17c0] sm:$0xff] }
 0x567   :  { %v3179_v24 = vmax.f32 %v2896_v20, 0.0  ;;  %v4373_v25 = vmax.f32 %v4090_v21, 0.0 }
 0x568   :  { %v706_v26 = vpop.f32.mrf.mxu0  ;;  %v1704_v27 = vpop.f32.mrf.mxu1 }
 0x569   :  { %v3375_v30 = vmax.f32 %v2181_v19, %v3179_v24  ;;  %2945 = vmatmul.f32.gmra.mxu2 %v5179_v22  ;;  %v707_v31 = vadd.f32 %v8717_v36, %v706_v26  ;;  %v1705_v32 = vadd.f32 %v8717_v36, %v1704_v27  ;;  %4139 = vmatmul.f32.gmra.mxu3 %v5375_v23  ;;  %v186_v22 = vld [vmem:[%s9445_s0 + $0x560] sm:$0xff] }
 0x56a   :  { %v4986_v23 = vld [vmem:[%s9445_s0 + $0xb80] sm:$0xff] }
 0x56b   :  { %v4569_v33 = vmax.f32 %v3375_v30, %v4373_v25  ;;  %v988_v34 = vmax.f32 %v707_v31, 0.0  ;;  %v1986_v4 = vmax.f32 %v1705_v32, 0.0  ;;  %753 = vmatmul.f32.gmra.mxu0 %v183_v28  ;;  %1751 = vmatmul.f32.gmra.mxu1 %v4983_v29 }
 0x56c   :  { %v2898_v35 = vpop.f32.mrf.mxu2  ;;  %v4092_v6 = vpop.f32.mrf.mxu3 }
 0x56d   :  { %4766 = vst.msk [vmem:[%s9447_s3 + $0x4c0] sm:$0xff] %vm4613_vm0, %v4569_v33  ;;  %v2182_v37 = vmax.f32 %v988_v34, %v1986_v4  ;;  %v2899_v8 = vadd.f32 %v8717_v36, %v2898_v35  ;;  %v4093_v39 = vadd.f32 %v8717_v36, %v4092_v6  ;;  %v5183_v4 = vld [vmem:[%s9445_s0 + $0x11a8] sm:$0xff] }
 0x56e   :  { %v5379_v35 = vld [vmem:[%s9445_s0 + $0x17c8] sm:$0xff] }
 0x56f   :  { %v3180_v43 = vmax.f32 %v2899_v8, 0.0  ;;  %v4374_v44 = vmax.f32 %v4093_v39, 0.0 }
 0x570   :  { %v709_v45 = vpop.f32.mrf.mxu0  ;;  %v1707_v46 = vpop.f32.mrf.mxu1 }
 0x571   :  { %v3376_v49 = vmax.f32 %v2182_v37, %v3180_v43  ;;  %2948 = vmatmul.f32.gmra.mxu2 %v5180_v16  ;;  %v710_v50 = vadd.f32 %v8717_v36, %v709_v45  ;;  %v1708_v51 = vadd.f32 %v8717_v36, %v1707_v46  ;;  %4142 = vmatmul.f32.gmra.mxu3 %v5376_v41  ;;  %v187_v16 = vld [vmem:[%s9445_s0 + $0x568] sm:$0xff] }
 0x572   :  { %v4987_v41 = vld [vmem:[%s9445_s0 + $0xb88] sm:$0xff] }
 0x573   :  { %v4570_v52 = vmax.f32 %v3376_v49, %v4374_v44  ;;  %v989_v53 = vmax.f32 %v710_v50, 0.0  ;;  %v1987_v54 = vmax.f32 %v1708_v51, 0.0  ;;  %756 = vmatmul.f32.gmra.mxu0 %v184_v47  ;;  %1754 = vmatmul.f32.gmra.mxu1 %v4984_v48 }
 0x574   :  { %v2901_v55 = vpop.f32.mrf.mxu2  ;;  %v4095_v56 = vpop.f32.mrf.mxu3 }
 0x575   :  { %4767 = vst.msk [vmem:[%s9447_s3 + $0x4c8] sm:$0xff] %vm4613_vm0, %v4570_v52  ;;  %v2183_v57 = vmax.f32 %v989_v53, %v1987_v54  ;;  %v2902_v58 = vadd.f32 %v8717_v36, %v2901_v55  ;;  %v4096_v59 = vadd.f32 %v8717_v36, %v4095_v56  ;;  %v5184_v54 = vld [vmem:[%s9445_s0 + $0x11b0] sm:$0xff] }
 0x576   :  { %v5380_v55 = vld [vmem:[%s9445_s0 + $0x17d0] sm:$0xff] }
 0x577   :  { %v3181_v62 = vmax.f32 %v2902_v58, 0.0  ;;  %v4375_v63 = vmax.f32 %v4096_v59, 0.0 }
 0x578   :  { %v712_v0 = vpop.f32.mrf.mxu0  ;;  %v1710_v1 = vpop.f32.mrf.mxu1 }
 0x579   :  { %v3377_v38 = vmax.f32 %v2183_v57, %v3181_v62  ;;  %2951 = vmatmul.f32.gmra.mxu2 %v5181_v60  ;;  %v713_v5 = vadd.f32 %v8717_v36, %v712_v0  ;;  %v1711_v40 = vadd.f32 %v8717_v36, %v1710_v1  ;;  %4145 = vmatmul.f32.gmra.mxu3 %v5377_v61  ;;  %v188_v60 = vld [vmem:[%s9445_s0 + $0x570] sm:$0xff] }
 0x57a   :  { %v4988_v61 = vld [vmem:[%s9445_s0 + $0xb90] sm:$0xff] }
 0x57b   :  { %v4571_v7 = vmax.f32 %v3377_v38, %v4375_v63  ;;  %v990_v42 = vmax.f32 %v713_v5, 0.0  ;;  %v1988_v9 = vmax.f32 %v1711_v40, 0.0  ;;  %759 = vmatmul.f32.gmra.mxu0 %v185_v2  ;;  %1757 = vmatmul.f32.gmra.mxu1 %v4985_v3 }
 0x57c   :  { %v2904_v10 = vpop.f32.mrf.mxu2  ;;  %v4098_v11 = vpop.f32.mrf.mxu3 }
 0x57d   :  { %4768 = vst.msk [vmem:[%s9447_s3 + $0x4d0] sm:$0xff] %vm4613_vm0, %v4571_v7  ;;  %v2184_v12 = vmax.f32 %v990_v42, %v1988_v9  ;;  %v2905_v13 = vadd.f32 %v8717_v36, %v2904_v10  ;;  %v4099_v14 = vadd.f32 %v8717_v36, %v4098_v11  ;;  %v5185_v9 = vld [vmem:[%s9445_s0 + $0x11b8] sm:$0xff] }
 0x57e   :  { %v5381_v10 = vld [vmem:[%s9445_s0 + $0x17d8] sm:$0xff] }
 0x57f   :  { %v3182_v18 = vmax.f32 %v2905_v13, 0.0  ;;  %v4376_v19 = vmax.f32 %v4099_v14, 0.0 }
 0x580   :  { %v715_v20 = vpop.f32.mrf.mxu0  ;;  %v1713_v21 = vpop.f32.mrf.mxu1 }
 0x581   :  { %v3378_v24 = vmax.f32 %v2184_v12, %v3182_v18  ;;  %2954 = vmatmul.f32.gmra.mxu2 %v5182_v15  ;;  %v716_v25 = vadd.f32 %v8717_v36, %v715_v20  ;;  %v1714_v26 = vadd.f32 %v8717_v36, %v1713_v21  ;;  %4148 = vmatmul.f32.gmra.mxu3 %v5378_v17  ;;  %v189_v15 = vld [vmem:[%s9445_s0 + $0x578] sm:$0xff] }
 0x582   :  { %v4989_v17 = vld [vmem:[%s9445_s0 + $0xb98] sm:$0xff] }
 0x583   :  { %v4572_v27 = vmax.f32 %v3378_v24, %v4376_v19  ;;  %v991_v28 = vmax.f32 %v716_v25, 0.0  ;;  %v1989_v29 = vmax.f32 %v1714_v26, 0.0  ;;  %762 = vmatmul.f32.gmra.mxu0 %v186_v22  ;;  %1760 = vmatmul.f32.gmra.mxu1 %v4986_v23 }
 0x584   :  { %v2907_v30 = vpop.f32.mrf.mxu2  ;;  %v4101_v31 = vpop.f32.mrf.mxu3 }
 0x585   :  { %4769 = vst.msk [vmem:[%s9447_s3 + $0x4d8] sm:$0xff] %vm4613_vm0, %v4572_v27  ;;  %v2185_v32 = vmax.f32 %v991_v28, %v1989_v29  ;;  %v2908_v33 = vadd.f32 %v8717_v36, %v2907_v30  ;;  %v4102_v34 = vadd.f32 %v8717_v36, %v4101_v31  ;;  %v5186_v29 = vld [vmem:[%s9445_s0 + $0x11c0] sm:$0xff] }
 0x586   :  { %v5382_v30 = vld [vmem:[%s9445_s0 + $0x17e0] sm:$0xff] }
 0x587   :  { %v3183_v6 = vmax.f32 %v2908_v33, 0.0  ;;  %v4377_v37 = vmax.f32 %v4102_v34, 0.0 }
 0x588   :  { %v718_v8 = vpop.f32.mrf.mxu0  ;;  %v1716_v39 = vpop.f32.mrf.mxu1 }
 0x589   :  { %v3379_v43 = vmax.f32 %v2185_v32, %v3183_v6  ;;  %2957 = vmatmul.f32.gmra.mxu2 %v5183_v4  ;;  %v719_v44 = vadd.f32 %v8717_v36, %v718_v8  ;;  %v1717_v45 = vadd.f32 %v8717_v36, %v1716_v39  ;;  %4151 = vmatmul.f32.gmra.mxu3 %v5379_v35  ;;  %v190_v4 = vld [vmem:[%s9445_s0 + $0x580] sm:$0xff] }
 0x58a   :  { %v4990_v35 = vld [vmem:[%s9445_s0 + $0xba0] sm:$0xff] }
 0x58b   :  { %v4573_v46 = vmax.f32 %v3379_v43, %v4377_v37  ;;  %v992_v47 = vmax.f32 %v719_v44, 0.0  ;;  %v1990_v48 = vmax.f32 %v1717_v45, 0.0  ;;  %765 = vmatmul.f32.gmra.mxu0 %v187_v16  ;;  %1763 = vmatmul.f32.gmra.mxu1 %v4987_v41 }
 0x58c   :  { %v2910_v49 = vpop.f32.mrf.mxu2  ;;  %v4104_v50 = vpop.f32.mrf.mxu3 }
 0x58d   :  { %4770 = vst.msk [vmem:[%s9447_s3 + $0x4e0] sm:$0xff] %vm4613_vm0, %v4573_v46  ;;  %v2186_v51 = vmax.f32 %v992_v47, %v1990_v48  ;;  %v2911_v52 = vadd.f32 %v8717_v36, %v2910_v49  ;;  %v4105_v53 = vadd.f32 %v8717_v36, %v4104_v50  ;;  %v5187_v48 = vld [vmem:[%s9445_s0 + $0x11c8] sm:$0xff] }
 0x58e   :  { %v5383_v49 = vld [vmem:[%s9445_s0 + $0x17e8] sm:$0xff] }
 0x58f   :  { %v3184_v56 = vmax.f32 %v2911_v52, 0.0  ;;  %v4378_v57 = vmax.f32 %v4105_v53, 0.0 }
 0x590   :  { %v721_v58 = vpop.f32.mrf.mxu0  ;;  %v1719_v59 = vpop.f32.mrf.mxu1 }
 0x591   :  { %v3380_v62 = vmax.f32 %v2186_v51, %v3184_v56  ;;  %2960 = vmatmul.f32.gmra.mxu2 %v5184_v54  ;;  %v722_v63 = vadd.f32 %v8717_v36, %v721_v58  ;;  %v1720_v0 = vadd.f32 %v8717_v36, %v1719_v59  ;;  %4154 = vmatmul.f32.gmra.mxu3 %v5380_v55  ;;  %v191_v54 = vld [vmem:[%s9445_s0 + $0x588] sm:$0xff] }
 0x592   :  { %v4991_v55 = vld [vmem:[%s9445_s0 + $0xba8] sm:$0xff] }
 0x593   :  { %v4574_v1 = vmax.f32 %v3380_v62, %v4378_v57  ;;  %v993_v2 = vmax.f32 %v722_v63, 0.0  ;;  %v1991_v3 = vmax.f32 %v1720_v0, 0.0  ;;  %768 = vmatmul.f32.gmra.mxu0 %v188_v60  ;;  %1766 = vmatmul.f32.gmra.mxu1 %v4988_v61 }
 0x594   :  { %v2913_v38 = vpop.f32.mrf.mxu2  ;;  %v4107_v5 = vpop.f32.mrf.mxu3 }
 0x595   :  { %4771 = vst.msk [vmem:[%s9447_s3 + $0x4e8] sm:$0xff] %vm4613_vm0, %v4574_v1  ;;  %v2187_v40 = vmax.f32 %v993_v2, %v1991_v3  ;;  %v2914_v7 = vadd.f32 %v8717_v36, %v2913_v38  ;;  %v4108_v42 = vadd.f32 %v8717_v36, %v4107_v5  ;;  %v5188_v3 = vld [vmem:[%s9445_s0 + $0x11d0] sm:$0xff] }
 0x596   :  { %v5384_v38 = vld [vmem:[%s9445_s0 + $0x17f0] sm:$0xff] }
 0x597   :  { %v3185_v11 = vmax.f32 %v2914_v7, 0.0  ;;  %v4379_v12 = vmax.f32 %v4108_v42, 0.0 }
 0x598   :  { %v724_v13 = vpop.f32.mrf.mxu0  ;;  %v1722_v14 = vpop.f32.mrf.mxu1 }
 0x599   :  { %v3381_v18 = vmax.f32 %v2187_v40, %v3185_v11  ;;  %2963 = vmatmul.f32.gmra.mxu2 %v5185_v9  ;;  %v725_v19 = vadd.f32 %v8717_v36, %v724_v13  ;;  %v1723_v20 = vadd.f32 %v8717_v36, %v1722_v14  ;;  %4157 = vmatmul.f32.gmra.mxu3 %v5381_v10  ;;  %v192_v9 = vld [vmem:[%s9445_s0 + $0x590] sm:$0xff] }
 0x59a   :  { %v4992_v10 = vld [vmem:[%s9445_s0 + $0xbb0] sm:$0xff] }
 0x59b   :  { %v4575_v21 = vmax.f32 %v3381_v18, %v4379_v12  ;;  %v994_v22 = vmax.f32 %v725_v19, 0.0  ;;  %v1992_v23 = vmax.f32 %v1723_v20, 0.0  ;;  %771 = vmatmul.f32.gmra.mxu0 %v189_v15  ;;  %1769 = vmatmul.f32.gmra.mxu1 %v4989_v17 }
 0x59c   :  { %v2916_v24 = vpop.f32.mrf.mxu2  ;;  %v4110_v25 = vpop.f32.mrf.mxu3 }
 0x59d   :  { %4772 = vst.msk [vmem:[%s9447_s3 + $0x4f0] sm:$0xff] %vm4613_vm0, %v4575_v21  ;;  %v2188_v26 = vmax.f32 %v994_v22, %v1992_v23  ;;  %v2917_v27 = vadd.f32 %v8717_v36, %v2916_v24  ;;  %v4111_v28 = vadd.f32 %v8717_v36, %v4110_v25  ;;  %v5189_v23 = vld [vmem:[%s9445_s0 + $0x11d8] sm:$0xff] }
 0x59e   :  { %v5385_v24 = vld [vmem:[%s9445_s0 + $0x17f8] sm:$0xff] }
 0x59f   :  { %v3186_v31 = vmax.f32 %v2917_v27, 0.0  ;;  %v4380_v32 = vmax.f32 %v4111_v28, 0.0 }
 0x5a0   :  { %v727_v33 = vpop.f32.mrf.mxu0  ;;  %v1725_v34 = vpop.f32.mrf.mxu1 }
 0x5a1   :  { %v3382_v6 = vmax.f32 %v2188_v26, %v3186_v31  ;;  %2966 = vmatmul.f32.gmra.mxu2 %v5186_v29  ;;  %v728_v37 = vadd.f32 %v8717_v36, %v727_v33  ;;  %v1726_v8 = vadd.f32 %v8717_v36, %v1725_v34  ;;  %4160 = vmatmul.f32.gmra.mxu3 %v5382_v30  ;;  %v193_v29 = vld [vmem:[%s9445_s0 + $0x598] sm:$0xff] }
 0x5a2   :  { %v4993_v30 = vld [vmem:[%s9445_s0 + $0xbb8] sm:$0xff] }
 0x5a3   :  { %v4576_v39 = vmax.f32 %v3382_v6, %v4380_v32  ;;  %v995_v16 = vmax.f32 %v728_v37, 0.0  ;;  %v1993_v41 = vmax.f32 %v1726_v8, 0.0  ;;  %774 = vmatmul.f32.gmra.mxu0 %v190_v4  ;;  %1772 = vmatmul.f32.gmra.mxu1 %v4990_v35 }
 0x5a4   :  { %v2919_v43 = vpop.f32.mrf.mxu2  ;;  %v4113_v44 = vpop.f32.mrf.mxu3 }
 0x5a5   :  { %4773 = vst.msk [vmem:[%s9447_s3 + $0x4f8] sm:$0xff] %vm4613_vm0, %v4576_v39  ;;  %v2189_v45 = vmax.f32 %v995_v16, %v1993_v41  ;;  %v2920_v46 = vadd.f32 %v8717_v36, %v2919_v43  ;;  %v4114_v47 = vadd.f32 %v8717_v36, %v4113_v44  ;;  %v5190_v41 = vld [vmem:[%s9445_s0 + $0x11e0] sm:$0xff] }
 0x5a6   :  { %v5386_v43 = vld [vmem:[%s9445_s0 + $0x1800] sm:$0xff] }
 0x5a7   :  { %v3187_v50 = vmax.f32 %v2920_v46, 0.0  ;;  %v4381_v51 = vmax.f32 %v4114_v47, 0.0 }
 0x5a8   :  { %v730_v52 = vpop.f32.mrf.mxu0  ;;  %v1728_v53 = vpop.f32.mrf.mxu1 }
 0x5a9   :  { %v3383_v56 = vmax.f32 %v2189_v45, %v3187_v50  ;;  %2969 = vmatmul.f32.gmra.mxu2 %v5187_v48  ;;  %v731_v57 = vadd.f32 %v8717_v36, %v730_v52  ;;  %v1729_v58 = vadd.f32 %v8717_v36, %v1728_v53  ;;  %4163 = vmatmul.f32.gmra.mxu3 %v5383_v49  ;;  %v194_v48 = vld [vmem:[%s9445_s0 + $0x5a0] sm:$0xff] }
 0x5aa   :  { %v4994_v49 = vld [vmem:[%s9445_s0 + $0xbc0] sm:$0xff] }
 0x5ab   :  { %v4577_v59 = vmax.f32 %v3383_v56, %v4381_v51  ;;  %v996_v60 = vmax.f32 %v731_v57, 0.0  ;;  %v1994_v61 = vmax.f32 %v1729_v58, 0.0  ;;  %777 = vmatmul.f32.gmra.mxu0 %v191_v54  ;;  %1775 = vmatmul.f32.gmra.mxu1 %v4991_v55 }
 0x5ac   :  { %v2922_v62 = vpop.f32.mrf.mxu2  ;;  %v4116_v63 = vpop.f32.mrf.mxu3 }
 0x5ad   :  { %4774 = vst.msk [vmem:[%s9447_s3 + $0x500] sm:$0xff] %vm4613_vm0, %v4577_v59  ;;  %v2190_v0 = vmax.f32 %v996_v60, %v1994_v61  ;;  %v2923_v1 = vadd.f32 %v8717_v36, %v2922_v62  ;;  %v4117_v2 = vadd.f32 %v8717_v36, %v4116_v63  ;;  %v5191_v61 = vld [vmem:[%s9445_s0 + $0x11e8] sm:$0xff] }
 0x5ae   :  { %v5387_v62 = vld [vmem:[%s9445_s0 + $0x1808] sm:$0xff] }
 0x5af   :  { %v3188_v5 = vmax.f32 %v2923_v1, 0.0  ;;  %v4382_v40 = vmax.f32 %v4117_v2, 0.0 }
 0x5b0   :  { %v733_v7 = vpop.f32.mrf.mxu0  ;;  %v1731_v42 = vpop.f32.mrf.mxu1 }
 0x5b1   :  { %v3384_v11 = vmax.f32 %v2190_v0, %v3188_v5  ;;  %2972 = vmatmul.f32.gmra.mxu2 %v5188_v3  ;;  %v734_v12 = vadd.f32 %v8717_v36, %v733_v7  ;;  %v1732_v13 = vadd.f32 %v8717_v36, %v1731_v42  ;;  %4166 = vmatmul.f32.gmra.mxu3 %v5384_v38  ;;  %v195_v3 = vld [vmem:[%s9445_s0 + $0x5a8] sm:$0xff] }
 0x5b2   :  { %v4995_v38 = vld [vmem:[%s9445_s0 + $0xbc8] sm:$0xff] }
 0x5b3   :  { %v4578_v14 = vmax.f32 %v3384_v11, %v4382_v40  ;;  %v997_v15 = vmax.f32 %v734_v12, 0.0  ;;  %v1995_v17 = vmax.f32 %v1732_v13, 0.0  ;;  %780 = vmatmul.f32.gmra.mxu0 %v192_v9  ;;  %1778 = vmatmul.f32.gmra.mxu1 %v4992_v10 }
 0x5b4   :  { %v2925_v18 = vpop.f32.mrf.mxu2  ;;  %v4119_v19 = vpop.f32.mrf.mxu3 }
 0x5b5   :  { %4775 = vst.msk [vmem:[%s9447_s3 + $0x508] sm:$0xff] %vm4613_vm0, %v4578_v14  ;;  %v2191_v20 = vmax.f32 %v997_v15, %v1995_v17  ;;  %v2926_v21 = vadd.f32 %v8717_v36, %v2925_v18  ;;  %v4120_v22 = vadd.f32 %v8717_v36, %v4119_v19  ;;  %v5192_v17 = vld [vmem:[%s9445_s0 + $0x11f0] sm:$0xff] }
 0x5b6   :  { %v5388_v18 = vld [vmem:[%s9445_s0 + $0x1810] sm:$0xff] }
 0x5b7   :  { %v3189_v25 = vmax.f32 %v2926_v21, 0.0  ;;  %v4383_v26 = vmax.f32 %v4120_v22, 0.0 }
 0x5b8   :  { %v736_v27 = vpop.f32.mrf.mxu0  ;;  %v1734_v28 = vpop.f32.mrf.mxu1 }
 0x5b9   :  { %v3385_v31 = vmax.f32 %v2191_v20, %v3189_v25  ;;  %2975 = vmatmul.f32.gmra.mxu2 %v5189_v23  ;;  %v737_v32 = vadd.f32 %v8717_v36, %v736_v27  ;;  %v1735_v33 = vadd.f32 %v8717_v36, %v1734_v28  ;;  %4169 = vmatmul.f32.gmra.mxu3 %v5385_v24  ;;  %v196_v23 = vld [vmem:[%s9445_s0 + $0x5b0] sm:$0xff] }
 0x5ba   :  { %v4996_v24 = vld [vmem:[%s9445_s0 + $0xbd0] sm:$0xff] }
 0x5bb   :  { %v4579_v34 = vmax.f32 %v3385_v31, %v4383_v26  ;;  %v998_v4 = vmax.f32 %v737_v32, 0.0  ;;  %v1996_v35 = vmax.f32 %v1735_v33, 0.0  ;;  %783 = vmatmul.f32.gmra.mxu0 %v193_v29  ;;  %1781 = vmatmul.f32.gmra.mxu1 %v4993_v30 }
 0x5bc   :  { %v2928_v6 = vpop.f32.mrf.mxu2  ;;  %v4122_v37 = vpop.f32.mrf.mxu3 }
 0x5bd   :  { %4776 = vst.msk [vmem:[%s9447_s3 + $0x510] sm:$0xff] %vm4613_vm0, %v4579_v34  ;;  %v2192_v8 = vmax.f32 %v998_v4, %v1996_v35  ;;  %v2929_v39 = vadd.f32 %v8717_v36, %v2928_v6  ;;  %v4123_v16 = vadd.f32 %v8717_v36, %v4122_v37  ;;  %v5193_v35 = vld [vmem:[%s9445_s0 + $0x11f8] sm:$0xff] }
 0x5be   :  { %v5389_v6 = vld [vmem:[%s9445_s0 + $0x1818] sm:$0xff] }
 0x5bf   :  { %v3190_v44 = vmax.f32 %v2929_v39, 0.0  ;;  %v4384_v45 = vmax.f32 %v4123_v16, 0.0 }
 0x5c0   :  { %v739_v46 = vpop.f32.mrf.mxu0  ;;  %v1737_v47 = vpop.f32.mrf.mxu1 }
 0x5c1   :  { %v3386_v50 = vmax.f32 %v2192_v8, %v3190_v44  ;;  %2978 = vmatmul.f32.gmra.mxu2 %v5190_v41  ;;  %v740_v51 = vadd.f32 %v8717_v36, %v739_v46  ;;  %v1738_v52 = vadd.f32 %v8717_v36, %v1737_v47  ;;  %4172 = vmatmul.f32.gmra.mxu3 %v5386_v43  ;;  %v197_v41 = vld [vmem:[%s9445_s0 + $0x5b8] sm:$0xff] }
 0x5c2   :  { %v4997_v43 = vld [vmem:[%s9445_s0 + $0xbd8] sm:$0xff] }
 0x5c3   :  { %v4580_v53 = vmax.f32 %v3386_v50, %v4384_v45  ;;  %v999_v54 = vmax.f32 %v740_v51, 0.0  ;;  %v1997_v55 = vmax.f32 %v1738_v52, 0.0  ;;  %786 = vmatmul.f32.gmra.mxu0 %v194_v48  ;;  %1784 = vmatmul.f32.gmra.mxu1 %v4994_v49 }
 0x5c4   :  { %v2931_v56 = vpop.f32.mrf.mxu2  ;;  %v4125_v57 = vpop.f32.mrf.mxu3 }
 0x5c5   :  { %4777 = vst.msk [vmem:[%s9447_s3 + $0x518] sm:$0xff] %vm4613_vm0, %v4580_v53  ;;  %v2193_v58 = vmax.f32 %v999_v54, %v1997_v55  ;;  %v2932_v59 = vadd.f32 %v8717_v36, %v2931_v56  ;;  %v4126_v60 = vadd.f32 %v8717_v36, %v4125_v57  ;;  %v5194_v55 = vld [vmem:[%s9445_s0 + $0x1200] sm:$0xff] }
 0x5c6   :  { %v5390_v56 = vld [vmem:[%s9445_s0 + $0x1820] sm:$0xff] }
 0x5c7   :  { %v3191_v63 = vmax.f32 %v2932_v59, 0.0  ;;  %v4385_v0 = vmax.f32 %v4126_v60, 0.0 }
 0x5c8   :  { %v742_v1 = vpop.f32.mrf.mxu0  ;;  %v1740_v2 = vpop.f32.mrf.mxu1 }
 0x5c9   :  { %v3387_v5 = vmax.f32 %v2193_v58, %v3191_v63  ;;  %2981 = vmatmul.f32.gmra.mxu2 %v5191_v61  ;;  %v743_v40 = vadd.f32 %v8717_v36, %v742_v1  ;;  %v1741_v7 = vadd.f32 %v8717_v36, %v1740_v2  ;;  %4175 = vmatmul.f32.gmra.mxu3 %v5387_v62  ;;  %v198_v61 = vld [vmem:[%s9445_s0 + $0x5c0] sm:$0xff] }
 0x5ca   :  { %v4998_v62 = vld [vmem:[%s9445_s0 + $0xbe0] sm:$0xff] }
 0x5cb   :  { %v4581_v42 = vmax.f32 %v3387_v5, %v4385_v0  ;;  %v1000_v9 = vmax.f32 %v743_v40, 0.0  ;;  %v1998_v10 = vmax.f32 %v1741_v7, 0.0  ;;  %789 = vmatmul.f32.gmra.mxu0 %v195_v3  ;;  %1787 = vmatmul.f32.gmra.mxu1 %v4995_v38 }
 0x5cc   :  { %v2934_v11 = vpop.f32.mrf.mxu2  ;;  %v4128_v12 = vpop.f32.mrf.mxu3 }
 0x5cd   :  { %4778 = vst.msk [vmem:[%s9447_s3 + $0x520] sm:$0xff] %vm4613_vm0, %v4581_v42  ;;  %v2194_v13 = vmax.f32 %v1000_v9, %v1998_v10  ;;  %v2935_v14 = vadd.f32 %v8717_v36, %v2934_v11  ;;  %v4129_v15 = vadd.f32 %v8717_v36, %v4128_v12  ;;  %v5195_v10 = vld [vmem:[%s9445_s0 + $0x1208] sm:$0xff] }
 0x5ce   :  { %v5391_v11 = vld [vmem:[%s9445_s0 + $0x1828] sm:$0xff] }
 0x5cf   :  { %v3192_v19 = vmax.f32 %v2935_v14, 0.0  ;;  %v4386_v20 = vmax.f32 %v4129_v15, 0.0 }
 0x5d0   :  { %v745_v21 = vpop.f32.mrf.mxu0  ;;  %v1743_v22 = vpop.f32.mrf.mxu1 }
 0x5d1   :  { %v3388_v25 = vmax.f32 %v2194_v13, %v3192_v19  ;;  %2984 = vmatmul.f32.gmra.mxu2 %v5192_v17  ;;  %v746_v26 = vadd.f32 %v8717_v36, %v745_v21  ;;  %v1744_v27 = vadd.f32 %v8717_v36, %v1743_v22  ;;  %4178 = vmatmul.f32.gmra.mxu3 %v5388_v18  ;;  %v199_v17 = vld [vmem:[%s9445_s0 + $0x5c8] sm:$0xff] }
 0x5d2   :  { %v4999_v18 = vld [vmem:[%s9445_s0 + $0xbe8] sm:$0xff] }
 0x5d3   :  { %v4582_v28 = vmax.f32 %v3388_v25, %v4386_v20  ;;  %v1001_v29 = vmax.f32 %v746_v26, 0.0  ;;  %v1999_v30 = vmax.f32 %v1744_v27, 0.0  ;;  %792 = vmatmul.f32.gmra.mxu0 %v196_v23  ;;  %1790 = vmatmul.f32.gmra.mxu1 %v4996_v24 }
 0x5d4   :  { %v2937_v31 = vpop.f32.mrf.mxu2  ;;  %v4131_v32 = vpop.f32.mrf.mxu3 }
 0x5d5   :  { %4779 = vst.msk [vmem:[%s9447_s3 + $0x528] sm:$0xff] %vm4613_vm0, %v4582_v28  ;;  %v2195_v33 = vmax.f32 %v1001_v29, %v1999_v30  ;;  %v2938_v34 = vadd.f32 %v8717_v36, %v2937_v31  ;;  %v4132_v4 = vadd.f32 %v8717_v36, %v4131_v32  ;;  %v5196_v30 = vld [vmem:[%s9445_s0 + $0x1210] sm:$0xff] }
 0x5d6   :  { %v5392_v31 = vld [vmem:[%s9445_s0 + $0x1830] sm:$0xff] }
 0x5d7   :  { %v3193_v37 = vmax.f32 %v2938_v34, 0.0  ;;  %v4387_v8 = vmax.f32 %v4132_v4, 0.0 }
 0x5d8   :  { %v748_v39 = vpop.f32.mrf.mxu0  ;;  %v1746_v16 = vpop.f32.mrf.mxu1 }
 0x5d9   :  { %v3389_v44 = vmax.f32 %v2195_v33, %v3193_v37  ;;  %2987 = vmatmul.f32.gmra.mxu2 %v5193_v35  ;;  %v749_v45 = vadd.f32 %v8717_v36, %v748_v39  ;;  %v1747_v46 = vadd.f32 %v8717_v36, %v1746_v16  ;;  %4181 = vmatmul.f32.gmra.mxu3 %v5389_v6  ;;  %v200_v35 = vld [vmem:[%s9445_s0 + $0x5d0] sm:$0xff] }
 0x5da   :  { %v5000_v6 = vld [vmem:[%s9445_s0 + $0xbf0] sm:$0xff] }
 0x5db   :  { %v4583_v47 = vmax.f32 %v3389_v44, %v4387_v8  ;;  %v1002_v48 = vmax.f32 %v749_v45, 0.0  ;;  %v2000_v49 = vmax.f32 %v1747_v46, 0.0  ;;  %795 = vmatmul.f32.gmra.mxu0 %v197_v41  ;;  %1793 = vmatmul.f32.gmra.mxu1 %v4997_v43 }
 0x5dc   :  { %v2940_v50 = vpop.f32.mrf.mxu2  ;;  %v4134_v51 = vpop.f32.mrf.mxu3 }
 0x5dd   :  { %4780 = vst.msk [vmem:[%s9447_s3 + $0x530] sm:$0xff] %vm4613_vm0, %v4583_v47  ;;  %v2196_v52 = vmax.f32 %v1002_v48, %v2000_v49  ;;  %v2941_v53 = vadd.f32 %v8717_v36, %v2940_v50  ;;  %v4135_v54 = vadd.f32 %v8717_v36, %v4134_v51  ;;  %v5197_v49 = vld [vmem:[%s9445_s0 + $0x1218] sm:$0xff] }
 0x5de   :  { %v5393_v50 = vld [vmem:[%s9445_s0 + $0x1838] sm:$0xff] }
 0x5df   :  { %v3194_v57 = vmax.f32 %v2941_v53, 0.0  ;;  %v4388_v58 = vmax.f32 %v4135_v54, 0.0 }
 0x5e0   :  { %v751_v59 = vpop.f32.mrf.mxu0  ;;  %v1749_v60 = vpop.f32.mrf.mxu1 }
 0x5e1   :  { %v3390_v63 = vmax.f32 %v2196_v52, %v3194_v57  ;;  %2990 = vmatmul.f32.gmra.mxu2 %v5194_v55  ;;  %v752_v0 = vadd.f32 %v8717_v36, %v751_v59  ;;  %v1750_v1 = vadd.f32 %v8717_v36, %v1749_v60  ;;  %4184 = vmatmul.f32.gmra.mxu3 %v5390_v56  ;;  %v201_v55 = vld [vmem:[%s9445_s0 + $0x5d8] sm:$0xff] }
 0x5e2   :  { %v5001_v56 = vld [vmem:[%s9445_s0 + $0xbf8] sm:$0xff] }
 0x5e3   :  { %v4584_v2 = vmax.f32 %v3390_v63, %v4388_v58  ;;  %v1003_v3 = vmax.f32 %v752_v0, 0.0  ;;  %v2001_v38 = vmax.f32 %v1750_v1, 0.0  ;;  %798 = vmatmul.f32.gmra.mxu0 %v198_v61  ;;  %1796 = vmatmul.f32.gmra.mxu1 %v4998_v62 }
 0x5e4   :  { %v2943_v5 = vpop.f32.mrf.mxu2  ;;  %v4137_v40 = vpop.f32.mrf.mxu3 }
 0x5e5   :  { %4781 = vst.msk [vmem:[%s9447_s3 + $0x538] sm:$0xff] %vm4613_vm0, %v4584_v2  ;;  %v2197_v7 = vmax.f32 %v1003_v3, %v2001_v38  ;;  %v2944_v42 = vadd.f32 %v8717_v36, %v2943_v5  ;;  %v4138_v9 = vadd.f32 %v8717_v36, %v4137_v40  ;;  %v9148_v2 = vld [vmem:[%s9446_s2] ss:$0 sm:$0xff] }
 0x5e6   :  { %v5198_v38 = vld [vmem:[%s9445_s0 + $0x1220] sm:$0xff] }
 0x5e7   :  { %v3195_v12 = vmax.f32 %v2944_v42, 0.0  ;;  %v4389_v13 = vmax.f32 %v4138_v9, 0.0  ;;  %v5394_v5 = vld [vmem:[%s9445_s0 + $0x1840] sm:$0xff] }
 0x5e8   :  { %v754_v14 = vpop.f32.mrf.mxu0  ;;  %v1752_v15 = vpop.f32.mrf.mxu1 }
 0x5e9   :  { %v3391_v19 = vmax.f32 %v2197_v7, %v3195_v12  ;;  %2993 = vmatmul.f32.gmra.mxu2 %v5195_v10  ;;  %v755_v20 = vadd.f32 %v8717_v36, %v754_v14  ;;  %v1753_v21 = vadd.f32 %v8717_v36, %v1752_v15  ;;  %4187 = vmatmul.f32.gmra.mxu3 %v5391_v11  ;;  %v202_v10 = vld [vmem:[%s9445_s0 + $0x5e0] sm:$0xff] }
 0x5ea   :  { %v5002_v11 = vld [vmem:[%s9445_s0 + $0xc00] sm:$0xff] }
 0x5eb   :  { %v4585_v22 = vmax.f32 %v3391_v19, %v4389_v13  ;;  %v1004_v23 = vmax.f32 %v755_v20, 0.0  ;;  %v2002_v24 = vmax.f32 %v1753_v21, 0.0  ;;  %801 = vmatmul.f32.gmra.mxu0 %v199_v17  ;;  %1799 = vmatmul.f32.gmra.mxu1 %v4999_v18 }
 0x5ec   :  { %v2946_v25 = vpop.f32.mrf.mxu2  ;;  %v4140_v26 = vpop.f32.mrf.mxu3 }
 0x5ed   :  { %4782 = vst.msk [vmem:[%s9447_s3 + $0x540] sm:$0xff] %vm4613_vm0, %v4585_v22  ;;  %v2198_v27 = vmax.f32 %v1004_v23, %v2002_v24  ;;  %v2947_v28 = vadd.f32 %v8717_v36, %v2946_v25  ;;  %v4141_v29 = vadd.f32 %v8717_v36, %v4140_v26  ;;  %v5199_v24 = vld [vmem:[%s9445_s0 + $0x1228] sm:$0xff] }
 0x5ee   :  { %v5395_v25 = vld [vmem:[%s9445_s0 + $0x1848] sm:$0xff] }
 0x5ef   :  { %v3196_v32 = vmax.f32 %v2947_v28, 0.0  ;;  %v4390_v33 = vmax.f32 %v4141_v29, 0.0 }
 0x5f0   :  { %v757_v34 = vpop.f32.mrf.mxu0  ;;  %v1755_v4 = vpop.f32.mrf.mxu1 }
 0x5f1   :  { %v3392_v37 = vmax.f32 %v2198_v27, %v3196_v32  ;;  %2996 = vmatmul.f32.gmra.mxu2 %v5196_v30  ;;  %v758_v8 = vadd.f32 %v8717_v36, %v757_v34  ;;  %v1756_v39 = vadd.f32 %v8717_v36, %v1755_v4  ;;  %4190 = vmatmul.f32.gmra.mxu3 %v5392_v31  ;;  %v203_v30 = vld [vmem:[%s9445_s0 + $0x5e8] sm:$0xff] }
 0x5f2   :  { %v5003_v31 = vld [vmem:[%s9445_s0 + $0xc08] sm:$0xff] }
 0x5f3   :  { %v4586_v16 = vmax.f32 %v3392_v37, %v4390_v33  ;;  %v1005_v41 = vmax.f32 %v758_v8, 0.0  ;;  %v2003_v43 = vmax.f32 %v1756_v39, 0.0  ;;  %804 = vmatmul.f32.gmra.mxu0 %v200_v35  ;;  %1802 = vmatmul.f32.gmra.mxu1 %v5000_v6 }
 0x5f4   :  { %v2949_v44 = vpop.f32.mrf.mxu2  ;;  %v4143_v45 = vpop.f32.mrf.mxu3 }
 0x5f5   :  { %4783 = vst.msk [vmem:[%s9447_s3 + $0x548] sm:$0xff] %vm4613_vm0, %v4586_v16  ;;  %v2199_v46 = vmax.f32 %v1005_v41, %v2003_v43  ;;  %v2950_v47 = vadd.f32 %v8717_v36, %v2949_v44  ;;  %v4144_v48 = vadd.f32 %v8717_v36, %v4143_v45  ;;  %v5200_v43 = vld [vmem:[%s9445_s0 + $0x1230] sm:$0xff] }
 0x5f6   :  { %v5396_v44 = vld [vmem:[%s9445_s0 + $0x1850] sm:$0xff] }
 0x5f7   :  { %v3197_v51 = vmax.f32 %v2950_v47, 0.0  ;;  %v4391_v52 = vmax.f32 %v4144_v48, 0.0 }
 0x5f8   :  { %v760_v53 = vpop.f32.mrf.mxu0  ;;  %v1758_v54 = vpop.f32.mrf.mxu1 }
 0x5f9   :  { %v3393_v57 = vmax.f32 %v2199_v46, %v3197_v51  ;;  %2999 = vmatmul.f32.gmra.mxu2 %v5197_v49  ;;  %v761_v58 = vadd.f32 %v8717_v36, %v760_v53  ;;  %v1759_v59 = vadd.f32 %v8717_v36, %v1758_v54  ;;  %4193 = vmatmul.f32.gmra.mxu3 %v5393_v50  ;;  %v204_v49 = vld [vmem:[%s9445_s0 + $0x5f0] sm:$0xff] }
 0x5fa   :  { %v5004_v50 = vld [vmem:[%s9445_s0 + $0xc10] sm:$0xff] }
 0x5fb   :  { %v4587_v60 = vmax.f32 %v3393_v57, %v4391_v52  ;;  %v1006_v61 = vmax.f32 %v761_v58, 0.0  ;;  %v2004_v62 = vmax.f32 %v1759_v59, 0.0  ;;  %807 = vmatmul.f32.gmra.mxu0 %v201_v55  ;;  %1805 = vmatmul.f32.gmra.mxu1 %v5001_v56 }
 0x5fc   :  { %v2952_v63 = vpop.f32.mrf.mxu2  ;;  %v4146_v0 = vpop.f32.mrf.mxu3 }
 0x5fd   :  { %4784 = vst.msk [vmem:[%s9447_s3 + $0x550] sm:$0xff] %vm4613_vm0, %v4587_v60  ;;  %v2200_v1 = vmax.f32 %v1006_v61, %v2004_v62  ;;  %v2953_v36 = vadd.f32 %v9148_v2, %v2952_v63  ;;  %v4147_v3 = vadd.f32 %v9148_v2, %v4146_v0  ;;  %v5201_v62 = vld [vmem:[%s9445_s0 + $0x1238] sm:$0xff] }
 0x5fe   :  { %v5397_v63 = vld [vmem:[%s9445_s0 + $0x1858] sm:$0xff] }
 0x5ff   :  { %v3198_v40 = vmax.f32 %v2953_v36, 0.0  ;;  %v4392_v7 = vmax.f32 %v4147_v3, 0.0 }
 0x600   :  { %v763_v42 = vpop.f32.mrf.mxu0  ;;  %v1761_v9 = vpop.f32.mrf.mxu1 }
 0x601   :  { %v3394_v12 = vmax.f32 %v2200_v1, %v3198_v40  ;;  %3002 = vmatmul.f32.gmra.mxu2 %v5198_v38  ;;  %v764_v13 = vadd.f32 %v9148_v2, %v763_v42  ;;  %v1762_v14 = vadd.f32 %v9148_v2, %v1761_v9  ;;  %4196 = vmatmul.f32.gmra.mxu3 %v5394_v5  ;;  %v205_v38 = vld [vmem:[%s9445_s0 + $0x5f8] sm:$0xff] }
 0x602   :  { %v5005_v5 = vld [vmem:[%s9445_s0 + $0xc18] sm:$0xff] }
 0x603   :  { %v4588_v15 = vmax.f32 %v3394_v12, %v4392_v7  ;;  %v1007_v17 = vmax.f32 %v764_v13, 0.0  ;;  %v2005_v18 = vmax.f32 %v1762_v14, 0.0  ;;  %810 = vmatmul.f32.gmra.mxu0 %v202_v10  ;;  %1808 = vmatmul.f32.gmra.mxu1 %v5002_v11 }
 0x604   :  { %v2955_v19 = vpop.f32.mrf.mxu2  ;;  %v4149_v20 = vpop.f32.mrf.mxu3 }
 0x605   :  { %4785 = vst.msk [vmem:[%s9447_s3 + $0x558] sm:$0xff] %vm4613_vm0, %v4588_v15  ;;  %v2201_v21 = vmax.f32 %v1007_v17, %v2005_v18  ;;  %v2956_v22 = vadd.f32 %v9148_v2, %v2955_v19  ;;  %v4150_v23 = vadd.f32 %v9148_v2, %v4149_v20  ;;  %v5202_v18 = vld [vmem:[%s9445_s0 + $0x1240] sm:$0xff] }
 0x606   :  { %v5398_v19 = vld [vmem:[%s9445_s0 + $0x1860] sm:$0xff] }
 0x607   :  { %v3199_v26 = vmax.f32 %v2956_v22, 0.0  ;;  %v4393_v27 = vmax.f32 %v4150_v23, 0.0 }
 0x608   :  { %v766_v28 = vpop.f32.mrf.mxu0  ;;  %v1764_v29 = vpop.f32.mrf.mxu1 }
 0x609   :  { %v3395_v32 = vmax.f32 %v2201_v21, %v3199_v26  ;;  %3005 = vmatmul.f32.gmra.mxu2 %v5199_v24  ;;  %v767_v33 = vadd.f32 %v9148_v2, %v766_v28  ;;  %v1765_v34 = vadd.f32 %v9148_v2, %v1764_v29  ;;  %4199 = vmatmul.f32.gmra.mxu3 %v5395_v25  ;;  %v206_v24 = vld [vmem:[%s9445_s0 + $0x600] sm:$0xff] }
 0x60a   :  { %v5006_v25 = vld [vmem:[%s9445_s0 + $0xc20] sm:$0xff] }
 0x60b   :  { %v4589_v4 = vmax.f32 %v3395_v32, %v4393_v27  ;;  %v1008_v35 = vmax.f32 %v767_v33, 0.0  ;;  %v2006_v6 = vmax.f32 %v1765_v34, 0.0  ;;  %813 = vmatmul.f32.gmra.mxu0 %v203_v30  ;;  %1811 = vmatmul.f32.gmra.mxu1 %v5003_v31 }
 0x60c   :  { %v2958_v37 = vpop.f32.mrf.mxu2  ;;  %v4152_v8 = vpop.f32.mrf.mxu3 }
 0x60d   :  { %4786 = vst.msk [vmem:[%s9447_s3 + $0x560] sm:$0xff] %vm4613_vm0, %v4589_v4  ;;  %v2202_v39 = vmax.f32 %v1008_v35, %v2006_v6  ;;  %v2959_v16 = vadd.f32 %v9148_v2, %v2958_v37  ;;  %v4153_v41 = vadd.f32 %v9148_v2, %v4152_v8  ;;  %v5203_v6 = vld [vmem:[%s9445_s0 + $0x1248] sm:$0xff] }
 0x60e   :  { %v5399_v37 = vld [vmem:[%s9445_s0 + $0x1868] sm:$0xff] }
 0x60f   :  { %v3200_v45 = vmax.f32 %v2959_v16, 0.0  ;;  %v4394_v46 = vmax.f32 %v4153_v41, 0.0 }
 0x610   :  { %v769_v47 = vpop.f32.mrf.mxu0  ;;  %v1767_v48 = vpop.f32.mrf.mxu1 }
 0x611   :  { %v3396_v51 = vmax.f32 %v2202_v39, %v3200_v45  ;;  %3008 = vmatmul.f32.gmra.mxu2 %v5200_v43  ;;  %v770_v52 = vadd.f32 %v9148_v2, %v769_v47  ;;  %v1768_v53 = vadd.f32 %v9148_v2, %v1767_v48  ;;  %4202 = vmatmul.f32.gmra.mxu3 %v5396_v44  ;;  %v207_v43 = vld [vmem:[%s9445_s0 + $0x608] sm:$0xff] }
 0x612   :  { %v5007_v44 = vld [vmem:[%s9445_s0 + $0xc28] sm:$0xff] }
 0x613   :  { %v4590_v54 = vmax.f32 %v3396_v51, %v4394_v46  ;;  %v1009_v55 = vmax.f32 %v770_v52, 0.0  ;;  %v2007_v56 = vmax.f32 %v1768_v53, 0.0  ;;  %816 = vmatmul.f32.gmra.mxu0 %v204_v49  ;;  %1814 = vmatmul.f32.gmra.mxu1 %v5004_v50 }
 0x614   :  { %v2961_v57 = vpop.f32.mrf.mxu2  ;;  %v4155_v58 = vpop.f32.mrf.mxu3 }
 0x615   :  { %4787 = vst.msk [vmem:[%s9447_s3 + $0x568] sm:$0xff] %vm4613_vm0, %v4590_v54  ;;  %v2203_v59 = vmax.f32 %v1009_v55, %v2007_v56  ;;  %v2962_v60 = vadd.f32 %v9148_v2, %v2961_v57  ;;  %v4156_v61 = vadd.f32 %v9148_v2, %v4155_v58  ;;  %v5204_v56 = vld [vmem:[%s9445_s0 + $0x1250] sm:$0xff] }
 0x616   :  { %v5400_v57 = vld [vmem:[%s9445_s0 + $0x1870] sm:$0xff] }
 0x617   :  { %v3201_v0 = vmax.f32 %v2962_v60, 0.0  ;;  %v4395_v1 = vmax.f32 %v4156_v61, 0.0 }
 0x618   :  { %v772_v36 = vpop.f32.mrf.mxu0  ;;  %v1770_v3 = vpop.f32.mrf.mxu1 }
 0x619   :  { %v3397_v40 = vmax.f32 %v2203_v59, %v3201_v0  ;;  %3011 = vmatmul.f32.gmra.mxu2 %v5201_v62  ;;  %v773_v7 = vadd.f32 %v9148_v2, %v772_v36  ;;  %v1771_v42 = vadd.f32 %v9148_v2, %v1770_v3  ;;  %4205 = vmatmul.f32.gmra.mxu3 %v5397_v63  ;;  %v208_v62 = vld [vmem:[%s9445_s0 + $0x610] sm:$0xff] }
 0x61a   :  { %v5008_v63 = vld [vmem:[%s9445_s0 + $0xc30] sm:$0xff] }
 0x61b   :  { %v4591_v9 = vmax.f32 %v3397_v40, %v4395_v1  ;;  %v1010_v10 = vmax.f32 %v773_v7, 0.0  ;;  %v2008_v11 = vmax.f32 %v1771_v42, 0.0  ;;  %819 = vmatmul.f32.gmra.mxu0 %v205_v38  ;;  %1817 = vmatmul.f32.gmra.mxu1 %v5005_v5 }
 0x61c   :  { %v2964_v12 = vpop.f32.mrf.mxu2  ;;  %v4158_v13 = vpop.f32.mrf.mxu3 }
 0x61d   :  { %4788 = vst.msk [vmem:[%s9447_s3 + $0x570] sm:$0xff] %vm4613_vm0, %v4591_v9  ;;  %v2204_v14 = vmax.f32 %v1010_v10, %v2008_v11  ;;  %v2965_v15 = vadd.f32 %v9148_v2, %v2964_v12  ;;  %v4159_v17 = vadd.f32 %v9148_v2, %v4158_v13  ;;  %v5205_v11 = vld [vmem:[%s9445_s0 + $0x1258] sm:$0xff] }
 0x61e   :  { %v5401_v12 = vld [vmem:[%s9445_s0 + $0x1878] sm:$0xff] }
 0x61f   :  { %v3202_v20 = vmax.f32 %v2965_v15, 0.0  ;;  %v4396_v21 = vmax.f32 %v4159_v17, 0.0 }
 0x620   :  { %v775_v22 = vpop.f32.mrf.mxu0  ;;  %v1773_v23 = vpop.f32.mrf.mxu1 }
 0x621   :  { %v3398_v26 = vmax.f32 %v2204_v14, %v3202_v20  ;;  %3014 = vmatmul.f32.gmra.mxu2 %v5202_v18  ;;  %v776_v27 = vadd.f32 %v9148_v2, %v775_v22  ;;  %v1774_v28 = vadd.f32 %v9148_v2, %v1773_v23  ;;  %4208 = vmatmul.f32.gmra.mxu3 %v5398_v19  ;;  %v209_v18 = vld [vmem:[%s9445_s0 + $0x618] sm:$0xff] }
 0x622   :  { %v5009_v19 = vld [vmem:[%s9445_s0 + $0xc38] sm:$0xff] }
 0x623   :  { %v4592_v29 = vmax.f32 %v3398_v26, %v4396_v21  ;;  %v1011_v30 = vmax.f32 %v776_v27, 0.0  ;;  %v2009_v31 = vmax.f32 %v1774_v28, 0.0  ;;  %822 = vmatmul.f32.gmra.mxu0 %v206_v24  ;;  %1820 = vmatmul.f32.gmra.mxu1 %v5006_v25 }
 0x624   :  { %v2967_v32 = vpop.f32.mrf.mxu2  ;;  %v4161_v33 = vpop.f32.mrf.mxu3 }
 0x625   :  { %4789 = vst.msk [vmem:[%s9447_s3 + $0x578] sm:$0xff] %vm4613_vm0, %v4592_v29  ;;  %v2205_v34 = vmax.f32 %v1011_v30, %v2009_v31  ;;  %v2968_v4 = vadd.f32 %v9148_v2, %v2967_v32  ;;  %v4162_v35 = vadd.f32 %v9148_v2, %v4161_v33 }
 0x627   :  { %v3203_v8 = vmax.f32 %v2968_v4, 0.0  ;;  %v4397_v39 = vmax.f32 %v4162_v35, 0.0 }
 0x628   :  { %v778_v16 = vpop.f32.mrf.mxu0  ;;  %v1776_v41 = vpop.f32.mrf.mxu1 }
 0x629   :  { %v3399_v45 = vmax.f32 %v2205_v34, %v3203_v8  ;;  %3017 = vmatmul.f32.gmra.mxu2 %v5203_v6  ;;  %v779_v46 = vadd.f32 %v9148_v2, %v778_v16  ;;  %v1777_v47 = vadd.f32 %v9148_v2, %v1776_v41  ;;  %4211 = vmatmul.f32.gmra.mxu3 %v5399_v37 }
 0x62b   :  { %v4593_v48 = vmax.f32 %v3399_v45, %v4397_v39  ;;  %v1012_v49 = vmax.f32 %v779_v46, 0.0  ;;  %v2010_v50 = vmax.f32 %v1777_v47, 0.0  ;;  %825 = vmatmul.f32.gmra.mxu0 %v207_v43  ;;  %1823 = vmatmul.f32.gmra.mxu1 %v5007_v44 }
 0x62c   :  { %v2970_v51 = vpop.f32.mrf.mxu2  ;;  %v4164_v52 = vpop.f32.mrf.mxu3 }
 0x62d   :  { %4790 = vst.msk [vmem:[%s9447_s3 + $0x580] sm:$0xff] %vm4613_vm0, %v4593_v48  ;;  %v2206_v53 = vmax.f32 %v1012_v49, %v2010_v50  ;;  %v2971_v54 = vadd.f32 %v9148_v2, %v2970_v51  ;;  %v4165_v55 = vadd.f32 %v9148_v2, %v4164_v52 }
 0x62f   :  { %v3204_v58 = vmax.f32 %v2971_v54, 0.0  ;;  %v4398_v59 = vmax.f32 %v4165_v55, 0.0 }
 0x630   :  { %v781_v60 = vpop.f32.mrf.mxu0  ;;  %v1779_v61 = vpop.f32.mrf.mxu1 }
 0x631   :  { %v3400_v0 = vmax.f32 %v2206_v53, %v3204_v58  ;;  %3020 = vmatmul.f32.gmra.mxu2 %v5204_v56  ;;  %v782_v1 = vadd.f32 %v9148_v2, %v781_v60  ;;  %v1780_v36 = vadd.f32 %v9148_v2, %v1779_v61  ;;  %4214 = vmatmul.f32.gmra.mxu3 %v5400_v57 }
 0x633   :  { %v4594_v3 = vmax.f32 %v3400_v0, %v4398_v59  ;;  %v1013_v38 = vmax.f32 %v782_v1, 0.0  ;;  %v2011_v5 = vmax.f32 %v1780_v36, 0.0  ;;  %828 = vmatmul.f32.gmra.mxu0 %v208_v62  ;;  %1826 = vmatmul.f32.gmra.mxu1 %v5008_v63 }
 0x634   :  { %v2973_v40 = vpop.f32.mrf.mxu2  ;;  %v4167_v7 = vpop.f32.mrf.mxu3 }
 0x635   :  { %4791 = vst.msk [vmem:[%s9447_s3 + $0x588] sm:$0xff] %vm4613_vm0, %v4594_v3  ;;  %v2207_v42 = vmax.f32 %v1013_v38, %v2011_v5  ;;  %v2974_v9 = vadd.f32 %v9148_v2, %v2973_v40  ;;  %v4168_v10 = vadd.f32 %v9148_v2, %v4167_v7 }
 0x637   :  { %v3205_v13 = vmax.f32 %v2974_v9, 0.0  ;;  %v4399_v14 = vmax.f32 %v4168_v10, 0.0 }
 0x638   :  { %v784_v15 = vpop.f32.mrf.mxu0  ;;  %v1782_v17 = vpop.f32.mrf.mxu1 }
 0x639   :  { %v3401_v20 = vmax.f32 %v2207_v42, %v3205_v13  ;;  %3023 = vmatmul.f32.gmra.mxu2 %v5205_v11  ;;  %v785_v21 = vadd.f32 %v9148_v2, %v784_v15  ;;  %v1783_v22 = vadd.f32 %v9148_v2, %v1782_v17  ;;  %4217 = vmatmul.f32.gmra.mxu3 %v5401_v12 }
 0x63b   :  { %v4595_v23 = vmax.f32 %v3401_v20, %v4399_v14  ;;  %v1014_v24 = vmax.f32 %v785_v21, 0.0  ;;  %v2012_v25 = vmax.f32 %v1783_v22, 0.0  ;;  %831 = vmatmul.f32.gmra.mxu0 %v209_v18  ;;  %1829 = vmatmul.f32.gmra.mxu1 %v5009_v19 }
 0x63c   :  { %v2976_v26 = vpop.f32.mrf.mxu2  ;;  %v4170_v27 = vpop.f32.mrf.mxu3 }
 0x63d   :  { %4792 = vst.msk [vmem:[%s9447_s3 + $0x590] sm:$0xff] %vm4613_vm0, %v4595_v23  ;;  %v2208_v28 = vmax.f32 %v1014_v24, %v2012_v25  ;;  %v2977_v29 = vadd.f32 %v9148_v2, %v2976_v26  ;;  %v4171_v30 = vadd.f32 %v9148_v2, %v4170_v27 }
 0x63f   :  { %v3206_v31 = vmax.f32 %v2977_v29, 0.0  ;;  %v4400_v32 = vmax.f32 %v4171_v30, 0.0 }
 0x640   :  { %v787_v33 = vpop.f32.mrf.mxu0  ;;  %v1785_v34 = vpop.f32.mrf.mxu1 }
 0x641   :  { %v3402_v4 = vmax.f32 %v2208_v28, %v3206_v31  ;;  %v788_v35 = vadd.f32 %v9148_v2, %v787_v33  ;;  %v1786_v6 = vadd.f32 %v9148_v2, %v1785_v34 }
 0x643   :  { %v4596_v37 = vmax.f32 %v3402_v4, %v4400_v32  ;;  %v1015_v8 = vmax.f32 %v788_v35, 0.0  ;;  %v2013_v39 = vmax.f32 %v1786_v6, 0.0 }
 0x644   :  { %v2979_v16 = vpop.f32.mrf.mxu2  ;;  %v4173_v41 = vpop.f32.mrf.mxu3 }
 0x645   :  { %4793 = vst.msk [vmem:[%s9447_s3 + $0x598] sm:$0xff] %vm4613_vm0, %v4596_v37  ;;  %v2209_v43 = vmax.f32 %v1015_v8, %v2013_v39  ;;  %v2980_v44 = vadd.f32 %v9148_v2, %v2979_v16  ;;  %v4174_v45 = vadd.f32 %v9148_v2, %v4173_v41 }
 0x647   :  { %v3207_v46 = vmax.f32 %v2980_v44, 0.0  ;;  %v4401_v47 = vmax.f32 %v4174_v45, 0.0 }
 0x648   :  { %v790_v48 = vpop.f32.mrf.mxu0  ;;  %v1788_v49 = vpop.f32.mrf.mxu1 }
 0x649   :  { %v3403_v50 = vmax.f32 %v2209_v43, %v3207_v46  ;;  %v791_v51 = vadd.f32 %v9148_v2, %v790_v48  ;;  %v1789_v52 = vadd.f32 %v9148_v2, %v1788_v49 }
 0x64b   :  { %v4597_v53 = vmax.f32 %v3403_v50, %v4401_v47  ;;  %v1016_v54 = vmax.f32 %v791_v51, 0.0  ;;  %v2014_v55 = vmax.f32 %v1789_v52, 0.0 }
 0x64c   :  { %v2982_v56 = vpop.f32.mrf.mxu2  ;;  %v4176_v57 = vpop.f32.mrf.mxu3 }
 0x64d   :  { %4794 = vst.msk [vmem:[%s9447_s3 + $0x5a0] sm:$0xff] %vm4613_vm0, %v4597_v53  ;;  %v2210_v58 = vmax.f32 %v1016_v54, %v2014_v55  ;;  %v2983_v59 = vadd.f32 %v9148_v2, %v2982_v56  ;;  %v4177_v60 = vadd.f32 %v9148_v2, %v4176_v57 }
 0x64f   :  { %v3208_v61 = vmax.f32 %v2983_v59, 0.0  ;;  %v4402_v62 = vmax.f32 %v4177_v60, 0.0 }
 0x650   :  { %v793_v63 = vpop.f32.mrf.mxu0  ;;  %v1791_v0 = vpop.f32.mrf.mxu1 }
 0x651   :  { %v3404_v1 = vmax.f32 %v2210_v58, %v3208_v61  ;;  %v794_v36 = vadd.f32 %v9148_v2, %v793_v63  ;;  %v1792_v3 = vadd.f32 %v9148_v2, %v1791_v0 }
 0x653   :  { %v4598_v38 = vmax.f32 %v3404_v1, %v4402_v62  ;;  %v1017_v5 = vmax.f32 %v794_v36, 0.0  ;;  %v2015_v40 = vmax.f32 %v1792_v3, 0.0 }
 0x654   :  { %v2985_v7 = vpop.f32.mrf.mxu2  ;;  %v4179_v42 = vpop.f32.mrf.mxu3 }
 0x655   :  { %4795 = vst.msk [vmem:[%s9447_s3 + $0x5a8] sm:$0xff] %vm4613_vm0, %v4598_v38  ;;  %v2211_v9 = vmax.f32 %v1017_v5, %v2015_v40  ;;  %v2986_v10 = vadd.f32 %v9148_v2, %v2985_v7  ;;  %v4180_v11 = vadd.f32 %v9148_v2, %v4179_v42 }
 0x657   :  { %v3209_v12 = vmax.f32 %v2986_v10, 0.0  ;;  %v4403_v13 = vmax.f32 %v4180_v11, 0.0 }
 0x658   :  { %v796_v14 = vpop.f32.mrf.mxu0  ;;  %v1794_v15 = vpop.f32.mrf.mxu1 }
 0x659   :  { %v3405_v17 = vmax.f32 %v2211_v9, %v3209_v12  ;;  %v797_v18 = vadd.f32 %v9148_v2, %v796_v14  ;;  %v1795_v19 = vadd.f32 %v9148_v2, %v1794_v15 }
 0x65b   :  { %v4599_v20 = vmax.f32 %v3405_v17, %v4403_v13  ;;  %v1018_v21 = vmax.f32 %v797_v18, 0.0  ;;  %v2016_v22 = vmax.f32 %v1795_v19, 0.0 }
 0x65c   :  { %v2988_v23 = vpop.f32.mrf.mxu2  ;;  %v4182_v24 = vpop.f32.mrf.mxu3 }
 0x65d   :  { %4796 = vst.msk [vmem:[%s9447_s3 + $0x5b0] sm:$0xff] %vm4613_vm0, %v4599_v20  ;;  %v2212_v25 = vmax.f32 %v1018_v21, %v2016_v22  ;;  %v2989_v26 = vadd.f32 %v9148_v2, %v2988_v23  ;;  %v4183_v27 = vadd.f32 %v9148_v2, %v4182_v24 }
 0x65f   :  { %v3210_v28 = vmax.f32 %v2989_v26, 0.0  ;;  %v4404_v29 = vmax.f32 %v4183_v27, 0.0 }
 0x660   :  { %v799_v30 = vpop.f32.mrf.mxu0  ;;  %v1797_v31 = vpop.f32.mrf.mxu1 }
 0x661   :  { %v3406_v32 = vmax.f32 %v2212_v25, %v3210_v28  ;;  %v800_v33 = vadd.f32 %v9148_v2, %v799_v30  ;;  %v1798_v34 = vadd.f32 %v9148_v2, %v1797_v31 }
 0x663   :  { %v4600_v4 = vmax.f32 %v3406_v32, %v4404_v29  ;;  %v1019_v35 = vmax.f32 %v800_v33, 0.0  ;;  %v2017_v6 = vmax.f32 %v1798_v34, 0.0 }
 0x664   :  { %v2991_v37 = vpop.f32.mrf.mxu2  ;;  %v4185_v8 = vpop.f32.mrf.mxu3 }
 0x665   :  { %4797 = vst.msk [vmem:[%s9447_s3 + $0x5b8] sm:$0xff] %vm4613_vm0, %v4600_v4  ;;  %v2213_v39 = vmax.f32 %v1019_v35, %v2017_v6  ;;  %v2992_v16 = vadd.f32 %v9148_v2, %v2991_v37  ;;  %v4186_v41 = vadd.f32 %v9148_v2, %v4185_v8 }
 0x667   :  { %v3211_v43 = vmax.f32 %v2992_v16, 0.0  ;;  %v4405_v44 = vmax.f32 %v4186_v41, 0.0 }
 0x668   :  { %v802_v45 = vpop.f32.mrf.mxu0  ;;  %v1800_v46 = vpop.f32.mrf.mxu1 }
 0x669   :  { %v3407_v47 = vmax.f32 %v2213_v39, %v3211_v43  ;;  %v803_v48 = vadd.f32 %v9148_v2, %v802_v45  ;;  %v1801_v49 = vadd.f32 %v9148_v2, %v1800_v46 }
 0x66b   :  { %v4601_v50 = vmax.f32 %v3407_v47, %v4405_v44  ;;  %v1020_v51 = vmax.f32 %v803_v48, 0.0  ;;  %v2018_v52 = vmax.f32 %v1801_v49, 0.0 }
 0x66c   :  { %v2994_v53 = vpop.f32.mrf.mxu2  ;;  %v4188_v54 = vpop.f32.mrf.mxu3 }
 0x66d   :  { %4798 = vst.msk [vmem:[%s9447_s3 + $0x5c0] sm:$0xff] %vm4613_vm0, %v4601_v50  ;;  %v2214_v55 = vmax.f32 %v1020_v51, %v2018_v52  ;;  %v2995_v56 = vadd.f32 %v9148_v2, %v2994_v53  ;;  %v4189_v57 = vadd.f32 %v9148_v2, %v4188_v54 }
 0x66f   :  { %v3212_v58 = vmax.f32 %v2995_v56, 0.0  ;;  %v4406_v59 = vmax.f32 %v4189_v57, 0.0 }
 0x670   :  { %v805_v60 = vpop.f32.mrf.mxu0  ;;  %v1803_v61 = vpop.f32.mrf.mxu1 }
 0x671   :  { %v3408_v62 = vmax.f32 %v2214_v55, %v3212_v58  ;;  %v806_v63 = vadd.f32 %v9148_v2, %v805_v60  ;;  %v1804_v0 = vadd.f32 %v9148_v2, %v1803_v61 }
 0x673   :  { %v4602_v1 = vmax.f32 %v3408_v62, %v4406_v59  ;;  %v1021_v36 = vmax.f32 %v806_v63, 0.0  ;;  %v2019_v3 = vmax.f32 %v1804_v0, 0.0 }
 0x674   :  { %v2997_v38 = vpop.f32.mrf.mxu2  ;;  %v4191_v5 = vpop.f32.mrf.mxu3 }
 0x675   :  { %4799 = vst.msk [vmem:[%s9447_s3 + $0x5c8] sm:$0xff] %vm4613_vm0, %v4602_v1  ;;  %v2215_v40 = vmax.f32 %v1021_v36, %v2019_v3  ;;  %v2998_v7 = vadd.f32 %v9148_v2, %v2997_v38  ;;  %v4192_v42 = vadd.f32 %v9148_v2, %v4191_v5 }
 0x677   :  { %v3213_v9 = vmax.f32 %v2998_v7, 0.0  ;;  %v4407_v10 = vmax.f32 %v4192_v42, 0.0 }
 0x678   :  { %v808_v11 = vpop.f32.mrf.mxu0  ;;  %v1806_v12 = vpop.f32.mrf.mxu1 }
 0x679   :  { %v3409_v13 = vmax.f32 %v2215_v40, %v3213_v9  ;;  %v809_v14 = vadd.f32 %v9148_v2, %v808_v11  ;;  %v1807_v15 = vadd.f32 %v9148_v2, %v1806_v12 }
 0x67b   :  { %v4603_v17 = vmax.f32 %v3409_v13, %v4407_v10  ;;  %v1022_v18 = vmax.f32 %v809_v14, 0.0  ;;  %v2020_v19 = vmax.f32 %v1807_v15, 0.0 }
 0x67c   :  { %v3000_v20 = vpop.f32.mrf.mxu2  ;;  %v4194_v21 = vpop.f32.mrf.mxu3 }
 0x67d   :  { %4800 = vst.msk [vmem:[%s9447_s3 + $0x5d0] sm:$0xff] %vm4613_vm0, %v4603_v17  ;;  %v2216_v22 = vmax.f32 %v1022_v18, %v2020_v19  ;;  %v3001_v23 = vadd.f32 %v9148_v2, %v3000_v20  ;;  %v4195_v24 = vadd.f32 %v9148_v2, %v4194_v21 }
 0x67f   :  { %v3214_v25 = vmax.f32 %v3001_v23, 0.0  ;;  %v4408_v26 = vmax.f32 %v4195_v24, 0.0 }
 0x680   :  { %v811_v27 = vpop.f32.mrf.mxu0  ;;  %v1809_v28 = vpop.f32.mrf.mxu1 }
 0x681   :  { %v3410_v29 = vmax.f32 %v2216_v22, %v3214_v25  ;;  %v812_v30 = vadd.f32 %v9148_v2, %v811_v27  ;;  %v1810_v31 = vadd.f32 %v9148_v2, %v1809_v28 }
 0x683   :  { %v4604_v32 = vmax.f32 %v3410_v29, %v4408_v26  ;;  %v1023_v33 = vmax.f32 %v812_v30, 0.0  ;;  %v2021_v34 = vmax.f32 %v1810_v31, 0.0 }
 0x684   :  { %v3003_v4 = vpop.f32.mrf.mxu2  ;;  %v4197_v35 = vpop.f32.mrf.mxu3 }
 0x685   :  { %4801 = vst.msk [vmem:[%s9447_s3 + $0x5d8] sm:$0xff] %vm4613_vm0, %v4604_v32  ;;  %v2217_v6 = vmax.f32 %v1023_v33, %v2021_v34  ;;  %v3004_v37 = vadd.f32 %v9148_v2, %v3003_v4  ;;  %v4198_v8 = vadd.f32 %v9148_v2, %v4197_v35 }
 0x687   :  { %v3215_v39 = vmax.f32 %v3004_v37, 0.0  ;;  %v4409_v16 = vmax.f32 %v4198_v8, 0.0 }
 0x688   :  { %v814_v41 = vpop.f32.mrf.mxu0  ;;  %v1812_v43 = vpop.f32.mrf.mxu1 }
 0x689   :  { %v3411_v44 = vmax.f32 %v2217_v6, %v3215_v39  ;;  %v815_v45 = vadd.f32 %v9148_v2, %v814_v41  ;;  %v1813_v46 = vadd.f32 %v9148_v2, %v1812_v43 }
 0x68b   :  { %v4605_v47 = vmax.f32 %v3411_v44, %v4409_v16  ;;  %v1024_v48 = vmax.f32 %v815_v45, 0.0  ;;  %v2022_v49 = vmax.f32 %v1813_v46, 0.0 }
 0x68c   :  { %v3006_v50 = vpop.f32.mrf.mxu2  ;;  %v4200_v51 = vpop.f32.mrf.mxu3 }
 0x68d   :  { %4802 = vst.msk [vmem:[%s9447_s3 + $0x5e0] sm:$0xff] %vm4613_vm0, %v4605_v47  ;;  %v2218_v52 = vmax.f32 %v1024_v48, %v2022_v49  ;;  %v3007_v53 = vadd.f32 %v9148_v2, %v3006_v50  ;;  %v4201_v54 = vadd.f32 %v9148_v2, %v4200_v51 }
 0x68f   :  { %v3216_v55 = vmax.f32 %v3007_v53, 0.0  ;;  %v4410_v56 = vmax.f32 %v4201_v54, 0.0 }
 0x690   :  { %v817_v57 = vpop.f32.mrf.mxu0  ;;  %v1815_v58 = vpop.f32.mrf.mxu1 }
 0x691   :  { %v3412_v59 = vmax.f32 %v2218_v52, %v3216_v55  ;;  %v818_v60 = vadd.f32 %v9148_v2, %v817_v57  ;;  %v1816_v61 = vadd.f32 %v9148_v2, %v1815_v58 }
 0x693   :  { %v4606_v62 = vmax.f32 %v3412_v59, %v4410_v56  ;;  %v1025_v63 = vmax.f32 %v818_v60, 0.0  ;;  %v2023_v0 = vmax.f32 %v1816_v61, 0.0 }
 0x694   :  { %v3009_v1 = vpop.f32.mrf.mxu2  ;;  %v4203_v36 = vpop.f32.mrf.mxu3 }
 0x695   :  { %4803 = vst.msk [vmem:[%s9447_s3 + $0x5e8] sm:$0xff] %vm4613_vm0, %v4606_v62  ;;  %v2219_v3 = vmax.f32 %v1025_v63, %v2023_v0  ;;  %v3010_v38 = vadd.f32 %v9148_v2, %v3009_v1  ;;  %v4204_v5 = vadd.f32 %v9148_v2, %v4203_v36 }
 0x697   :  { %v3217_v40 = vmax.f32 %v3010_v38, 0.0  ;;  %v4411_v7 = vmax.f32 %v4204_v5, 0.0 }
 0x698   :  { %v820_v42 = vpop.f32.mrf.mxu0  ;;  %v1818_v9 = vpop.f32.mrf.mxu1 }
 0x699   :  { %v3413_v10 = vmax.f32 %v2219_v3, %v3217_v40  ;;  %v821_v11 = vadd.f32 %v9148_v2, %v820_v42  ;;  %v1819_v12 = vadd.f32 %v9148_v2, %v1818_v9 }
 0x69b   :  { %v4607_v13 = vmax.f32 %v3413_v10, %v4411_v7  ;;  %v1026_v14 = vmax.f32 %v821_v11, 0.0  ;;  %v2024_v15 = vmax.f32 %v1819_v12, 0.0 }
 0x69c   :  { %v3012_v17 = vpop.f32.mrf.mxu2  ;;  %v4206_v18 = vpop.f32.mrf.mxu3 }
 0x69d   :  { %4804 = vst.msk [vmem:[%s9447_s3 + $0x5f0] sm:$0xff] %vm4613_vm0, %v4607_v13  ;;  %v2220_v19 = vmax.f32 %v1026_v14, %v2024_v15  ;;  %v3013_v20 = vadd.f32 %v9148_v2, %v3012_v17  ;;  %v4207_v21 = vadd.f32 %v9148_v2, %v4206_v18 }
 0x69f   :  { %v3218_v22 = vmax.f32 %v3013_v20, 0.0  ;;  %v4412_v23 = vmax.f32 %v4207_v21, 0.0 }
 0x6a0   :  { %v823_v24 = vpop.f32.mrf.mxu0  ;;  %v1821_v25 = vpop.f32.mrf.mxu1 }
 0x6a1   :  { %v3414_v26 = vmax.f32 %v2220_v19, %v3218_v22  ;;  %v824_v27 = vadd.f32 %v9148_v2, %v823_v24  ;;  %v1822_v28 = vadd.f32 %v9148_v2, %v1821_v25 }
 0x6a3   :  { %v4608_v29 = vmax.f32 %v3414_v26, %v4412_v23  ;;  %v1027_v30 = vmax.f32 %v824_v27, 0.0  ;;  %v2025_v31 = vmax.f32 %v1822_v28, 0.0 }
 0x6a4   :  { %v3015_v32 = vpop.f32.mrf.mxu2  ;;  %v4209_v33 = vpop.f32.mrf.mxu3 }
 0x6a5   :  { %4805 = vst.msk [vmem:[%s9447_s3 + $0x5f8] sm:$0xff] %vm4613_vm0, %v4608_v29  ;;  %v2221_v34 = vmax.f32 %v1027_v30, %v2025_v31  ;;  %v3016_v4 = vadd.f32 %v9148_v2, %v3015_v32  ;;  %v4210_v35 = vadd.f32 %v9148_v2, %v4209_v33 }
 0x6a7   :  { %v3219_v6 = vmax.f32 %v3016_v4, 0.0  ;;  %v4413_v37 = vmax.f32 %v4210_v35, 0.0 }
 0x6a8   :  { %v826_v8 = vpop.f32.mrf.mxu0  ;;  %v1824_v39 = vpop.f32.mrf.mxu1 }
 0x6a9   :  { %v3415_v16 = vmax.f32 %v2221_v34, %v3219_v6  ;;  %v827_v41 = vadd.f32 %v9148_v2, %v826_v8  ;;  %v1825_v43 = vadd.f32 %v9148_v2, %v1824_v39 }
 0x6ab   :  { %v4609_v44 = vmax.f32 %v3415_v16, %v4413_v37  ;;  %v1028_v45 = vmax.f32 %v827_v41, 0.0  ;;  %v2026_v46 = vmax.f32 %v1825_v43, 0.0 }
 0x6ac   :  { %v3018_v47 = vpop.f32.mrf.mxu2  ;;  %v4212_v48 = vpop.f32.mrf.mxu3 }
 0x6ad   :  { %4806 = vst.msk [vmem:[%s9447_s3 + $0x600] sm:$0xff] %vm4613_vm0, %v4609_v44  ;;  %v2222_v49 = vmax.f32 %v1028_v45, %v2026_v46  ;;  %v3019_v50 = vadd.f32 %v9148_v2, %v3018_v47  ;;  %v4213_v51 = vadd.f32 %v9148_v2, %v4212_v48 }
 0x6af   :  { %v3220_v52 = vmax.f32 %v3019_v50, 0.0  ;;  %v4414_v53 = vmax.f32 %v4213_v51, 0.0 }
 0x6b0   :  { %v829_v54 = vpop.f32.mrf.mxu0  ;;  %v1827_v55 = vpop.f32.mrf.mxu1 }
 0x6b1   :  { %v3416_v56 = vmax.f32 %v2222_v49, %v3220_v52  ;;  %v830_v57 = vadd.f32 %v9148_v2, %v829_v54  ;;  %v1828_v58 = vadd.f32 %v9148_v2, %v1827_v55 }
 0x6b3   :  { %v4610_v59 = vmax.f32 %v3416_v56, %v4414_v53  ;;  %v1029_v60 = vmax.f32 %v830_v57, 0.0  ;;  %v2027_v61 = vmax.f32 %v1828_v58, 0.0 }
 0x6b4   :  { %v3021_v62 = vpop.f32.mrf.mxu2  ;;  %v4215_v63 = vpop.f32.mrf.mxu3 }
 0x6b5   :  { %4807 = vst.msk [vmem:[%s9447_s3 + $0x608] sm:$0xff] %vm4613_vm0, %v4610_v59  ;;  %v2223_v0 = vmax.f32 %v1029_v60, %v2027_v61  ;;  %v3022_v1 = vadd.f32 %v9148_v2, %v3021_v62  ;;  %v4216_v36 = vadd.f32 %v9148_v2, %v4215_v63 }
 0x6b7   :  { %v3221_v3 = vmax.f32 %v3022_v1, 0.0  ;;  %v4415_v38 = vmax.f32 %v4216_v36, 0.0 }
 0x6b8   :  { %v832_v5 = vpop.f32.mrf.mxu0  ;;  %v1830_v40 = vpop.f32.mrf.mxu1 }
 0x6b9   :  { %v3417_v7 = vmax.f32 %v2223_v0, %v3221_v3  ;;  %v833_v42 = vadd.f32 %v9148_v2, %v832_v5  ;;  %v1831_v9 = vadd.f32 %v9148_v2, %v1830_v40 }
 0x6bb   :  { %v4611_v10 = vmax.f32 %v3417_v7, %v4415_v38  ;;  %v1030_v11 = vmax.f32 %v833_v42, 0.0  ;;  %v2028_v12 = vmax.f32 %v1831_v9, 0.0 }
 0x6bc   :  { %v3024_v13 = vpop.f32.mrf.mxu2  ;;  %v4218_v14 = vpop.f32.mrf.mxu3 }
 0x6bd   :  { %4808 = vst.msk [vmem:[%s9447_s3 + $0x610] sm:$0xff] %vm4613_vm0, %v4611_v10  ;;  %v2224_v15 = vmax.f32 %v1030_v11, %v2028_v12  ;;  %v3025_v17 = vadd.f32 %v9148_v2, %v3024_v13  ;;  %v4219_v18 = vadd.f32 %v9148_v2, %v4218_v14 }
 0x6bf   :  { %v3222_v19 = vmax.f32 %v3025_v17, 0.0  ;;  %v4416_v20 = vmax.f32 %v4219_v18, 0.0 }
 0x6c1   :  { %v3418_v21 = vmax.f32 %v2224_v15, %v3222_v19 }
 0x6c3   :  { %v4612_v22 = vmax.f32 %v3418_v21, %v4416_v20 }
 0x6c5   :  { %4809 = vst.msk [vmem:[%s9447_s3 + $0x618] sm:$0xff] %vm4613_vm0, %v4612_v22 }

// kernel: example_forward.3
= control target key start
LH: loop header
LB: loop body
LE: loop exit
PB: predicated region body
PF: predicated region fallthrough
CT: control target
= control target key end

     0   :  { %s5024_s1 = inlined_call_operand.vmem [shape: f32[256,128], index: 1, kind: input, shape index: {}]   ;;  %s5025_s2 = inlined_call_operand.vmem [shape: f32[1,128], index: 2, kind: input, shape index: {}]   ;;  %s5026_s0 = inlined_call_operand.vmem [shape: f32[4,25,8,256], index: 0, kind: input, shape index: {}]   ;;  %s5027_s3 = inlined_call_operand.vmem [shape: f32[25,128,128], index: 3, kind: input, shape index: {}]   ;;  %s5028_s4 = inlined_call_operand.vmem [shape: f32[1,128], index: 4, kind: input, shape index: {}]   ;;  %s5029_s6 = inlined_call_operand.vmem [shape: f32[1,128], index: 6, kind: input, shape index: {}]   ;;  %s5030_s5 = inlined_call_operand.vmem [shape: f32[128,128], index: 5, kind: input, shape index: {}]   ;;  %s5031_s7 = inlined_call_operand.vmem [shape: f32[128,128], index: 7, kind: input, shape index: {}]   ;;  %s5032_s8 = inlined_call_operand.vmem [shape: f32[1,128], index: 8, kind: input, shape index: {}]   ;;  %s5033_s9 = inlined_call_operand.vmem [shape: f32[8,128], index: 9, kind: output, shape index: {}]  }
   0x1   :  { %v2407_v0 = vld [vmem:[%s5024_s1 + $0x78] sm:$0xff]  ;;  %v2417_v2 = vld [vmem:[%s5024_s1 + $0x70] sm:$0xff]  ;;  %v2431_v4 = vld [vmem:[%s5024_s1 + $0x68] sm:$0xff] }
   0x2   :  { %v2412_v1 = vld [vmem:[%s5024_s1 + $0xf8] sm:$0xff]  ;;  %118 = vmatpush.msra.mxu0 %v2407_v0  ;;  %v2424_v3 = vld [vmem:[%s5024_s1 + $0xf0] sm:$0xff]  ;;  %378 = vmatpush.msra.mxu2 %v2407_v0  ;;  %v2436_v5 = vld [vmem:[%s5024_s1 + $0xe8] sm:$0xff] }
   0x3   :  { %210 = vmatpush.msra.mxu1 %v2412_v1  ;;  %470 = vmatpush.msra.mxu3 %v2412_v1  ;;  %v2445_v6 = vld [vmem:[%s5024_s1 + $0x60] sm:$0xff]  ;;  %v2459_v8 = vld [vmem:[%s5024_s1 + $0x58] sm:$0xff]  ;;  %v2473_v10 = vld [vmem:[%s5024_s1 + $0x50] sm:$0xff] }
   0x4   :  { %119 = vmatpush.msra.mxu0 %v2417_v2  ;;  %379 = vmatpush.msra.mxu2 %v2417_v2  ;;  %v2450_v7 = vld [vmem:[%s5024_s1 + $0xe0] sm:$0xff]  ;;  %v2464_v9 = vld [vmem:[%s5024_s1 + $0xd8] sm:$0xff]  ;;  %v2478_v11 = vld [vmem:[%s5024_s1 + $0xd0] sm:$0xff] }
   0x5   :  { %211 = vmatpush.msra.mxu1 %v2424_v3  ;;  %471 = vmatpush.msra.mxu3 %v2424_v3  ;;  %v2487_v12 = vld [vmem:[%s5024_s1 + $0x48] sm:$0xff]  ;;  %v2501_v14 = vld [vmem:[%s5024_s1 + $0x40] sm:$0xff]  ;;  %v2515_v16 = vld [vmem:[%s5024_s1 + $0x38] sm:$0xff] }
   0x6   :  { %120 = vmatpush.msra.mxu0 %v2431_v4  ;;  %380 = vmatpush.msra.mxu2 %v2431_v4  ;;  %v2492_v13 = vld [vmem:[%s5024_s1 + $0xc8] sm:$0xff]  ;;  %v2506_v15 = vld [vmem:[%s5024_s1 + $0xc0] sm:$0xff]  ;;  %v2520_v17 = vld [vmem:[%s5024_s1 + $0xb8] sm:$0xff] }
   0x7   :  { %212 = vmatpush.msra.mxu1 %v2436_v5  ;;  %472 = vmatpush.msra.mxu3 %v2436_v5  ;;  %v2529_v18 = vld [vmem:[%s5024_s1 + $0x30] sm:$0xff]  ;;  %v2543_v20 = vld [vmem:[%s5024_s1 + $0x28] sm:$0xff]  ;;  %v2557_v22 = vld [vmem:[%s5024_s1 + $0x20] sm:$0xff] }
   0x8   :  { %121 = vmatpush.msra.mxu0 %v2445_v6  ;;  %381 = vmatpush.msra.mxu2 %v2445_v6  ;;  %v2534_v19 = vld [vmem:[%s5024_s1 + $0xb0] sm:$0xff]  ;;  %v2548_v21 = vld [vmem:[%s5024_s1 + $0xa8] sm:$0xff]  ;;  %v2562_v23 = vld [vmem:[%s5024_s1 + $0xa0] sm:$0xff] }
   0x9   :  { %213 = vmatpush.msra.mxu1 %v2450_v7  ;;  %473 = vmatpush.msra.mxu3 %v2450_v7  ;;  %v2571_v24 = vld [vmem:[%s5024_s1 + $0x18] sm:$0xff]  ;;  %v2585_v26 = vld [vmem:[%s5024_s1 + $0x10] sm:$0xff]  ;;  %v2599_v28 = vld [vmem:[%s5024_s1 + $0x8] sm:$0xff] }
   0xa   :  { %122 = vmatpush.msra.mxu0 %v2459_v8  ;;  %382 = vmatpush.msra.mxu2 %v2459_v8  ;;  %v2576_v25 = vld [vmem:[%s5024_s1 + $0x98] sm:$0xff]  ;;  %v2590_v27 = vld [vmem:[%s5024_s1 + $0x90] sm:$0xff]  ;;  %v2604_v29 = vld [vmem:[%s5024_s1 + $0x88] sm:$0xff] }
   0xb   :  { %214 = vmatpush.msra.mxu1 %v2464_v9  ;;  %474 = vmatpush.msra.mxu3 %v2464_v9  ;;  %v2613_v30 = vld [vmem:[%s5024_s1] sm:$0xff]  ;;  %v33_v33 = vld [vmem:[%s5026_s0 + $0x8] sm:$0xff]  ;;  %v2198_v34 = vld [vmem:[%s5026_s0 + $0x190] sm:$0xff] }
   0xc   :  { %123 = vmatpush.msra.mxu0 %v2473_v10  ;;  %383 = vmatpush.msra.mxu2 %v2473_v10  ;;  %v2618_v31 = vld [vmem:[%s5024_s1 + $0x80] sm:$0xff]  ;;  %v2199_v35 = vld [vmem:[%s5026_s0 + $0x198] sm:$0xff]  ;;  %v34_v36 = vld [vmem:[%s5026_s0 + $0x10] sm:$0xff] }
   0xd   :  { %215 = vmatpush.msra.mxu1 %v2478_v11  ;;  %475 = vmatpush.msra.mxu3 %v2478_v11  ;;  %v32_v32 = vld [vmem:[%s5026_s0] sm:$0xff]  ;;  %v35_v37 = vld [vmem:[%s5026_s0 + $0x18] sm:$0xff]  ;;  %v2201_v39 = vld [vmem:[%s5026_s0 + $0x1a8] sm:$0xff] }
   0xe   :  { %124 = vmatpush.msra.mxu0 %v2487_v12  ;;  %384 = vmatpush.msra.mxu2 %v2487_v12  ;;  %v2200_v38 = vld [vmem:[%s5026_s0 + $0x1a0] sm:$0xff]  ;;  %v37_v41 = vld [vmem:[%s5026_s0 + $0x28] sm:$0xff]  ;;  %v2202_v42 = vld [vmem:[%s5026_s0 + $0x1b0] sm:$0xff] }
   0xf   :  { %216 = vmatpush.msra.mxu1 %v2492_v13  ;;  %476 = vmatpush.msra.mxu3 %v2492_v13  ;;  %v36_v40 = vld [vmem:[%s5026_s0 + $0x20] sm:$0xff]  ;;  %v2203_v43 = vld [vmem:[%s5026_s0 + $0x1b8] sm:$0xff]  ;;  %v38_v44 = vld [vmem:[%s5026_s0 + $0x30] sm:$0xff] }
  0x10   :  { %125 = vmatpush.msra.mxu0 %v2501_v14  ;;  %385 = vmatpush.msra.mxu2 %v2501_v14  ;;  %v39_v45 = vld [vmem:[%s5026_s0 + $0x38] sm:$0xff]  ;;  %v2204_v46 = vld [vmem:[%s5026_s0 + $0x1c0] sm:$0xff]  ;;  %v2205_v47 = vld [vmem:[%s5026_s0 + $0x1c8] sm:$0xff] }
  0x11   :  { %217 = vmatpush.msra.mxu1 %v2506_v15  ;;  %477 = vmatpush.msra.mxu3 %v2506_v15  ;;  %v40_v48 = vld [vmem:[%s5026_s0 + $0x40] sm:$0xff]  ;;  %v41_v49 = vld [vmem:[%s5026_s0 + $0x48] sm:$0xff]  ;;  %v2206_v50 = vld [vmem:[%s5026_s0 + $0x1d0] sm:$0xff] }
  0x12   :  { %126 = vmatpush.msra.mxu0 %v2515_v16  ;;  %386 = vmatpush.msra.mxu2 %v2515_v16  ;;  %v2207_v51 = vld [vmem:[%s5026_s0 + $0x1d8] sm:$0xff]  ;;  %v42_v52 = vld [vmem:[%s5026_s0 + $0x50] sm:$0xff]  ;;  %v2208_v54 = vld [vmem:[%s5026_s0 + $0x1e0] sm:$0xff] }
  0x13   :  { %218 = vmatpush.msra.mxu1 %v2520_v17  ;;  %478 = vmatpush.msra.mxu3 %v2520_v17  ;;  %v43_v53 = vld [vmem:[%s5026_s0 + $0x58] sm:$0xff]  ;;  %v2209_v55 = vld [vmem:[%s5026_s0 + $0x1e8] sm:$0xff]  ;;  %v44_v56 = vld [vmem:[%s5026_s0 + $0x60] sm:$0xff] }
  0x14   :  { %127 = vmatpush.msra.mxu0 %v2529_v18  ;;  %387 = vmatpush.msra.mxu2 %v2529_v18  ;;  %v45_v57 = vld [vmem:[%s5026_s0 + $0x68] sm:$0xff]  ;;  %v2210_v58 = vld [vmem:[%s5026_s0 + $0x1f0] sm:$0xff]  ;;  %v2211_v59 = vld [vmem:[%s5026_s0 + $0x1f8] sm:$0xff] }
  0x15   :  { %219 = vmatpush.msra.mxu1 %v2534_v19  ;;  %479 = vmatpush.msra.mxu3 %v2534_v19  ;;  %v46_v60 = vld [vmem:[%s5026_s0 + $0x70] sm:$0xff]  ;;  %v47_v61 = vld [vmem:[%s5026_s0 + $0x78] sm:$0xff]  ;;  %v2212_v62 = vld [vmem:[%s5026_s0 + $0x200] sm:$0xff] }
  0x16   :  { %128 = vmatpush.msra.mxu0 %v2543_v20  ;;  %388 = vmatpush.msra.mxu2 %v2543_v20  ;;  %v2213_v63 = vld [vmem:[%s5026_s0 + $0x208] sm:$0xff] }
  0x17   :  { %220 = vmatpush.msra.mxu1 %v2548_v21  ;;  %480 = vmatpush.msra.mxu3 %v2548_v21 }
  0x18   :  { %129 = vmatpush.msra.mxu0 %v2557_v22  ;;  %389 = vmatpush.msra.mxu2 %v2557_v22 }
  0x19   :  { %221 = vmatpush.msra.mxu1 %v2562_v23  ;;  %481 = vmatpush.msra.mxu3 %v2562_v23 }
  0x1a   :  { %130 = vmatpush.msra.mxu0 %v2571_v24  ;;  %390 = vmatpush.msra.mxu2 %v2571_v24 }
  0x1b   :  { %222 = vmatpush.msra.mxu1 %v2576_v25  ;;  %482 = vmatpush.msra.mxu3 %v2576_v25 }
  0x1c   :  { %131 = vmatpush.msra.mxu0 %v2585_v26  ;;  %391 = vmatpush.msra.mxu2 %v2585_v26 }
  0x1d   :  { %223 = vmatpush.msra.mxu1 %v2590_v27  ;;  %483 = vmatpush.msra.mxu3 %v2590_v27 }
  0x1e   :  { %132 = vmatpush.msra.mxu0 %v2599_v28  ;;  %392 = vmatpush.msra.mxu2 %v2599_v28 }
  0x1f   :  { %224 = vmatpush.msra.mxu1 %v2604_v29  ;;  %484 = vmatpush.msra.mxu3 %v2604_v29 }
  0x20   :  { %133 = vmatpush.msra.mxu0 %v2613_v30  ;;  %393 = vmatpush.msra.mxu2 %v2613_v30 }
  0x21   :  { %225 = vmatpush.msra.mxu1 %v2618_v31  ;;  %485 = vmatpush.msra.mxu3 %v2618_v31 }
  0x22   :  { %134 = vmatmul.f32.vlgmr.msra.gmra.mxu0 %v32_v32  ;;  %226 = vmatmul.f32.vlgmr.msra.gmra.mxu1 %v33_v33  ;;  %v2887_v32 = vld [vmem:[%s5025_s2] ss:$0 sm:$0xff] }
  0x23   :  { %394 = vmatmul.f32.vlgmr.msra.gmra.mxu2 %v2198_v34  ;;  %486 = vmatmul.f32.vlgmr.msra.gmra.mxu3 %v2199_v35  ;;  %v64_v35 = vld [vmem:[%s5026_s0 + $0x100] sm:$0xff] }
  0x24   :  { %948 = vmatpush.msrb.mxu2 %v2407_v0  ;;  %1040 = vmatpush.msrb.mxu3 %v2412_v1 }
  0x25   :  { %663 = vmatpush.msrb.mxu0 %v2407_v0  ;;  %755 = vmatpush.msrb.mxu1 %v2412_v1  ;;  %v48_v0 = vld [vmem:[%s5026_s0 + $0x80] sm:$0xff]  ;;  %v49_v1 = vld [vmem:[%s5026_s0 + $0x88] sm:$0xff] }
  0x26   :  { %949 = vmatpush.msrb.mxu2 %v2417_v2  ;;  %1041 = vmatpush.msrb.mxu3 %v2424_v3 }
  0x27   :  { %664 = vmatpush.msrb.mxu0 %v2417_v2  ;;  %756 = vmatpush.msrb.mxu1 %v2424_v3  ;;  %v2214_v2 = vld [vmem:[%s5026_s0 + $0x210] sm:$0xff]  ;;  %v2215_v3 = vld [vmem:[%s5026_s0 + $0x218] sm:$0xff] }
  0x28   :  { %950 = vmatpush.msrb.mxu2 %v2431_v4  ;;  %1042 = vmatpush.msrb.mxu3 %v2436_v5 }
  0x29   :  { %665 = vmatpush.msrb.mxu0 %v2431_v4  ;;  %757 = vmatpush.msrb.mxu1 %v2436_v5  ;;  %v50_v4 = vld [vmem:[%s5026_s0 + $0x90] sm:$0xff]  ;;  %v51_v5 = vld [vmem:[%s5026_s0 + $0x98] sm:$0xff] }
  0x2a   :  { %137 = vmatmul.f32.gmra.mxu0 %v34_v36  ;;  %229 = vmatmul.f32.gmra.mxu1 %v35_v37  ;;  %v65_v36 = vld [vmem:[%s5026_s0 + $0x108] sm:$0xff]  ;;  %v2230_v37 = vld [vmem:[%s5026_s0 + $0x290] sm:$0xff] }
  0x2b   :  { %397 = vmatmul.f32.gmra.mxu2 %v2200_v38  ;;  %489 = vmatmul.f32.gmra.mxu3 %v2201_v39  ;;  %v2231_v38 = vld [vmem:[%s5026_s0 + $0x298] sm:$0xff] }
  0x2c   :  { %951 = vmatpush.msrb.mxu2 %v2445_v6  ;;  %1043 = vmatpush.msrb.mxu3 %v2450_v7 }
  0x2d   :  { %666 = vmatpush.msrb.mxu0 %v2445_v6  ;;  %758 = vmatpush.msrb.mxu1 %v2450_v7  ;;  %v2216_v6 = vld [vmem:[%s5026_s0 + $0x220] sm:$0xff]  ;;  %v2217_v7 = vld [vmem:[%s5026_s0 + $0x228] sm:$0xff] }
  0x2e   :  { %952 = vmatpush.msrb.mxu2 %v2459_v8  ;;  %1044 = vmatpush.msrb.mxu3 %v2464_v9 }
  0x2f   :  { %667 = vmatpush.msrb.mxu0 %v2459_v8  ;;  %759 = vmatpush.msrb.mxu1 %v2464_v9  ;;  %v52_v8 = vld [vmem:[%s5026_s0 + $0xa0] sm:$0xff]  ;;  %v53_v9 = vld [vmem:[%s5026_s0 + $0xa8] sm:$0xff] }
  0x30   :  { %953 = vmatpush.msrb.mxu2 %v2473_v10  ;;  %1045 = vmatpush.msrb.mxu3 %v2478_v11 }
  0x31   :  { %668 = vmatpush.msrb.mxu0 %v2473_v10  ;;  %760 = vmatpush.msrb.mxu1 %v2478_v11  ;;  %v2218_v10 = vld [vmem:[%s5026_s0 + $0x230] sm:$0xff]  ;;  %v2219_v11 = vld [vmem:[%s5026_s0 + $0x238] sm:$0xff] }
  0x32   :  { %140 = vmatmul.f32.gmra.mxu0 %v36_v40  ;;  %232 = vmatmul.f32.gmra.mxu1 %v37_v41 }
  0x33   :  { %400 = vmatmul.f32.gmra.mxu2 %v2202_v42  ;;  %492 = vmatmul.f32.gmra.mxu3 %v2203_v43 }
  0x34   :  { %954 = vmatpush.msrb.mxu2 %v2487_v12  ;;  %1046 = vmatpush.msrb.mxu3 %v2492_v13 }
  0x35   :  { %669 = vmatpush.msrb.mxu0 %v2487_v12  ;;  %761 = vmatpush.msrb.mxu1 %v2492_v13  ;;  %v54_v12 = vld [vmem:[%s5026_s0 + $0xb0] sm:$0xff]  ;;  %v55_v13 = vld [vmem:[%s5026_s0 + $0xb8] sm:$0xff] }
  0x36   :  { %955 = vmatpush.msrb.mxu2 %v2501_v14  ;;  %1047 = vmatpush.msrb.mxu3 %v2506_v15 }
  0x37   :  { %670 = vmatpush.msrb.mxu0 %v2501_v14  ;;  %762 = vmatpush.msrb.mxu1 %v2506_v15  ;;  %v2220_v14 = vld [vmem:[%s5026_s0 + $0x240] sm:$0xff]  ;;  %v2221_v15 = vld [vmem:[%s5026_s0 + $0x248] sm:$0xff] }
  0x38   :  { %956 = vmatpush.msrb.mxu2 %v2515_v16  ;;  %1048 = vmatpush.msrb.mxu3 %v2520_v17 }
  0x39   :  { %671 = vmatpush.msrb.mxu0 %v2515_v16  ;;  %763 = vmatpush.msrb.mxu1 %v2520_v17  ;;  %v56_v16 = vld [vmem:[%s5026_s0 + $0xc0] sm:$0xff]  ;;  %v57_v17 = vld [vmem:[%s5026_s0 + $0xc8] sm:$0xff] }
  0x3a   :  { %143 = vmatmul.f32.gmra.mxu0 %v38_v44  ;;  %235 = vmatmul.f32.gmra.mxu1 %v39_v45 }
  0x3b   :  { %403 = vmatmul.f32.gmra.mxu2 %v2204_v46  ;;  %495 = vmatmul.f32.gmra.mxu3 %v2205_v47  ;;  %v66_v46 = vld [vmem:[%s5026_s0 + $0x110] sm:$0xff]  ;;  %v67_v47 = vld [vmem:[%s5026_s0 + $0x118] sm:$0xff] }
  0x3c   :  { %957 = vmatpush.msrb.mxu2 %v2529_v18  ;;  %1049 = vmatpush.msrb.mxu3 %v2534_v19 }
  0x3d   :  { %672 = vmatpush.msrb.mxu0 %v2529_v18  ;;  %764 = vmatpush.msrb.mxu1 %v2534_v19  ;;  %v2222_v18 = vld [vmem:[%s5026_s0 + $0x250] sm:$0xff]  ;;  %v2223_v19 = vld [vmem:[%s5026_s0 + $0x258] sm:$0xff] }
  0x3e   :  { %958 = vmatpush.msrb.mxu2 %v2543_v20  ;;  %1050 = vmatpush.msrb.mxu3 %v2548_v21 }
  0x3f   :  { %673 = vmatpush.msrb.mxu0 %v2543_v20  ;;  %765 = vmatpush.msrb.mxu1 %v2548_v21  ;;  %v58_v20 = vld [vmem:[%s5026_s0 + $0xd0] sm:$0xff]  ;;  %v59_v21 = vld [vmem:[%s5026_s0 + $0xd8] sm:$0xff] }
  0x40   :  { %959 = vmatpush.msrb.mxu2 %v2557_v22  ;;  %1051 = vmatpush.msrb.mxu3 %v2562_v23 }
  0x41   :  { %674 = vmatpush.msrb.mxu0 %v2557_v22  ;;  %766 = vmatpush.msrb.mxu1 %v2562_v23  ;;  %v2224_v22 = vld [vmem:[%s5026_s0 + $0x260] sm:$0xff]  ;;  %v2225_v23 = vld [vmem:[%s5026_s0 + $0x268] sm:$0xff] }
  0x42   :  { %146 = vmatmul.f32.gmra.mxu0 %v40_v48  ;;  %238 = vmatmul.f32.gmra.mxu1 %v41_v49  ;;  %v2232_v48 = vld [vmem:[%s5026_s0 + $0x2a0] sm:$0xff]  ;;  %v2233_v49 = vld [vmem:[%s5026_s0 + $0x2a8] sm:$0xff] }
  0x43   :  { %406 = vmatmul.f32.gmra.mxu2 %v2206_v50  ;;  %498 = vmatmul.f32.gmra.mxu3 %v2207_v51 }
  0x44   :  { %960 = vmatpush.msrb.mxu2 %v2571_v24  ;;  %1052 = vmatpush.msrb.mxu3 %v2576_v25 }
  0x45   :  { %675 = vmatpush.msrb.mxu0 %v2571_v24  ;;  %767 = vmatpush.msrb.mxu1 %v2576_v25  ;;  %v60_v24 = vld [vmem:[%s5026_s0 + $0xe0] sm:$0xff]  ;;  %v61_v25 = vld [vmem:[%s5026_s0 + $0xe8] sm:$0xff] }
  0x46   :  { %961 = vmatpush.msrb.mxu2 %v2585_v26  ;;  %1053 = vmatpush.msrb.mxu3 %v2590_v27 }
  0x47   :  { %676 = vmatpush.msrb.mxu0 %v2585_v26  ;;  %768 = vmatpush.msrb.mxu1 %v2590_v27  ;;  %v2226_v26 = vld [vmem:[%s5026_s0 + $0x270] sm:$0xff]  ;;  %v2227_v27 = vld [vmem:[%s5026_s0 + $0x278] sm:$0xff] }
  0x48   :  { %962 = vmatpush.msrb.mxu2 %v2599_v28  ;;  %1054 = vmatpush.msrb.mxu3 %v2604_v29 }
  0x49   :  { %677 = vmatpush.msrb.mxu0 %v2599_v28  ;;  %769 = vmatpush.msrb.mxu1 %v2604_v29  ;;  %v62_v28 = vld [vmem:[%s5026_s0 + $0xf0] sm:$0xff]  ;;  %v63_v29 = vld [vmem:[%s5026_s0 + $0xf8] sm:$0xff] }
  0x4a   :  { %149 = vmatmul.f32.gmra.mxu0 %v42_v52  ;;  %241 = vmatmul.f32.gmra.mxu1 %v43_v53 }
  0x4b   :  { %409 = vmatmul.f32.gmra.mxu2 %v2208_v54  ;;  %501 = vmatmul.f32.gmra.mxu3 %v2209_v55 }
  0x4c   :  { %678 = vmatpush.msrb.mxu0 %v2613_v30  ;;  %770 = vmatpush.msrb.mxu1 %v2618_v31 }
  0x4d   :  { %963 = vmatpush.msrb.mxu2 %v2613_v30  ;;  %1055 = vmatpush.msrb.mxu3 %v2618_v31  ;;  %v2228_v30 = vld [vmem:[%s5026_s0 + $0x280] sm:$0xff]  ;;  %v2229_v31 = vld [vmem:[%s5026_s0 + $0x288] sm:$0xff] }
  0x52   :  { %152 = vmatmul.f32.gmra.mxu0 %v44_v56  ;;  %244 = vmatmul.f32.gmra.mxu1 %v45_v57 }
  0x53   :  { %412 = vmatmul.f32.gmra.mxu2 %v2210_v58  ;;  %504 = vmatmul.f32.gmra.mxu3 %v2211_v59 }
  0x5a   :  { %155 = vmatmul.f32.gmra.mxu0 %v46_v60  ;;  %247 = vmatmul.f32.gmra.mxu1 %v47_v61  ;;  %v68_v61 = vld [vmem:[%s5026_s0 + $0x120] sm:$0xff] }
  0x5b   :  { %415 = vmatmul.f32.gmra.mxu2 %v2212_v62  ;;  %507 = vmatmul.f32.gmra.mxu3 %v2213_v63  ;;  %v69_v62 = vld [vmem:[%s5026_s0 + $0x128] sm:$0xff]  ;;  %v2234_v63 = vld [vmem:[%s5026_s0 + $0x2b0] sm:$0xff] }
  0x62   :  { %158 = vmatmul.f32.gmra.mxu0 %v48_v0  ;;  %250 = vmatmul.f32.gmra.mxu1 %v49_v1  ;;  %v2235_v0 = vld [vmem:[%s5026_s0 + $0x2b8] sm:$0xff] }
  0x63   :  { %418 = vmatmul.f32.gmra.mxu2 %v2214_v2  ;;  %510 = vmatmul.f32.gmra.mxu3 %v2215_v3 }
  0x6a   :  { %161 = vmatmul.f32.gmra.mxu0 %v50_v4  ;;  %253 = vmatmul.f32.gmra.mxu1 %v51_v5 }
  0x6b   :  { %421 = vmatmul.f32.gmra.mxu2 %v2216_v6  ;;  %513 = vmatmul.f32.gmra.mxu3 %v2217_v7 }
  0x72   :  { %164 = vmatmul.f32.gmra.mxu0 %v52_v8  ;;  %256 = vmatmul.f32.gmra.mxu1 %v53_v9 }
  0x73   :  { %424 = vmatmul.f32.gmra.mxu2 %v2218_v10  ;;  %516 = vmatmul.f32.gmra.mxu3 %v2219_v11 }
  0x7a   :  { %167 = vmatmul.f32.gmra.mxu0 %v54_v12  ;;  %259 = vmatmul.f32.gmra.mxu1 %v55_v13  ;;  %v70_v12 = vld [vmem:[%s5026_s0 + $0x130] sm:$0xff]  ;;  %v71_v13 = vld [vmem:[%s5026_s0 + $0x138] sm:$0xff] }
  0x7b   :  { %427 = vmatmul.f32.gmra.mxu2 %v2220_v14  ;;  %519 = vmatmul.f32.gmra.mxu3 %v2221_v15  ;;  %v2236_v14 = vld [vmem:[%s5026_s0 + $0x2c0] sm:$0xff]  ;;  %v2237_v15 = vld [vmem:[%s5026_s0 + $0x2c8] sm:$0xff] }
  0x82   :  { %170 = vmatmul.f32.gmra.mxu0 %v56_v16  ;;  %262 = vmatmul.f32.gmra.mxu1 %v57_v17 }
  0x83   :  { %430 = vmatmul.f32.gmra.mxu2 %v2222_v18  ;;  %522 = vmatmul.f32.gmra.mxu3 %v2223_v19 }
  0x8a   :  { %173 = vmatmul.f32.gmra.mxu0 %v58_v20  ;;  %265 = vmatmul.f32.gmra.mxu1 %v59_v21 }
  0x8b   :  { %433 = vmatmul.f32.gmra.mxu2 %v2224_v22  ;;  %525 = vmatmul.f32.gmra.mxu3 %v2225_v23 }
  0x92   :  { %176 = vmatmul.f32.gmra.mxu0 %v60_v24  ;;  %268 = vmatmul.f32.gmra.mxu1 %v61_v25 }
  0x93   :  { %436 = vmatmul.f32.gmra.mxu2 %v2226_v26  ;;  %528 = vmatmul.f32.gmra.mxu3 %v2227_v27  ;;  %v72_v27 = vld [vmem:[%s5026_s0 + $0x140] sm:$0xff] }
  0x9a   :  { %179 = vmatmul.f32.gmra.mxu0 %v62_v28  ;;  %271 = vmatmul.f32.gmra.mxu1 %v63_v29  ;;  %v73_v28 = vld [vmem:[%s5026_s0 + $0x148] sm:$0xff]  ;;  %v2238_v29 = vld [vmem:[%s5026_s0 + $0x2d0] sm:$0xff] }
  0x9b   :  { %439 = vmatmul.f32.gmra.mxu2 %v2228_v30  ;;  %531 = vmatmul.f32.gmra.mxu3 %v2229_v31  ;;  %v2239_v30 = vld [vmem:[%s5026_s0 + $0x2d8] sm:$0xff] }
  0x9f   :  { %v135_v33 = vpop.f32.mrf.mxu0  ;;  %v227_v34 = vpop.f32.mrf.mxu1 }
  0xa0   :  { %v136_v39 = vadd.f32 %v2887_v32, %v135_v33 }
  0xa2   :  { %182 = vmatmul.f32.gmra.mxu0 %v64_v35  ;;  %274 = vmatmul.f32.gmra.mxu1 %v65_v36  ;;  %v228_v42 = vadd.f32 %v227_v34, %v136_v39 }
  0xa3   :  { %442 = vmatmul.f32.gmra.mxu2 %v2230_v37  ;;  %534 = vmatmul.f32.gmra.mxu3 %v2231_v38 }
  0xa4   :  { %v302_v51 = vmax.f32 %v228_v42, 0.0 }
  0xa6   :  { %v395_v40 = vpop.f32.mrf.mxu2  ;;  %v487_v41 = vpop.f32.mrf.mxu3 }
  0xa7   :  { %v396_v43 = vadd.f32 %v2887_v32, %v395_v40  ;;  %v138_v44 = vpop.f32.mrf.mxu0  ;;  %v230_v45 = vpop.f32.mrf.mxu1 }
  0xa8   :  { %v139_v53 = vadd.f32 %v2887_v32, %v138_v44  ;;  %v75_v44 = vld [vmem:[%s5026_s0 + $0x158] sm:$0xff] }
  0xa9   :  { %v488_v50 = vadd.f32 %v487_v41, %v396_v43  ;;  %v74_v43 = vld [vmem:[%s5026_s0 + $0x150] sm:$0xff] }
  0xaa   :  { %185 = vmatmul.f32.gmra.mxu0 %v66_v46  ;;  %277 = vmatmul.f32.gmra.mxu1 %v67_v47  ;;  %v231_v57 = vadd.f32 %v230_v45, %v139_v53  ;;  %v2240_v45 = vld [vmem:[%s5026_s0 + $0x2e0] sm:$0xff]  ;;  %v2241_v46 = vld [vmem:[%s5026_s0 + $0x2e8] sm:$0xff] }
  0xab   :  { %v562_v52 = vmax.f32 %v488_v50, 0.0  ;;  %445 = vmatmul.f32.gmra.mxu2 %v2232_v48  ;;  %537 = vmatmul.f32.gmra.mxu3 %v2233_v49 }
  0xac   :  { %v303_v2 = vmax.f32 %v231_v57, 0.0 }
  0xad   :  { %v2916_v54 = vmax.f32 %v302_v51, %v562_v52 }
  0xae   :  { %v398_v55 = vpop.f32.mrf.mxu2  ;;  %v490_v56 = vpop.f32.mrf.mxu3 }
  0xaf   :  { %v399_v58 = vadd.f32 %v2887_v32, %v398_v55  ;;  %v141_v59 = vpop.f32.mrf.mxu0  ;;  %v233_v60 = vpop.f32.mrf.mxu1 }
  0xb0   :  { %v142_v4 = vadd.f32 %v2887_v32, %v141_v59  ;;  %v76_v59 = vld [vmem:[%s5026_s0 + $0x160] sm:$0xff] }
  0xb1   :  { %v491_v1 = vadd.f32 %v490_v56, %v399_v58 }
  0xb2   :  { %188 = vmatmul.f32.gmra.mxu0 %v68_v61  ;;  %280 = vmatmul.f32.gmra.mxu1 %v69_v62  ;;  %v234_v8 = vadd.f32 %v233_v60, %v142_v4  ;;  %v77_v60 = vld [vmem:[%s5026_s0 + $0x168] sm:$0xff]  ;;  %v2242_v61 = vld [vmem:[%s5026_s0 + $0x2f0] sm:$0xff]  ;;  %v2243_v62 = vld [vmem:[%s5026_s0 + $0x2f8] sm:$0xff] }
  0xb3   :  { %v563_v3 = vmax.f32 %v491_v1, 0.0  ;;  %448 = vmatmul.f32.gmra.mxu2 %v2234_v63  ;;  %540 = vmatmul.f32.gmra.mxu3 %v2235_v0 }
  0xb4   :  { %v304_v17 = vmax.f32 %v234_v8, 0.0 }
  0xb5   :  { %v2932_v5 = vmax.f32 %v303_v2, %v563_v3 }
  0xb6   :  { %v401_v6 = vpop.f32.mrf.mxu2  ;;  %v493_v7 = vpop.f32.mrf.mxu3 }
  0xb7   :  { %v402_v9 = vadd.f32 %v2887_v32, %v401_v6  ;;  %v144_v10 = vpop.f32.mrf.mxu0  ;;  %v236_v11 = vpop.f32.mrf.mxu1 }
  0xb8   :  { %v145_v19 = vadd.f32 %v2887_v32, %v144_v10 }
  0xb9   :  { %v494_v16 = vadd.f32 %v493_v7, %v402_v9 }
  0xba   :  { %191 = vmatmul.f32.gmra.mxu0 %v70_v12  ;;  %283 = vmatmul.f32.gmra.mxu1 %v71_v13  ;;  %v237_v23 = vadd.f32 %v236_v11, %v145_v19  ;;  %v78_v11 = vld [vmem:[%s5026_s0 + $0x170] sm:$0xff]  ;;  %v79_v12 = vld [vmem:[%s5026_s0 + $0x178] sm:$0xff]  ;;  %v2244_v13 = vld [vmem:[%s5026_s0 + $0x300] sm:$0xff] }
  0xbb   :  { %v564_v18 = vmax.f32 %v494_v16, 0.0  ;;  %451 = vmatmul.f32.gmra.mxu2 %v2236_v14  ;;  %543 = vmatmul.f32.gmra.mxu3 %v2237_v15  ;;  %v2245_v14 = vld [vmem:[%s5026_s0 + $0x308] sm:$0xff] }
  0xbc   :  { %v305_v33 = vmax.f32 %v237_v23, 0.0 }
  0xbd   :  { %v2948_v20 = vmax.f32 %v304_v17, %v564_v18 }
  0xbe   :  { %v404_v21 = vpop.f32.mrf.mxu2  ;;  %v496_v22 = vpop.f32.mrf.mxu3 }
  0xbf   :  { %v405_v24 = vadd.f32 %v2887_v32, %v404_v21  ;;  %v147_v25 = vpop.f32.mrf.mxu0  ;;  %v239_v26 = vpop.f32.mrf.mxu1 }
  0xc0   :  { %v148_v35 = vadd.f32 %v2887_v32, %v147_v25 }
  0xc1   :  { %v497_v31 = vadd.f32 %v496_v22, %v405_v24 }
  0xc2   :  { %194 = vmatmul.f32.gmra.mxu0 %v72_v27  ;;  %286 = vmatmul.f32.gmra.mxu1 %v73_v28  ;;  %v240_v39 = vadd.f32 %v239_v26, %v148_v35  ;;  %v80_v27 = vld [vmem:[%s5026_s0 + $0x180] sm:$0xff]  ;;  %v81_v28 = vld [vmem:[%s5026_s0 + $0x188] sm:$0xff] }
  0xc3   :  { %v565_v34 = vmax.f32 %v497_v31, 0.0  ;;  %454 = vmatmul.f32.gmra.mxu2 %v2238_v29  ;;  %546 = vmatmul.f32.gmra.mxu3 %v2239_v30  ;;  %v2246_v29 = vld [vmem:[%s5026_s0 + $0x310] sm:$0xff]  ;;  %v2247_v30 = vld [vmem:[%s5026_s0 + $0x318] sm:$0xff] }
  0xc4   :  { %v306_v48 = vmax.f32 %v240_v39, 0.0 }
  0xc5   :  { %v2964_v36 = vmax.f32 %v305_v33, %v565_v34 }
  0xc6   :  { %v407_v37 = vpop.f32.mrf.mxu2  ;;  %v499_v38 = vpop.f32.mrf.mxu3 }
  0xc7   :  { %v408_v40 = vadd.f32 %v2887_v32, %v407_v37  ;;  %v150_v41 = vpop.f32.mrf.mxu0  ;;  %v242_v42 = vpop.f32.mrf.mxu1 }
  0xc8   :  { %v151_v50 = vadd.f32 %v2887_v32, %v150_v41 }
  0xc9   :  { %v500_v47 = vadd.f32 %v499_v38, %v408_v40 }
  0xca   :  { %197 = vmatmul.f32.gmra.mxu0 %v74_v43  ;;  %289 = vmatmul.f32.gmra.mxu1 %v75_v44  ;;  %v243_v55 = vadd.f32 %v242_v42, %v151_v50  ;;  %v2248_v44 = vld [vmem:[%s5026_s0 + $0x320] sm:$0xff] }
  0xcb   :  { %v566_v49 = vmax.f32 %v500_v47, 0.0  ;;  %457 = vmatmul.f32.gmra.mxu2 %v2240_v45  ;;  %549 = vmatmul.f32.gmra.mxu3 %v2241_v46  ;;  %v2249_v45 = vld [vmem:[%s5026_s0 + $0x328] sm:$0xff]  ;;  %v2298_v46 = vld [vmem:[%s5026_s0 + $0x4b0] sm:$0xff]  ;;  %v2299_v47 = vld [vmem:[%s5026_s0 + $0x4b8] sm:$0xff] }
  0xcc   :  { %v307_v0 = vmax.f32 %v243_v55, 0.0 }
  0xcd   :  { %v2980_v51 = vmax.f32 %v306_v48, %v566_v49 }
  0xce   :  { %v410_v52 = vpop.f32.mrf.mxu2  ;;  %v502_v53 = vpop.f32.mrf.mxu3 }
  0xcf   :  { %v411_v56 = vadd.f32 %v2887_v32, %v410_v52  ;;  %v153_v57 = vpop.f32.mrf.mxu0  ;;  %v245_v58 = vpop.f32.mrf.mxu1 }
  0xd0   :  { %v154_v2 = vadd.f32 %v2887_v32, %v153_v57 }
  0xd1   :  { %v503_v63 = vadd.f32 %v502_v53, %v411_v56 }
  0xd2   :  { %200 = vmatmul.f32.gmra.mxu0 %v76_v59  ;;  %292 = vmatmul.f32.gmra.mxu1 %v77_v60  ;;  %v246_v7 = vadd.f32 %v245_v58, %v154_v2 }
  0xd3   :  { %v567_v1 = vmax.f32 %v503_v63, 0.0  ;;  %460 = vmatmul.f32.gmra.mxu2 %v2242_v61  ;;  %552 = vmatmul.f32.gmra.mxu3 %v2243_v62  ;;  %v2250_v61 = vld [vmem:[%s5026_s0 + $0x330] sm:$0xff]  ;;  %v2251_v62 = vld [vmem:[%s5026_s0 + $0x338] sm:$0xff]  ;;  %v2300_v63 = vld [vmem:[%s5026_s0 + $0x4c0] sm:$0xff] }
  0xd4   :  { %v308_v16 = vmax.f32 %v246_v7, 0.0 }
  0xd5   :  { %v2996_v3 = vmax.f32 %v307_v0, %v567_v1  ;;  %v2301_v0 = vld [vmem:[%s5026_s0 + $0x4c8] sm:$0xff] }
  0xd6   :  { %v413_v4 = vpop.f32.mrf.mxu2  ;;  %v505_v6 = vpop.f32.mrf.mxu3 }
  0xd7   :  { %v414_v8 = vadd.f32 %v2887_v32, %v413_v4  ;;  %v156_v9 = vpop.f32.mrf.mxu0  ;;  %v248_v10 = vpop.f32.mrf.mxu1 }
  0xd8   :  { %v157_v18 = vadd.f32 %v2887_v32, %v156_v9 }
  0xd9   :  { %v506_v15 = vadd.f32 %v505_v6, %v414_v8 }
  0xda   :  { %203 = vmatmul.f32.gmra.mxu0 %v78_v11  ;;  %295 = vmatmul.f32.gmra.mxu1 %v79_v12  ;;  %v249_v23 = vadd.f32 %v248_v10, %v157_v18 }
  0xdb   :  { %v568_v17 = vmax.f32 %v506_v15, 0.0  ;;  %463 = vmatmul.f32.gmra.mxu2 %v2244_v13  ;;  %555 = vmatmul.f32.gmra.mxu3 %v2245_v14  ;;  %v2252_v14 = vld [vmem:[%s5026_s0 + $0x340] sm:$0xff]  ;;  %v2253_v15 = vld [vmem:[%s5026_s0 + $0x348] sm:$0xff] }
  0xdc   :  { %v309_v33 = vmax.f32 %v249_v23, 0.0 }
  0xdd   :  { %v3012_v19 = vmax.f32 %v308_v16, %v568_v17  ;;  %v2302_v16 = vld [vmem:[%s5026_s0 + $0x4d0] sm:$0xff]  ;;  %v2303_v17 = vld [vmem:[%s5026_s0 + $0x4d8] sm:$0xff] }
  0xde   :  { %v416_v21 = vpop.f32.mrf.mxu2  ;;  %v508_v22 = vpop.f32.mrf.mxu3 }
  0xdf   :  { %v417_v24 = vadd.f32 %v2887_v32, %v416_v21  ;;  %v159_v25 = vpop.f32.mrf.mxu0  ;;  %v251_v26 = vpop.f32.mrf.mxu1 }
  0xe0   :  { %v160_v35 = vadd.f32 %v2887_v32, %v159_v25 }
  0xe1   :  { %v509_v31 = vadd.f32 %v508_v22, %v417_v24 }
  0xe2   :  { %206 = vmatmul.f32.gmra.mxu0 %v80_v27  ;;  %298 = vmatmul.f32.gmra.mxu1 %v81_v28  ;;  %v252_v40 = vadd.f32 %v251_v26, %v160_v35  ;;  %v2305_v35 = vld [vmem:[%s5026_s0 + $0x4e8] sm:$0xff] }
  0xe3   :  { %v569_v34 = vmax.f32 %v509_v31, 0.0  ;;  %466 = vmatmul.f32.gmra.mxu2 %v2246_v29  ;;  %558 = vmatmul.f32.gmra.mxu3 %v2247_v30  ;;  %v2254_v31 = vld [vmem:[%s5026_s0 + $0x350] sm:$0xff] }
  0xe4   :  { %v310_v49 = vmax.f32 %v252_v40, 0.0 }
  0xe5   :  { %v3028_v37 = vmax.f32 %v309_v33, %v569_v34  ;;  %v2255_v33 = vld [vmem:[%s5026_s0 + $0x358] sm:$0xff]  ;;  %v2304_v34 = vld [vmem:[%s5026_s0 + $0x4e0] sm:$0xff] }
  0xe6   :  { %v419_v38 = vpop.f32.mrf.mxu2  ;;  %v511_v39 = vpop.f32.mrf.mxu3 }
  0xe7   :  { %v420_v41 = vadd.f32 %v2887_v32, %v419_v38  ;;  %v162_v42 = vpop.f32.mrf.mxu0  ;;  %v254_v43 = vpop.f32.mrf.mxu1 }
  0xe8   :  { %v163_v52 = vadd.f32 %v2887_v32, %v162_v42 }
  0xe9   :  { %v512_v48 = vadd.f32 %v511_v39, %v420_v41 }
  0xea   :  { %679 = vmatmul.f32.vlgmr.msrb.gmra.mxu0 %v2248_v44  ;;  %771 = vmatmul.f32.vlgmr.msrb.gmra.mxu1 %v2249_v45  ;;  %v255_v57 = vadd.f32 %v254_v43, %v163_v52  ;;  %v2306_v52 = vld [vmem:[%s5026_s0 + $0x4f0] sm:$0xff] }
  0xeb   :  { %v570_v50 = vmax.f32 %v512_v48, 0.0  ;;  %964 = vmatmul.f32.vlgmr.msrb.gmra.mxu2 %v2298_v46  ;;  %1056 = vmatmul.f32.vlgmr.msrb.gmra.mxu3 %v2299_v47 }
  0xec   :  { %v311_v2 = vmax.f32 %v255_v57, 0.0 }
  0xed   :  { %v3044_v53 = vmax.f32 %v310_v49, %v570_v50  ;;  %v2256_v49 = vld [vmem:[%s5026_s0 + $0x360] sm:$0xff]  ;;  %v2257_v50 = vld [vmem:[%s5026_s0 + $0x368] sm:$0xff] }
  0xee   :  { %v422_v55 = vpop.f32.mrf.mxu2  ;;  %v514_v56 = vpop.f32.mrf.mxu3 }
  0xef   :  { %v423_v58 = vadd.f32 %v2887_v32, %v422_v55  ;;  %v165_v59 = vpop.f32.mrf.mxu0  ;;  %v257_v60 = vpop.f32.mrf.mxu1  ;;  %v2307_v55 = vld [vmem:[%s5026_s0 + $0x4f8] sm:$0xff] }
  0xf0   :  { %v166_v6 = vadd.f32 %v2887_v32, %v165_v59 }
  0xf1   :  { %v515_v1 = vadd.f32 %v514_v56, %v423_v58 }
  0xf2   :  { %682 = vmatmul.f32.gmra.mxu0 %v2250_v61  ;;  %774 = vmatmul.f32.gmra.mxu1 %v2251_v62  ;;  %v258_v10 = vadd.f32 %v257_v60, %v166_v6  ;;  %v1197_v61 = vld [vmem:[%s5027_s3 + $0x78] sm:$0xff]  ;;  %v2258_v6 = vld [vmem:[%s5026_s0 + $0x370] sm:$0xff] }
  0xf3   :  { %v571_v4 = vmax.f32 %v515_v1, 0.0  ;;  %967 = vmatmul.f32.gmra.mxu2 %v2300_v63  ;;  %1059 = vmatmul.f32.gmra.mxu3 %v2301_v0 }
  0xf4   :  { %v312_v21 = vmax.f32 %v258_v10, 0.0  ;;  %1582 = vmatpush.msra.mxu0 %v1197_v61  ;;  %v2309_v10 = vld [vmem:[%s5026_s0 + $0x508] sm:$0xff] }
  0xf5   :  { %v3060_v7 = vmax.f32 %v311_v2, %v571_v4  ;;  %v1195_v61 = vld [vmem:[%s5027_s3 + $0x68] sm:$0xff] }
  0xf6   :  { %v425_v8 = vpop.f32.mrf.mxu2  ;;  %v517_v9 = vpop.f32.mrf.mxu3 }
  0xf7   :  { %v426_v11 = vadd.f32 %v2887_v32, %v425_v8  ;;  %v168_v12 = vpop.f32.mrf.mxu0  ;;  %v260_v13 = vpop.f32.mrf.mxu1  ;;  %v2259_v8 = vld [vmem:[%s5026_s0 + $0x378] sm:$0xff] }
  0xf8   :  { %v169_v23 = vadd.f32 %v2887_v32, %v168_v12 }
  0xf9   :  { %v518_v18 = vadd.f32 %v517_v9, %v426_v11  ;;  %v2308_v9 = vld [vmem:[%s5026_s0 + $0x500] sm:$0xff] }
  0xfa   :  { %685 = vmatmul.f32.gmra.mxu0 %v2252_v14  ;;  %777 = vmatmul.f32.gmra.mxu1 %v2253_v15  ;;  %v261_v27 = vadd.f32 %v260_v13, %v169_v23 }
  0xfb   :  { %v572_v22 = vmax.f32 %v518_v18, 0.0  ;;  %970 = vmatmul.f32.gmra.mxu2 %v2302_v16  ;;  %1062 = vmatmul.f32.gmra.mxu3 %v2303_v17  ;;  %v1196_v16 = vld [vmem:[%s5027_s3 + $0x70] sm:$0xff]  ;;  %v1229_v17 = vld [vmem:[%s5027_s3 + $0x178] sm:$0xff] }
  0xfc   :  { %v313_v39 = vmax.f32 %v261_v27, 0.0  ;;  %1583 = vmatpush.msra.mxu0 %v1196_v16  ;;  %1622 = vmatpush.msra.mxu2 %v1229_v17  ;;  %v2260_v27 = vld [vmem:[%s5026_s0 + $0x380] sm:$0xff] }
  0xfd   :  { %v3076_v24 = vmax.f32 %v312_v21, %v572_v22 }
  0xfe   :  { %v428_v25 = vpop.f32.mrf.mxu2  ;;  %v520_v26 = vpop.f32.mrf.mxu3  ;;  %1584 = vmatpush.msra.mxu0 %v1195_v61  ;;  %v2319_v61 = vld [vmem:[%s5026_s0 + $0x558] sm:$0xff] }
  0xff   :  { %v429_v28 = vadd.f32 %v2887_v32, %v428_v25  ;;  %v171_v29 = vpop.f32.mrf.mxu0  ;;  %v263_v30 = vpop.f32.mrf.mxu1 }
 0x100   :  { %v172_v41 = vadd.f32 %v2887_v32, %v171_v29  ;;  %v2310_v29 = vld [vmem:[%s5026_s0 + $0x510] sm:$0xff] }
 0x101   :  { %v521_v38 = vadd.f32 %v520_v26, %v429_v28  ;;  %v2261_v28 = vld [vmem:[%s5026_s0 + $0x388] sm:$0xff] }
 0x102   :  { %688 = vmatmul.f32.gmra.mxu0 %v2254_v31  ;;  %780 = vmatmul.f32.gmra.mxu1 %v2255_v33  ;;  %v264_v45 = vadd.f32 %v263_v30, %v172_v41  ;;  %v2311_v30 = vld [vmem:[%s5026_s0 + $0x518] sm:$0xff] }
 0x103   :  { %v573_v40 = vmax.f32 %v521_v38, 0.0  ;;  %973 = vmatmul.f32.gmra.mxu2 %v2304_v34  ;;  %1065 = vmatmul.f32.gmra.mxu3 %v2305_v35 }
 0x104   :  { %v314_v57 = vmax.f32 %v264_v45, 0.0 }
 0x105   :  { %v3092_v42 = vmax.f32 %v313_v39, %v573_v40  ;;  %v1245_v39 = vld [vmem:[%s5027_s3 + $0x1f8] sm:$0xff] }
 0x106   :  { %v431_v43 = vpop.f32.mrf.mxu2  ;;  %v523_v44 = vpop.f32.mrf.mxu3  ;;  %v1213_v40 = vld [vmem:[%s5027_s3 + $0xf8] sm:$0xff]  ;;  %1642 = vmatpush.msra.mxu3 %v1245_v39 }
 0x107   :  { %v432_v46 = vadd.f32 %v2887_v32, %v431_v43  ;;  %v174_v47 = vpop.f32.mrf.mxu0  ;;  %v266_v48 = vpop.f32.mrf.mxu1  ;;  %1602 = vmatpush.msra.mxu1 %v1213_v40 }
 0x108   :  { %v175_v59 = vadd.f32 %v2887_v32, %v174_v47 }
 0x109   :  { %v524_v56 = vadd.f32 %v523_v44, %v432_v46 }
 0x10a   :  { %691 = vmatmul.f32.gmra.mxu0 %v2256_v49  ;;  %783 = vmatmul.f32.gmra.mxu1 %v2257_v50  ;;  %v267_v0 = vadd.f32 %v266_v48, %v175_v59  ;;  %v2262_v48 = vld [vmem:[%s5026_s0 + $0x390] sm:$0xff]  ;;  %v2263_v49 = vld [vmem:[%s5026_s0 + $0x398] sm:$0xff]  ;;  %v2312_v50 = vld [vmem:[%s5026_s0 + $0x520] sm:$0xff] }
 0x10b   :  { %v574_v58 = vmax.f32 %v524_v56, 0.0  ;;  %976 = vmatmul.f32.gmra.mxu2 %v2306_v52  ;;  %1068 = vmatmul.f32.gmra.mxu3 %v2307_v55  ;;  %v2313_v52 = vld [vmem:[%s5026_s0 + $0x528] sm:$0xff] }
 0x10c   :  { %v315_v12 = vmax.f32 %v267_v0, 0.0 }
 0x10d   :  { %v3108_v60 = vmax.f32 %v314_v57, %v574_v58 }
 0x10e   :  { %v434_v62 = vpop.f32.mrf.mxu2  ;;  %v526_v63 = vpop.f32.mrf.mxu3 }
 0x10f   :  { %v435_v1 = vadd.f32 %v2887_v32, %v434_v62  ;;  %v177_v2 = vpop.f32.mrf.mxu0  ;;  %v269_v4 = vpop.f32.mrf.mxu1  ;;  %v1228_v62 = vld [vmem:[%s5027_s3 + $0x170] sm:$0xff] }
 0x110   :  { %v178_v14 = vadd.f32 %v2887_v32, %v177_v2  ;;  %1623 = vmatpush.msra.mxu2 %v1228_v62 }
 0x111   :  { %v527_v11 = vadd.f32 %v526_v63, %v435_v1  ;;  %v1244_v63 = vld [vmem:[%s5027_s3 + $0x1f0] sm:$0xff] }
 0x112   :  { %694 = vmatmul.f32.gmra.mxu0 %v2258_v6  ;;  %786 = vmatmul.f32.gmra.mxu1 %v2259_v8  ;;  %v270_v22 = vadd.f32 %v269_v4, %v178_v14 }
 0x113   :  { %v575_v13 = vmax.f32 %v527_v11, 0.0  ;;  %979 = vmatmul.f32.gmra.mxu2 %v2308_v9  ;;  %1071 = vmatmul.f32.gmra.mxu3 %v2309_v10  ;;  %v2264_v9 = vld [vmem:[%s5026_s0 + $0x3a0] sm:$0xff]  ;;  %v2265_v10 = vld [vmem:[%s5026_s0 + $0x3a8] sm:$0xff]  ;;  %v2314_v11 = vld [vmem:[%s5026_s0 + $0x530] sm:$0xff] }
 0x114   :  { %v316_v33 = vmax.f32 %v270_v22, 0.0  ;;  %1643 = vmatpush.msra.mxu3 %v1244_v63  ;;  %v1194_v22 = vld [vmem:[%s5027_s3 + $0x60] sm:$0xff] }
 0x115   :  { %v3127_v15 = vmax.f32 %v315_v12, %v575_v13  ;;  %v2315_v12 = vld [vmem:[%s5026_s0 + $0x538] sm:$0xff]  ;;  %1585 = vmatpush.msra.mxu0 %v1194_v22  ;;  %v2321_v22 = vld [vmem:[%s5026_s0 + $0x568] sm:$0xff] }
 0x116   :  { %v437_v18 = vpop.f32.mrf.mxu2  ;;  %v529_v21 = vpop.f32.mrf.mxu3 }
 0x117   :  { %v438_v23 = vadd.f32 %v2887_v32, %v437_v18  ;;  %v180_v25 = vpop.f32.mrf.mxu0  ;;  %v272_v26 = vpop.f32.mrf.mxu1 }
 0x118   :  { %v181_v35 = vadd.f32 %v2887_v32, %v180_v25 }
 0x119   :  { %v530_v31 = vadd.f32 %v529_v21, %v438_v23  ;;  %v1212_v21 = vld [vmem:[%s5027_s3 + $0xf0] sm:$0xff] }
 0x11a   :  { %697 = vmatmul.f32.gmra.mxu0 %v2260_v27  ;;  %789 = vmatmul.f32.gmra.mxu1 %v2261_v28  ;;  %v273_v44 = vadd.f32 %v272_v26, %v181_v35 }
 0x11b   :  { %v576_v34 = vmax.f32 %v530_v31, 0.0  ;;  %982 = vmatmul.f32.gmra.mxu2 %v2310_v29  ;;  %1074 = vmatmul.f32.gmra.mxu3 %v2311_v30  ;;  %v2266_v30 = vld [vmem:[%s5026_s0 + $0x3b0] sm:$0xff]  ;;  %v2267_v31 = vld [vmem:[%s5026_s0 + $0x3b8] sm:$0xff] }
 0x11c   :  { %v317_v56 = vmax.f32 %v273_v44, 0.0  ;;  %1603 = vmatpush.msra.mxu1 %v1212_v21  ;;  %v1227_v44 = vld [vmem:[%s5027_s3 + $0x168] sm:$0xff]  ;;  %v2320_v21 = vld [vmem:[%s5026_s0 + $0x560] sm:$0xff] }
 0x11d   :  { %v3149_v38 = vmax.f32 %v316_v33, %v576_v34  ;;  %v2316_v33 = vld [vmem:[%s5026_s0 + $0x540] sm:$0xff]  ;;  %v2317_v34 = vld [vmem:[%s5026_s0 + $0x548] sm:$0xff]  ;;  %1624 = vmatpush.msra.mxu2 %v1227_v44  ;;  %v2322_v44 = vld [vmem:[%s5026_s0 + $0x570] sm:$0xff] }
 0x11e   :  { %v440_v41 = vpop.f32.mrf.mxu2  ;;  %v532_v43 = vpop.f32.mrf.mxu3 }
 0x11f   :  { %v441_v45 = vadd.f32 %v2887_v32, %v440_v41  ;;  %v183_v46 = vpop.f32.mrf.mxu0  ;;  %v275_v47 = vpop.f32.mrf.mxu1 }
 0x120   :  { %v184_v58 = vadd.f32 %v2887_v32, %v183_v46  ;;  %v1211_v46 = vld [vmem:[%s5027_s3 + $0xe8] sm:$0xff] }
 0x121   :  { %v533_v55 = vadd.f32 %v532_v43, %v441_v45  ;;  %v1243_v45 = vld [vmem:[%s5027_s3 + $0x1e8] sm:$0xff]  ;;  %1604 = vmatpush.msra.mxu1 %v1211_v46 }
 0x122   :  { %700 = vmatmul.f32.gmra.mxu0 %v2262_v48  ;;  %792 = vmatmul.f32.gmra.mxu1 %v2263_v49  ;;  %v276_v2 = vadd.f32 %v275_v47, %v184_v58  ;;  %v2318_v58 = vld [vmem:[%s5026_s0 + $0x550] sm:$0xff] }
 0x123   :  { %v577_v57 = vmax.f32 %v533_v55, 0.0  ;;  %985 = vmatmul.f32.gmra.mxu2 %v2312_v50  ;;  %1077 = vmatmul.f32.gmra.mxu3 %v2313_v52 }
 0x124   :  { %v318_v14 = vmax.f32 %v276_v2, 0.0  ;;  %1644 = vmatpush.msra.mxu3 %v1243_v45  ;;  %v2323_v45 = vld [vmem:[%s5026_s0 + $0x578] sm:$0xff] }
 0x125   :  { %v3171_v59 = vmax.f32 %v317_v56, %v577_v57  ;;  %v2268_v56 = vld [vmem:[%s5026_s0 + $0x3c0] sm:$0xff]  ;;  %v2269_v57 = vld [vmem:[%s5026_s0 + $0x3c8] sm:$0xff] }
 0x126   :  { %v443_v0 = vpop.f32.mrf.mxu2  ;;  %v535_v1 = vpop.f32.mrf.mxu3 }
 0x127   :  { %v444_v4 = vadd.f32 %v2887_v32, %v443_v0  ;;  %v186_v6 = vpop.f32.mrf.mxu0  ;;  %v278_v8 = vpop.f32.mrf.mxu1 }
 0x128   :  { %v187_v17 = vadd.f32 %v2887_v32, %v186_v6  ;;  %v1226_v6 = vld [vmem:[%s5027_s3 + $0x160] sm:$0xff] }
 0x129   :  { %v536_v13 = vadd.f32 %v535_v1, %v444_v4  ;;  %v1193_v4 = vld [vmem:[%s5027_s3 + $0x58] sm:$0xff]  ;;  %1625 = vmatpush.msra.mxu2 %v1226_v6 }
 0x12a   :  { %703 = vmatmul.f32.gmra.mxu0 %v2264_v9  ;;  %795 = vmatmul.f32.gmra.mxu1 %v2265_v10  ;;  %v279_v26 = vadd.f32 %v278_v8, %v187_v17  ;;  %v1242_v8 = vld [vmem:[%s5027_s3 + $0x1e0] sm:$0xff]  ;;  %v2271_v17 = vld [vmem:[%s5026_s0 + $0x3d8] sm:$0xff] }
 0x12b   :  { %v578_v16 = vmax.f32 %v536_v13, 0.0  ;;  %988 = vmatmul.f32.gmra.mxu2 %v2314_v11  ;;  %1080 = vmatmul.f32.gmra.mxu3 %v2315_v12  ;;  %v2275_v6 = vld [vmem:[%s5026_s0 + $0x3f8] sm:$0xff] }
 0x12c   :  { %v319_v39 = vmax.f32 %v279_v26, 0.0  ;;  %1586 = vmatpush.msra.mxu0 %v1193_v4  ;;  %1645 = vmatpush.msra.mxu3 %v1242_v8  ;;  %v2274_v4 = vld [vmem:[%s5026_s0 + $0x3f0] sm:$0xff]  ;;  %v2324_v8 = vld [vmem:[%s5026_s0 + $0x580] sm:$0xff] }
 0x12d   :  { %v3196_v18 = vmax.f32 %v318_v14, %v578_v16  ;;  %v2270_v16 = vld [vmem:[%s5026_s0 + $0x3d0] sm:$0xff] }
 0x12e   :  { %v446_v23 = vpop.f32.mrf.mxu2  ;;  %v538_v25 = vpop.f32.mrf.mxu3 }
 0x12f   :  { %v447_v27 = vadd.f32 %v2887_v32, %v446_v23  ;;  %v189_v28 = vpop.f32.mrf.mxu0  ;;  %v281_v29 = vpop.f32.mrf.mxu1 }
 0x130   :  { %v190_v41 = vadd.f32 %v2887_v32, %v189_v28 }
 0x131   :  { %v539_v35 = vadd.f32 %v538_v25, %v447_v27 }
 0x132   :  { %706 = vmatmul.f32.gmra.mxu0 %v2266_v30  ;;  %798 = vmatmul.f32.gmra.mxu1 %v2267_v31  ;;  %v282_v49 = vadd.f32 %v281_v29, %v190_v41  ;;  %v1210_v29 = vld [vmem:[%s5027_s3 + $0xe0] sm:$0xff]  ;;  %v2273_v41 = vld [vmem:[%s5026_s0 + $0x3e8] sm:$0xff] }
 0x133   :  { %v579_v40 = vmax.f32 %v539_v35, 0.0  ;;  %991 = vmatmul.f32.gmra.mxu2 %v2316_v33  ;;  %1083 = vmatmul.f32.gmra.mxu3 %v2317_v34 }
 0x134   :  { %v320_v63 = vmax.f32 %v282_v49, 0.0  ;;  %1605 = vmatpush.msra.mxu1 %v1210_v29  ;;  %v2276_v29 = vld [vmem:[%s5026_s0 + $0x400] sm:$0xff] }
 0x135   :  { %v3218_v43 = vmax.f32 %v319_v39, %v579_v40  ;;  %v2272_v40 = vld [vmem:[%s5026_s0 + $0x3e0] sm:$0xff] }
 0x136   :  { %v449_v47 = vpop.f32.mrf.mxu2  ;;  %v541_v48 = vpop.f32.mrf.mxu3 }
 0x137   :  { %v450_v50 = vadd.f32 %v2887_v32, %v449_v47  ;;  %v192_v52 = vpop.f32.mrf.mxu0  ;;  %v284_v55 = vpop.f32.mrf.mxu1 }
 0x138   :  { %v193_v1 = vadd.f32 %v2887_v32, %v192_v52  ;;  %v1192_v52 = vld [vmem:[%s5027_s3 + $0x50] sm:$0xff] }
 0x139   :  { %v542_v62 = vadd.f32 %v541_v48, %v450_v50  ;;  %1587 = vmatpush.msra.mxu0 %v1192_v52 }
 0x13a   :  { %709 = vmatmul.f32.gmra.mxu0 %v2268_v56  ;;  %801 = vmatmul.f32.gmra.mxu1 %v2269_v57  ;;  %v285_v11 = vadd.f32 %v284_v55, %v193_v1  ;;  %v1225_v55 = vld [vmem:[%s5027_s3 + $0x158] sm:$0xff] }
 0x13b   :  { %v580_v0 = vmax.f32 %v542_v62, 0.0  ;;  %994 = vmatmul.f32.gmra.mxu2 %v2318_v58  ;;  %1086 = vmatmul.f32.gmra.mxu3 %v2319_v61  ;;  %v1241_v58 = vld [vmem:[%s5027_s3 + $0x1d8] sm:$0xff] }
 0x13c   :  { %v321_v25 = vmax.f32 %v285_v11, 0.0  ;;  %1626 = vmatpush.msra.mxu2 %v1225_v55  ;;  %v1209_v61 = vld [vmem:[%s5027_s3 + $0xd8] sm:$0xff]  ;;  %1646 = vmatpush.msra.mxu3 %v1241_v58  ;;  %v2328_v58 = vld [vmem:[%s5026_s0 + $0x5a0] sm:$0xff] }
 0x13d   :  { %v3243_v2 = vmax.f32 %v320_v63, %v580_v0  ;;  %1606 = vmatpush.msra.mxu1 %v1209_v61  ;;  %v2329_v61 = vld [vmem:[%s5026_s0 + $0x5a8] sm:$0xff] }
 0x13e   :  { %v452_v9 = vpop.f32.mrf.mxu2  ;;  %v544_v10 = vpop.f32.mrf.mxu3 }
 0x13f   :  { %v453_v12 = vadd.f32 %v2887_v32, %v452_v9  ;;  %v195_v13 = vpop.f32.mrf.mxu0  ;;  %v287_v14 = vpop.f32.mrf.mxu1  ;;  %v2325_v9 = vld [vmem:[%s5026_s0 + $0x588] sm:$0xff] }
 0x140   :  { %v196_v27 = vadd.f32 %v2887_v32, %v195_v13 }
 0x141   :  { %v545_v23 = vadd.f32 %v544_v10, %v453_v12 }
 0x142   :  { %712 = vmatmul.f32.gmra.mxu0 %v2270_v16  ;;  %804 = vmatmul.f32.gmra.mxu1 %v2271_v17  ;;  %v288_v33 = vadd.f32 %v287_v14, %v196_v27 }
 0x143   :  { %v581_v26 = vmax.f32 %v545_v23, 0.0  ;;  %997 = vmatmul.f32.gmra.mxu2 %v2320_v21  ;;  %1089 = vmatmul.f32.gmra.mxu3 %v2321_v22  ;;  %v1191_v21 = vld [vmem:[%s5027_s3 + $0x48] sm:$0xff]  ;;  %v1224_v22 = vld [vmem:[%s5027_s3 + $0x150] sm:$0xff] }
 0x144   :  { %v322_v47 = vmax.f32 %v288_v33, 0.0  ;;  %1588 = vmatpush.msra.mxu0 %v1191_v21  ;;  %1627 = vmatpush.msra.mxu2 %v1224_v22  ;;  %v2327_v33 = vld [vmem:[%s5026_s0 + $0x598] sm:$0xff] }
 0x145   :  { %v3268_v28 = vmax.f32 %v321_v25, %v581_v26  ;;  %v1221_v21 = vld [vmem:[%s5027_s3 + $0x138] sm:$0xff] }
 0x146   :  { %v455_v30 = vpop.f32.mrf.mxu2  ;;  %v547_v31 = vpop.f32.mrf.mxu3  ;;  %v1237_v22 = vld [vmem:[%s5027_s3 + $0x1b8] sm:$0xff] }
 0x147   :  { %v456_v34 = vadd.f32 %v2887_v32, %v455_v30  ;;  %v198_v35 = vpop.f32.mrf.mxu0  ;;  %v290_v39 = vpop.f32.mrf.mxu1  ;;  %v2277_v30 = vld [vmem:[%s5026_s0 + $0x408] sm:$0xff] }
 0x148   :  { %v199_v49 = vadd.f32 %v2887_v32, %v198_v35 }
 0x149   :  { %v548_v46 = vadd.f32 %v547_v31, %v456_v34  ;;  %v2326_v31 = vld [vmem:[%s5026_s0 + $0x590] sm:$0xff] }
 0x14a   :  { %715 = vmatmul.f32.gmra.mxu0 %v2272_v40  ;;  %807 = vmatmul.f32.gmra.mxu1 %v2273_v41  ;;  %v291_v62 = vadd.f32 %v290_v39, %v199_v49 }
 0x14b   :  { %v582_v48 = vmax.f32 %v548_v46, 0.0  ;;  %1000 = vmatmul.f32.gmra.mxu2 %v2322_v44  ;;  %1092 = vmatmul.f32.gmra.mxu3 %v2323_v45  ;;  %v1240_v44 = vld [vmem:[%s5027_s3 + $0x1d0] sm:$0xff] }
 0x14c   :  { %v323_v11 = vmax.f32 %v291_v62, 0.0  ;;  %1647 = vmatpush.msra.mxu3 %v1240_v44  ;;  %v1207_v62 = vld [vmem:[%s5027_s3 + $0xc8] sm:$0xff]  ;;  %v2331_v44 = vld [vmem:[%s5026_s0 + $0x5b8] sm:$0xff] }
 0x14d   :  { %v3287_v50 = vmax.f32 %v322_v47, %v582_v48  ;;  %v1208_v47 = vld [vmem:[%s5027_s3 + $0xd0] sm:$0xff] }
 0x14e   :  { %v458_v56 = vpop.f32.mrf.mxu2  ;;  %v550_v57 = vpop.f32.mrf.mxu3  ;;  %1607 = vmatpush.msra.mxu1 %v1208_v47  ;;  %v1187_v47 = vld [vmem:[%s5027_s3 + $0x28] sm:$0xff] }
 0x14f   :  { %5034 = vst [vmem:[#allocation2_spill] sm:$0xff] %v3287_v50  ;;  %v459_v63 = vadd.f32 %v2887_v32, %v458_v56  ;;  %v201_v0 = vpop.f32.mrf.mxu0  ;;  %v293_v1 = vpop.f32.mrf.mxu1  ;;  %v2278_v56 = vld [vmem:[%s5026_s0 + $0x410] sm:$0xff] }
 0x150   :  { %v202_v13 = vadd.f32 %v2887_v32, %v201_v0  ;;  %1608 = vmatpush.msra.mxu1 %v1207_v62  ;;  %v1239_v0 = vld [vmem:[%s5027_s3 + $0x1c8] sm:$0xff]  ;;  %v1234_v62 = vld [vmem:[%s5027_s3 + $0x1a0] sm:$0xff] }
 0x151   :  { %v551_v10 = vadd.f32 %v550_v57, %v459_v63  ;;  %v2279_v57 = vld [vmem:[%s5026_s0 + $0x418] sm:$0xff]  ;;  %1648 = vmatpush.msra.mxu3 %v1239_v0 }
 0x152   :  { %718 = vmatmul.f32.gmra.mxu0 %v2274_v4  ;;  %810 = vmatmul.f32.gmra.mxu1 %v2275_v6  ;;  %v294_v23 = vadd.f32 %v293_v1, %v202_v13  ;;  %v1190_v1 = vld [vmem:[%s5027_s3 + $0x40] sm:$0xff]  ;;  %v1189_v13 = vld [vmem:[%s5027_s3 + $0x38] sm:$0xff] }
 0x153   :  { %v583_v12 = vmax.f32 %v551_v10, 0.0  ;;  %1003 = vmatmul.f32.gmra.mxu2 %v2324_v8  ;;  %1095 = vmatmul.f32.gmra.mxu3 %v2325_v9  ;;  %v3373_v8 = vld [vmem:[%s5025_s2] ss:$0 sm:$0xff] }
 0x154   :  { %v324_v35 = vmax.f32 %v294_v23, 0.0  ;;  %v1206_v10 = vld [vmem:[%s5027_s3 + $0xc0] sm:$0xff]  ;;  %1589 = vmatpush.msra.mxu0 %v1190_v1 }
 0x155   :  { %v3315_v14 = vmax.f32 %v323_v11, %v583_v12  ;;  %v1222_v11 = vld [vmem:[%s5027_s3 + $0x140] sm:$0xff]  ;;  %1609 = vmatpush.msra.mxu1 %v1206_v10 }
 0x156   :  { %v461_v16 = vpop.f32.mrf.mxu2  ;;  %v553_v17 = vpop.f32.mrf.mxu3  ;;  %v1238_v12 = vld [vmem:[%s5027_s3 + $0x1c0] sm:$0xff]  ;;  %1590 = vmatpush.msra.mxu0 %v1189_v13 }
 0x157   :  { %5035 = vst [vmem:[#allocation3_spill] sm:$0xff] %v3315_v14  ;;  %v462_v25 = vadd.f32 %v2887_v32, %v461_v16  ;;  %v204_v26 = vpop.f32.mrf.mxu0  ;;  %v296_v27 = vpop.f32.mrf.mxu1  ;;  %1649 = vmatpush.msra.mxu3 %v1238_v12  ;;  %v2283_v12 = vld [vmem:[%s5026_s0 + $0x438] sm:$0xff]  ;;  %v2332_v13 = vld [vmem:[%s5026_s0 + $0x5c0] sm:$0xff]  ;;  %v1295_v14 = vld [vmem:[%s5027_s3 + $0x388] sm:$0xff] }
 0x158   :  { %v205_v40 = vadd.f32 %v2887_v32, %v204_v26  ;;  %v1188_v26 = vld [vmem:[%s5027_s3 + $0x30] sm:$0xff] }
 0x159   :  { %v554_v34 = vadd.f32 %v553_v17, %v462_v25  ;;  %v1205_v17 = vld [vmem:[%s5027_s3 + $0xb8] sm:$0xff]  ;;  %1650 = vmatpush.msra.mxu3 %v1237_v22  ;;  %1591 = vmatpush.msra.mxu0 %v1188_v26  ;;  %v1184_v22 = vld [vmem:[%s5027_s3 + $0x10] sm:$0xff] }
 0x15a   :  { %721 = vmatmul.f32.gmra.mxu0 %v2276_v29  ;;  %813 = vmatmul.f32.gmra.mxu1 %v2277_v30  ;;  %v297_v48 = vadd.f32 %v296_v27, %v205_v40  ;;  %v1204_v27 = vld [vmem:[%s5027_s3 + $0xb0] sm:$0xff] }
 0x15b   :  { %v584_v39 = vmax.f32 %v554_v34, 0.0  ;;  %1006 = vmatmul.f32.gmra.mxu2 %v2326_v31  ;;  %1098 = vmatmul.f32.gmra.mxu3 %v2327_v33  ;;  %v1220_v29 = vld [vmem:[%s5027_s3 + $0x130] sm:$0xff] }
 0x15c   :  { %v325_v4 = vmax.f32 %v297_v48, 0.0  ;;  %1610 = vmatpush.msra.mxu1 %v1205_v17  ;;  %v2330_v40 = vld [vmem:[%s5026_s0 + $0x5b0] sm:$0xff]  ;;  %v1203_v48 = vld [vmem:[%s5027_s3 + $0xa8] sm:$0xff]  ;;  %1592 = vmatpush.msra.mxu0 %v1187_v47 }
 0x15d   :  { %v3337_v41 = vmax.f32 %v324_v35, %v584_v39  ;;  %v2280_v35 = vld [vmem:[%s5026_s0 + $0x420] sm:$0xff]  ;;  %v2281_v39 = vld [vmem:[%s5026_s0 + $0x428] sm:$0xff]  ;;  %v1232_v26 = vld [vmem:[%s5027_s3 + $0x190] sm:$0xff] }
 0x15e   :  { %v464_v45 = vpop.f32.mrf.mxu2  ;;  %v556_v46 = vpop.f32.mrf.mxu3  ;;  %1611 = vmatpush.msra.mxu1 %v1204_v27  ;;  %v2333_v17 = vld [vmem:[%s5026_s0 + $0x5c8] sm:$0xff] }
 0x15f   :  { %5036 = vst [vmem:[#allocation4_spill] sm:$0xff] %v3337_v41  ;;  %v465_v49 = vadd.f32 %v2887_v32, %v464_v45  ;;  %v207_v52 = vpop.f32.mrf.mxu0  ;;  %v299_v55 = vpop.f32.mrf.mxu1  ;;  %v1223_v32 = vld [vmem:[%s5027_s3 + $0x148] sm:$0xff] }
 0x160   :  { %1628 = vmatpush.msra.mxu2 %v1223_v32  ;;  %v208_v9 = vadd.f32 %v3373_v8, %v207_v52  ;;  %1612 = vmatpush.msra.mxu1 %v1203_v48  ;;  %v1183_v27 = vld [vmem:[%s5027_s3 + $0x8] sm:$0xff]  ;;  %v2284_v48 = vld [vmem:[%s5026_s0 + $0x440] sm:$0xff] }
 0x161   :  { %v557_v63 = vadd.f32 %v556_v46, %v465_v49  ;;  %v1236_v46 = vld [vmem:[%s5027_s3 + $0x1b0] sm:$0xff]  ;;  %v1219_v49 = vld [vmem:[%s5027_s3 + $0x128] sm:$0xff] }
 0x162   :  { %724 = vmatmul.f32.gmra.mxu0 %v2278_v56  ;;  %816 = vmatmul.f32.gmra.mxu1 %v2279_v57  ;;  %v300_v30 = vadd.f32 %v299_v55, %v208_v9  ;;  %v1235_v56 = vld [vmem:[%s5027_s3 + $0x1a8] sm:$0xff]  ;;  %v1186_v57 = vld [vmem:[%s5027_s3 + $0x20] sm:$0xff] }
 0x163   :  { %v585_v6 = vmax.f32 %v557_v63, 0.0  ;;  %1009 = vmatmul.f32.gmra.mxu2 %v2328_v58  ;;  %1101 = vmatmul.f32.gmra.mxu3 %v2329_v61  ;;  %v1202_v58 = vld [vmem:[%s5027_s3 + $0xa0] sm:$0xff]  ;;  %v1185_v63 = vld [vmem:[%s5027_s3 + $0x18] sm:$0xff]  ;;  %v2345_v41 = vld [vmem:[%s5026_s0 + $0x628] sm:$0xff] }
 0x164   :  { %1629 = vmatpush.msra.mxu2 %v1222_v11  ;;  %v326_v52 = vmax.f32 %v300_v30, 0.0  ;;  %1651 = vmatpush.msra.mxu3 %v1236_v46  ;;  %v1218_v61 = vld [vmem:[%s5027_s3 + $0x120] sm:$0xff]  ;;  %v2282_v11 = vld [vmem:[%s5026_s0 + $0x430] sm:$0xff]  ;;  %v1215_v30 = vld [vmem:[%s5027_s3 + $0x108] sm:$0xff] }
 0x165   :  { %v3388_v16 = vmax.f32 %v325_v4, %v585_v6  ;;  %1593 = vmatpush.msra.mxu0 %v1186_v57  ;;  %v1201_v4 = vld [vmem:[%s5027_s3 + $0x98] sm:$0xff]  ;;  %1613 = vmatpush.msra.mxu1 %v1202_v58 }
 0x166   :  { %v467_v23 = vpop.f32.mrf.mxu2  ;;  %v559_v25 = vpop.f32.mrf.mxu3  ;;  %1630 = vmatpush.msra.mxu2 %v1221_v21  ;;  %1652 = vmatpush.msra.mxu3 %v1235_v56  ;;  %v1217_v6 = vld [vmem:[%s5027_s3 + $0x118] sm:$0xff]  ;;  %v1230_v56 = vld [vmem:[%s5027_s3 + $0x180] sm:$0xff] }
 0x167   :  { %5037 = vst [vmem:[#allocation5_spill] sm:$0xff] %v3388_v16  ;;  %v468_v31 = vadd.f32 %v3373_v8, %v467_v23  ;;  %v3409_v33 = vpop.f32.mrf.mxu0  ;;  %v3411_v34 = vpop.f32.mrf.mxu1  ;;  %1594 = vmatpush.msra.mxu0 %v1185_v63  ;;  %1614 = vmatpush.msra.mxu1 %v1201_v4  ;;  %v1233_v21 = vld [vmem:[%s5027_s3 + $0x198] sm:$0xff]  ;;  %v1200_v23 = vld [vmem:[%s5027_s3 + $0x90] sm:$0xff] }
 0x168   :  { %1631 = vmatpush.msra.mxu2 %v1220_v29  ;;  %1653 = vmatpush.msra.mxu3 %v1234_v62  ;;  %v1199_v29 = vld [vmem:[%s5027_s3 + $0x88] sm:$0xff]  ;;  %v1261_v57 = vld [vmem:[%s5027_s3 + $0x278] sm:$0xff]  ;;  %v1260_v63 = vld [vmem:[%s5027_s3 + $0x270] sm:$0xff] }
 0x169   :  { %v560_v45 = vadd.f32 %v559_v25, %v468_v31  ;;  %v1216_v25 = vld [vmem:[%s5027_s3 + $0x110] sm:$0xff]  ;;  %1595 = vmatpush.msra.mxu0 %v1184_v22  ;;  %1615 = vmatpush.msra.mxu1 %v1200_v23  ;;  %v1231_v31 = vld [vmem:[%s5027_s3 + $0x188] sm:$0xff]  ;;  %v1277_v58 = vld [vmem:[%s5027_s3 + $0x2f8] sm:$0xff] }
 0x16a   :  { %727 = vmatmul.f32.gmra.mxu0 %v2280_v35  ;;  %819 = vmatmul.f32.gmra.mxu1 %v2281_v39  ;;  %v1182_v35 = vld [vmem:[%s5027_s3] sm:$0xff]  ;;  %v1309_v62 = vld [vmem:[%s5027_s3 + $0x3f8] sm:$0xff]  ;;  %v1276_v4 = vld [vmem:[%s5027_s3 + $0x2f0] sm:$0xff] }
 0x16b   :  { %v586_v55 = vmax.f32 %v560_v45, 0.0  ;;  %1012 = vmatmul.f32.gmra.mxu2 %v2330_v40  ;;  %1104 = vmatmul.f32.gmra.mxu3 %v2331_v44  ;;  %v1198_v44 = vld [vmem:[%s5027_s3 + $0x80] sm:$0xff]  ;;  %v1291_v22 = vld [vmem:[%s5027_s3 + $0x368] sm:$0xff] }
 0x16c   :  { %1632 = vmatpush.msra.mxu2 %v1219_v49  ;;  %1654 = vmatpush.msra.mxu3 %v1233_v21  ;;  %v1214_v45 = vld [vmem:[%s5027_s3 + $0x100] sm:$0xff]  ;;  %v2285_v49 = vld [vmem:[%s5026_s0 + $0x448] sm:$0xff] }
 0x16d   :  { %v3449_v32 = vmax.f32 %v326_v52, %v586_v55  ;;  %1596 = vmatpush.msra.mxu0 %v1183_v27  ;;  %1616 = vmatpush.msra.mxu1 %v1199_v29  ;;  %v2334_v52 = vld [vmem:[%s5026_s0 + $0x5d0] sm:$0xff]  ;;  %v2335_v55 = vld [vmem:[%s5026_s0 + $0x5d8] sm:$0xff]  ;;  %v1275_v21 = vld [vmem:[%s5027_s3 + $0x2e8] sm:$0xff] }
 0x16e   :  { %v3457_v0 = vpop.f32.mrf.mxu2  ;;  %v3459_v1 = vpop.f32.mrf.mxu3  ;;  %1633 = vmatpush.msra.mxu2 %v1218_v61  ;;  %1655 = vmatpush.msra.mxu3 %v1232_v26  ;;  %v1293_v61 = vld [vmem:[%s5027_s3 + $0x378] sm:$0xff]  ;;  %v2286_v26 = vld [vmem:[%s5026_s0 + $0x450] sm:$0xff]  ;;  %v2336_v29 = vld [vmem:[%s5026_s0 + $0x5e0] sm:$0xff] }
 0x16f   :  { %5038 = vst [vmem:[#allocation6_spill] sm:$0xff] %v3449_v32  ;;  %v3467_v9 = vpop.f32.mrf.mxu0  ;;  %v3469_v10 = vpop.f32.mrf.mxu1  ;;  %1597 = vmatpush.msra.mxu0 %v1182_v35  ;;  %1617 = vmatpush.msra.mxu1 %v1198_v44  ;;  %v2287_v27 = vld [vmem:[%s5026_s0 + $0x458] sm:$0xff]  ;;  %v1258_v35 = vld [vmem:[%s5027_s3 + $0x260] sm:$0xff]  ;;  %v2294_v32 = vld [vmem:[%s5026_s0 + $0x490] sm:$0xff] }
 0x170   :  { %1634 = vmatpush.msra.mxu2 %v1217_v6  ;;  %1656 = vmatpush.msra.mxu3 %v1231_v31  ;;  %v1292_v6 = vld [vmem:[%s5027_s3 + $0x370] sm:$0xff]  ;;  %v1307_v31 = vld [vmem:[%s5027_s3 + $0x3e8] sm:$0xff]  ;;  %v1274_v44 = vld [vmem:[%s5027_s3 + $0x2e0] sm:$0xff]  ;;  %v684_v50 = vadd.f32 %v3373_v8, %v3467_v9 }
 0x171   :  { %1662 = vmatpush.msrb.mxu0 %v1261_v57  ;;  %1682 = vmatpush.msrb.mxu1 %v1277_v58  ;;  %v1256_v57 = vld [vmem:[%s5027_s3 + $0x250] sm:$0xff] }
 0x172   :  { %730 = vmatmul.f32.gmra.mxu0 %v2282_v11  ;;  %822 = vmatmul.f32.gmra.mxu1 %v2283_v12  ;;  %v1308_v11 = vld [vmem:[%s5027_s3 + $0x3f0] sm:$0xff]  ;;  %v1259_v12 = vld [vmem:[%s5027_s3 + $0x268] sm:$0xff] }
 0x173   :  { %1015 = vmatmul.f32.gmra.mxu2 %v2332_v13  ;;  %1107 = vmatmul.f32.gmra.mxu3 %v2333_v17 }
 0x174   :  { %1635 = vmatpush.msra.mxu2 %v1216_v25  ;;  %1657 = vmatpush.msra.mxu3 %v1230_v56  ;;  %v1305_v56 = vld [vmem:[%s5027_s3 + $0x3d8] sm:$0xff] }
 0x175   :  { %1663 = vmatpush.msrb.mxu0 %v1260_v63  ;;  %1683 = vmatpush.msrb.mxu1 %v1276_v4  ;;  %v1288_v63 = vld [vmem:[%s5027_s3 + $0x350] sm:$0xff] }
 0x176   :  { %v3513_v39 = vpop.f32.mrf.mxu2  ;;  %v3515_v40 = vpop.f32.mrf.mxu3  ;;  %1636 = vmatpush.msra.mxu2 %v1215_v30  ;;  %1722 = vmatpush.msrb.mxu3 %v1309_v62  ;;  %v2337_v30 = vld [vmem:[%s5026_s0 + $0x5e8] sm:$0xff]  ;;  %v1272_v62 = vld [vmem:[%s5027_s3 + $0x2d0] sm:$0xff] }
 0x177   :  { %v3523_v46 = vpop.f32.mrf.mxu0  ;;  %v3525_v47 = vpop.f32.mrf.mxu1  ;;  %1664 = vmatpush.msrb.mxu0 %v1259_v12  ;;  %1684 = vmatpush.msrb.mxu1 %v1275_v21  ;;  %v2289_v12 = vld [vmem:[%s5026_s0 + $0x468] sm:$0xff]  ;;  %v2338_v21 = vld [vmem:[%s5026_s0 + $0x5f0] sm:$0xff]  ;;  %v969_v9 = vadd.f32 %v3373_v8, %v3513_v39 }
 0x178   :  { %1637 = vmatpush.msra.mxu2 %v1214_v45  ;;  %1723 = vmatpush.msrb.mxu3 %v1308_v11  ;;  %v1290_v45 = vld [vmem:[%s5027_s3 + $0x360] sm:$0xff] }
 0x179   :  { %1665 = vmatpush.msrb.mxu0 %v1258_v35  ;;  %1685 = vmatpush.msrb.mxu1 %v1274_v44  ;;  %v2288_v11 = vld [vmem:[%s5026_s0 + $0x460] sm:$0xff] }
 0x17a   :  { %733 = vmatmul.f32.gmra.mxu0 %v2284_v48  ;;  %825 = vmatmul.f32.gmra.mxu1 %v2285_v49  ;;  %v1306_v48 = vld [vmem:[%s5027_s3 + $0x3e0] sm:$0xff]  ;;  %v1257_v49 = vld [vmem:[%s5027_s3 + $0x258] sm:$0xff] }
 0x17b   :  { %1018 = vmatmul.f32.gmra.mxu2 %v2334_v52  ;;  %1110 = vmatmul.f32.gmra.mxu3 %v2335_v55  ;;  %v1273_v52 = vld [vmem:[%s5027_s3 + $0x2d8] sm:$0xff]  ;;  %v1254_v35 = vld [vmem:[%s5027_s3 + $0x240] sm:$0xff] }
 0x17c   :  { %1702 = vmatpush.msrb.mxu2 %v1293_v61  ;;  %1724 = vmatpush.msrb.mxu3 %v1307_v31  ;;  %v1289_v55 = vld [vmem:[%s5027_s3 + $0x358] sm:$0xff]  ;;  %v1303_v31 = vld [vmem:[%s5027_s3 + $0x3c8] sm:$0xff]  ;;  %v1270_v44 = vld [vmem:[%s5027_s3 + $0x2c0] sm:$0xff] }
 0x17d   :  { %1666 = vmatpush.msrb.mxu0 %v1257_v49  ;;  %1686 = vmatpush.msrb.mxu1 %v1273_v52  ;;  %v1253_v49 = vld [vmem:[%s5027_s3 + $0x238] sm:$0xff] }
 0x17e   :  { %v3569_v13 = vpop.f32.mrf.mxu2  ;;  %v3571_v17 = vpop.f32.mrf.mxu3  ;;  %1703 = vmatpush.msrb.mxu2 %v1292_v6  ;;  %1725 = vmatpush.msrb.mxu3 %v1306_v48  ;;  %v1302_v48 = vld [vmem:[%s5027_s3 + $0x3c0] sm:$0xff] }
 0x17f   :  { %v3579_v23 = vpop.f32.mrf.mxu0  ;;  %v3581_v25 = vpop.f32.mrf.mxu1  ;;  %1667 = vmatpush.msrb.mxu0 %v1256_v57  ;;  %1687 = vmatpush.msrb.mxu1 %v1272_v62  ;;  %v1285_v57 = vld [vmem:[%s5027_s3 + $0x338] sm:$0xff] }
 0x180   :  { %1704 = vmatpush.msrb.mxu2 %v1291_v22  ;;  %v2339_v22 = vld [vmem:[%s5026_s0 + $0x5f8] sm:$0xff]  ;;  %1726 = vmatpush.msrb.mxu3 %v1305_v56 }
 0x181   :  { %v1269_v56 = vld [vmem:[%s5027_s3 + $0x2b8] sm:$0xff] }
 0x182   :  { %736 = vmatmul.f32.gmra.mxu0 %v2286_v26  ;;  %828 = vmatmul.f32.gmra.mxu1 %v2287_v27  ;;  %v1304_v26 = vld [vmem:[%s5027_s3 + $0x3d0] sm:$0xff]  ;;  %v1255_v27 = vld [vmem:[%s5027_s3 + $0x248] sm:$0xff] }
 0x183   :  { %1021 = vmatmul.f32.gmra.mxu2 %v2336_v29  ;;  %1113 = vmatmul.f32.gmra.mxu3 %v2337_v30  ;;  %v1271_v29 = vld [vmem:[%s5027_s3 + $0x2c8] sm:$0xff] }
 0x184   :  { %1705 = vmatpush.msrb.mxu2 %v1290_v45  ;;  %v1287_v30 = vld [vmem:[%s5027_s3 + $0x348] sm:$0xff]  ;;  %1727 = vmatpush.msrb.mxu3 %v1304_v26  ;;  %v1286_v45 = vld [vmem:[%s5027_s3 + $0x340] sm:$0xff]  ;;  %v1301_v26 = vld [vmem:[%s5027_s3 + $0x3b8] sm:$0xff] }
 0x185   :  { %1668 = vmatpush.msrb.mxu0 %v1255_v27  ;;  %1688 = vmatpush.msrb.mxu1 %v1271_v29  ;;  %v1252_v27 = vld [vmem:[%s5027_s3 + $0x230] sm:$0xff] }
 0x186   :  { %v3625_v58 = vpop.f32.mrf.mxu2  ;;  %v3627_v61 = vpop.f32.mrf.mxu3  ;;  %1706 = vmatpush.msrb.mxu2 %v1289_v55  ;;  %1728 = vmatpush.msrb.mxu3 %v1303_v31  ;;  %v1268_v29 = vld [vmem:[%s5027_s3 + $0x2b0] sm:$0xff] }
 0x187   :  { %v3635_v4 = vpop.f32.mrf.mxu0  ;;  %v3637_v6 = vpop.f32.mrf.mxu1  ;;  %1669 = vmatpush.msrb.mxu0 %v1254_v35  ;;  %1689 = vmatpush.msrb.mxu1 %v1270_v44  ;;  %v1300_v31 = vld [vmem:[%s5027_s3 + $0x3b0] sm:$0xff]  ;;  %v1251_v35 = vld [vmem:[%s5027_s3 + $0x228] sm:$0xff] }
 0x188   :  { %1707 = vmatpush.msrb.mxu2 %v1288_v63  ;;  %1729 = vmatpush.msrb.mxu3 %v1302_v48  ;;  %v1267_v44 = vld [vmem:[%s5027_s3 + $0x2a8] sm:$0xff] }
 0x189   :  { %1670 = vmatpush.msrb.mxu0 %v1253_v49  ;;  %1690 = vmatpush.msrb.mxu1 %v1269_v56  ;;  %v1299_v48 = vld [vmem:[%s5027_s3 + $0x3a8] sm:$0xff]  ;;  %v1250_v49 = vld [vmem:[%s5027_s3 + $0x220] sm:$0xff] }
 0x18a   :  { %739 = vmatmul.f32.gmra.mxu0 %v2288_v11  ;;  %831 = vmatmul.f32.gmra.mxu1 %v2289_v12  ;;  %v2290_v11 = vld [vmem:[%s5026_s0 + $0x470] sm:$0xff]  ;;  %v2291_v12 = vld [vmem:[%s5026_s0 + $0x478] sm:$0xff] }
 0x18b   :  { %1024 = vmatmul.f32.gmra.mxu2 %v2338_v21  ;;  %1116 = vmatmul.f32.gmra.mxu3 %v2339_v22  ;;  %v2340_v21 = vld [vmem:[%s5026_s0 + $0x600] sm:$0xff]  ;;  %v2341_v22 = vld [vmem:[%s5026_s0 + $0x608] sm:$0xff] }
 0x18c   :  { %1708 = vmatpush.msrb.mxu2 %v1287_v30  ;;  %v1284_v30 = vld [vmem:[%s5027_s3 + $0x330] sm:$0xff]  ;;  %1730 = vmatpush.msrb.mxu3 %v1301_v26  ;;  %v2292_v26 = vld [vmem:[%s5026_s0 + $0x480] sm:$0xff] }
 0x18d   :  { %1671 = vmatpush.msrb.mxu0 %v1252_v27  ;;  %1691 = vmatpush.msrb.mxu1 %v1268_v29  ;;  %v2293_v27 = vld [vmem:[%s5026_s0 + $0x488] sm:$0xff]  ;;  %v2342_v29 = vld [vmem:[%s5026_s0 + $0x610] sm:$0xff] }
 0x18e   :  { %v3681_v52 = vpop.f32.mrf.mxu2  ;;  %v3683_v55 = vpop.f32.mrf.mxu3  ;;  %1709 = vmatpush.msrb.mxu2 %v1286_v45  ;;  %v1283_v45 = vld [vmem:[%s5027_s3 + $0x328] sm:$0xff]  ;;  %1731 = vmatpush.msrb.mxu3 %v1300_v31  ;;  %v1298_v31 = vld [vmem:[%s5027_s3 + $0x3a0] sm:$0xff] }
 0x18f   :  { %v3691_v62 = vpop.f32.mrf.mxu0  ;;  %v3693_v63 = vpop.f32.mrf.mxu1  ;;  %1672 = vmatpush.msrb.mxu0 %v1251_v35  ;;  %1692 = vmatpush.msrb.mxu1 %v1267_v44  ;;  %v1249_v35 = vld [vmem:[%s5027_s3 + $0x218] sm:$0xff] }
 0x190   :  { %1710 = vmatpush.msrb.mxu2 %v1285_v57  ;;  %1732 = vmatpush.msrb.mxu3 %v1299_v48  ;;  %v1265_v44 = vld [vmem:[%s5027_s3 + $0x298] sm:$0xff] }
 0x191   :  { %1673 = vmatpush.msrb.mxu0 %v1250_v49  ;;  %v1297_v48 = vld [vmem:[%s5027_s3 + $0x398] sm:$0xff]  ;;  %v1248_v49 = vld [vmem:[%s5027_s3 + $0x210] sm:$0xff] }
 0x192   :  { %742 = vmatmul.f32.gmra.mxu0 %v2290_v11  ;;  %834 = vmatmul.f32.gmra.mxu1 %v2291_v12  ;;  %v1266_v11 = vld [vmem:[%s5027_s3 + $0x2a0] sm:$0xff] }
 0x193   :  { %1027 = vmatmul.f32.gmra.mxu2 %v2340_v21  ;;  %1119 = vmatmul.f32.gmra.mxu3 %v2341_v22  ;;  %v1282_v12 = vld [vmem:[%s5027_s3 + $0x320] sm:$0xff] }
 0x194   :  { %1711 = vmatpush.msrb.mxu2 %v1284_v30  ;;  %v2343_v30 = vld [vmem:[%s5026_s0 + $0x618] sm:$0xff]  ;;  %1693 = vmatpush.msrb.mxu1 %v1266_v11  ;;  %v1264_v11 = vld [vmem:[%s5027_s3 + $0x290] sm:$0xff] }
 0x195   :  { %1733 = vmatpush.msrb.mxu3 %v1298_v31  ;;  %1674 = vmatpush.msrb.mxu0 %v1249_v35  ;;  %v1263_v31 = vld [vmem:[%s5027_s3 + $0x288] sm:$0xff] }
 0x196   :  { %v3737_v56 = vpop.f32.mrf.mxu2  ;;  %v3739_v57 = vpop.f32.mrf.mxu3  ;;  %1712 = vmatpush.msrb.mxu2 %v1283_v45  ;;  %v1281_v45 = vld [vmem:[%s5027_s3 + $0x318] sm:$0xff]  ;;  %1694 = vmatpush.msrb.mxu1 %v1265_v44  ;;  %v1279_v35 = vld [vmem:[%s5027_s3 + $0x308] sm:$0xff] }
 0x197   :  { %v3747_v21 = vpop.f32.mrf.mxu0  ;;  %v3749_v22 = vpop.f32.mrf.mxu1  ;;  %1734 = vmatpush.msrb.mxu3 %v1297_v48  ;;  %1675 = vmatpush.msrb.mxu0 %v1248_v49  ;;  %v2295_v48 = vld [vmem:[%s5026_s0 + $0x498] sm:$0xff]  ;;  %v2344_v49 = vld [vmem:[%s5026_s0 + $0x620] sm:$0xff] }
 0x198   :  { %1713 = vmatpush.msrb.mxu2 %v1282_v12  ;;  %v1280_v12 = vld [vmem:[%s5027_s3 + $0x310] sm:$0xff]  ;;  %1695 = vmatpush.msrb.mxu1 %v1264_v11  ;;  %v1246_v11 = vld [vmem:[%s5027_s3 + $0x200] sm:$0xff] }
 0x19a   :  { %745 = vmatmul.f32.gmra.mxu0 %v2292_v26  ;;  %837 = vmatmul.f32.gmra.mxu1 %v2293_v27  ;;  %v1296_v26 = vld [vmem:[%s5027_s3 + $0x390] sm:$0xff]  ;;  %v1247_v27 = vld [vmem:[%s5027_s3 + $0x208] sm:$0xff] }
 0x19b   :  { %1030 = vmatmul.f32.gmra.mxu2 %v2342_v29  ;;  %1122 = vmatmul.f32.gmra.mxu3 %v2343_v30 }
 0x19c   :  { %1714 = vmatpush.msrb.mxu2 %v1281_v45  ;;  %1735 = vmatpush.msrb.mxu3 %v1296_v26  ;;  %v1262_v26 = vld [vmem:[%s5027_s3 + $0x280] sm:$0xff] }
 0x19d   :  { %1676 = vmatpush.msrb.mxu0 %v1247_v27  ;;  %1696 = vmatpush.msrb.mxu1 %v1263_v31  ;;  %v1278_v27 = vld [vmem:[%s5027_s3 + $0x300] sm:$0xff]  ;;  %v687_v31 = vadd.f32 %v3373_v8, %v3523_v46  ;;  %v972_v46 = vadd.f32 %v3373_v8, %v3569_v13 }
 0x19e   :  { %v3793_v29 = vpop.f32.mrf.mxu2  ;;  %v3795_v30 = vpop.f32.mrf.mxu3  ;;  %1715 = vmatpush.msrb.mxu2 %v1280_v12  ;;  %v681_v12 = vadd.f32 %v3373_v8, %v3409_v33  ;;  %v1294_v33 = vld [vmem:[%s5027_s3 + $0x380] sm:$0xff]  ;;  %1736 = vmatpush.msrb.mxu3 %v1295_v14 }
 0x19f   :  { %v3803_v44 = vpop.f32.mrf.mxu0  ;;  %v3805_v45 = vpop.f32.mrf.mxu1  ;;  %1677 = vmatpush.msrb.mxu0 %v1246_v11  ;;  %1697 = vmatpush.msrb.mxu1 %v1262_v26  ;;  %v2296_v13 = vld [vmem:[%s5026_s0 + $0x4a0] sm:$0xff] }
 0x1a0   :  { %1716 = vmatpush.msrb.mxu2 %v1279_v35  ;;  %v690_v35 = vadd.f32 %v3373_v8, %v3579_v23  ;;  %v975_v23 = vadd.f32 %v3373_v8, %v3625_v58  ;;  %1737 = vmatpush.msrb.mxu3 %v1294_v33  ;;  %v1064_v58 = vadd.f32 %v3571_v17, %v972_v46 }
 0x1a1   :  { %v693_v33 = vadd.f32 %v3373_v8, %v3635_v4  ;;  %v702_v46 = vadd.f32 %v3373_v8, %v3803_v44  ;;  %v981_v4 = vadd.f32 %v3373_v8, %v3737_v56  ;;  %v984_v44 = vadd.f32 %v3373_v8, %v3793_v29  ;;  %v1325_v29 = vld [vmem:[%s5027_s3 + $0x478] sm:$0xff] }
 0x1a2   :  { %748 = vmatmul.f32.gmra.mxu0 %v2294_v32  ;;  %840 = vmatmul.f32.gmra.mxu1 %v2295_v48  ;;  %v966_v32 = vadd.f32 %v3373_v8, %v3457_v0  ;;  %v776_v48 = vadd.f32 %v3469_v10, %v684_v50  ;;  %v779_v0 = vadd.f32 %v3525_v47, %v687_v31  ;;  %v2346_v47 = vld [vmem:[%s5026_s0 + $0x630] sm:$0xff] }
 0x1a3   :  { %1033 = vmatmul.f32.gmra.mxu2 %v2344_v49  ;;  %1125 = vmatmul.f32.gmra.mxu3 %v2345_v41  ;;  %v773_v41 = vadd.f32 %v3411_v34, %v681_v12  ;;  %v782_v14 = vadd.f32 %v3581_v25, %v690_v35  ;;  %v2297_v34 = vld [vmem:[%s5026_s0 + $0x4a8] sm:$0xff]  ;;  %v1061_v10 = vadd.f32 %v3515_v40, %v969_v9  ;;  %v2347_v25 = vld [vmem:[%s5026_s0 + $0x638] sm:$0xff]  ;;  %v1134_v9 = vmax.f32 %v1064_v58, 0.0 }
 0x1a4   :  { %1717 = vmatpush.msrb.mxu2 %v1278_v27  ;;  %v1058_v50 = vadd.f32 %v3459_v1, %v966_v32  ;;  %v1067_v12 = vadd.f32 %v3627_v61, %v975_v23  ;;  %v848_v27 = vmax.f32 %v776_v48, 0.0  ;;  %v849_v31 = vmax.f32 %v779_v0, 0.0 }
 0x1a5   :  { %v847_v26 = vmax.f32 %v773_v41, 0.0  ;;  %v850_v1 = vmax.f32 %v782_v14, 0.0  ;;  %v1133_v35 = vmax.f32 %v1061_v10, 0.0  ;;  %v696_v32 = vadd.f32 %v3373_v8, %v3691_v62 }
 0x1a6   :  { %v986_v49 = vpop.f32.mrf.mxu2  ;;  %v1078_v16 = vpop.f32.mrf.mxu3  ;;  %v1132_v40 = vmax.f32 %v1058_v50, 0.0  ;;  %v1135_v17 = vmax.f32 %v1067_v12, 0.0  ;;  %v699_v61 = vadd.f32 %v3373_v8, %v3747_v21  ;;  %v873_v41 = vmax.f32 %v2932_v5, %v848_v27  ;;  %v1356_v27 = vld [vmem:[%s5027_s3 + $0x570] sm:$0xff] }
 0x1a7   :  { %v3854_v39 = vpop.f32.mrf.mxu0  ;;  %v3856_v11 = vpop.f32.mrf.mxu1  ;;  %v872_v23 = vmax.f32 %v2916_v54, %v847_v26  ;;  %v978_v48 = vadd.f32 %v3373_v8, %v3681_v52  ;;  %v874_v14 = vmax.f32 %v2948_v20, %v849_v31  ;;  %v875_v21 = vmax.f32 %v2964_v36, %v850_v1  ;;  %v1323_v1 = vld [vmem:[%s5027_s3 + $0x468] sm:$0xff] }
 0x1a8   :  { %v987_v54 = vadd.f32 %v3373_v8, %v986_v49  ;;  %v785_v56 = vadd.f32 %v3637_v6, %v693_v33  ;;  %v788_v50 = vadd.f32 %v3693_v63, %v696_v32  ;;  %v791_v20 = vadd.f32 %v3749_v22, %v699_v61  ;;  %v1341_v49 = vld [vmem:[%s5027_s3 + $0x4f8] sm:$0xff]  ;;  %v1371_v61 = vld [vmem:[%s5027_s3 + $0x5e8] sm:$0xff] }
 0x1a9   :  { %v1157_v52 = vmax.f32 %v872_v23, %v1132_v40  ;;  %v1159_v10 = vmax.f32 %v874_v14, %v1134_v9  ;;  %v794_v36 = vadd.f32 %v3805_v45, %v702_v46  ;;  %v1073_v6 = vadd.f32 %v3739_v57, %v981_v4  ;;  %v1357_v63 = vld [vmem:[%s5027_s3 + $0x578] sm:$0xff]  ;;  %v1340_v57 = vld [vmem:[%s5027_s3 + $0x4f0] sm:$0xff]  ;;  %v1339_v40 = vld [vmem:[%s5027_s3 + $0x4e8] sm:$0xff] }
 0x1aa   :  { %751 = vmatmul.f32.gmra.mxu0 %v2296_v13  ;;  %843 = vmatmul.f32.gmra.mxu1 %v2297_v34  ;;  %v1158_v34 = vmax.f32 %v873_v41, %v1133_v35  ;;  %v1373_v22 = vld [vmem:[%s5027_s3 + $0x5f8] sm:$0xff]  ;;  %v1076_v45 = vadd.f32 %v3795_v30, %v984_v44  ;;  %v1079_v58 = vadd.f32 %v1078_v16, %v987_v54  ;;  %v851_v12 = vmax.f32 %v785_v56, 0.0  ;;  %v1372_v16 = vld [vmem:[%s5027_s3 + $0x5f0] sm:$0xff]  ;;  %v1322_v4 = vld [vmem:[%s5027_s3 + $0x460] sm:$0xff] }
 0x1ab   :  { %1036 = vmatmul.f32.gmra.mxu2 %v2346_v47  ;;  %1128 = vmatmul.f32.gmra.mxu3 %v2347_v25  ;;  %v1160_v47 = vmax.f32 %v875_v21, %v1135_v17  ;;  %v1070_v25 = vadd.f32 %v3683_v55, %v978_v48  ;;  %v1324_v55 = vld [vmem:[%s5027_s3 + $0x470] sm:$0xff]  ;;  %v852_v26 = vmax.f32 %v788_v50, 0.0  ;;  %v853_v30 = vmax.f32 %v791_v20, 0.0  ;;  %v1355_v17 = vld [vmem:[%s5027_s3 + $0x568] sm:$0xff]  ;;  %v1338_v14 = vld [vmem:[%s5027_s3 + $0x4e0] sm:$0xff] }
 0x1ac   :  { %v854_v31 = vmax.f32 %v794_v36, 0.0  ;;  %v1137_v33 = vmax.f32 %v1073_v6, 0.0  ;;  %v1138_v46 = vmax.f32 %v1076_v45, 0.0  ;;  %v1139_v23 = vmax.f32 %v1079_v58, 0.0  ;;  %v1354_v54 = vld [vmem:[%s5027_s3 + $0x560] sm:$0xff]  ;;  %v1369_v20 = vld [vmem:[%s5027_s3 + $0x5d8] sm:$0xff] }
 0x1ad   :  { %v1136_v35 = vmax.f32 %v1070_v25, 0.0  ;;  %v876_v21 = vmax.f32 %v2980_v51, %v851_v12  ;;  %v877_v44 = vmax.f32 %v2996_v3, %v852_v26  ;;  %v1320_v36 = vld [vmem:[%s5027_s3 + $0x450] sm:$0xff]  ;;  %v1335_v45 = vld [vmem:[%s5027_s3 + $0x4c8] sm:$0xff]  ;;  %v1318_v26 = vld [vmem:[%s5027_s3 + $0x440] sm:$0xff] }
 0x1ae   :  { %v3888_v0 = vpop.f32.mrf.mxu2  ;;  %v3890_v62 = vpop.f32.mrf.mxu3  ;;  %v879_v56 = vmax.f32 %v3028_v37, %v854_v31  ;;  %v1353_v37 = vld [vmem:[%s5027_s3 + $0x558] sm:$0xff]  ;;  %v1368_v25 = vld [vmem:[%s5027_s3 + $0x5d0] sm:$0xff]  ;;  %v1367_v12 = vld [vmem:[%s5027_s3 + $0x5c8] sm:$0xff] }
 0x1af   :  { %v3897_v5 = vpop.f32.mrf.mxu0  ;;  %v3899_v13 = vpop.f32.mrf.mxu1  ;;  %v1161_v50 = vmax.f32 %v876_v21, %v1136_v35  ;;  %v1162_v51 = vmax.f32 %v877_v44, %v1137_v33  ;;  %v1317_v31 = vld [vmem:[%s5027_s3 + $0x438] sm:$0xff]  ;;  %v1316_v33 = vld [vmem:[%s5027_s3 + $0x430] sm:$0xff] }
 0x1b0   :  { %v1365_v35 = vld [vmem:[%s5027_s3 + $0x5b8] sm:$0xff] }
 0x1b2   :  { %1598 = vmatmul.f32.vlgmr.msra.gmra.mxu0 %v1157_v52  ;;  %1618 = vmatmul.f32.vlgmr.msra.gmra.mxu1 %v1158_v34  ;;  %v1370_v52 = vld [vmem:[%s5027_s3 + $0x5e0] sm:$0xff]  ;;  %v878_v34 = vmax.f32 %v3012_v19, %v853_v30  ;;  %v1337_v19 = vld [vmem:[%s5027_s3 + $0x4d8] sm:$0xff] }
 0x1b3   :  { %1638 = vmatmul.f32.vlgmr.msra.gmra.mxu2 %v1159_v10  ;;  %1658 = vmatmul.f32.vlgmr.msra.gmra.mxu3 %v1160_v47  ;;  %v1164_v10 = vmax.f32 %v879_v56, %v1139_v23  ;;  %v1321_v47 = vld [vmem:[%s5027_s3 + $0x458] sm:$0xff]  ;;  %v1366_v30 = vld [vmem:[%s5027_s3 + $0x5c0] sm:$0xff]  ;;  %v1348_v23 = vld [vmem:[%s5027_s3 + $0x530] sm:$0xff]  ;;  %v990_v56 = vadd.f32 %v3373_v8, %v3888_v0 }
 0x1b4   :  { %1742 = vmatpush.msra.mxu0 %v1325_v29  ;;  %1762 = vmatpush.msra.mxu1 %v1341_v49  ;;  %v1163_v3 = vmax.f32 %v878_v34, %v1138_v46  ;;  %v1336_v29 = vld [vmem:[%s5027_s3 + $0x4d0] sm:$0xff]  ;;  %v708_v46 = vadd.f32 %v3373_v8, %v3897_v5  ;;  %v1315_v5 = vld [vmem:[%s5027_s3 + $0x428] sm:$0xff]  ;;  %v1314_v0 = vld [vmem:[%s5027_s3 + $0x420] sm:$0xff] }
 0x1b5   :  { %1782 = vmatpush.msra.mxu2 %v1357_v63  ;;  %1802 = vmatpush.msra.mxu3 %v1373_v22  ;;  %v1352_v49 = vld [vmem:[%s5027_s3 + $0x550] sm:$0xff]  ;;  %v1319_v22 = vld [vmem:[%s5027_s3 + $0x448] sm:$0xff] }
 0x1b6   :  { %1743 = vmatpush.msra.mxu0 %v1324_v55  ;;  %1763 = vmatpush.msra.mxu1 %v1340_v57  ;;  %v3938_v32 = vpop.f32.mrf.mxu2  ;;  %v3940_v9 = vpop.f32.mrf.mxu3  ;;  %v1351_v57 = vld [vmem:[%s5027_s3 + $0x548] sm:$0xff] }
 0x1b7   :  { %1783 = vmatpush.msra.mxu2 %v1356_v27  ;;  %1803 = vmatpush.msra.mxu3 %v1372_v16  ;;  %v3948_v41 = vpop.f32.mrf.mxu0  ;;  %v3950_v48 = vpop.f32.mrf.mxu1  ;;  %v1334_v27 = vld [vmem:[%s5027_s3 + $0x4c0] sm:$0xff] }
 0x1b8   :  { %1744 = vmatpush.msra.mxu0 %v1323_v1  ;;  %1764 = vmatpush.msra.mxu1 %v1339_v40  ;;  %v1350_v16 = vld [vmem:[%s5027_s3 + $0x540] sm:$0xff]  ;;  %v1333_v1 = vld [vmem:[%s5027_s3 + $0x4b8] sm:$0xff]  ;;  %v711_v44 = vadd.f32 %v3373_v8, %v3948_v41  ;;  %v993_v41 = vadd.f32 %v3373_v8, %v3938_v32 }
 0x1b9   :  { %1784 = vmatpush.msra.mxu2 %v1355_v17  ;;  %1804 = vmatpush.msra.mxu3 %v1371_v61  ;;  %v1349_v40 = vld [vmem:[%s5027_s3 + $0x538] sm:$0xff]  ;;  %v1332_v17 = vld [vmem:[%s5027_s3 + $0x4b0] sm:$0xff]  ;;  %v705_v61 = vadd.f32 %v3373_v8, %v3854_v39  ;;  %v1330_v32 = vld [vmem:[%s5027_s3 + $0x4a0] sm:$0xff] }
 0x1ba   :  { %1745 = vmatpush.msra.mxu0 %v1322_v4  ;;  %1765 = vmatpush.msra.mxu1 %v1338_v14  ;;  %v1364_v4 = vld [vmem:[%s5027_s3 + $0x5b0] sm:$0xff] }
 0x1bb   :  { %1785 = vmatpush.msra.mxu2 %v1354_v54  ;;  %1805 = vmatpush.msra.mxu3 %v1370_v52  ;;  %v1331_v54 = vld [vmem:[%s5027_s3 + $0x4a8] sm:$0xff] }
 0x1bc   :  { %1678 = vmatmul.f32.vlgmr.msrb.gmra.mxu0 %v1161_v50  ;;  %1698 = vmatmul.f32.vlgmr.msrb.gmra.mxu1 %v1162_v51  ;;  %v1347_v50 = vld [vmem:[%s5027_s3 + $0x528] sm:$0xff] }
 0x1bd   :  { %1718 = vmatmul.f32.vlgmr.msrb.gmra.mxu2 %v1163_v3  ;;  %1738 = vmatmul.f32.vlgmr.msrb.gmra.mxu3 %v1164_v10  ;;  %v1363_v51 = vld [vmem:[%s5027_s3 + $0x5a8] sm:$0xff] }
 0x1be   :  { %1746 = vmatpush.msra.mxu0 %v1321_v47  ;;  %1766 = vmatpush.msra.mxu1 %v1337_v19  ;;  %v995_v6 = vpop.f32.mrf.mxu2  ;;  %v3992_v63 = vpop.f32.mrf.mxu3  ;;  %v797_v47 = vadd.f32 %v3856_v11, %v705_v61  ;;  %v800_v19 = vadd.f32 %v3899_v13, %v708_v46  ;;  %v1313_v11 = vld [vmem:[%s5027_s3 + $0x418] sm:$0xff] }
 0x1bf   :  { %1786 = vmatpush.msra.mxu2 %v1353_v37  ;;  %1806 = vmatpush.msra.mxu3 %v1369_v20  ;;  %v713_v58 = vpop.f32.mrf.mxu0  ;;  %v805_v55 = vpop.f32.mrf.mxu1  ;;  %v996_v3 = vadd.f32 %v3373_v8, %v995_v6  ;;  %v1346_v37 = vld [vmem:[%s5027_s3 + $0x520] sm:$0xff]  ;;  %v803_v20 = vadd.f32 %v3950_v48, %v711_v44  ;;  %v1329_v13 = vld [vmem:[%s5027_s3 + $0x498] sm:$0xff] }
 0x1c0   :  { %1747 = vmatpush.msra.mxu0 %v1320_v36  ;;  %1767 = vmatpush.msra.mxu1 %v1336_v29  ;;  %v714_v39 = vadd.f32 %v3373_v8, %v713_v58  ;;  %v1082_v29 = vadd.f32 %v3890_v62, %v990_v56  ;;  %v1345_v48 = vld [vmem:[%s5027_s3 + $0x518] sm:$0xff]  ;;  %v1312_v62 = vld [vmem:[%s5027_s3 + $0x410] sm:$0xff]  ;;  %v856_v58 = vmax.f32 %v800_v19, 0.0  ;;  %v1342_v44 = vld [vmem:[%s5027_s3 + $0x500] sm:$0xff] }
 0x1c1   :  { %1787 = vmatpush.msra.mxu2 %v1352_v49  ;;  %1807 = vmatpush.msra.mxu3 %v1368_v25  ;;  %v1085_v49 = vadd.f32 %v3940_v9, %v993_v41  ;;  %v1361_v25 = vld [vmem:[%s5027_s3 + $0x598] sm:$0xff]  ;;  %v1088_v6 = vadd.f32 %v3992_v63, %v996_v3  ;;  %v1328_v9 = vld [vmem:[%s5027_s3 + $0x490] sm:$0xff] }
 0x1c2   :  { %1748 = vmatpush.msra.mxu0 %v1319_v22  ;;  %1768 = vmatpush.msra.mxu1 %v1335_v45  ;;  %v806_v36 = vadd.f32 %v805_v55, %v714_v39  ;;  %v855_v45 = vmax.f32 %v797_v47, 0.0  ;;  %v1344_v55 = vld [vmem:[%s5027_s3 + $0x510] sm:$0xff]  ;;  %v1358_v39 = vld [vmem:[%s5027_s3 + $0x580] sm:$0xff] }
 0x1c3   :  { %1788 = vmatpush.msra.mxu2 %v1351_v57  ;;  %1808 = vmatpush.msra.mxu3 %v1367_v12  ;;  %v1360_v63 = vld [vmem:[%s5027_s3 + $0x590] sm:$0xff]  ;;  %v1142_v61 = vmax.f32 %v1088_v6, 0.0  ;;  %v1385_v6 = vld [vmem:[%s5027_s3 + $0x658] sm:$0xff] }
 0x1c4   :  { %1749 = vmatpush.msra.mxu0 %v1318_v26  ;;  %1769 = vmatpush.msra.mxu1 %v1334_v27  ;;  %v857_v26 = vmax.f32 %v803_v20, 0.0  ;;  %v858_v27 = vmax.f32 %v806_v36, 0.0  ;;  %v1387_v20 = vld [vmem:[%s5027_s3 + $0x668] sm:$0xff] }
 0x1c5   :  { %1789 = vmatpush.msra.mxu2 %v1350_v16  ;;  %1809 = vmatpush.msra.mxu3 %v1366_v30  ;;  %v1311_v16 = vld [vmem:[%s5027_s3 + $0x408] sm:$0xff] }
 0x1c6   :  { %1750 = vmatpush.msra.mxu0 %v1317_v31  ;;  %1770 = vmatpush.msra.mxu1 %v1333_v1  ;;  %v998_v14 = vpop.f32.mrf.mxu2  ;;  %v1090_v21 = vpop.f32.mrf.mxu3  ;;  %v1327_v30 = vld [vmem:[%s5027_s3 + $0x488] sm:$0xff] }
 0x1c7   :  { %1790 = vmatpush.msra.mxu2 %v1349_v40  ;;  %1810 = vmatpush.msra.mxu3 %v1365_v35  ;;  %v4055_v52 = vpop.f32.mrf.mxu0  ;;  %v4057_v34 = vpop.f32.mrf.mxu1  ;;  %v999_v10 = vadd.f32 %v3373_v8, %v998_v14  ;;  %v1362_v8 = vld [vmem:[%s5027_s3 + $0x5a0] sm:$0xff]  ;;  %v1140_v40 = vmax.f32 %v1082_v29, 0.0  ;;  %v1141_v35 = vmax.f32 %v1085_v49, 0.0  ;;  %v880_v14 = vmax.f32 %v3044_v53, %v855_v45  ;;  %v1403_v36 = vld [vmem:[%s5027_s3 + $0x6e8] sm:$0xff] }
 0x1c8   :  { %1751 = vmatpush.msra.mxu0 %v1316_v33  ;;  %1771 = vmatpush.msra.mxu1 %v1332_v17  ;;  %v1343_v33 = vld [vmem:[%s5027_s3 + $0x508] sm:$0xff]  ;;  %v1386_v29 = vld [vmem:[%s5027_s3 + $0x660] sm:$0xff] }
 0x1c9   :  { %1791 = vmatpush.msra.mxu2 %v1348_v23  ;;  %1811 = vmatpush.msra.mxu3 %v1364_v4  ;;  %v1091_v22 = vadd.f32 %v1090_v21, %v999_v10  ;;  %v1359_v17 = vld [vmem:[%s5027_s3 + $0x588] sm:$0xff]  ;;  %v1310_v23 = vld [vmem:[%s5027_s3 + $0x400] sm:$0xff]  ;;  %v881_v21 = vmax.f32 %v3060_v7, %v856_v58  ;;  %v1165_v56 = vmax.f32 %v880_v14, %v1140_v40  ;;  %v1381_v14 = vld [vmem:[%s5027_s3 + $0x638] sm:$0xff] }
 0x1ca   :  { %1752 = vmatpush.msra.mxu0 %v1315_v5  ;;  %1772 = vmatpush.msra.mxu1 %v1331_v54  ;;  %v1326_v4 = vld [vmem:[%s5027_s3 + $0x480] sm:$0xff]  ;;  %v882_v5 = vmax.f32 %v3076_v24, %v857_v26  ;;  %v883_v54 = vmax.f32 %v3092_v42, %v858_v27  ;;  %v1405_v24 = vld [vmem:[%s5027_s3 + $0x6f8] sm:$0xff]  ;;  %v1383_v40 = vld [vmem:[%s5027_s3 + $0x648] sm:$0xff] }
 0x1cb   :  { %1792 = vmatpush.msra.mxu2 %v1347_v50  ;;  %1812 = vmatpush.msra.mxu3 %v1363_v51  ;;  %v1143_v46 = vmax.f32 %v1091_v22, 0.0  ;;  %v1166_v53 = vmax.f32 %v881_v21, %v1141_v35  ;;  %v1389_v50 = vld [vmem:[%s5027_s3 + $0x678] sm:$0xff]  ;;  %v1402_v49 = vld [vmem:[%s5027_s3 + $0x6e0] sm:$0xff]  ;;  %v1399_v35 = vld [vmem:[%s5027_s3 + $0x6c8] sm:$0xff] }
 0x1cc   :  { %1753 = vmatpush.msra.mxu0 %v1314_v0  ;;  %1773 = vmatpush.msra.mxu1 %v1330_v32  ;;  %v1167_v7 = vmax.f32 %v882_v5, %v1142_v61  ;;  %v1421_v42 = vld [vmem:[%s5027_s3 + $0x778] sm:$0xff]  ;;  %v1388_v0 = vld [vmem:[%s5027_s3 + $0x670] sm:$0xff]  ;;  %v1382_v61 = vld [vmem:[%s5027_s3 + $0x640] sm:$0xff] }
 0x1cd   :  { %1793 = vmatpush.msra.mxu2 %v1346_v37  ;;  %1813 = vmatpush.msra.mxu3 %v1362_v8  ;;  %v1168_v41 = vmax.f32 %v883_v54, %v1143_v46  ;;  %v1437_v51 = vld [vmem:[%s5027_s3 + $0x7f8] sm:$0xff]  ;;  %v1404_v32 = vld [vmem:[%s5027_s3 + $0x6f0] sm:$0xff]  ;;  %v1398_v46 = vld [vmem:[%s5027_s3 + $0x6c0] sm:$0xff] }
 0x1ce   :  { %1754 = vmatpush.msra.mxu0 %v1313_v11  ;;  %1774 = vmatpush.msra.mxu1 %v1329_v13  ;;  %v4113_v57 = vpop.f32.mrf.mxu2  ;;  %v4115_v12 = vpop.f32.mrf.mxu3  ;;  %v1420_v37 = vld [vmem:[%s5027_s3 + $0x770] sm:$0xff]  ;;  %v1419_v11 = vld [vmem:[%s5027_s3 + $0x768] sm:$0xff]  ;;  %v1401_v22 = vld [vmem:[%s5027_s3 + $0x6d8] sm:$0xff] }
 0x1cf   :  { %1794 = vmatpush.msra.mxu2 %v1345_v48  ;;  %1814 = vmatpush.msra.mxu3 %v1361_v25  ;;  %v4123_v31 = vpop.f32.mrf.mxu0  ;;  %v4125_v1 = vpop.f32.mrf.mxu1  ;;  %v1436_v8 = vld [vmem:[%s5027_s3 + $0x7f0] sm:$0xff]  ;;  %v1435_v13 = vld [vmem:[%s5027_s3 + $0x7e8] sm:$0xff]  ;;  %v1418_v48 = vld [vmem:[%s5027_s3 + $0x760] sm:$0xff] }
 0x1d0   :  { %1755 = vmatpush.msra.mxu0 %v1312_v62  ;;  %1775 = vmatpush.msra.mxu1 %v1328_v9  ;;  %v1434_v25 = vld [vmem:[%s5027_s3 + $0x7e0] sm:$0xff]  ;;  %v1417_v62 = vld [vmem:[%s5027_s3 + $0x758] sm:$0xff] }
 0x1d1   :  { %1795 = vmatpush.msra.mxu2 %v1344_v55  ;;  %1815 = vmatpush.msra.mxu3 %v1360_v63  ;;  %v1433_v9 = vld [vmem:[%s5027_s3 + $0x7d8] sm:$0xff]  ;;  %v1384_v55 = vld [vmem:[%s5027_s3 + $0x650] sm:$0xff] }
 0x1d2   :  { %1756 = vmatpush.msra.mxu0 %v1311_v16  ;;  %1776 = vmatpush.msra.mxu1 %v1327_v30  ;;  %v1400_v63 = vld [vmem:[%s5027_s3 + $0x6d0] sm:$0xff]  ;;  %v1397_v21 = vld [vmem:[%s5027_s3 + $0x6b8] sm:$0xff] }
 0x1d3   :  { %1796 = vmatpush.msra.mxu2 %v1343_v33  ;;  %1816 = vmatpush.msra.mxu3 %v1359_v17  ;;  %v1416_v16 = vld [vmem:[%s5027_s3 + $0x750] sm:$0xff]  ;;  %v1415_v33 = vld [vmem:[%s5027_s3 + $0x748] sm:$0xff] }
 0x1d4   :  { %1757 = vmatpush.msra.mxu0 %v1310_v23  ;;  %1777 = vmatpush.msra.mxu1 %v1326_v4  ;;  %v1432_v30 = vld [vmem:[%s5027_s3 + $0x7d0] sm:$0xff]  ;;  %v1431_v17 = vld [vmem:[%s5027_s3 + $0x7c8] sm:$0xff]  ;;  %v1414_v23 = vld [vmem:[%s5027_s3 + $0x740] sm:$0xff] }
 0x1d5   :  { %1797 = vmatpush.msra.mxu2 %v1342_v44  ;;  %1817 = vmatpush.msra.mxu3 %v1358_v39  ;;  %v1430_v4 = vld [vmem:[%s5027_s3 + $0x7c0] sm:$0xff]  ;;  %v1413_v44 = vld [vmem:[%s5027_s3 + $0x738] sm:$0xff] }
 0x1d6   :  { %1758 = vmatmul.f32.vlgmr.msra.gmra.mxu0 %v1165_v56  ;;  %1778 = vmatmul.f32.vlgmr.msra.gmra.mxu1 %v1166_v53  ;;  %v4161_v3 = vpop.f32.mrf.mxu2  ;;  %v4163_v10 = vpop.f32.mrf.mxu3  ;;  %v1429_v39 = vld [vmem:[%s5027_s3 + $0x7b8] sm:$0xff]  ;;  %v1380_v56 = vld [vmem:[%s5027_s3 + $0x630] sm:$0xff] }
 0x1d7   :  { %1798 = vmatmul.f32.vlgmr.msra.gmra.mxu2 %v1167_v7  ;;  %1818 = vmatmul.f32.vlgmr.msra.gmra.mxu3 %v1168_v41  ;;  %v4171_v47 = vpop.f32.mrf.mxu0  ;;  %v4173_v19 = vpop.f32.mrf.mxu1  ;;  %v1396_v53 = vld [vmem:[%s5027_s3 + $0x6b0] sm:$0xff]  ;;  %v4282_v41 = vld [vmem:[%s5025_s2] ss:$0 sm:$0xff] }
 0x1d8   :  { %1822 = vmatpush.msrb.mxu0 %v1389_v50  ;;  %1842 = vmatpush.msrb.mxu1 %v1405_v24  ;;  %v717_v50 = vadd.f32 %v4282_v41, %v4055_v52  ;;  %v720_v24 = vadd.f32 %v4282_v41, %v4123_v31  ;;  %v1379_v31 = vld [vmem:[%s5027_s3 + $0x628] sm:$0xff] }
 0x1d9   :  { %1862 = vmatpush.msrb.mxu2 %v1421_v42  ;;  %1882 = vmatpush.msrb.mxu3 %v1437_v51  ;;  %v1412_v42 = vld [vmem:[%s5027_s3 + $0x730] sm:$0xff] }
 0x1da   :  { %1823 = vmatpush.msrb.mxu0 %v1388_v0  ;;  %1843 = vmatpush.msrb.mxu1 %v1404_v32  ;;  %v1428_v51 = vld [vmem:[%s5027_s3 + $0x7b0] sm:$0xff]  ;;  %v723_v32 = vadd.f32 %v4282_v41, %v4171_v47  ;;  %v1411_v47 = vld [vmem:[%s5027_s3 + $0x728] sm:$0xff] }
 0x1db   :  { %1863 = vmatpush.msrb.mxu2 %v1420_v37  ;;  %1883 = vmatpush.msrb.mxu3 %v1436_v8  ;;  %v1395_v37 = vld [vmem:[%s5027_s3 + $0x6a8] sm:$0xff]  ;;  %v1002_v8 = vadd.f32 %v4282_v41, %v4113_v57 }
 0x1dc   :  { %1824 = vmatpush.msrb.mxu0 %v1387_v20  ;;  %1844 = vmatpush.msrb.mxu1 %v1403_v36  ;;  %v1005_v20 = vadd.f32 %v4282_v41, %v4161_v3  ;;  %v1427_v36 = vld [vmem:[%s5027_s3 + $0x7a8] sm:$0xff]  ;;  %v1378_v3 = vld [vmem:[%s5027_s3 + $0x620] sm:$0xff] }
 0x1dd   :  { %1864 = vmatpush.msrb.mxu2 %v1419_v11  ;;  %1884 = vmatpush.msrb.mxu3 %v1435_v13  ;;  %v1394_v13 = vld [vmem:[%s5027_s3 + $0x6a0] sm:$0xff] }
 0x1de   :  { %1825 = vmatpush.msrb.mxu0 %v1386_v29  ;;  %1845 = vmatpush.msrb.mxu1 %v1402_v49  ;;  %v4217_v45 = vpop.f32.mrf.mxu2  ;;  %v4219_v58 = vpop.f32.mrf.mxu3  ;;  %v809_v29 = vadd.f32 %v4057_v34, %v717_v50  ;;  %v812_v49 = vadd.f32 %v4125_v1, %v720_v24  ;;  %v1377_v34 = vld [vmem:[%s5027_s3 + $0x618] sm:$0xff]  ;;  %v1406_v24 = vld [vmem:[%s5027_s3 + $0x700] sm:$0xff] }
 0x1df   :  { %1865 = vmatpush.msrb.mxu2 %v1418_v48  ;;  %1885 = vmatpush.msrb.mxu3 %v1434_v25  ;;  %v725_v26 = vpop.f32.mrf.mxu0  ;;  %v4227_v27 = vpop.f32.mrf.mxu1  ;;  %v1008_v11 = vadd.f32 %v4282_v41, %v4217_v45  ;;  %v1410_v48 = vld [vmem:[%s5027_s3 + $0x720] sm:$0xff]  ;;  %v1393_v1 = vld [vmem:[%s5027_s3 + $0x698] sm:$0xff] }
 0x1e0   :  { %1826 = vmatpush.msrb.mxu0 %v1385_v6  ;;  %1846 = vmatpush.msrb.mxu1 %v1401_v22  ;;  %v726_v52 = vadd.f32 %v4282_v41, %v725_v26  ;;  %v1426_v25 = vld [vmem:[%s5027_s3 + $0x7a0] sm:$0xff]  ;;  %v815_v6 = vadd.f32 %v4173_v19, %v723_v32  ;;  %v1409_v19 = vld [vmem:[%s5027_s3 + $0x718] sm:$0xff] }
 0x1e1   :  { %1866 = vmatpush.msrb.mxu2 %v1417_v62  ;;  %1886 = vmatpush.msrb.mxu3 %v1433_v9  ;;  %v1094_v62 = vadd.f32 %v4115_v12, %v1002_v8  ;;  %v1097_v9 = vadd.f32 %v4163_v10, %v1005_v20  ;;  %v1425_v45 = vld [vmem:[%s5027_s3 + $0x798] sm:$0xff]  ;;  %v1100_v26 = vadd.f32 %v4219_v58, %v1008_v11  ;;  %v1376_v12 = vld [vmem:[%s5027_s3 + $0x610] sm:$0xff] }
 0x1e2   :  { %1827 = vmatpush.msrb.mxu0 %v1384_v55  ;;  %1847 = vmatpush.msrb.mxu1 %v1400_v63  ;;  %v818_v22 = vadd.f32 %v4227_v27, %v726_v52  ;;  %v1392_v10 = vld [vmem:[%s5027_s3 + $0x690] sm:$0xff] }
 0x1e3   :  { %1867 = vmatpush.msrb.mxu2 %v1416_v16  ;;  %1887 = vmatpush.msrb.mxu3 %v1432_v30  ;;  %v859_v30 = vmax.f32 %v809_v29, 0.0  ;;  %v1408_v58 = vld [vmem:[%s5027_s3 + $0x710] sm:$0xff]  ;;  %v1451_v29 = vld [vmem:[%s5027_s3 + $0x868] sm:$0xff] }
 0x1e4   :  { %1828 = vmatpush.msrb.mxu0 %v1383_v40  ;;  %1848 = vmatpush.msrb.mxu1 %v1399_v35  ;;  %v860_v40 = vmax.f32 %v812_v49, 0.0  ;;  %v1424_v35 = vld [vmem:[%s5027_s3 + $0x790] sm:$0xff]  ;;  %v1467_v49 = vld [vmem:[%s5027_s3 + $0x8e8] sm:$0xff] }
 0x1e5   :  { %1868 = vmatpush.msrb.mxu2 %v1415_v33  ;;  %1888 = vmatpush.msrb.mxu3 %v1431_v17  ;;  %v861_v33 = vmax.f32 %v815_v6, 0.0  ;;  %v862_v17 = vmax.f32 %v818_v22, 0.0  ;;  %v1452_v11 = vld [vmem:[%s5027_s3 + $0x870] sm:$0xff]  ;;  %v1450_v22 = vld [vmem:[%s5027_s3 + $0x860] sm:$0xff] }
 0x1e6   :  { %1829 = vmatpush.msrb.mxu0 %v1382_v61  ;;  %1849 = vmatpush.msrb.mxu1 %v1398_v46  ;;  %v1010_v5 = vpop.f32.mrf.mxu2  ;;  %v1102_v54 = vpop.f32.mrf.mxu3  ;;  %v1375_v61 = vld [vmem:[%s5027_s3 + $0x608] sm:$0xff]  ;;  %v885_v50 = vmax.f32 %v3127_v15, %v860_v40  ;;  %v1464_v40 = vld [vmem:[%s5027_s3 + $0x8d0] sm:$0xff] }
 0x1e7   :  { %1869 = vmatpush.msrb.mxu2 %v1414_v23  ;;  %1889 = vmatpush.msrb.mxu3 %v1430_v4  ;;  %v4277_v7 = vpop.f32.mrf.mxu0  ;;  %v4294_v0 = vpop.f32.mrf.mxu1  ;;  %v1011_v57 = vadd.f32 %v4282_v41, %v1010_v5  ;;  %v1391_v46 = vld [vmem:[%s5027_s3 + $0x688] sm:$0xff]  ;;  %v1144_v23 = vmax.f32 %v1094_v62, 0.0  ;;  %v1145_v4 = vmax.f32 %v1097_v9, 0.0  ;;  %v887_v32 = vmax.f32 %v3171_v59, %v862_v17  ;;  %v1469_v59 = vld [vmem:[%s5027_s3 + $0x8f8] sm:$0xff]  ;;  %v1498_v62 = vld [vmem:[%s5027_s3 + $0x9e0] sm:$0xff] }
 0x1e8   :  { %1830 = vmatpush.msrb.mxu0 %v1381_v14  ;;  %1850 = vmatpush.msrb.mxu1 %v1397_v21  ;;  %v1407_v14 = vld [vmem:[%s5027_s3 + $0x708] sm:$0xff] }
 0x1e9   :  { %1870 = vmatpush.msrb.mxu2 %v1413_v44  ;;  %1890 = vmatpush.msrb.mxu3 %v1429_v39  ;;  %v1103_v27 = vadd.f32 %v1102_v54, %v1011_v57  ;;  %v1423_v21 = vld [vmem:[%s5027_s3 + $0x788] sm:$0xff]  ;;  %v1146_v39 = vmax.f32 %v1100_v26, 0.0  ;;  %v1374_v54 = vld [vmem:[%s5027_s3 + $0x600] sm:$0xff]  ;;  %v1468_v57 = vld [vmem:[%s5027_s3 + $0x8f0] sm:$0xff] }
 0x1ea   :  { %1831 = vmatpush.msrb.mxu0 %v1380_v56  ;;  %1851 = vmatpush.msrb.mxu1 %v1396_v53  ;;  %v1390_v56 = vld [vmem:[%s5027_s3 + $0x680] sm:$0xff]  ;;  %v884_v53 = vmax.f32 %v3108_v60, %v859_v30  ;;  %v1170_v60 = vmax.f32 %v885_v50, %v1145_v4  ;;  %v1465_v26 = vld [vmem:[%s5027_s3 + $0x8d8] sm:$0xff]  ;;  %v1448_v30 = vld [vmem:[%s5027_s3 + $0x850] sm:$0xff] }
 0x1eb   :  { %1871 = vmatpush.msrb.mxu2 %v1412_v42  ;;  %1891 = vmatpush.msrb.mxu3 %v1428_v51  ;;  %v1147_v5 = vmax.f32 %v1103_v27, 0.0  ;;  %v1422_v42 = vld [vmem:[%s5027_s3 + $0x780] sm:$0xff]  ;;  %v886_v51 = vmax.f32 %v3149_v38, %v861_v33  ;;  %v1453_v38 = vld [vmem:[%s5027_s3 + $0x878] sm:$0xff]  ;;  %v1447_v33 = vld [vmem:[%s5027_s3 + $0x848] sm:$0xff] }
 0x1ec   :  { %1832 = vmatpush.msrb.mxu0 %v1379_v31  ;;  %1852 = vmatpush.msrb.mxu1 %v1395_v37  ;;  %v1169_v52 = vmax.f32 %v884_v53, %v1144_v23  ;;  %v1481_v27 = vld [vmem:[%s5027_s3 + $0x958] sm:$0xff]  ;;  %v1463_v17 = vld [vmem:[%s5027_s3 + $0x8c8] sm:$0xff]  ;;  %v1446_v23 = vld [vmem:[%s5027_s3 + $0x840] sm:$0xff] }
 0x1ed   :  { %1872 = vmatpush.msrb.mxu2 %v1411_v47  ;;  %1892 = vmatpush.msrb.mxu3 %v1427_v36  ;;  %v1171_v37 = vmax.f32 %v886_v51, %v1146_v39  ;;  %v1172_v8 = vmax.f32 %v887_v32, %v1147_v5  ;;  %v1485_v47 = vld [vmem:[%s5027_s3 + $0x978] sm:$0xff]  ;;  %v1462_v4 = vld [vmem:[%s5027_s3 + $0x8c0] sm:$0xff]  ;;  %v1444_v51 = vld [vmem:[%s5027_s3 + $0x830] sm:$0xff] }
 0x1ee   :  { %1833 = vmatpush.msrb.mxu0 %v1378_v3  ;;  %1853 = vmatpush.msrb.mxu1 %v1394_v13  ;;  %v4348_v55 = vpop.f32.mrf.mxu2  ;;  %v4350_v63 = vpop.f32.mrf.mxu3  ;;  %v1501_v36 = vld [vmem:[%s5027_s3 + $0x9f8] sm:$0xff]  ;;  %v1484_v3 = vld [vmem:[%s5027_s3 + $0x970] sm:$0xff] }
 0x1ef   :  { %1873 = vmatpush.msrb.mxu2 %v1410_v48  ;;  %1893 = vmatpush.msrb.mxu3 %v1426_v25  ;;  %v4359_v16 = vpop.f32.mrf.mxu0  ;;  %v4379_v44 = vpop.f32.mrf.mxu1  ;;  %v1500_v13 = vld [vmem:[%s5027_s3 + $0x9f0] sm:$0xff]  ;;  %v1483_v48 = vld [vmem:[%s5027_s3 + $0x968] sm:$0xff]  ;;  %v1477_v53 = vld [vmem:[%s5027_s3 + $0x938] sm:$0xff] }
 0x1f0   :  { %1834 = vmatpush.msrb.mxu0 %v1377_v34  ;;  %1854 = vmatpush.msrb.mxu1 %v1393_v1  ;;  %v1499_v25 = vld [vmem:[%s5027_s3 + $0x9e8] sm:$0xff]  ;;  %v1466_v34 = vld [vmem:[%s5027_s3 + $0x8e0] sm:$0xff]  ;;  %v1493_v50 = vld [vmem:[%s5027_s3 + $0x9b8] sm:$0xff] }
 0x1f1   :  { %1874 = vmatpush.msrb.mxu2 %v1409_v19  ;;  %1894 = vmatpush.msrb.mxu3 %v1425_v45  ;;  %v1482_v1 = vld [vmem:[%s5027_s3 + $0x960] sm:$0xff]  ;;  %v1449_v45 = vld [vmem:[%s5027_s3 + $0x858] sm:$0xff]  ;;  %v1460_v32 = vld [vmem:[%s5027_s3 + $0x8b0] sm:$0xff] }
 0x1f2   :  { %1835 = vmatpush.msrb.mxu0 %v1376_v12  ;;  %1855 = vmatpush.msrb.mxu1 %v1392_v10  ;;  %v1497_v12 = vld [vmem:[%s5027_s3 + $0x9d8] sm:$0xff] }
 0x1f3   :  { %1875 = vmatpush.msrb.mxu2 %v1408_v58  ;;  %1895 = vmatpush.msrb.mxu3 %v1424_v35  ;;  %v1480_v58 = vld [vmem:[%s5027_s3 + $0x950] sm:$0xff] }
 0x1f4   :  { %1836 = vmatpush.msrb.mxu0 %v1375_v61  ;;  %1856 = vmatpush.msrb.mxu1 %v1391_v46  ;;  %v1496_v35 = vld [vmem:[%s5027_s3 + $0x9d0] sm:$0xff]  ;;  %v1479_v61 = vld [vmem:[%s5027_s3 + $0x948] sm:$0xff] }
 0x1f5   :  { %1876 = vmatpush.msrb.mxu2 %v1407_v14  ;;  %1896 = vmatpush.msrb.mxu3 %v1423_v21  ;;  %v1495_v46 = vld [vmem:[%s5027_s3 + $0x9c8] sm:$0xff]  ;;  %v1478_v14 = vld [vmem:[%s5027_s3 + $0x940] sm:$0xff] }
 0x1f6   :  { %1837 = vmatpush.msrb.mxu0 %v1374_v54  ;;  %1857 = vmatpush.msrb.mxu1 %v1390_v56  ;;  %v4397_v15 = vpop.f32.mrf.mxu2  ;;  %v4399_v31 = vpop.f32.mrf.mxu3  ;;  %v1494_v21 = vld [vmem:[%s5027_s3 + $0x9c0] sm:$0xff]  ;;  %v1445_v54 = vld [vmem:[%s5027_s3 + $0x838] sm:$0xff] }
 0x1f7   :  { %1877 = vmatpush.msrb.mxu2 %v1406_v24  ;;  %1897 = vmatpush.msrb.mxu3 %v1422_v42  ;;  %v4407_v20 = vpop.f32.mrf.mxu0  ;;  %v4439_v6 = vpop.f32.mrf.mxu1  ;;  %v1461_v56 = vld [vmem:[%s5027_s3 + $0x8b8] sm:$0xff] }
 0x1f8   :  { %1838 = vmatmul.f32.vlgmr.msrb.gmra.mxu0 %v1169_v52  ;;  %1858 = vmatmul.f32.vlgmr.msrb.gmra.mxu1 %v1170_v60  ;;  %v729_v52 = vadd.f32 %v4282_v41, %v4277_v7  ;;  %v732_v60 = vadd.f32 %v4282_v41, %v4359_v16  ;;  %v1443_v7 = vld [vmem:[%s5027_s3 + $0x828] sm:$0xff] }
 0x1f9   :  { %1878 = vmatmul.f32.vlgmr.msrb.gmra.mxu2 %v1171_v37  ;;  %1898 = vmatmul.f32.vlgmr.msrb.gmra.mxu3 %v1172_v8  ;;  %v1476_v37 = vld [vmem:[%s5027_s3 + $0x930] sm:$0xff]  ;;  %v1459_v16 = vld [vmem:[%s5027_s3 + $0x8a8] sm:$0xff] }
 0x1fa   :  { %1902 = vmatpush.msra.mxu0 %v1453_v38  ;;  %1922 = vmatpush.msra.mxu1 %v1469_v59  ;;  %v1492_v8 = vld [vmem:[%s5027_s3 + $0x9b0] sm:$0xff]  ;;  %v735_v59 = vadd.f32 %v4282_v41, %v4407_v20  ;;  %v1475_v20 = vld [vmem:[%s5027_s3 + $0x928] sm:$0xff] }
 0x1fb   :  { %1942 = vmatpush.msra.mxu2 %v1485_v47  ;;  %1962 = vmatpush.msra.mxu3 %v1501_v36  ;;  %v1014_v36 = vadd.f32 %v4282_v41, %v4348_v55  ;;  %v1442_v55 = vld [vmem:[%s5027_s3 + $0x820] sm:$0xff] }
 0x1fc   :  { %1903 = vmatpush.msra.mxu0 %v1452_v11  ;;  %1923 = vmatpush.msra.mxu1 %v1468_v57  ;;  %v1017_v11 = vadd.f32 %v4282_v41, %v4397_v15  ;;  %v1491_v57 = vld [vmem:[%s5027_s3 + $0x9a8] sm:$0xff]  ;;  %v1458_v15 = vld [vmem:[%s5027_s3 + $0x8a0] sm:$0xff] }
 0x1fd   :  { %1943 = vmatpush.msra.mxu2 %v1484_v3  ;;  %1963 = vmatpush.msra.mxu3 %v1500_v13 }
 0x1fe   :  { %1904 = vmatpush.msra.mxu0 %v1451_v29  ;;  %1924 = vmatpush.msra.mxu1 %v1467_v49  ;;  %v4453_v9 = vpop.f32.mrf.mxu2  ;;  %v4455_v19 = vpop.f32.mrf.mxu3  ;;  %v821_v29 = vadd.f32 %v4294_v0, %v729_v52  ;;  %v824_v49 = vadd.f32 %v4379_v44, %v732_v60  ;;  %v1441_v0 = vld [vmem:[%s5027_s3 + $0x818] sm:$0xff] }
 0x1ff   :  { %1944 = vmatpush.msra.mxu2 %v1483_v48  ;;  %1964 = vmatpush.msra.mxu3 %v1499_v25  ;;  %v737_v10 = vpop.f32.mrf.mxu0  ;;  %v829_v39 = vpop.f32.mrf.mxu1  ;;  %v1020_v3 = vadd.f32 %v4282_v41, %v4453_v9  ;;  %v1474_v48 = vld [vmem:[%s5027_s3 + $0x920] sm:$0xff]  ;;  %v1457_v44 = vld [vmem:[%s5027_s3 + $0x898] sm:$0xff]  ;;  %v1109_v9 = vadd.f32 %v4399_v31, %v1017_v11  ;;  %v1456_v31 = vld [vmem:[%s5027_s3 + $0x890] sm:$0xff] }
 0x200   :  { %1905 = vmatpush.msra.mxu0 %v1450_v22  ;;  %1925 = vmatpush.msra.mxu1 %v1466_v34  ;;  %v738_v42 = vadd.f32 %v4282_v41, %v737_v10  ;;  %v1490_v25 = vld [vmem:[%s5027_s3 + $0x9a0] sm:$0xff]  ;;  %v827_v34 = vadd.f32 %v4439_v6, %v735_v59  ;;  %v1473_v6 = vld [vmem:[%s5027_s3 + $0x918] sm:$0xff]  ;;  %v863_v10 = vmax.f32 %v821_v29, 0.0 }
 0x201   :  { %1945 = vmatpush.msra.mxu2 %v1482_v1  ;;  %1965 = vmatpush.msra.mxu3 %v1498_v62  ;;  %v1106_v62 = vadd.f32 %v4350_v63, %v1014_v36  ;;  %v1440_v63 = vld [vmem:[%s5027_s3 + $0x810] sm:$0xff]  ;;  %v1517_v60 = vld [vmem:[%s5027_s3 + $0xa78] sm:$0xff]  ;;  %v1530_v29 = vld [vmem:[%s5027_s3 + $0xae0] sm:$0xff] }
 0x202   :  { %1906 = vmatpush.msra.mxu0 %v1449_v45  ;;  %1926 = vmatpush.msra.mxu1 %v1465_v26  ;;  %v830_v13 = vadd.f32 %v829_v39, %v738_v42  ;;  %v1489_v26 = vld [vmem:[%s5027_s3 + $0x998] sm:$0xff]  ;;  %v1564_v36 = vld [vmem:[%s5027_s3 + $0xbf0] sm:$0xff] }
 0x203   :  { %1946 = vmatpush.msra.mxu2 %v1481_v27  ;;  %1966 = vmatpush.msra.mxu3 %v1497_v12  ;;  %v1112_v27 = vadd.f32 %v4455_v19, %v1020_v3  ;;  %v1488_v19 = vld [vmem:[%s5027_s3 + $0x990] sm:$0xff]  ;;  %v1565_v59 = vld [vmem:[%s5027_s3 + $0xbf8] sm:$0xff]  ;;  %v1547_v3 = vld [vmem:[%s5027_s3 + $0xb68] sm:$0xff] }
 0x204   :  { %1907 = vmatpush.msra.mxu0 %v1448_v30  ;;  %1927 = vmatpush.msra.mxu1 %v1464_v40  ;;  %v866_v12 = vmax.f32 %v830_v13, 0.0  ;;  %v864_v30 = vmax.f32 %v824_v49, 0.0  ;;  %v1472_v40 = vld [vmem:[%s5027_s3 + $0x910] sm:$0xff]  ;;  %v1563_v13 = vld [vmem:[%s5027_s3 + $0xbe8] sm:$0xff]  ;;  %v1546_v49 = vld [vmem:[%s5027_s3 + $0xb60] sm:$0xff] }
 0x205   :  { %1947 = vmatpush.msra.mxu2 %v1480_v58  ;;  %1967 = vmatpush.msra.mxu3 %v1496_v35  ;;  %v865_v35 = vmax.f32 %v827_v34, 0.0  ;;  %v1150_v39 = vmax.f32 %v1112_v27, 0.0  ;;  %v1513_v34 = vld [vmem:[%s5027_s3 + $0xa58] sm:$0xff]  ;;  %v1560_v27 = vld [vmem:[%s5027_s3 + $0xbd0] sm:$0xff] }
 0x206   :  { %1908 = vmatpush.msra.mxu0 %v1447_v33  ;;  %1928 = vmatpush.msra.mxu1 %v1463_v17  ;;  %v1022_v5 = vpop.f32.mrf.mxu2  ;;  %v1114_v24 = vpop.f32.mrf.mxu3  ;;  %v1439_v17 = vld [vmem:[%s5027_s3 + $0x808] sm:$0xff] }
 0x207   :  { %1948 = vmatpush.msra.mxu2 %v1479_v61  ;;  %1968 = vmatpush.msra.mxu3 %v1495_v46  ;;  %v4534_v38 = vpop.f32.mrf.mxu0  ;;  %v1023_v47 = vadd.f32 %v4282_v41, %v1022_v5  ;;  %v4582_v45 = vpop.f32.mrf.mxu1  ;;  %v1455_v61 = vld [vmem:[%s5027_s3 + $0x888] sm:$0xff]  ;;  %v1148_v46 = vmax.f32 %v1106_v62, 0.0  ;;  %v891_v5 = vmax.f32 %v3268_v28, %v866_v12  ;;  %v1470_v28 = vld [vmem:[%s5027_s3 + $0x900] sm:$0xff]  ;;  %v1512_v62 = vld [vmem:[%s5027_s3 + $0xa50] sm:$0xff] }
 0x208   :  { %1909 = vmatpush.msra.mxu0 %v1446_v23  ;;  %1929 = vmatpush.msra.mxu1 %v1462_v4  ;;  %v1149_v23 = vmax.f32 %v1109_v9, 0.0  ;;  %v1471_v4 = vld [vmem:[%s5027_s3 + $0x908] sm:$0xff]  ;;  %v1528_v9 = vld [vmem:[%s5027_s3 + $0xad0] sm:$0xff] }
 0x209   :  { %1949 = vmatpush.msra.mxu2 %v1478_v14  ;;  %1969 = vmatpush.msra.mxu3 %v1494_v21  ;;  %v1115_v1 = vadd.f32 %v1114_v24, %v1023_v47  ;;  %v1487_v14 = vld [vmem:[%s5027_s3 + $0x988] sm:$0xff]  ;;  %v1486_v24 = vld [vmem:[%s5027_s3 + $0x980] sm:$0xff]  ;;  %v1548_v47 = vld [vmem:[%s5027_s3 + $0xb70] sm:$0xff] }
 0x20a   :  { %1910 = vmatpush.msra.mxu0 %v1445_v54  ;;  %1930 = vmatpush.msra.mxu1 %v1461_v56  ;;  %v1438_v54 = vld [vmem:[%s5027_s3 + $0x800] sm:$0xff]  ;;  %v1511_v12 = vld [vmem:[%s5027_s3 + $0xa48] sm:$0xff] }
 0x20b   :  { %1950 = vmatpush.msra.mxu2 %v1477_v53  ;;  %1970 = vmatpush.msra.mxu3 %v1493_v50  ;;  %v1151_v33 = vmax.f32 %v1115_v1, 0.0  ;;  %v1454_v56 = vld [vmem:[%s5027_s3 + $0x880] sm:$0xff]  ;;  %v888_v53 = vmax.f32 %v3196_v18, %v863_v10  ;;  %v889_v50 = vmax.f32 %v3218_v43, %v864_v30  ;;  %v1529_v1 = vld [vmem:[%s5027_s3 + $0xad8] sm:$0xff]  ;;  %v1559_v10 = vld [vmem:[%s5027_s3 + $0xbc8] sm:$0xff] }
 0x20c   :  { %1911 = vmatpush.msra.mxu0 %v1444_v51  ;;  %1931 = vmatpush.msra.mxu1 %v1460_v32  ;;  %v890_v51 = vmax.f32 %v3243_v2, %v865_v35  ;;  %v1549_v2 = vld [vmem:[%s5027_s3 + $0xb78] sm:$0xff]  ;;  %v1542_v35 = vld [vmem:[%s5027_s3 + $0xb40] sm:$0xff] }
 0x20d   :  { %1951 = vmatpush.msra.mxu2 %v1476_v37  ;;  %1971 = vmatpush.msra.mxu3 %v1492_v8  ;;  %v1176_v32 = vmax.f32 %v891_v5, %v1151_v33  ;;  %v1173_v18 = vmax.f32 %v888_v53, %v1148_v46  ;;  %v1174_v52 = vmax.f32 %v889_v50, %v1149_v23  ;;  %v1533_v37 = vld [vmem:[%s5027_s3 + $0xaf8] sm:$0xff]  ;;  %v1558_v33 = vld [vmem:[%s5027_s3 + $0xbc0] sm:$0xff]  ;;  %v1508_v5 = vld [vmem:[%s5027_s3 + $0xa30] sm:$0xff] }
 0x20e   :  { %1912 = vmatpush.msra.mxu0 %v1443_v7  ;;  %1932 = vmatpush.msra.mxu1 %v1459_v16  ;;  %v4571_v22 = vpop.f32.mrf.mxu2  ;;  %v4603_v58 = vpop.f32.mrf.mxu3  ;;  %v1175_v43 = vmax.f32 %v890_v51, %v1150_v39  ;;  %v1516_v7 = vld [vmem:[%s5027_s3 + $0xa70] sm:$0xff]  ;;  %v1525_v46 = vld [vmem:[%s5027_s3 + $0xab8] sm:$0xff] }
 0x20f   :  { %1952 = vmatpush.msra.mxu2 %v1475_v20  ;;  %1972 = vmatpush.msra.mxu3 %v1491_v57  ;;  %v4617_v21 = vpop.f32.mrf.mxu0  ;;  %v4643_v8 = vpop.f32.mrf.mxu1  ;;  %v1532_v16 = vld [vmem:[%s5027_s3 + $0xaf0] sm:$0xff]  ;;  %v1515_v20 = vld [vmem:[%s5027_s3 + $0xa68] sm:$0xff]  ;;  %v1541_v23 = vld [vmem:[%s5027_s3 + $0xb38] sm:$0xff] }
 0x210   :  { %1913 = vmatpush.msra.mxu0 %v1442_v55  ;;  %1933 = vmatpush.msra.mxu1 %v1458_v15  ;;  %v1531_v57 = vld [vmem:[%s5027_s3 + $0xae8] sm:$0xff]  ;;  %v1514_v15 = vld [vmem:[%s5027_s3 + $0xa60] sm:$0xff]  ;;  %v744_v53 = vadd.f32 %v4282_v41, %v4617_v21  ;;  %v1540_v50 = vld [vmem:[%s5027_s3 + $0xb30] sm:$0xff] }
 0x211   :  { %1953 = vmatpush.msra.mxu2 %v1474_v48  ;;  %1973 = vmatpush.msra.mxu3 %v1490_v25  ;;  %v1562_v48 = vld [vmem:[%s5027_s3 + $0xbe0] sm:$0xff]  ;;  %v1523_v21 = vld [vmem:[%s5027_s3 + $0xaa8] sm:$0xff] }
 0x212   :  { %1914 = vmatpush.msra.mxu0 %v1441_v0  ;;  %1934 = vmatpush.msra.mxu1 %v1457_v44  ;;  %v1545_v0 = vld [vmem:[%s5027_s3 + $0xb58] sm:$0xff] }
 0x213   :  { %1954 = vmatpush.msra.mxu2 %v1473_v6  ;;  %1974 = vmatpush.msra.mxu3 %v1489_v26  ;;  %v1561_v44 = vld [vmem:[%s5027_s3 + $0xbd8] sm:$0xff]  ;;  %v1544_v26 = vld [vmem:[%s5027_s3 + $0xb50] sm:$0xff] }
 0x214   :  { %1915 = vmatpush.msra.mxu0 %v1440_v63  ;;  %1935 = vmatpush.msra.mxu1 %v1456_v31  ;;  %v1527_v63 = vld [vmem:[%s5027_s3 + $0xac8] sm:$0xff] }
 0x215   :  { %1955 = vmatpush.msra.mxu2 %v1472_v40  ;;  %1975 = vmatpush.msra.mxu3 %v1488_v19  ;;  %v1543_v31 = vld [vmem:[%s5027_s3 + $0xb48] sm:$0xff]  ;;  %v1510_v40 = vld [vmem:[%s5027_s3 + $0xa40] sm:$0xff] }
 0x216   :  { %1916 = vmatpush.msra.mxu0 %v1439_v17  ;;  %1936 = vmatpush.msra.mxu1 %v1455_v61  ;;  %v4634_v42 = vpop.f32.mrf.mxu2  ;;  %v4663_v11 = vpop.f32.mrf.mxu3  ;;  %v1526_v19 = vld [vmem:[%s5027_s3 + $0xac0] sm:$0xff]  ;;  %v1509_v61 = vld [vmem:[%s5027_s3 + $0xa38] sm:$0xff] }
 0x217   :  { %1956 = vmatpush.msra.mxu2 %v1471_v4  ;;  %1976 = vmatpush.msra.mxu3 %v1487_v14  ;;  %v4677_v55 = vpop.f32.mrf.mxu0  ;;  %v4711_v6 = vpop.f32.mrf.mxu1  ;;  %v1557_v4 = vld [vmem:[%s5027_s3 + $0xbb8] sm:$0xff] }
 0x218   :  { %1917 = vmatpush.msra.mxu0 %v1438_v54  ;;  %1937 = vmatpush.msra.mxu1 %v1454_v56  ;;  %v1524_v54 = vld [vmem:[%s5027_s3 + $0xab0] sm:$0xff]  ;;  %v741_v56 = vadd.f32 %v4282_v41, %v4534_v38  ;;  %v1507_v38 = vld [vmem:[%s5027_s3 + $0xa28] sm:$0xff] }
 0x219   :  { %1957 = vmatpush.msra.mxu2 %v1470_v28  ;;  %1977 = vmatpush.msra.mxu3 %v1486_v24  ;;  %v1556_v28 = vld [vmem:[%s5027_s3 + $0xbb0] sm:$0xff]  ;;  %v747_v24 = vadd.f32 %v4282_v41, %v4677_v55  ;;  %v1537_v55 = vld [vmem:[%s5027_s3 + $0xb18] sm:$0xff] }
 0x21a   :  { %1918 = vmatmul.f32.vlgmr.msra.gmra.mxu0 %v1173_v18  ;;  %1938 = vmatmul.f32.vlgmr.msra.gmra.mxu1 %v1174_v52  ;;  %v1029_v18 = vadd.f32 %v4282_v41, %v4634_v42  ;;  %v1522_v42 = vld [vmem:[%s5027_s3 + $0xaa0] sm:$0xff] }
 0x21b   :  { %1958 = vmatmul.f32.vlgmr.msra.gmra.mxu2 %v1175_v43  ;;  %1978 = vmatmul.f32.vlgmr.msra.gmra.mxu3 %v1176_v32  ;;  %v1026_v32 = vadd.f32 %v4282_v41, %v4571_v22  ;;  %v1539_v43 = vld [vmem:[%s5027_s3 + $0xb28] sm:$0xff]  ;;  %v1506_v22 = vld [vmem:[%s5027_s3 + $0xa20] sm:$0xff] }
 0x21c   :  { %1982 = vmatpush.msrb.mxu0 %v1517_v60  ;;  %2002 = vmatpush.msrb.mxu1 %v1533_v37  ;;  %v1555_v60 = vld [vmem:[%s5027_s3 + $0xba8] sm:$0xff] }
 0x21d   :  { %2022 = vmatpush.msrb.mxu2 %v1549_v2  ;;  %2042 = vmatpush.msrb.mxu3 %v1565_v59  ;;  %v833_v59 = vadd.f32 %v4582_v45, %v741_v56  ;;  %v1505_v45 = vld [vmem:[%s5027_s3 + $0xa18] sm:$0xff] }
 0x21e   :  { %1983 = vmatpush.msrb.mxu0 %v1516_v7  ;;  %2003 = vmatpush.msrb.mxu1 %v1532_v16  ;;  %v4691_v25 = vpop.f32.mrf.mxu2  ;;  %v4731_v30 = vpop.f32.mrf.mxu3  ;;  %v836_v7 = vadd.f32 %v4643_v8, %v744_v53  ;;  %v1521_v8 = vld [vmem:[%s5027_s3 + $0xa98] sm:$0xff]  ;;  %v1580_v53 = vld [vmem:[%s5027_s3 + $0xc70] sm:$0xff] }
 0x21f   :  { %2023 = vmatpush.msrb.mxu2 %v1548_v47  ;;  %2043 = vmatpush.msrb.mxu3 %v1564_v36  ;;  %v749_v17 = vpop.f32.mrf.mxu0  ;;  %v841_v52 = vpop.f32.mrf.mxu1  ;;  %v1032_v37 = vadd.f32 %v4282_v41, %v4691_v25  ;;  %v1538_v47 = vld [vmem:[%s5027_s3 + $0xb20] sm:$0xff]  ;;  %v1581_v56 = vld [vmem:[%s5027_s3 + $0xc78] sm:$0xff] }
 0x220   :  { %1984 = vmatpush.msrb.mxu0 %v1515_v20  ;;  %2004 = vmatpush.msrb.mxu1 %v1531_v57  ;;  %v750_v39 = vadd.f32 %v4282_v41, %v749_v17  ;;  %v1554_v36 = vld [vmem:[%s5027_s3 + $0xba0] sm:$0xff]  ;;  %v839_v20 = vadd.f32 %v4711_v6, %v747_v24  ;;  %v868_v25 = vmax.f32 %v836_v7, 0.0  ;;  %v1577_v24 = vld [vmem:[%s5027_s3 + $0xc58] sm:$0xff] }
 0x221   :  { %2024 = vmatpush.msrb.mxu2 %v1547_v3  ;;  %2044 = vmatpush.msrb.mxu3 %v1563_v13  ;;  %v1118_v3 = vadd.f32 %v4603_v58, %v1026_v32  ;;  %v1121_v13 = vadd.f32 %v4663_v11, %v1029_v18  ;;  %v1504_v58 = vld [vmem:[%s5027_s3 + $0xa10] sm:$0xff]  ;;  %v1573_v18 = vld [vmem:[%s5027_s3 + $0xc38] sm:$0xff] }
 0x222   :  { %1985 = vmatpush.msrb.mxu0 %v1514_v15  ;;  %2005 = vmatpush.msrb.mxu1 %v1530_v29  ;;  %v842_v2 = vadd.f32 %v841_v52, %v750_v39  ;;  %v1553_v15 = vld [vmem:[%s5027_s3 + $0xb98] sm:$0xff]  ;;  %v1124_v29 = vadd.f32 %v4731_v30, %v1032_v37  ;;  %v1520_v11 = vld [vmem:[%s5027_s3 + $0xa90] sm:$0xff]  ;;  %v1502_v30 = vld [vmem:[%s5027_s3 + $0xa00] sm:$0xff] }
 0x223   :  { %2025 = vmatpush.msrb.mxu2 %v1546_v49  ;;  %2045 = vmatpush.msrb.mxu3 %v1562_v48  ;;  %v867_v48 = vmax.f32 %v833_v59, 0.0  ;;  %v1152_v6 = vmax.f32 %v1118_v3, 0.0  ;;  %v1570_v59 = vld [vmem:[%s5027_s3 + $0xc20] sm:$0xff] }
 0x224   :  { %1986 = vmatpush.msrb.mxu0 %v1513_v34  ;;  %2006 = vmatpush.msrb.mxu1 %v1529_v1  ;;  %v870_v49 = vmax.f32 %v842_v2, 0.0  ;;  %v1536_v34 = vld [vmem:[%s5027_s3 + $0xb10] sm:$0xff]  ;;  %v1571_v2 = vld [vmem:[%s5027_s3 + $0xc28] sm:$0xff]  ;;  %v1566_v3 = vld [vmem:[%s5027_s3 + $0xc00] sm:$0xff] }
 0x225   :  { %2026 = vmatpush.msrb.mxu2 %v1545_v0  ;;  %2046 = vmatpush.msrb.mxu3 %v1561_v44  ;;  %v1552_v1 = vld [vmem:[%s5027_s3 + $0xb90] sm:$0xff]  ;;  %v869_v0 = vmax.f32 %v839_v20, 0.0 }
 0x226   :  { %1987 = vmatpush.msrb.mxu0 %v1512_v62  ;;  %2007 = vmatpush.msrb.mxu1 %v1528_v9  ;;  %v1034_v14 = vpop.f32.mrf.mxu2  ;;  %v1126_v16 = vpop.f32.mrf.mxu3  ;;  %v1503_v62 = vld [vmem:[%s5027_s3 + $0xa08] sm:$0xff] }
 0x227   :  { %2027 = vmatpush.msrb.mxu2 %v1544_v26  ;;  %2047 = vmatpush.msrb.mxu3 %v1560_v27  ;;  %v1035_v51 = vadd.f32 %v4282_v41, %v1034_v14  ;;  %v1519_v9 = vld [vmem:[%s5027_s3 + $0xa88] sm:$0xff]  ;;  %v1153_v26 = vmax.f32 %v1121_v13, 0.0  ;;  %v752_v32 = vpop.f32.mrf.mxu0 }
 0x228   :  { %1988 = vmatpush.msrb.mxu0 %v1511_v12  ;;  %2008 = vmatpush.msrb.mxu1 %v1527_v63  ;;  %v1535_v27 = vld [vmem:[%s5027_s3 + $0xb08] sm:$0xff]  ;;  %v1154_v63 = vmax.f32 %v1124_v29, 0.0 }
 0x229   :  { %2028 = vmatpush.msrb.mxu2 %v1543_v31  ;;  %2048 = vmatpush.msrb.mxu3 %v1559_v10  ;;  %v1127_v57 = vadd.f32 %v1126_v16, %v1035_v51  ;;  %v1551_v12 = vld [vmem:[%s5027_s3 + $0xb88] sm:$0xff]  ;;  %v5039_v31 = vld [vmem:[#allocation5_spill] sm:$0xff]  ;;  %v1574_v51 = vld [vmem:[%s5027_s3 + $0xc40] sm:$0xff] }
 0x22a   :  { %1989 = vmatpush.msrb.mxu0 %v1510_v40  ;;  %2009 = vmatpush.msrb.mxu1 %v1526_v19  ;;  %v895_v10 = vmax.f32 %v5039_v31, %v870_v49  ;;  %v1518_v40 = vld [vmem:[%s5027_s3 + $0xa80] sm:$0xff] }
 0x22b   :  { %2029 = vmatpush.msrb.mxu2 %v1542_v35  ;;  %2049 = vmatpush.msrb.mxu3 %v1558_v33  ;;  %v1155_v44 = vmax.f32 %v1127_v57, 0.0  ;;  %v5040_v19 = vld [vmem:[#allocation2_spill] sm:$0xff]  ;;  %v5041_v33 = vld [vmem:[#allocation3_spill] sm:$0xff] }
 0x22c   :  { %1990 = vmatpush.msrb.mxu0 %v1509_v61  ;;  %2010 = vmatpush.msrb.mxu1 %v1525_v46  ;;  %v892_v35 = vmax.f32 %v5040_v19, %v867_v48  ;;  %v893_v17 = vmax.f32 %v5041_v33, %v868_v25  ;;  %v1534_v61 = vld [vmem:[%s5027_s3 + $0xb00] sm:$0xff]  ;;  %v1567_v57 = vld [vmem:[%s5027_s3 + $0xc08] sm:$0xff] }
 0x22d   :  { %2030 = vmatpush.msrb.mxu2 %v1541_v23  ;;  %2050 = vmatpush.msrb.mxu3 %v1557_v4  ;;  %v1550_v46 = vld [vmem:[%s5027_s3 + $0xb80] sm:$0xff]  ;;  %v5042_v23 = vld [vmem:[#allocation4_spill] sm:$0xff]  ;;  %v1180_v14 = vmax.f32 %v895_v10, %v1155_v44  ;;  %v2127_v44 = vld [vmem:[%s5030_s5 + $0x78] sm:$0xff] }
 0x22e   :  { %1991 = vmatpush.msrb.mxu0 %v1508_v5  ;;  %2011 = vmatpush.msrb.mxu1 %v1524_v54  ;;  %v894_v4 = vmax.f32 %v5042_v23, %v869_v0  ;;  %v1177_v39 = vmax.f32 %v892_v35, %v1152_v6  ;;  %v1178_v5 = vmax.f32 %v893_v17, %v1153_v26  ;;  %v1037_v52 = vpop.f32.mrf.mxu2  ;;  %v1129_v7 = vpop.f32.mrf.mxu3  ;;  %v2125_v6 = vld [vmem:[%s5030_s5 + $0x68] sm:$0xff]  ;;  %v2120_v35 = vld [vmem:[%s5030_s5 + $0x40] sm:$0xff] }
 0x22f   :  { %2031 = vmatpush.msrb.mxu2 %v1540_v50  ;;  %2051 = vmatpush.msrb.mxu3 %v1556_v28  ;;  %v1579_v50 = vld [vmem:[%s5027_s3 + $0xc68] sm:$0xff]  ;;  %v1578_v28 = vld [vmem:[%s5027_s3 + $0xc60] sm:$0xff]  ;;  %v1038_v37 = vadd.f32 %v4282_v41, %v1037_v52 }
 0x230   :  { %1992 = vmatpush.msrb.mxu0 %v1507_v38  ;;  %2012 = vmatpush.msrb.mxu1 %v1523_v21  ;;  %v1179_v54 = vmax.f32 %v894_v4, %v1154_v63  ;;  %v1576_v38 = vld [vmem:[%s5027_s3 + $0xc50] sm:$0xff]  ;;  %v1575_v21 = vld [vmem:[%s5027_s3 + $0xc48] sm:$0xff] }
 0x231   :  { %2032 = vmatpush.msrb.mxu2 %v1539_v43  ;;  %2052 = vmatpush.msrb.mxu3 %v1555_v60  ;;  %v753_v43 = vadd.f32 %v4282_v41, %v752_v32  ;;  %v1572_v60 = vld [vmem:[%s5027_s3 + $0xc30] sm:$0xff]  ;;  %v1130_v16 = vadd.f32 %v1129_v7, %v1038_v37  ;;  %v2121_v19 = vld [vmem:[%s5030_s5 + $0x48] sm:$0xff]  ;;  %v2168_v37 = vld [vmem:[%s5031_s7 + $0x78] sm:$0xff] }
 0x232   :  { %1993 = vmatpush.msrb.mxu0 %v1506_v22  ;;  %2013 = vmatpush.msrb.mxu1 %v1522_v42  ;;  %v844_v22 = vpop.f32.mrf.mxu1  ;;  %v2118_v4 = vld [vmem:[%s5030_s5 + $0x30] sm:$0xff]  ;;  %v2113_v32 = vld [vmem:[%s5030_s5 + $0x8] sm:$0xff] }
 0x233   :  { %2033 = vmatpush.msrb.mxu2 %v1538_v47  ;;  %2053 = vmatpush.msrb.mxu3 %v1554_v36  ;;  %v845_v42 = vadd.f32 %v844_v22, %v753_v43  ;;  %v1569_v47 = vld [vmem:[%s5027_s3 + $0xc18] sm:$0xff]  ;;  %v1568_v36 = vld [vmem:[%s5027_s3 + $0xc10] sm:$0xff]  ;;  %v1156_v20 = vmax.f32 %v1130_v16, 0.0 }
 0x234   :  { %1994 = vmatpush.msrb.mxu0 %v1505_v45  ;;  %2014 = vmatpush.msrb.mxu1 %v1521_v8  ;;  %v5043_v45 = vld [vmem:[#allocation6_spill] sm:$0xff] }
 0x235   :  { %2034 = vmatpush.msrb.mxu2 %v1537_v55  ;;  %2054 = vmatpush.msrb.mxu3 %v1553_v15  ;;  %v871_v41 = vmax.f32 %v845_v42, 0.0  ;;  %v1599_v55 = vpop.f32.mrf.mxu0  ;;  %v2166_v42 = vld [vmem:[%s5031_s7 + $0x68] sm:$0xff] }
 0x236   :  { %1995 = vmatpush.msrb.mxu0 %v1504_v58  ;;  %2015 = vmatpush.msrb.mxu1 %v1520_v11  ;;  %v1639_v29 = vpop.f32.mrf.mxu2  ;;  %v1659_v11 = vpop.f32.mrf.mxu3 }
 0x237   :  { %2035 = vmatpush.msrb.mxu2 %v1536_v34  ;;  %2055 = vmatpush.msrb.mxu3 %v1552_v1  ;;  %v896_v8 = vmax.f32 %v5043_v45, %v871_v41  ;;  %v2164_v41 = vld [vmem:[%s5031_s7 + $0x58] sm:$0xff] }
 0x238   :  { %1996 = vmatpush.msrb.mxu0 %v1503_v62  ;;  %2016 = vmatpush.msrb.mxu1 %v1519_v9  ;;  %v2126_v9 = vld [vmem:[%s5030_s5 + $0x70] sm:$0xff] }
 0x239   :  { %2036 = vmatpush.msrb.mxu2 %v1535_v27  ;;  %2056 = vmatpush.msrb.mxu3 %v1551_v12  ;;  %v1181_v13 = vmax.f32 %v896_v8, %v1156_v20  ;;  %v2124_v27 = vld [vmem:[%s5030_s5 + $0x60] sm:$0xff]  ;;  %v2123_v12 = vld [vmem:[%s5030_s5 + $0x58] sm:$0xff]  ;;  %v2163_v20 = vld [vmem:[%s5031_s7 + $0x50] sm:$0xff] }
 0x23a   :  { %1997 = vmatpush.msrb.mxu0 %v1502_v30  ;;  %2017 = vmatpush.msrb.mxu1 %v1518_v40  ;;  %v1619_v15 = vpop.f32.mrf.mxu1  ;;  %v2122_v30 = vld [vmem:[%s5030_s5 + $0x50] sm:$0xff] }
 0x23b   :  { %2037 = vmatpush.msrb.mxu2 %v1534_v61  ;;  %2057 = vmatpush.msrb.mxu3 %v1550_v46  ;;  %v2082_v49 = vadd.f32 %v1619_v15, %v1599_v55  ;;  %v2119_v46 = vld [vmem:[%s5030_s5 + $0x38] sm:$0xff] }
 0x23c   :  { %1998 = vmatmul.f32.vlgmr.msrb.gmra.mxu0 %v1177_v39  ;;  %2018 = vmatmul.f32.vlgmr.msrb.gmra.mxu1 %v1178_v5  ;;  %v2160_v15 = vld [vmem:[%s5031_s7 + $0x38] sm:$0xff] }
 0x23d   :  { %2038 = vmatmul.f32.vlgmr.msrb.gmra.mxu2 %v1179_v54  ;;  %2058 = vmatmul.f32.vlgmr.msrb.gmra.mxu3 %v1180_v14  ;;  %v2083_v58 = vadd.f32 %v2082_v49, %v1639_v29  ;;  %v1679_v25 = vpop.f32.mrf.mxu0  ;;  %v2117_v14 = vld [vmem:[%s5030_s5 + $0x28] sm:$0xff]  ;;  %v2159_v29 = vld [vmem:[%s5031_s7 + $0x30] sm:$0xff] }
 0x23e   :  { %2062 = vmatpush.msra.mxu0 %v1581_v56  ;;  %2132 = vmatpush.msra.mxu1 %v2127_v44  ;;  %v2116_v56 = vld [vmem:[%s5030_s5 + $0x20] sm:$0xff] }
 0x23f   :  { %v2084_v48 = vadd.f32 %v2083_v58, %v1659_v11  ;;  %2173 = vmatpush.msra.mxu2 %v2168_v37 }
 0x240   :  { %2063 = vmatpush.msra.mxu0 %v1580_v53  ;;  %v1719_v62 = vpop.f32.mrf.mxu2  ;;  %2133 = vmatpush.msra.mxu1 %v2126_v9  ;;  %v1739_v63 = vpop.f32.mrf.mxu3 }
 0x241   :  { %v2085_v34 = vadd.f32 %v2084_v48, %v1679_v25  ;;  %v2158_v48 = vld [vmem:[%s5031_s7 + $0x28] sm:$0xff] }
 0x242   :  { %2064 = vmatpush.msra.mxu0 %v1579_v50  ;;  %v1699_v1 = vpop.f32.mrf.mxu1  ;;  %2134 = vmatpush.msra.mxu1 %v2125_v6  ;;  %v2115_v50 = vld [vmem:[%s5030_s5 + $0x18] sm:$0xff] }
 0x243   :  { %v2086_v0 = vadd.f32 %v2085_v34, %v1699_v1  ;;  %v2157_v34 = vld [vmem:[%s5031_s7 + $0x20] sm:$0xff]  ;;  %v2156_v1 = vld [vmem:[%s5031_s7 + $0x18] sm:$0xff] }
 0x244   :  { %2065 = vmatpush.msra.mxu0 %v1578_v28  ;;  %2135 = vmatpush.msra.mxu1 %v2124_v27 }
 0x245   :  { %v2087_v26 = vadd.f32 %v2086_v0, %v1719_v62  ;;  %v2349_v62 = vld [vmem:[%s5028_s4] ss:$0 sm:$0xff] }
 0x246   :  { %2066 = vmatpush.msra.mxu0 %v1577_v24  ;;  %2136 = vmatpush.msra.mxu1 %v2123_v12  ;;  %v2155_v12 = vld [vmem:[%s5031_s7 + $0x10] sm:$0xff] }
 0x247   :  { %v2088_v10 = vadd.f32 %v2087_v26, %v1739_v63  ;;  %v2154_v63 = vld [vmem:[%s5031_s7 + $0x8] sm:$0xff] }
 0x248   :  { %2067 = vmatpush.msra.mxu0 %v1576_v38  ;;  %2137 = vmatpush.msra.mxu1 %v2122_v30 }
 0x24a   :  { %2068 = vmatpush.msra.mxu0 %v1575_v21  ;;  %2138 = vmatpush.msra.mxu1 %v2121_v19  ;;  %v2114_v21 = vld [vmem:[%s5030_s5 + $0x10] sm:$0xff] }
 0x24c   :  { %2069 = vmatpush.msra.mxu0 %v1574_v51  ;;  %2139 = vmatpush.msra.mxu1 %v2120_v35  ;;  %v2351_v35 = vld [vmem:[%s5032_s8] ss:$0 sm:$0xff] }
 0x24e   :  { %2070 = vmatpush.msra.mxu0 %v1573_v18  ;;  %2140 = vmatpush.msra.mxu1 %v2119_v46  ;;  %v2112_v18 = vld [vmem:[%s5030_s5] sm:$0xff] }
 0x250   :  { %2071 = vmatpush.msra.mxu0 %v1572_v60  ;;  %2141 = vmatpush.msra.mxu1 %v2118_v4 }
 0x252   :  { %2072 = vmatpush.msra.mxu0 %v1571_v2  ;;  %2142 = vmatpush.msra.mxu1 %v2117_v14  ;;  %v2167_v2 = vld [vmem:[%s5031_s7 + $0x70] sm:$0xff] }
 0x253   :  { %v1759_v31 = vpop.f32.mrf.mxu0  ;;  %v1779_v33 = vpop.f32.mrf.mxu1  ;;  %2174 = vmatpush.msra.mxu2 %v2167_v2 }
 0x254   :  { %2073 = vmatpush.msra.mxu0 %v1570_v59  ;;  %v2089_v40 = vadd.f32 %v2088_v10, %v1759_v31  ;;  %2143 = vmatpush.msra.mxu1 %v2116_v56  ;;  %v2165_v59 = vld [vmem:[%s5031_s7 + $0x60] sm:$0xff] }
 0x255   :  { %2175 = vmatpush.msra.mxu2 %v2166_v42  ;;  %v2153_v31 = vld [vmem:[%s5031_s7] sm:$0xff] }
 0x256   :  { %2074 = vmatpush.msra.mxu0 %v1569_v47  ;;  %v2090_v61 = vadd.f32 %v2089_v40, %v1779_v33  ;;  %2144 = vmatpush.msra.mxu1 %v2115_v50  ;;  %v2350_v10 = vld [vmem:[%s5029_s6] ss:$0 sm:$0xff] }
 0x257   :  { %2176 = vmatpush.msra.mxu2 %v2165_v59 }
 0x258   :  { %2075 = vmatpush.msra.mxu0 %v1568_v36  ;;  %2145 = vmatpush.msra.mxu1 %v2114_v21 }
 0x259   :  { %2177 = vmatpush.msra.mxu2 %v2164_v41 }
 0x25a   :  { %2076 = vmatpush.msra.mxu0 %v1567_v57  ;;  %v1799_v17 = vpop.f32.mrf.mxu2  ;;  %v1819_v39 = vpop.f32.mrf.mxu3  ;;  %2146 = vmatpush.msra.mxu1 %v2113_v32  ;;  %v2162_v57 = vld [vmem:[%s5031_s7 + $0x48] sm:$0xff] }
 0x25b   :  { %v2091_v23 = vadd.f32 %v2090_v61, %v1799_v17  ;;  %2178 = vmatpush.msra.mxu2 %v2163_v20 }
 0x25c   :  { %2077 = vmatpush.msra.mxu0 %v1566_v3  ;;  %2147 = vmatpush.msra.mxu1 %v2112_v18 }
 0x25d   :  { %2078 = vmatmul.f32.vlgmr.msra.gmra.mxu0 %v1181_v13  ;;  %v2092_v54 = vadd.f32 %v2091_v23, %v1819_v39  ;;  %v2161_v13 = vld [vmem:[%s5031_s7 + $0x40] sm:$0xff]  ;;  %2179 = vmatpush.msra.mxu2 %v2162_v57 }
 0x25f   :  { %2180 = vmatpush.msra.mxu2 %v2161_v13 }
 0x261   :  { %2181 = vmatpush.msra.mxu2 %v2160_v15 }
 0x263   :  { %2182 = vmatpush.msra.mxu2 %v2159_v29 }
 0x265   :  { %2183 = vmatpush.msra.mxu2 %v2158_v48 }
 0x267   :  { %2184 = vmatpush.msra.mxu2 %v2157_v34 }
 0x269   :  { %2185 = vmatpush.msra.mxu2 %v2156_v1 }
 0x26b   :  { %2186 = vmatpush.msra.mxu2 %v2155_v12 }
 0x26d   :  { %2187 = vmatpush.msra.mxu2 %v2154_v63 }
 0x26f   :  { %2188 = vmatpush.msra.mxu2 %v2153_v31 }
 0x275   :  { %v1839_v5 = vpop.f32.mrf.mxu0  ;;  %v1859_v28 = vpop.f32.mrf.mxu1 }
 0x276   :  { %v2093_v53 = vadd.f32 %v2092_v54, %v1839_v5 }
 0x278   :  { %v2094_v38 = vadd.f32 %v2093_v53, %v1859_v28 }
 0x27c   :  { %v1879_v24 = vpop.f32.mrf.mxu2  ;;  %v1899_v52 = vpop.f32.mrf.mxu3 }
 0x27d   :  { %v2095_v51 = vadd.f32 %v2094_v38, %v1879_v24 }
 0x27f   :  { %v2096_v60 = vadd.f32 %v2095_v51, %v1899_v52 }
 0x297   :  { %v1919_v43 = vpop.f32.mrf.mxu0  ;;  %v1939_v7 = vpop.f32.mrf.mxu1 }
 0x298   :  { %v2097_v22 = vadd.f32 %v2096_v60, %v1919_v43 }
 0x29a   :  { %v2098_v47 = vadd.f32 %v2097_v22, %v1939_v7 }
 0x29e   :  { %v1959_v16 = vpop.f32.mrf.mxu2  ;;  %v1979_v45 = vpop.f32.mrf.mxu3 }
 0x29f   :  { %v2099_v36 = vadd.f32 %v2098_v47, %v1959_v16 }
 0x2a1   :  { %v2100_v3 = vadd.f32 %v2099_v36, %v1979_v45 }
 0x2b9   :  { %v1999_v8 = vpop.f32.mrf.mxu0  ;;  %v2019_v49 = vpop.f32.mrf.mxu1 }
 0x2ba   :  { %v2101_v55 = vadd.f32 %v2100_v3, %v1999_v8 }
 0x2bc   :  { %v2102_v11 = vadd.f32 %v2101_v55, %v2019_v49 }
 0x2c0   :  { %v2039_v58 = vpop.f32.mrf.mxu2  ;;  %v2059_v0 = vpop.f32.mrf.mxu3 }
 0x2c1   :  { %v2103_v25 = vadd.f32 %v2102_v11, %v2039_v58 }
 0x2c3   :  { %v2104_v44 = vadd.f32 %v2103_v25, %v2059_v0 }
 0x2da   :  { %v2079_v9 = vpop.f32.mrf.mxu0 }
 0x2db   :  { %v2105_v6 = vadd.f32 %v2104_v44, %v2079_v9 }
 0x2dd   :  { %v2110_v26 = vadd.f32 %v2349_v62, %v2105_v6 }
 0x2df   :  { %v2111_v27 = vmax.f32 %v2110_v26, 0.0 }
 0x2e1   :  { %2148 = vmatmul.f32.vlgmr.msra.gmra.mxu1 %v2111_v27 }
 0x35e   :  { %v2149_v30 = vpop.f32.mrf.mxu1 }
 0x35f   :  { %v2150_v40 = vadd.f32 %v2350_v10, %v2149_v30 }
 0x361   :  { %v2152_v19 = vmax.f32 %v2150_v40, 0.0 }
 0x363   :  { %2189 = vmatmul.f32.vlgmr.msra.gmra.mxu2 %v2152_v19 }
 0x3e6   :  { %v2190_v33 = vpop.f32.mrf.mxu2 }
 0x3e7   :  { %v2191_v17 = vadd.f32 %v2351_v35, %v2190_v33 }
 0x3e9   :  { %2193 = vst [vmem:[%s5033_s9] sm:$0xff] %v2191_v17 }

</bundles_post_ra>
